<compile_context>
chip_gen: v5e
topology: v5e:2x2
jax: 0.10.0
libtpu: 0.0.40
codegen_flags: <defaults>
</compile_context>

<pallas_src>
import functools

import jax
import jax.numpy as jnp
from jax.experimental import pallas as pl
from jax.experimental.pallas import tpu as pltpu

_EPS = 1e-5
_LANE = 128


def _round_up(x, m):
    return (x + m - 1) // m * m


def _hw_config():
    """Generation-dependent tiling / VMEM-limit defaults."""
    try:
        vmem = int(pltpu.get_tpu_info().vmem_capacity_bytes)
    except Exception:
        vmem = 64 * 1024 * 1024
    if vmem >= 100 * 1024 * 1024:   # v5e / v6e class: 128 MiB physical VMEM
        return {'vmem_limit': 64 * 1024 * 1024, 'conv_rows': 1024, 'bn_rows': 4096}
    # v7x class: 64 MiB physical / 32 MiB scoped default -> stay conservative
    return {'vmem_limit': 32 * 1024 * 1024, 'conv_rows': 512, 'bn_rows': 2048}


_HW = _hw_config()


def _pick_tile_h(h, w, target_rows):
    """Largest divisor of h with tile_h*w <= target and tile_h*w % 8 == 0.
    Falls back to the full image (block == full rows dim -> always legal)."""
    best = None
    for d in range(1, h + 1):
        if h % d == 0 and d * w <= target_rows and (d * w) % 8 == 0:
            best = d
    return best if best is not None else h


def _pick_rows_tile(rows, target):
    """Multiple-of-8 row tile <= target; aims for >=2 grid blocks (v7x megacore).
    Callers pad rows up to a multiple of the tile, so no divisor constraint."""
    half = _round_up(pl.cdiv(rows, 2), 8)
    return max(8, min(target, half))


# ------------------------------ Pallas kernels -------------------------------
def _conv3x3_band_kernel(x_ref, w_ref, y_ref, ps_ref, psq_ref, *,
                         tile_h, n_bands, w_out, cin, cpad, single_matmul):
    """3x3 stride-1 conv on one output-row band.

    x_ref : whole padded image [H+2, W+2, Cin] bf16 (resident across the band axis);
            the halo'd band is sliced in-kernel (no duplicated HBM band copy).
    Emits bf16 conv output plus f32 partial sum / sum-of-squares for BN stats.
    """
    if n_bands == 1:
        band = x_ref[...]
    else:
        b = pl.program_id(1)
        band = x_ref[pl.ds(b * tile_h, tile_h + 2), :, :]
    rows_t = tile_h * w_out

    if single_matmul:
        # Cin lane-aligned: single K=9*Cin matmul keeps the MXU pipe full.
        taps = [band[kh:kh + tile_h, kw:kw + w_out, :].reshape(rows_t, cin)
                for kh in range(3) for kw in range(3)]
        patch = jnp.concatenate(taps, axis=-1)                       # [rows_t, 9*Cin]
        acc = jnp.dot(patch, w_ref[...], preferred_element_type=jnp.float32)
    else:
        # Cin not a multiple of 128: 9 accumulating dots, no lane concat / patch slab.
        acc = None
        for t in range(9):
            kh, kw = divmod(t, 3)
            tap = band[kh:kh + tile_h, kw:kw + w_out, :].reshape(rows_t, cin)
            p = jnp.dot(tap, w_ref[t], preferred_element_type=jnp.float32)
            acc = p if acc is None else acc + p

    y_ref[...] = acc.astype(y_ref.dtype)
    ps_ref[...] = jnp.broadcast_to(jnp.sum(acc, axis=0, keepdims=True), (8, cpad))
    psq_ref[...] = jnp.broadcast_to(jnp.sum(acc * acc, axis=0, keepdims=True), (8, cpad))


def _rows_matmul_kernel(a_ref, w_ref, y_ref, ps_ref, psq_ref):
    """[tile, K] @ [K, Cpad] -> bf16 out + f32 stat partials (stride-2 conv / 1x1 ds)."""
    acc = jnp.dot(a_ref[...], w_ref[...], preferred_element_type=jnp.float32)
    cpad = acc.shape[1]
    y_ref[...] = acc.astype(y_ref.dtype)
    ps_ref[...] = jnp.broadcast_to(jnp.sum(acc, axis=0, keepdims=True), (8, cpad))
    psq_ref[...] = jnp.broadcast_to(jnp.sum(acc * acc, axis=0, keepdims=True), (8, cpad))


def _bn_act_kernel(y_ref, sc_ref, sh_ref, o_ref, *, relu):
    y = y_ref[...].astype(jnp.float32) * sc_ref[...] + sh_ref[...]
    if relu:
        y = jnp.maximum(y, 0.0)
    o_ref[...] = y.astype(o_ref.dtype)


def _bn_add_affine_act_kernel(y_ref, sc_ref, sh_ref, i_ref, isc_ref, ish_ref, o_ref, *, relu):
    """BN(y) + BN(identity_conv) (downsample affine folded in) + ReLU."""
    y = y_ref[...].astype(jnp.float32) * sc_ref[...] + sh_ref[...]
    y = y + (i_ref[...].astype(jnp.float32) * isc_ref[...] + ish_ref[...])
    if relu:
        y = jnp.maximum(y, 0.0)
    o_ref[...] = y.astype(o_ref.dtype)


def _bn_add_x_act_kernel(y_ref, sc_ref, sh_ref, x_ref, o_ref, *, relu, cin, cpad):
    """BN(y) + identity x (read directly, lane-padded in-kernel) + ReLU."""
    y = y_ref[...].astype(jnp.float32) * sc_ref[...] + sh_ref[...]
    idt = x_ref[...].astype(jnp.float32)
    if cin < cpad:
        idt = jnp.concatenate(
            [idt, jnp.zeros((idt.shape[0], cpad - cin), jnp.float32)], axis=-1)
    y = y + idt
    if relu:
        y = jnp.maximum(y, 0.0)
    o_ref[...] = y.astype(o_ref.dtype)


# ------------------------------ Pallas wrappers -------------------------------
def _conv3x3_s1_pallas(x_nhwc, w_oihw, cpad, *, target_rows, vmem_limit):
    """3x3 conv, stride 1, pad 1.  Returns (bf16 [N*H*W, cpad], f32 [cpad] sum,
    f32 [cpad] sum-of-squares).  Lanes >= Cout are exactly zero."""
    n, h, w, cin = x_nhwc.shape
    cout = w_oihw.shape[0]
    tile_h = _pick_tile_h(h, w, target_rows)
    n_bands = h // tile_h
    block_rows = tile_h * w

    xp = jnp.pad(x_nhwc.astype(jnp.bfloat16), ((0, 0), (1, 1), (1, 1), (0, 0)))

    # OIHW -> (tap, Cin, Cout), lane-padded to cpad, bf16.
    wk = jnp.transpose(w_oihw, (2, 3, 1, 0)).reshape(9, cin, cout)
    wk = jnp.pad(wk, ((0, 0), (0, 0), (0, cpad - cout))).astype(jnp.bfloat16)
    single_matmul = (cin % _LANE == 0)
    if single_matmul:
        wk = wk.reshape(9 * cin, cpad)
        w_spec = pl.BlockSpec((9 * cin, cpad), lambda i, b: (0, 0))
    else:
        w_spec = pl.BlockSpec((9, cin, cpad), lambda i, b: (0, 0, 0))

    kernel = functools.partial(
        _conv3x3_band_kernel, tile_h=tile_h, n_bands=n_bands, w_out=w,
        cin=cin, cpad=cpad, single_matmul=single_matmul)

    y, ps, psq = pl.pallas_call(
        kernel,
        out_shape=[jax.ShapeDtypeStruct((n, h * w, cpad), jnp.bfloat16),
                   jax.ShapeDtypeStruct((n, n_bands, 8, cpad), jnp.float32),
                   jax.ShapeDtypeStruct((n, n_bands, 8, cpad), jnp.float32)],
        grid=(n, n_bands),
        in_specs=[
            # Whole padded image; block index constant along the band axis -> DMA'd
            # once per image and kept resident (no overlapping-band HBM duplication).
            pl.BlockSpec((None, h + 2, w + 2, cin), lambda i, b: (i, 0, 0, 0)),
            w_spec,
        ],
        out_specs=[pl.BlockSpec((None, block_rows, cpad), lambda i, b: (i, b, 0)),
                   pl.BlockSpec((None, None, 8, cpad), lambda i, b: (i, b, 0, 0)),
                   pl.BlockSpec((None, None, 8, cpad), lambda i, b: (i, b, 0, 0))],
        compiler_params=pltpu.CompilerParams(
            dimension_semantics=("parallel", "parallel"),
            vmem_limit_bytes=vmem_limit),
    )(xp, wk)

    psum = jnp.sum(ps[:, :, 0, :], axis=(0, 1))
    psumsq = jnp.sum(psq[:, :, 0, :], axis=(0, 1))
    return y.reshape(n * h * w, cpad), psum, psumsq


def _rows_matmul_pallas(a_bf16, w_bf16, cpad, *, target_rows, vmem_limit):
    """a: [rows, K] bf16, w: [K, cpad] bf16 -> (bf16 [rows, cpad], stat partials)."""
    rows, k = a_bf16.shape
    tile = _pick_rows_tile(rows, target_rows)
    rows_p = _round_up(rows, tile)
    if rows_p != rows:
        a_bf16 = jnp.pad(a_bf16, ((0, rows_p - rows), (0, 0)))   # zero rows -> 0 partials
    n_tiles = rows_p // tile

    y, ps, psq = pl.pallas_call(
        _rows_matmul_kernel,
        out_shape=[jax.ShapeDtypeStruct((rows_p, cpad), jnp.bfloat16),
                   jax.ShapeDtypeStruct((n_tiles, 8, cpad), jnp.float32),
                   jax.ShapeDtypeStruct((n_tiles, 8, cpad), jnp.float32)],
        grid=(n_tiles,),
        in_specs=[pl.BlockSpec((tile, k), lambda i: (i, 0)),
                  pl.BlockSpec((k, cpad), lambda i: (0, 0))],
        out_specs=[pl.BlockSpec((tile, cpad), lambda i: (i, 0)),
                   pl.BlockSpec((None, 8, cpad), lambda i: (i, 0, 0)),
                   pl.BlockSpec((None, 8, cpad), lambda i: (i, 0, 0))],
        compiler_params=pltpu.CompilerParams(
            dimension_semantics=("parallel",),
            vmem_limit_bytes=vmem_limit),
    )(a_bf16, w_bf16)

    psum = jnp.sum(ps[:, 0, :], axis=0)
    psumsq = jnp.sum(psq[:, 0, :], axis=0)
    y = y if rows_p == rows else y[:rows]
    return y, psum, psumsq


def _bn_act_pallas(y, scale, shift, *, identity=None, iscale=None, ishift=None,
                   x_identity=None, relu=True, out_dtype=jnp.float32,
                   target_rows, vmem_limit):
    """Rows-tiled: out = [relu]( y*scale + shift  [+ identity*iscale + ishift | + x] )."""
    rows, cpad = y.shape
    tile = _pick_rows_tile(rows, target_rows)
    rows_p = _round_up(rows, tile)

    def padr(a):
        return a if a.shape[0] == rows_p else jnp.pad(a, ((0, rows_p - a.shape[0]), (0, 0)))

    row_spec = pl.BlockSpec((tile, cpad), lambda i: (i, 0))
    ch_spec = pl.BlockSpec((1, cpad), lambda i: (0, 0))

    if identity is not None:
        kernel = functools.partial(_bn_add_affine_act_kernel, relu=relu)
        args = (padr(y), scale, shift, padr(identity), iscale, ishift)
        in_specs = [row_spec, ch_spec, ch_spec, row_spec, ch_spec, ch_spec]
    elif x_identity is not None:
        cin = x_identity.shape[1]
        kernel = functools.partial(_bn_add_x_act_kernel, relu=relu, cin=cin, cpad=cpad)
        x_spec = pl.BlockSpec((tile, cin), lambda i: (i, 0))
        args = (padr(y), scale, shift, padr(x_identity))
        in_specs = [row_spec, ch_spec, ch_spec, x_spec]
    else:
        kernel = functools.partial(_bn_act_kernel, relu=relu)
        args = (padr(y), scale, shift)
        in_specs = [row_spec, ch_spec, ch_spec]

    out = pl.pallas_call(
        kernel,
        out_shape=jax.ShapeDtypeStruct((rows_p, cpad), out_dtype),
        grid=(rows_p // tile,),
        in_specs=in_specs,
        out_specs=row_spec,
        compiler_params=pltpu.CompilerParams(
            dimension_semantics=("parallel",),
            vmem_limit_bytes=vmem_limit),
    )(*args)
    return out if rows_p == rows else out[:rows]


def _bn_scale_shift_from_sums(psum, psumsq, count, gamma, beta, cout, cpad, eps=_EPS):
    """Training-mode batch stats from in-kernel partial sums (no re-read of the conv
    output).  Padded channels get scale=shift=0 so they stay exactly zero."""
    mean = psum[:cout] / count
    var = jnp.maximum(psumsq[:cout] / count - mean * mean, 0.0)
    scale = gamma * jax.lax.rsqrt(var + eps)
    shift = beta - mean * scale
    pad = (0, cpad - cout)
    return (jnp.pad(scale, pad).reshape(1, cpad).astype(jnp.float32),
            jnp.pad(shift, pad).reshape(1, cpad).astype(jnp.float32))


# --------------------------------- forward -----------------------------------
def residual_block_forward(x_nchw, params, stride=1):
    cfg = _HW
    n, cin, h, w = x_nchw.shape
    cout = params['w1'].shape[0]
    ho = (h + 2 - 3) // stride + 1
    wo = (w + 2 - 3) // stride + 1
    cpad = _round_up(cout, _LANE)
    rows = n * ho * wo

    x = jnp.transpose(x_nchw, (0, 2, 3, 1)).astype(jnp.float32)        # NCHW -> NHWC

    # ---------------- conv1 (3x3, stride, pad=1) ----------------
    if stride == 1:
        y1_raw, ps1, psq1 = _conv3x3_s1_pallas(
            x, params['w1'], cpad, target_rows=cfg['conv_rows'], vmem_limit=cfg['vmem_limit'])
    else:
        # Stride-2 conv: 9 taps gathered in XLA (2.25x input volume; this conv is rare
        # and its output grid is 4x smaller), then rows-tiled matmul with K=9*Cin.
        # TODO(synk): move the strided tap gather in-kernel (halo DMA) like stride-1.
        xp = jnp.pad(x, ((0, 0), (1, 1), (1, 1), (0, 0)))
        taps = [xp[:, kh:kh + stride * (ho - 1) + 1:stride,
                      kw:kw + stride * (wo - 1) + 1:stride, :].reshape(rows, cin)
                for kh in range(3) for kw in range(3)]
        a = jnp.concatenate(taps, axis=-1).astype(jnp.bfloat16)
        wk = jnp.transpose(params['w1'], (2, 3, 1, 0)).reshape(9 * cin, cout)
        wk = jnp.pad(wk, ((0, 0), (0, cpad - cout))).astype(jnp.bfloat16)
        y1_raw, ps1, psq1 = _rows_matmul_pallas(
            a, wk, cpad, target_rows=cfg['conv_rows'], vmem_limit=cfg['vmem_limit'])

    s1, b1 = _bn_scale_shift_from_sums(ps1, psq1, rows, params['g1'], params['b1'], cout, cpad)
    y1 = _bn_act_pallas(y1_raw, s1, b1, relu=True, out_dtype=jnp.bfloat16,
                        target_rows=cfg['bn_rows'], vmem_limit=cfg['vmem_limit'])
    y1_nhwc = y1.reshape(n, ho, wo, cpad)
    if cout != cpad:
        y1_nhwc = y1_nhwc[..., :cout]      # drop lane padding (skipped when cout == cpad)

    # ---------------- shortcut ----------------
    if stride == 1:
        assert cin == cout, "stride=1 identity shortcut requires in_channels == out_channels"
        x_id = x.reshape(rows, cin)        # free reshape; no lane-pad pass, no dummy affine
        identity = isc = ish = None
    else:
        # 1x1 conv, stride 2: spatial subsample + rows-tiled matmul; its BN is folded
        # into the final fused add/ReLU pass as an affine (scale, shift).
        x_sub = x[:, ::stride, ::stride, :].reshape(rows, cin).astype(jnp.bfloat16)
        wds = jnp.transpose(params['w_ds'][:, :, 0, 0], (1, 0))        # [Cin, Cout]
        wds = jnp.pad(wds, ((0, 0), (0, cpad - cout))).astype(jnp.bfloat16)
        identity, ips, ipsq = _rows_matmul_pallas(
            x_sub, wds, cpad, target_rows=cfg['bn_rows'], vmem_limit=cfg['vmem_limit'])
        isc, ish = _bn_scale_shift_from_sums(ips, ipsq, rows, params['g_ds'], params['b_ds'],
                                             cout, cpad)
        x_id = None

    # ---------------- conv2 (3x3, stride 1) + BN2 + residual + ReLU ----------------
    y2_raw, ps2, psq2 = _conv3x3_s1_pallas(
        y1_nhwc, params['w2'], cpad, target_rows=cfg['conv_rows'], vmem_limit=cfg['vmem_limit'])
    s2, b2 = _bn_scale_shift_from_sums(ps2, psq2, rows, params['g2'], params['b2'], cout, cpad)
    out = _bn_act_pallas(y2_raw, s2, b2, identity=identity, iscale=isc, ishift=ish,
                         x_identity=x_id, relu=True, out_dtype=jnp.float32,
                         target_rows=cfg['bn_rows'], vmem_limit=cfg['vmem_limit'])
    out = out.reshape(n, ho, wo, cpad)
    if cout != cpad:
        out = out[..., :cout]
    return jnp.transpose(out, (0, 3, 1, 2))                            # NHWC -> NCHW


_forward_jit = jax.jit(residual_block_forward, static_argnames=("stride",))


# ----------------------------- pure-JAX reference ------------------------------
def _ref_conv(x, w, stride, pad):
    return jax.lax.conv_general_dilated(
        x, w, (stride, stride), [(pad, pad), (pad, pad)],
        dimension_numbers=('NCHW', 'OIHW', 'NCHW'))


def _ref_bn(x, gamma, beta, eps=_EPS):
    mean = jnp.mean(x, axis=(0, 2, 3), keepdims=True)
    var = jnp.mean((x - mean) ** 2, axis=(0, 2, 3), keepdims=True)
    return ((x - mean) * jax.lax.rsqrt(var + eps)) * gamma.reshape(1, -1, 1, 1) \
        + beta.reshape(1, -1, 1, 1)


def residual_block_reference(x, params, stride=1):
    y = jax.nn.relu(_ref_bn(_ref_conv(x, params['w1'], stride, 1), params['g1'], params['b1']))
    y = _ref_bn(_ref_conv(y, params['w2'], 1, 1), params['g2'], params['b2'])
    if stride != 1:
        identity = _ref_bn(_ref_conv(x, params['w_ds'], stride, 0),
                           params['g_ds'], params['b_ds'])
    else:
        identity = x
    return jax.nn.relu(y + identity)


# ----------------------------- deterministic params ----------------------------
def init_params(key, cin, cout, stride):
    ks = jax.random.split(key, 8)
    params = {
        'w1': 0.1 * jax.random.normal(ks[0], (cout, cin, 3, 3), jnp.float32),
        'g1': 1.0 + 0.1 * jax.random.normal(ks[1], (cout,), jnp.float32),
        'b1': 0.1 * jax.random.normal(ks[2], (cout,), jnp.float32),
        'w2': 0.1 * jax.random.normal(ks[3], (cout, cout, 3, 3), jnp.float32),
        'g2': 1.0 + 0.1 * jax.random.normal(ks[4], (cout,), jnp.float32),
        'b2': 0.1 * jax.random.normal(ks[5], (cout,), jnp.float32),
    }
    if stride != 1:
        params['w_ds'] = 0.1 * jax.random.normal(ks[6], (cout, cin, 1, 1), jnp.float32)
        params['g_ds'] = 1.0 + 0.05 * jax.random.normal(ks[7], (cout,), jnp.float32)
        params['b_ds'] = jnp.full((cout,), 0.05, jnp.float32)
    return params


if __name__ == "__main__":
    key = jax.random.PRNGKey(0)
    k_x1, k_p1, k_x2, k_p2 = jax.random.split(key, 4)

    # bf16 MXU operands + bf16 intermediate storage (f32 accumulation / f32 BN math)
    # -> loosen tolerance vs. the pure-f32 reference.
    ATOL = RTOL = 5e-2

    # Case 1: stride=1, identity shortcut (32x32 so the conv grid can have >1 band/image).
    x1 = jax.random.normal(k_x1, (2, 8, 32, 32), jnp.float32)
    p1 = init_params(k_p1, 8, 8, stride=1)
    out1 = jax.block_until_ready(_forward_jit(x1, p1, stride=1))
    ref1 = residual_block_reference(x1, p1, stride=1)
    assert out1.shape == (2, 8, 32, 32)
    err1 = float(jnp.max(jnp.abs(out1 - ref1)))
    assert jnp.allclose(out1, ref1, atol=ATOL, rtol=RTOL), f"stride=1 mismatch, max err {err1}"

    # Case 2: stride=2, downsample shortcut (1x1 conv stride 2 + BN).
    x2 = jax.random.normal(k_x2, (2, 4, 16, 16), jnp.float32)
    p2 = init_params(k_p2, 4, 8, stride=2)
    out2 = jax.block_until_ready(_forward_jit(x2, p2, stride=2))
    ref2 = residual_block_reference(x2, p2, stride=2)
    assert out2.shape == (2, 8, 8, 8)
    err2 = float(jnp.max(jnp.abs(out2 - ref2)))
    assert jnp.allclose(out2, ref2, atol=ATOL, rtol=RTOL), f"stride=2 mismatch, max err {err2}"

    print("KERNEL_OK")
</pallas_src>

<mosaic_0001>
module attributes {stable_mosaic.version = 11 : i64} {
  func.func @_conv3x3_band_kernel(%arg0: i32, %arg1: i32, %arg2: memref<1x34x34x8xbf16, #tpu.memory_space<vmem>>, %arg3: memref<9x8x128xbf16, #tpu.memory_space<vmem>>, %arg4: memref<1x512x128xbf16, #tpu.memory_space<vmem>>, %arg5: memref<1x1x8x128xf32, #tpu.memory_space<vmem>>, %arg6: memref<1x1x8x128xf32, #tpu.memory_space<vmem>>) attributes {dimension_semantics = [#tpu.dimension_semantics<parallel>, #tpu.dimension_semantics<parallel>], iteration_bounds = array<i64: 2, 2>, scalar_prefetch = 0 : i64, scratch_operands = 0 : i64, tpu.core_type = #tpu.core_type<tc>, window_params = [{transform_indices = @transform_0, window_bounds = array<i64: 1, 34, 34, 8>}, {pipeline_mode = #tpu.pipeline_mode<synchronous>, transform_indices = @transform_1, window_bounds = array<i64: 9, 8, 128>}, {transform_indices = @transform_2, window_bounds = array<i64: 1, 512, 128>}, {transform_indices = @transform_3, window_bounds = array<i64: 1, 1, 8, 128>}, {transform_indices = @transform_4, window_bounds = array<i64: 1, 1, 8, 128>}]} {
    %c16_i32 = arith.constant 16 : i32
    %0 = arith.muli %arg1, %c16_i32 : i32
    %c0 = arith.constant 0 : index
    %1 = arith.index_cast %0 : i32 to index
    %c0_0 = arith.constant 0 : index
    %c0_1 = arith.constant 0 : index
    %2 = vector.load %arg2[%c0, %1, %c0_0, %c0_1] : memref<1x34x34x8xbf16, #tpu.memory_space<vmem>>, vector<1x18x34x8xbf16>
    %3 = vector.shape_cast %2 : vector<1x18x34x8xbf16> to vector<18x34x8xbf16>
    %4 = vector.extract_strided_slice %3 {offsets = [0, 0, 0], sizes = [16, 32, 8], strides = [1, 1, 1]} : vector<18x34x8xbf16> to vector<16x32x8xbf16>
    %5 = vector.shape_cast %4 : vector<16x32x8xbf16> to vector<512x8xbf16>
    %c0_2 = arith.constant 0 : index
    %c0_3 = arith.constant 0 : index
    %c0_4 = arith.constant 0 : index
    %6 = vector.load %arg3[%c0_2, %c0_3, %c0_4] : memref<9x8x128xbf16, #tpu.memory_space<vmem>>, vector<1x8x128xbf16>
    %7 = vector.shape_cast %6 : vector<1x8x128xbf16> to vector<8x128xbf16>
    %cst = arith.constant dense<0.000000e+00> : vector<512x128xf32>
    %8 = tpu.matmul %5, %7, %cst {dimension_numbers = #tpu.dot_dimension_numbers<[1], [0], [0], [1], [0, 0, 1, 1], [], []>} : vector<512x8xbf16>, vector<8x128xbf16>, vector<512x128xf32> -> vector<512x128xf32>
    %9 = vector.extract_strided_slice %3 {offsets = [0, 1, 0], sizes = [16, 32, 8], strides = [1, 1, 1]} : vector<18x34x8xbf16> to vector<16x32x8xbf16>
    %10 = vector.shape_cast %9 : vector<16x32x8xbf16> to vector<512x8xbf16>
    %c1 = arith.constant 1 : index
    %c0_5 = arith.constant 0 : index
    %c0_6 = arith.constant 0 : index
    %11 = vector.load %arg3[%c1, %c0_5, %c0_6] : memref<9x8x128xbf16, #tpu.memory_space<vmem>>, vector<1x8x128xbf16>
    %12 = vector.shape_cast %11 : vector<1x8x128xbf16> to vector<8x128xbf16>
    %cst_7 = arith.constant dense<0.000000e+00> : vector<512x128xf32>
    %13 = tpu.matmul %10, %12, %cst_7 {dimension_numbers = #tpu.dot_dimension_numbers<[1], [0], [0], [1], [0, 0, 1, 1], [], []>} : vector<512x8xbf16>, vector<8x128xbf16>, vector<512x128xf32> -> vector<512x128xf32>
    %14 = arith.addf %8, %13 : vector<512x128xf32>
    %15 = vector.extract_strided_slice %3 {offsets = [0, 2, 0], sizes = [16, 32, 8], strides = [1, 1, 1]} : vector<18x34x8xbf16> to vector<16x32x8xbf16>
    %16 = vector.shape_cast %15 : vector<16x32x8xbf16> to vector<512x8xbf16>
    %c2 = arith.constant 2 : index
    %c0_8 = arith.constant 0 : index
    %c0_9 = arith.constant 0 : index
    %17 = vector.load %arg3[%c2, %c0_8, %c0_9] : memref<9x8x128xbf16, #tpu.memory_space<vmem>>, vector<1x8x128xbf16>
    %18 = vector.shape_cast %17 : vector<1x8x128xbf16> to vector<8x128xbf16>
    %cst_10 = arith.constant dense<0.000000e+00> : vector<512x128xf32>
    %19 = tpu.matmul %16, %18, %cst_10 {dimension_numbers = #tpu.dot_dimension_numbers<[1], [0], [0], [1], [0, 0, 1, 1], [], []>} : vector<512x8xbf16>, vector<8x128xbf16>, vector<512x128xf32> -> vector<512x128xf32>
    %20 = arith.addf %14, %19 : vector<512x128xf32>
    %21 = vector.extract_strided_slice %3 {offsets = [1, 0, 0], sizes = [16, 32, 8], strides = [1, 1, 1]} : vector<18x34x8xbf16> to vector<16x32x8xbf16>
    %22 = vector.shape_cast %21 : vector<16x32x8xbf16> to vector<512x8xbf16>
    %c3 = arith.constant 3 : index
    %c0_11 = arith.constant 0 : index
    %c0_12 = arith.constant 0 : index
    %23 = vector.load %arg3[%c3, %c0_11, %c0_12] : memref<9x8x128xbf16, #tpu.memory_space<vmem>>, vector<1x8x128xbf16>
    %24 = vector.shape_cast %23 : vector<1x8x128xbf16> to vector<8x128xbf16>
    %cst_13 = arith.constant dense<0.000000e+00> : vector<512x128xf32>
    %25 = tpu.matmul %22, %24, %cst_13 {dimension_numbers = #tpu.dot_dimension_numbers<[1], [0], [0], [1], [0, 0, 1, 1], [], []>} : vector<512x8xbf16>, vector<8x128xbf16>, vector<512x128xf32> -> vector<512x128xf32>
    %26 = arith.addf %20, %25 : vector<512x128xf32>
    %27 = vector.extract_strided_slice %3 {offsets = [1, 1, 0], sizes = [16, 32, 8], strides = [1, 1, 1]} : vector<18x34x8xbf16> to vector<16x32x8xbf16>
    %28 = vector.shape_cast %27 : vector<16x32x8xbf16> to vector<512x8xbf16>
    %c4 = arith.constant 4 : index
    %c0_14 = arith.constant 0 : index
    %c0_15 = arith.constant 0 : index
    %29 = vector.load %arg3[%c4, %c0_14, %c0_15] : memref<9x8x128xbf16, #tpu.memory_space<vmem>>, vector<1x8x128xbf16>
    %30 = vector.shape_cast %29 : vector<1x8x128xbf16> to vector<8x128xbf16>
    %cst_16 = arith.constant dense<0.000000e+00> : vector<512x128xf32>
    %31 = tpu.matmul %28, %30, %cst_16 {dimension_numbers = #tpu.dot_dimension_numbers<[1], [0], [0], [1], [0, 0, 1, 1], [], []>} : vector<512x8xbf16>, vector<8x128xbf16>, vector<512x128xf32> -> vector<512x128xf32>
    %32 = arith.addf %26, %31 : vector<512x128xf32>
    %33 = vector.extract_strided_slice %3 {offsets = [1, 2, 0], sizes = [16, 32, 8], strides = [1, 1, 1]} : vector<18x34x8xbf16> to vector<16x32x8xbf16>
    %34 = vector.shape_cast %33 : vector<16x32x8xbf16> to vector<512x8xbf16>
    %c5 = arith.constant 5 : index
    %c0_17 = arith.constant 0 : index
    %c0_18 = arith.constant 0 : index
    %35 = vector.load %arg3[%c5, %c0_17, %c0_18] : memref<9x8x128xbf16, #tpu.memory_space<vmem>>, vector<1x8x128xbf16>
    %36 = vector.shape_cast %35 : vector<1x8x128xbf16> to vector<8x128xbf16>
    %cst_19 = arith.constant dense<0.000000e+00> : vector<512x128xf32>
    %37 = tpu.matmul %34, %36, %cst_19 {dimension_numbers = #tpu.dot_dimension_numbers<[1], [0], [0], [1], [0, 0, 1, 1], [], []>} : vector<512x8xbf16>, vector<8x128xbf16>, vector<512x128xf32> -> vector<512x128xf32>
    %38 = arith.addf %32, %37 : vector<512x128xf32>
    %39 = vector.extract_strided_slice %3 {offsets = [2, 0, 0], sizes = [16, 32, 8], strides = [1, 1, 1]} : vector<18x34x8xbf16> to vector<16x32x8xbf16>
    %40 = vector.shape_cast %39 : vector<16x32x8xbf16> to vector<512x8xbf16>
    %c6 = arith.constant 6 : index
    %c0_20 = arith.constant 0 : index
    %c0_21 = arith.constant 0 : index
    %41 = vector.load %arg3[%c6, %c0_20, %c0_21] : memref<9x8x128xbf16, #tpu.memory_space<vmem>>, vector<1x8x128xbf16>
    %42 = vector.shape_cast %41 : vector<1x8x128xbf16> to vector<8x128xbf16>
    %cst_22 = arith.constant dense<0.000000e+00> : vector<512x128xf32>
    %43 = tpu.matmul %40, %42, %cst_22 {dimension_numbers = #tpu.dot_dimension_numbers<[1], [0], [0], [1], [0, 0, 1, 1], [], []>} : vector<512x8xbf16>, vector<8x128xbf16>, vector<512x128xf32> -> vector<512x128xf32>
    %44 = arith.addf %38, %43 : vector<512x128xf32>
    %45 = vector.extract_strided_slice %3 {offsets = [2, 1, 0], sizes = [16, 32, 8], strides = [1, 1, 1]} : vector<18x34x8xbf16> to vector<16x32x8xbf16>
    %46 = vector.shape_cast %45 : vector<16x32x8xbf16> to vector<512x8xbf16>
    %c7 = arith.constant 7 : index
    %c0_23 = arith.constant 0 : index
    %c0_24 = arith.constant 0 : index
    %47 = vector.load %arg3[%c7, %c0_23, %c0_24] : memref<9x8x128xbf16, #tpu.memory_space<vmem>>, vector<1x8x128xbf16>
    %48 = vector.shape_cast %47 : vector<1x8x128xbf16> to vector<8x128xbf16>
    %cst_25 = arith.constant dense<0.000000e+00> : vector<512x128xf32>
    %49 = tpu.matmul %46, %48, %cst_25 {dimension_numbers = #tpu.dot_dimension_numbers<[1], [0], [0], [1], [0, 0, 1, 1], [], []>} : vector<512x8xbf16>, vector<8x128xbf16>, vector<512x128xf32> -> vector<512x128xf32>
    %50 = arith.addf %44, %49 : vector<512x128xf32>
    %51 = vector.extract_strided_slice %3 {offsets = [2, 2, 0], sizes = [16, 32, 8], strides = [1, 1, 1]} : vector<18x34x8xbf16> to vector<16x32x8xbf16>
    %52 = vector.shape_cast %51 : vector<16x32x8xbf16> to vector<512x8xbf16>
    %c8 = arith.constant 8 : index
    %c0_26 = arith.constant 0 : index
    %c0_27 = arith.constant 0 : index
    %53 = vector.load %arg3[%c8, %c0_26, %c0_27] : memref<9x8x128xbf16, #tpu.memory_space<vmem>>, vector<1x8x128xbf16>
    %54 = vector.shape_cast %53 : vector<1x8x128xbf16> to vector<8x128xbf16>
    %cst_28 = arith.constant dense<0.000000e+00> : vector<512x128xf32>
    %55 = tpu.matmul %52, %54, %cst_28 {dimension_numbers = #tpu.dot_dimension_numbers<[1], [0], [0], [1], [0, 0, 1, 1], [], []>} : vector<512x8xbf16>, vector<8x128xbf16>, vector<512x128xf32> -> vector<512x128xf32>
    %56 = arith.addf %50, %55 : vector<512x128xf32>
    %57 = arith.truncf %56 : vector<512x128xf32> to vector<512x128xbf16>
    %c0_29 = arith.constant 0 : index
    %c0_30 = arith.constant 0 : index
    %c0_31 = arith.constant 0 : index
    %58 = vector.load %arg4[%c0_29, %c0_30, %c0_31] : memref<1x512x128xbf16, #tpu.memory_space<vmem>>, vector<1x512x128xbf16>
    %59 = vector.shape_cast %58 : vector<1x512x128xbf16> to vector<512x128xbf16>
    %60 = vector.shape_cast %57 : vector<512x128xbf16> to vector<1x512x128xbf16>
    tpu.vector_store %arg4[%c0_29, %c0_30, %c0_31], %60 {strides = array<i32>} : memref<1x512x128xbf16, #tpu.memory_space<vmem>>, vector<1x512x128xbf16>,
    %cst_32 = arith.constant dense<0.000000e+00> : vector<128xf32>
    %61 = vector.multi_reduction <add>, %56, %cst_32 [0] : vector<512x128xf32> to vector<128xf32>
    %62 = vector.shape_cast %61 : vector<128xf32> to vector<1x128xf32>
    %63 = vector.shape_cast %62 : vector<1x128xf32> to vector<1x128xf32>
    %64 = vector.broadcast %63 : vector<1x128xf32> to vector<8x128xf32>
    %c0_33 = arith.constant 0 : index
    %c0_34 = arith.constant 0 : index
    %c0_35 = arith.constant 0 : index
    %c0_36 = arith.constant 0 : index
    %65 = vector.load %arg5[%c0_33, %c0_34, %c0_35, %c0_36] : memref<1x1x8x128xf32, #tpu.memory_space<vmem>>, vector<1x1x8x128xf32>
    %66 = vector.shape_cast %65 : vector<1x1x8x128xf32> to vector<8x128xf32>
    %67 = vector.shape_cast %64 : vector<8x128xf32> to vector<1x1x8x128xf32>
    tpu.vector_store %arg5[%c0_33, %c0_34, %c0_35, %c0_36], %67 {strides = array<i32>} : memref<1x1x8x128xf32, #tpu.memory_space<vmem>>, vector<1x1x8x128xf32>,
    %68 = arith.mulf %56, %56 : vector<512x128xf32>
    %cst_37 = arith.constant dense<0.000000e+00> : vector<128xf32>
    %69 = vector.multi_reduction <add>, %68, %cst_37 [0] : vector<512x128xf32> to vector<128xf32>
    %70 = vector.shape_cast %69 : vector<128xf32> to vector<1x128xf32>
    %71 = vector.shape_cast %70 : vector<1x128xf32> to vector<1x128xf32>
    %72 = vector.broadcast %71 : vector<1x128xf32> to vector<8x128xf32>
    %c0_38 = arith.constant 0 : index
    %c0_39 = arith.constant 0 : index
    %c0_40 = arith.constant 0 : index
    %c0_41 = arith.constant 0 : index
    %73 = vector.load %arg6[%c0_38, %c0_39, %c0_40, %c0_41] : memref<1x1x8x128xf32, #tpu.memory_space<vmem>>, vector<1x1x8x128xf32>
    %74 = vector.shape_cast %73 : vector<1x1x8x128xf32> to vector<8x128xf32>
    %75 = vector.shape_cast %72 : vector<8x128xf32> to vector<1x1x8x128xf32>
    tpu.vector_store %arg6[%c0_38, %c0_39, %c0_40, %c0_41], %75 {strides = array<i32>} : memref<1x1x8x128xf32, #tpu.memory_space<vmem>>, vector<1x1x8x128xf32>,
    return
  }
  func.func @transform_0(%arg0: i32, %arg1: i32) -> (i32, i32, i32, i32) {
    %c0_i32 = arith.constant 0 : i32
    %c0_i32_0 = arith.constant 0 : i32
    %c0_i32_1 = arith.constant 0 : i32
    %c0_i32_2 = arith.constant 0 : i32
    return %arg0, %c0_i32, %c0_i32_0, %c0_i32_1 : i32, i32, i32, i32
  }
  func.func @transform_1(%arg0: i32, %arg1: i32) -> (i32, i32, i32) {
    %c0_i32 = arith.constant 0 : i32
    %c0_i32_0 = arith.constant 0 : i32
    %c0_i32_1 = arith.constant 0 : i32
    %c0_i32_2 = arith.constant 0 : i32
    return %c0_i32, %c0_i32_0, %c0_i32_1 : i32, i32, i32
  }
  func.func @transform_2(%arg0: i32, %arg1: i32) -> (i32, i32, i32) {
    %c0_i32 = arith.constant 0 : i32
    %c0_i32_0 = arith.constant 0 : i32
    return %arg0, %arg1, %c0_i32 : i32, i32, i32
  }
  func.func @transform_3(%arg0: i32, %arg1: i32) -> (i32, i32, i32, i32) {
    %c0_i32 = arith.constant 0 : i32
    %c0_i32_0 = arith.constant 0 : i32
    %c0_i32_1 = arith.constant 0 : i32
    return %arg0, %arg1, %c0_i32, %c0_i32_0 : i32, i32, i32, i32
  }
  func.func @transform_4(%arg0: i32, %arg1: i32) -> (i32, i32, i32, i32) {
    %c0_i32 = arith.constant 0 : i32
    %c0_i32_0 = arith.constant 0 : i32
    %c0_i32_1 = arith.constant 0 : i32
    return %arg0, %arg1, %c0_i32, %c0_i32_0 : i32, i32, i32, i32
  }
}

module attributes {stable_mosaic.version = 11 : i64} {
  func.func @_bn_act_kernel(%arg0: i32, %arg1: memref<1024x128xbf16, #tpu.memory_space<vmem>>, %arg2: memref<1x128xf32, #tpu.memory_space<vmem>>, %arg3: memref<1x128xf32, #tpu.memory_space<vmem>>, %arg4: memref<1024x128xbf16, #tpu.memory_space<vmem>>) attributes {dimension_semantics = [#tpu.dimension_semantics<parallel>], iteration_bounds = array<i64: 2>, scalar_prefetch = 0 : i64, scratch_operands = 0 : i64, tpu.core_type = #tpu.core_type<tc>, window_params = [{transform_indices = @transform_0, window_bounds = array<i64: 1024, 128>}, {pipeline_mode = #tpu.pipeline_mode<synchronous>, transform_indices = @transform_1, window_bounds = array<i64: 1, 128>}, {pipeline_mode = #tpu.pipeline_mode<synchronous>, transform_indices = @transform_2, window_bounds = array<i64: 1, 128>}, {transform_indices = @transform_3, window_bounds = array<i64: 1024, 128>}]} {
    %c0 = arith.constant 0 : index
    %c0_0 = arith.constant 0 : index
    %0 = vector.load %arg1[%c0, %c0_0] : memref<1024x128xbf16, #tpu.memory_space<vmem>>, vector<1024x128xbf16>
    %1 = arith.extf %0 : vector<1024x128xbf16> to vector<1024x128xf32>
    %c0_1 = arith.constant 0 : index
    %c0_2 = arith.constant 0 : index
    %2 = vector.load %arg2[%c0_1, %c0_2] : memref<1x128xf32, #tpu.memory_space<vmem>>, vector<1x128xf32>
    %3 = vector.broadcast %2 : vector<1x128xf32> to vector<1024x128xf32>
    %4 = arith.mulf %1, %3 : vector<1024x128xf32>
    %c0_3 = arith.constant 0 : index
    %c0_4 = arith.constant 0 : index
    %5 = vector.load %arg3[%c0_3, %c0_4] : memref<1x128xf32, #tpu.memory_space<vmem>>, vector<1x128xf32>
    %6 = vector.broadcast %5 : vector<1x128xf32> to vector<1024x128xf32>
    %7 = arith.addf %4, %6 : vector<1024x128xf32>
    %cst = arith.constant 0.000000e+00 : f32
    %8 = vector.broadcast %cst : f32 to vector<1024x128xf32>
    %9 = arith.maximumf %7, %8 : vector<1024x128xf32>
    %10 = arith.truncf %9 : vector<1024x128xf32> to vector<1024x128xbf16>
    %c0_5 = arith.constant 0 : index
    %c0_6 = arith.constant 0 : index
    %11 = vector.load %arg4[%c0_5, %c0_6] : memref<1024x128xbf16, #tpu.memory_space<vmem>>, vector<1024x128xbf16>
    tpu.vector_store %arg4[%c0_5, %c0_6], %10 {strides = array<i32>} : memref<1024x128xbf16, #tpu.memory_space<vmem>>, vector<1024x128xbf16>,
    return
  }
  func.func @transform_0(%arg0: i32) -> (i32, i32) {
    %c0_i32 = arith.constant 0 : i32
    %c0_i32_0 = arith.constant 0 : i32
    return %arg0, %c0_i32 : i32, i32
  }
  func.func @transform_1(%arg0: i32) -> (i32, i32) {
    %c0_i32 = arith.constant 0 : i32
    %c0_i32_0 = arith.constant 0 : i32
    %c0_i32_1 = arith.constant 0 : i32
    return %c0_i32, %c0_i32_0 : i32, i32
  }
  func.func @transform_2(%arg0: i32) -> (i32, i32) {
    %c0_i32 = arith.constant 0 : i32
    %c0_i32_0 = arith.constant 0 : i32
    %c0_i32_1 = arith.constant 0 : i32
    return %c0_i32, %c0_i32_0 : i32, i32
  }
  func.func @transform_3(%arg0: i32) -> (i32, i32) {
    %c0_i32 = arith.constant 0 : i32
    %c0_i32_0 = arith.constant 0 : i32
    return %arg0, %c0_i32 : i32, i32
  }
}

module attributes {stable_mosaic.version = 11 : i64} {
  func.func @_bn_add_x_act_kernel(%arg0: i32, %arg1: memref<1024x128xbf16, #tpu.memory_space<vmem>>, %arg2: memref<1x128xf32, #tpu.memory_space<vmem>>, %arg3: memref<1x128xf32, #tpu.memory_space<vmem>>, %arg4: memref<1024x8xf32, #tpu.memory_space<vmem>>, %arg5: memref<1024x128xf32, #tpu.memory_space<vmem>>) attributes {dimension_semantics = [#tpu.dimension_semantics<parallel>], iteration_bounds = array<i64: 2>, scalar_prefetch = 0 : i64, scratch_operands = 0 : i64, tpu.core_type = #tpu.core_type<tc>, window_params = [{transform_indices = @transform_0, window_bounds = array<i64: 1024, 128>}, {pipeline_mode = #tpu.pipeline_mode<synchronous>, transform_indices = @transform_1, window_bounds = array<i64: 1, 128>}, {pipeline_mode = #tpu.pipeline_mode<synchronous>, transform_indices = @transform_2, window_bounds = array<i64: 1, 128>}, {transform_indices = @transform_3, window_bounds = array<i64: 1024, 8>}, {transform_indices = @transform_4, window_bounds = array<i64: 1024, 128>}]} {
    %c0 = arith.constant 0 : index
    %c0_0 = arith.constant 0 : index
    %0 = vector.load %arg1[%c0, %c0_0] : memref<1024x128xbf16, #tpu.memory_space<vmem>>, vector<1024x128xbf16>
    %1 = arith.extf %0 : vector<1024x128xbf16> to vector<1024x128xf32>
    %c0_1 = arith.constant 0 : index
    %c0_2 = arith.constant 0 : index
    %2 = vector.load %arg2[%c0_1, %c0_2] : memref<1x128xf32, #tpu.memory_space<vmem>>, vector<1x128xf32>
    %3 = vector.broadcast %2 : vector<1x128xf32> to vector<1024x128xf32>
    %4 = arith.mulf %1, %3 : vector<1024x128xf32>
    %c0_3 = arith.constant 0 : index
    %c0_4 = arith.constant 0 : index
    %5 = vector.load %arg3[%c0_3, %c0_4] : memref<1x128xf32, #tpu.memory_space<vmem>>, vector<1x128xf32>
    %6 = vector.broadcast %5 : vector<1x128xf32> to vector<1024x128xf32>
    %7 = arith.addf %4, %6 : vector<1024x128xf32>
    %c0_5 = arith.constant 0 : index
    %c0_6 = arith.constant 0 : index
    %8 = vector.load %arg4[%c0_5, %c0_6] : memref<1024x8xf32, #tpu.memory_space<vmem>>, vector<1024x8xf32>
    %cst = arith.constant 0.000000e+00 : f32
    %9 = vector.broadcast %cst : f32 to vector<1024x120xf32>
    %10 = tpu.concatenate %8, %9 in 1 : vector<1024x8xf32>, vector<1024x120xf32> -> vector<1024x128xf32>
    %11 = arith.addf %7, %10 : vector<1024x128xf32>
    %cst_7 = arith.constant 0.000000e+00 : f32
    %12 = vector.broadcast %cst_7 : f32 to vector<1024x128xf32>
    %13 = arith.maximumf %11, %12 : vector<1024x128xf32>
    %c0_8 = arith.constant 0 : index
    %c0_9 = arith.constant 0 : index
    %14 = vector.load %arg5[%c0_8, %c0_9] : memref<1024x128xf32, #tpu.memory_space<vmem>>, vector<1024x128xf32>
    tpu.vector_store %arg5[%c0_8, %c0_9], %13 {strides = array<i32>} : memref<1024x128xf32, #tpu.memory_space<vmem>>, vector<1024x128xf32>,
    return
  }
  func.func @transform_0(%arg0: i32) -> (i32, i32) {
    %c0_i32 = arith.constant 0 : i32
    %c0_i32_0 = arith.constant 0 : i32
    return %arg0, %c0_i32 : i32, i32
  }
  func.func @transform_1(%arg0: i32) -> (i32, i32) {
    %c0_i32 = arith.constant 0 : i32
    %c0_i32_0 = arith.constant 0 : i32
    %c0_i32_1 = arith.constant 0 : i32
    return %c0_i32, %c0_i32_0 : i32, i32
  }
  func.func @transform_2(%arg0: i32) -> (i32, i32) {
    %c0_i32 = arith.constant 0 : i32
    %c0_i32_0 = arith.constant 0 : i32
    %c0_i32_1 = arith.constant 0 : i32
    return %c0_i32, %c0_i32_0 : i32, i32
  }
  func.func @transform_3(%arg0: i32) -> (i32, i32) {
    %c0_i32 = arith.constant 0 : i32
    %c0_i32_0 = arith.constant 0 : i32
    return %arg0, %c0_i32 : i32, i32
  }
  func.func @transform_4(%arg0: i32) -> (i32, i32) {
    %c0_i32 = arith.constant 0 : i32
    %c0_i32_0 = arith.constant 0 : i32
    return %arg0, %c0_i32 : i32, i32
  }
}

</mosaic_0001>

<bundles_post_ra>
// kernel: residual_block_forward.5
= control target key start
LH: loop header
LB: loop body
LE: loop exit
PB: predicated region body
PF: predicated region fallthrough
CT: control target
= control target key end

     0   :  { %s1887_s12 = smov 0   ;;  %s2319_s0 = inlined_call_operand.vmem [shape: bf16[2048,128], index: 0, kind: input, shape index: {}]   ;;  %s2320_s1 = inlined_call_operand.vmem [shape: f32[1,128], index: 1, kind: input, shape index: {}]   ;;  %s2321_s2 = inlined_call_operand.vmem [shape: f32[1,128], index: 2, kind: input, shape index: {}]   ;;  %s2322_s3 = inlined_call_operand.vmem [shape: bf16[2048,128], index: 3, kind: output, shape index: {}]  }
   0x1 LB: > { %s1134_s13 = sadd.s32 4294967295, %s1865_s12   ;;  %p1138_p0 = scmp.ge.s32.totalorder %s1865_s12, 1  ;;  %s1865_s12 = sphi %s1887_s12, %s13_s12  }
   0x2   : > { %p138_p1 = scmp.lt.s32.totalorder %s1865_s12, 3 }
   0x4   : > { %p139_p2 = pnand %p1138_p0, %p138_p1 }
   0x5   : > { %s1139_s14 = sshll.u32 (!%p139_p2), %s1134_s13, 7 }
   0x6   : > { %142 = sbr.rel (%p139_p2) target bundleno = 165 (0xa5), region = 32  ;;  %p163_p3 = scmp.lt.s32.totalorder (!%p139_p2), %s1139_s14, 255 }
   0xb   : > { %s2324_s14 = smov (!%p163_p3, %s1139_s14), 255  ;;  %v1908_v0 = vld [vmem:[%s2320_s1] ss:$0 sm:$0xff] }
   0xc   : > { %s1140_s15 = sshll.u32 %s2324_s14, 2  ;;  %v1916_v6 = vld [vmem:[%s2321_s2] ss:$0 sm:$0xff] }
   0xd   : > { %s1903_s18 = scalar_lea.vmem %s2319_s0, %s1140_s15  ;;  %s1942_s25 = scalar_lea.vmem %s2322_s3, %s1140_s15 }
   0xe   : > { %v1146_v1 = vld [vmem:[%s1903_s18] sm:$0xff]   ;;  %v1721_v2 = vld [vmem:[%s1903_s18 + $0x8] sm:$0xff]   ;;  %v1722_v3 = vld [vmem:[%s1903_s18 + $0x10] sm:$0xff]  }
   0xf   : > { %v1147_v4 = vunpack.c.l.bf16 %v1146_v1  ;;  %v1148_v5 = vunpack.c.h.bf16 %v1146_v1  ;;  %v1151_v7 = vunpack.c.l.bf16 %v1721_v2  ;;  %v1152_v8 = vunpack.c.h.bf16 %v1721_v2  ;;  %v1723_v9 = vld [vmem:[%s1903_s18 + $0x18] sm:$0xff]   ;;  %v1724_v30 = vld [vmem:[%s1903_s18 + $0x20] sm:$0xff]   ;;  %v1725_v35 = vld [vmem:[%s1903_s18 + $0x28] sm:$0xff]  }
  0x10   : > { %v1155_v10 = vunpack.c.l.bf16 %v1722_v3  ;;  %v1156_v11 = vunpack.c.h.bf16 %v1722_v3  ;;  %v1159_v12 = vunpack.c.l.bf16 %v1723_v9  ;;  %v1160_v13 = vunpack.c.h.bf16 %v1723_v9  ;;  %v1726_v40 = vld [vmem:[%s1903_s18 + $0x30] sm:$0xff]   ;;  %v1727_v45 = vld [vmem:[%s1903_s18 + $0x38] sm:$0xff]   ;;  %v1728_v3 = vld [vmem:[%s1903_s18 + $0x40] sm:$0xff]  }
  0x11   : > { %v434_v14 = vmul.f32 %v1908_v0, %v1147_v4  ;;  %v435_v15 = vmul.f32 %v1908_v0, %v1148_v5  ;;  %v436_v16 = vmul.f32 %v1908_v0, %v1151_v7  ;;  %v437_v17 = vmul.f32 %v1908_v0, %v1152_v8 }
  0x12   : > { %v438_v18 = vmul.f32 %v1908_v0, %v1155_v10  ;;  %v439_v19 = vmul.f32 %v1908_v0, %v1156_v11  ;;  %v440_v20 = vmul.f32 %v1908_v0, %v1159_v12  ;;  %v441_v21 = vmul.f32 %v1908_v0, %v1160_v13  ;;  %v1729_v13 = vld [vmem:[%s1903_s18 + $0x48] sm:$0xff]  }
  0x13   : > { %v566_v22 = vadd.f32 %v1916_v6, %v434_v14  ;;  %v567_v23 = vadd.f32 %v1916_v6, %v435_v15  ;;  %v568_v24 = vadd.f32 %v1916_v6, %v436_v16  ;;  %v569_v25 = vadd.f32 %v1916_v6, %v437_v17 }
  0x14   : > { %v570_v26 = vadd.f32 %v1916_v6, %v438_v18  ;;  %v571_v27 = vadd.f32 %v1916_v6, %v439_v19  ;;  %v572_v28 = vadd.f32 %v1916_v6, %v440_v20  ;;  %v573_v29 = vadd.f32 %v1916_v6, %v441_v21  ;;  %v1730_v18 = vld [vmem:[%s1903_s18 + $0x50] sm:$0xff]  }
  0x15   : > { %v694_v31 = vmax.f32 %v566_v22, 0.0  ;;  %v695_v32 = vmax.f32 %v567_v23, 0.0  ;;  %v696_v33 = vmax.f32 %v568_v24, 0.0  ;;  %v697_v34 = vmax.f32 %v569_v25, 0.0  ;;  %v1731_v23 = vld [vmem:[%s1903_s18 + $0x58] sm:$0xff]  }
  0x16   : > { %v698_v36 = vmax.f32 %v570_v26, 0.0  ;;  %v699_v37 = vmax.f32 %v571_v27, 0.0  ;;  %v700_v38 = vmax.f32 %v572_v28, 0.0  ;;  %v701_v39 = vmax.f32 %v573_v29, 0.0 }
  0x17   : > { %v1404_v41 = vpack.c.bf16 %v695_v32, %v694_v31  ;;  %v1409_v42 = vpack.c.bf16 %v697_v34, %v696_v33  ;;  %v1163_v43 = vunpack.c.l.bf16 %v1724_v30  ;;  %v1164_v44 = vunpack.c.h.bf16 %v1724_v30 }
  0x18   : > { %v1414_v46 = vpack.c.bf16 %v699_v37, %v698_v36  ;;  %v1419_v47 = vpack.c.bf16 %v701_v39, %v700_v38  ;;  %v1167_v48 = vunpack.c.l.bf16 %v1725_v35  ;;  %v1168_v49 = vunpack.c.h.bf16 %v1725_v35 }
  0x19   : > { %1405 = vst [vmem:[%s1942_s25] sm:$0xff] %v1404_v41   ;;  %v442_v50 = vmul.f32 %v1908_v0, %v1163_v43  ;;  %v443_v51 = vmul.f32 %v1908_v0, %v1164_v44  ;;  %v1171_v52 = vunpack.c.l.bf16 %v1726_v40  ;;  %v1172_v53 = vunpack.c.h.bf16 %v1726_v40  ;;  %v1732_v40 = vld [vmem:[%s1903_s18 + $0x60] sm:$0xff]  }
  0x1a   : > { %1784 = vst [vmem:[%s1942_s25 + $0x8] sm:$0xff] %v1409_v42   ;;  %v444_v54 = vmul.f32 %v1908_v0, %v1167_v48  ;;  %v445_v55 = vmul.f32 %v1908_v0, %v1168_v49  ;;  %v1175_v56 = vunpack.c.l.bf16 %v1727_v45  ;;  %v1176_v57 = vunpack.c.h.bf16 %v1727_v45 }
  0x1b   : > { %1785 = vst [vmem:[%s1942_s25 + $0x10] sm:$0xff] %v1414_v46   ;;  %v574_v58 = vadd.f32 %v1916_v6, %v442_v50  ;;  %v575_v59 = vadd.f32 %v1916_v6, %v443_v51  ;;  %v446_v60 = vmul.f32 %v1908_v0, %v1171_v52  ;;  %v447_v61 = vmul.f32 %v1908_v0, %v1172_v53  ;;  %v1733_v53 = vld [vmem:[%s1903_s18 + $0x68] sm:$0xff]  }
  0x1c   : > { %1786 = vst [vmem:[%s1942_s25 + $0x18] sm:$0xff] %v1419_v47   ;;  %v576_v62 = vadd.f32 %v1916_v6, %v444_v54  ;;  %v577_v63 = vadd.f32 %v1916_v6, %v445_v55  ;;  %v448_v1 = vmul.f32 %v1908_v0, %v1175_v56  ;;  %v449_v2 = vmul.f32 %v1908_v0, %v1176_v57 }
  0x1d   : > { %v702_v4 = vmax.f32 %v574_v58, 0.0  ;;  %v703_v5 = vmax.f32 %v575_v59, 0.0  ;;  %v578_v7 = vadd.f32 %v1916_v6, %v446_v60  ;;  %v579_v8 = vadd.f32 %v1916_v6, %v447_v61  ;;  %v1734_v58 = vld [vmem:[%s1903_s18 + $0x70] sm:$0xff]  }
  0x1e   : > { %v704_v9 = vmax.f32 %v576_v62, 0.0  ;;  %v705_v10 = vmax.f32 %v577_v63, 0.0  ;;  %v580_v11 = vadd.f32 %v1916_v6, %v448_v1  ;;  %v581_v12 = vadd.f32 %v1916_v6, %v449_v2  ;;  %v1735_v63 = vld [vmem:[%s1903_s18 + $0x78] sm:$0xff]  }
  0x1f   : > { %v1424_v14 = vpack.c.bf16 %v703_v5, %v702_v4  ;;  %v706_v15 = vmax.f32 %v578_v7, 0.0  ;;  %v707_v16 = vmax.f32 %v579_v8, 0.0  ;;  %v1179_v17 = vunpack.c.l.bf16 %v1728_v3 }
  0x20   : > { %v1429_v19 = vpack.c.bf16 %v705_v10, %v704_v9  ;;  %v708_v20 = vmax.f32 %v580_v11, 0.0  ;;  %v709_v21 = vmax.f32 %v581_v12, 0.0  ;;  %v1180_v22 = vunpack.c.h.bf16 %v1728_v3 }
  0x21   : > { %1787 = vst [vmem:[%s1942_s25 + $0x20] sm:$0xff] %v1424_v14   ;;  %v1434_v24 = vpack.c.bf16 %v707_v16, %v706_v15  ;;  %v450_v25 = vmul.f32 %v1908_v0, %v1179_v17  ;;  %v1183_v26 = vunpack.c.l.bf16 %v1729_v13  ;;  %v1184_v27 = vunpack.c.h.bf16 %v1729_v13  ;;  %v1736_v14 = vld [vmem:[%s1903_s18 + $0x80] sm:$0xff]  }
  0x22   : > { %1788 = vst [vmem:[%s1942_s25 + $0x28] sm:$0xff] %v1429_v19   ;;  %v1439_v28 = vpack.c.bf16 %v709_v21, %v708_v20  ;;  %v451_v29 = vmul.f32 %v1908_v0, %v1180_v22  ;;  %v1187_v30 = vunpack.c.l.bf16 %v1730_v18  ;;  %v1188_v31 = vunpack.c.h.bf16 %v1730_v18 }
  0x23   : > { %1789 = vst [vmem:[%s1942_s25 + $0x30] sm:$0xff] %v1434_v24   ;;  %v582_v32 = vadd.f32 %v1916_v6, %v450_v25  ;;  %v452_v33 = vmul.f32 %v1908_v0, %v1183_v26  ;;  %v453_v34 = vmul.f32 %v1908_v0, %v1184_v27  ;;  %v1191_v35 = vunpack.c.l.bf16 %v1731_v23 }
  0x24   : > { %1790 = vst [vmem:[%s1942_s25 + $0x38] sm:$0xff] %v1439_v28   ;;  %v583_v36 = vadd.f32 %v1916_v6, %v451_v29  ;;  %v454_v37 = vmul.f32 %v1908_v0, %v1187_v30  ;;  %v455_v38 = vmul.f32 %v1908_v0, %v1188_v31  ;;  %v1192_v39 = vunpack.c.h.bf16 %v1731_v23  ;;  %v1737_v31 = vld [vmem:[%s1903_s18 + $0x88] sm:$0xff]  }
  0x25   : > { %v710_v41 = vmax.f32 %v582_v32, 0.0  ;;  %v584_v42 = vadd.f32 %v1916_v6, %v452_v33  ;;  %v585_v43 = vadd.f32 %v1916_v6, %v453_v34  ;;  %v456_v44 = vmul.f32 %v1908_v0, %v1191_v35 }
  0x26   : > { %v711_v45 = vmax.f32 %v583_v36, 0.0  ;;  %v586_v46 = vadd.f32 %v1916_v6, %v454_v37  ;;  %v587_v47 = vadd.f32 %v1916_v6, %v455_v38  ;;  %v457_v48 = vmul.f32 %v1908_v0, %v1192_v39  ;;  %v1738_v36 = vld [vmem:[%s1903_s18 + $0x90] sm:$0xff]  }
  0x27   : > { %v712_v49 = vmax.f32 %v584_v42, 0.0  ;;  %v713_v50 = vmax.f32 %v585_v43, 0.0  ;;  %v588_v51 = vadd.f32 %v1916_v6, %v456_v44  ;;  %v1195_v52 = vunpack.c.l.bf16 %v1732_v40 }
  0x28   : > { %v1444_v54 = vpack.c.bf16 %v711_v45, %v710_v41  ;;  %v714_v55 = vmax.f32 %v586_v46, 0.0  ;;  %v715_v56 = vmax.f32 %v587_v47, 0.0  ;;  %v589_v57 = vadd.f32 %v1916_v6, %v457_v48  ;;  %v1739_v41 = vld [vmem:[%s1903_s18 + $0x98] sm:$0xff]  }
  0x29   : > { %v1449_v59 = vpack.c.bf16 %v713_v50, %v712_v49  ;;  %v716_v60 = vmax.f32 %v588_v51, 0.0  ;;  %v1196_v61 = vunpack.c.h.bf16 %v1732_v40  ;;  %v458_v62 = vmul.f32 %v1908_v0, %v1195_v52 }
  0x2a   : > { %1791 = vst [vmem:[%s1942_s25 + $0x40] sm:$0xff] %v1444_v54   ;;  %v1454_v1 = vpack.c.bf16 %v715_v56, %v714_v55  ;;  %v717_v2 = vmax.f32 %v589_v57, 0.0  ;;  %v1199_v3 = vunpack.c.l.bf16 %v1733_v53  ;;  %v1200_v4 = vunpack.c.h.bf16 %v1733_v53  ;;  %v1740_v54 = vld [vmem:[%s1903_s18 + $0xa0] sm:$0xff]  }
  0x2b   : > { %1792 = vst [vmem:[%s1942_s25 + $0x48] sm:$0xff] %v1449_v59   ;;  %v459_v5 = vmul.f32 %v1908_v0, %v1196_v61  ;;  %v590_v7 = vadd.f32 %v1916_v6, %v458_v62  ;;  %v1203_v8 = vunpack.c.l.bf16 %v1734_v58  ;;  %v1204_v9 = vunpack.c.h.bf16 %v1734_v58 }
  0x2c   : > { %1793 = vst [vmem:[%s1942_s25 + $0x50] sm:$0xff] %v1454_v1   ;;  %v1459_v10 = vpack.c.bf16 %v717_v2, %v716_v60  ;;  %v460_v11 = vmul.f32 %v1908_v0, %v1199_v3  ;;  %v461_v12 = vmul.f32 %v1908_v0, %v1200_v4  ;;  %v1207_v13 = vunpack.c.l.bf16 %v1735_v63  ;;  %v1741_v4 = vld [vmem:[%s1903_s18 + $0xa8] sm:$0xff]  }
  0x2d   : > { %v591_v15 = vadd.f32 %v1916_v6, %v459_v5  ;;  %v718_v16 = vmax.f32 %v590_v7, 0.0  ;;  %v462_v17 = vmul.f32 %v1908_v0, %v1203_v8  ;;  %v463_v18 = vmul.f32 %v1908_v0, %v1204_v9 }
  0x2e   : > { %1794 = vst [vmem:[%s1942_s25 + $0x58] sm:$0xff] %v1459_v10   ;;  %v592_v19 = vadd.f32 %v1916_v6, %v460_v11  ;;  %v593_v20 = vadd.f32 %v1916_v6, %v461_v12  ;;  %v1208_v21 = vunpack.c.h.bf16 %v1735_v63  ;;  %v464_v22 = vmul.f32 %v1908_v0, %v1207_v13 }
  0x2f   : > { %v719_v23 = vmax.f32 %v591_v15, 0.0  ;;  %v594_v24 = vadd.f32 %v1916_v6, %v462_v17  ;;  %v595_v25 = vadd.f32 %v1916_v6, %v463_v18  ;;  %v1211_v26 = vunpack.c.l.bf16 %v1736_v14 }
  0x30   : > { %v720_v27 = vmax.f32 %v592_v19, 0.0  ;;  %v721_v28 = vmax.f32 %v593_v20, 0.0  ;;  %v465_v29 = vmul.f32 %v1908_v0, %v1208_v21  ;;  %v596_v30 = vadd.f32 %v1916_v6, %v464_v22  ;;  %v1743_v19 = vld [vmem:[%s1903_s18 + $0xb8] sm:$0xff]  }
  0x31   : > { %v1464_v32 = vpack.c.bf16 %v719_v23, %v718_v16  ;;  %v722_v33 = vmax.f32 %v594_v24, 0.0  ;;  %v723_v34 = vmax.f32 %v595_v25, 0.0  ;;  %v1212_v35 = vunpack.c.h.bf16 %v1736_v14  ;;  %v1742_v14 = vld [vmem:[%s1903_s18 + $0xb0] sm:$0xff]  }
  0x32   : > { %v1469_v37 = vpack.c.bf16 %v721_v28, %v720_v27  ;;  %v597_v38 = vadd.f32 %v1916_v6, %v465_v29  ;;  %v724_v39 = vmax.f32 %v596_v30, 0.0  ;;  %v466_v40 = vmul.f32 %v1908_v0, %v1211_v26 }
  0x33   : > { %1795 = vst [vmem:[%s1942_s25 + $0x60] sm:$0xff] %v1464_v32   ;;  %v1474_v42 = vpack.c.bf16 %v723_v34, %v722_v33  ;;  %v467_v43 = vmul.f32 %v1908_v0, %v1212_v35  ;;  %v1215_v44 = vunpack.c.l.bf16 %v1737_v31  ;;  %v1216_v45 = vunpack.c.h.bf16 %v1737_v31  ;;  %v1744_v32 = vld [vmem:[%s1903_s18 + $0xc0] sm:$0xff]  }
  0x34   : > { %1796 = vst [vmem:[%s1942_s25 + $0x68] sm:$0xff] %v1469_v37   ;;  %v725_v46 = vmax.f32 %v597_v38, 0.0  ;;  %v598_v47 = vadd.f32 %v1916_v6, %v466_v40  ;;  %v1219_v48 = vunpack.c.l.bf16 %v1738_v36  ;;  %v1220_v49 = vunpack.c.h.bf16 %v1738_v36 }
  0x35   : > { %1797 = vst [vmem:[%s1942_s25 + $0x70] sm:$0xff] %v1474_v42   ;;  %v599_v50 = vadd.f32 %v1916_v6, %v467_v43  ;;  %v468_v51 = vmul.f32 %v1908_v0, %v1215_v44  ;;  %v469_v52 = vmul.f32 %v1908_v0, %v1216_v45  ;;  %v1223_v53 = vunpack.c.l.bf16 %v1739_v41  ;;  %v1745_v45 = vld [vmem:[%s1903_s18 + $0xc8] sm:$0xff]  }
  0x36   : > { %v1479_v55 = vpack.c.bf16 %v725_v46, %v724_v39  ;;  %v726_v56 = vmax.f32 %v598_v47, 0.0  ;;  %v470_v57 = vmul.f32 %v1908_v0, %v1219_v48  ;;  %v471_v58 = vmul.f32 %v1908_v0, %v1220_v49 }
  0x37   : > { %v727_v59 = vmax.f32 %v599_v50, 0.0  ;;  %v600_v60 = vadd.f32 %v1916_v6, %v468_v51  ;;  %v601_v61 = vadd.f32 %v1916_v6, %v469_v52  ;;  %v1224_v62 = vunpack.c.h.bf16 %v1739_v41 }
  0x38   : > { %1798 = vst [vmem:[%s1942_s25 + $0x78] sm:$0xff] %v1479_v55   ;;  %v602_v63 = vadd.f32 %v1916_v6, %v470_v57  ;;  %v603_v1 = vadd.f32 %v1916_v6, %v471_v58  ;;  %v472_v2 = vmul.f32 %v1908_v0, %v1223_v53  ;;  %v1227_v3 = vunpack.c.l.bf16 %v1740_v54 }
  0x39   : > { %v1484_v5 = vpack.c.bf16 %v727_v59, %v726_v56  ;;  %v728_v7 = vmax.f32 %v600_v60, 0.0  ;;  %v729_v8 = vmax.f32 %v601_v61, 0.0  ;;  %v473_v9 = vmul.f32 %v1908_v0, %v1224_v62 }
  0x3a   : > { %v730_v10 = vmax.f32 %v602_v63, 0.0  ;;  %v731_v11 = vmax.f32 %v603_v1, 0.0  ;;  %v604_v12 = vadd.f32 %v1916_v6, %v472_v2  ;;  %v1228_v13 = vunpack.c.h.bf16 %v1740_v54  ;;  %v1746_v54 = vld [vmem:[%s1903_s18 + $0xd0] sm:$0xff]   ;;  %v1747_v63 = vld [vmem:[%s1903_s18 + $0xd8] sm:$0xff]  }
  0x3b   : > { %1799 = vst [vmem:[%s1942_s25 + $0x80] sm:$0xff] %v1484_v5   ;;  %v1489_v15 = vpack.c.bf16 %v729_v8, %v728_v7  ;;  %v605_v16 = vadd.f32 %v1916_v6, %v473_v9  ;;  %v474_v17 = vmul.f32 %v1908_v0, %v1227_v3  ;;  %v1231_v18 = vunpack.c.l.bf16 %v1741_v4 }
  0x3c   : > { %v1494_v20 = vpack.c.bf16 %v731_v11, %v730_v10  ;;  %v732_v21 = vmax.f32 %v604_v12, 0.0  ;;  %v475_v22 = vmul.f32 %v1908_v0, %v1228_v13  ;;  %v1232_v23 = vunpack.c.h.bf16 %v1741_v4  ;;  %v1748_v10 = vld [vmem:[%s1903_s18 + $0xe0] sm:$0xff]  }
  0x3d   : > { %1800 = vst [vmem:[%s1942_s25 + $0x88] sm:$0xff] %v1489_v15   ;;  %v733_v24 = vmax.f32 %v605_v16, 0.0  ;;  %v606_v25 = vadd.f32 %v1916_v6, %v474_v17  ;;  %v476_v26 = vmul.f32 %v1908_v0, %v1231_v18  ;;  %v1235_v27 = vunpack.c.l.bf16 %v1742_v14 }
  0x3e   : > { %1801 = vst [vmem:[%s1942_s25 + $0x90] sm:$0xff] %v1494_v20   ;;  %v607_v28 = vadd.f32 %v1916_v6, %v475_v22  ;;  %v477_v29 = vmul.f32 %v1908_v0, %v1232_v23  ;;  %v1236_v30 = vunpack.c.h.bf16 %v1742_v14  ;;  %v1239_v31 = vunpack.c.l.bf16 %v1743_v19  ;;  %v1749_v23 = vld [vmem:[%s1903_s18 + $0xe8] sm:$0xff]  }
  0x3f   : > { %v1499_v33 = vpack.c.bf16 %v733_v24, %v732_v21  ;;  %v734_v34 = vmax.f32 %v606_v25, 0.0  ;;  %v608_v35 = vadd.f32 %v1916_v6, %v476_v26  ;;  %v478_v36 = vmul.f32 %v1908_v0, %v1235_v27 }
  0x40   : > { %v735_v37 = vmax.f32 %v607_v28, 0.0  ;;  %v609_v38 = vadd.f32 %v1916_v6, %v477_v29  ;;  %v479_v39 = vmul.f32 %v1908_v0, %v1236_v30  ;;  %v1240_v40 = vunpack.c.h.bf16 %v1743_v19 }
  0x41   : > { %1802 = vst [vmem:[%s1942_s25 + $0x98] sm:$0xff] %v1499_v33   ;;  %v736_v41 = vmax.f32 %v608_v35, 0.0  ;;  %v610_v42 = vadd.f32 %v1916_v6, %v478_v36  ;;  %v480_v43 = vmul.f32 %v1908_v0, %v1239_v31  ;;  %v1243_v44 = vunpack.c.l.bf16 %v1744_v32 }
  0x42   : > { %v1504_v46 = vpack.c.bf16 %v735_v37, %v734_v34  ;;  %v737_v47 = vmax.f32 %v609_v38, 0.0  ;;  %v611_v48 = vadd.f32 %v1916_v6, %v479_v39  ;;  %v481_v49 = vmul.f32 %v1908_v0, %v1240_v40 }
  0x43   : > { %v738_v50 = vmax.f32 %v610_v42, 0.0  ;;  %v612_v51 = vadd.f32 %v1916_v6, %v480_v43  ;;  %v1244_v52 = vunpack.c.h.bf16 %v1744_v32  ;;  %v482_v53 = vmul.f32 %v1908_v0, %v1243_v44  ;;  %v1750_v32 = vld [vmem:[%s1903_s18 + $0xf0] sm:$0xff]  }
  0x44   : > { %1803 = vst [vmem:[%s1942_s25 + $0xa0] sm:$0xff] %v1504_v46   ;;  %v1509_v55 = vpack.c.bf16 %v737_v47, %v736_v41  ;;  %v739_v56 = vmax.f32 %v611_v48, 0.0  ;;  %v613_v57 = vadd.f32 %v1916_v6, %v481_v49  ;;  %v1247_v58 = vunpack.c.l.bf16 %v1745_v45  ;;  %v1751_v41 = vld [vmem:[%s1903_s18 + $0xf8] sm:$0xff]  }
  0x45   : > { %v740_v59 = vmax.f32 %v612_v51, 0.0  ;;  %v483_v60 = vmul.f32 %v1908_v0, %v1244_v52  ;;  %v614_v61 = vadd.f32 %v1916_v6, %v482_v53  ;;  %v1248_v62 = vunpack.c.h.bf16 %v1745_v45 }
  0x46   : > { %1804 = vst [vmem:[%s1942_s25 + $0xa8] sm:$0xff] %v1509_v55   ;;  %v1514_v1 = vpack.c.bf16 %v739_v56, %v738_v50  ;;  %v741_v2 = vmax.f32 %v613_v57, 0.0  ;;  %v484_v3 = vmul.f32 %v1908_v0, %v1247_v58  ;;  %v1251_v4 = vunpack.c.l.bf16 %v1746_v54  ;;  %v1752_v50 = vld [vmem:[%s1903_s18 + $0x100] sm:$0xff]  }
  0x47   : > { %v615_v5 = vadd.f32 %v1916_v6, %v483_v60  ;;  %v742_v7 = vmax.f32 %v614_v61, 0.0  ;;  %v485_v8 = vmul.f32 %v1908_v0, %v1248_v62  ;;  %v1252_v9 = vunpack.c.h.bf16 %v1746_v54 }
  0x48   : > { %1805 = vst [vmem:[%s1942_s25 + $0xb0] sm:$0xff] %v1514_v1   ;;  %v1519_v11 = vpack.c.bf16 %v741_v2, %v740_v59  ;;  %v616_v12 = vadd.f32 %v1916_v6, %v484_v3  ;;  %v486_v13 = vmul.f32 %v1908_v0, %v1251_v4  ;;  %v1255_v14 = vunpack.c.l.bf16 %v1747_v63 }
  0x49   : > { %v743_v15 = vmax.f32 %v615_v5, 0.0  ;;  %v617_v16 = vadd.f32 %v1916_v6, %v485_v8  ;;  %v487_v17 = vmul.f32 %v1908_v0, %v1252_v9  ;;  %v1256_v18 = vunpack.c.h.bf16 %v1747_v63  ;;  %v1753_v63 = vld [vmem:[%s1903_s18 + $0x108] sm:$0xff]  }
  0x4a   : > { %1806 = vst [vmem:[%s1942_s25 + $0xb8] sm:$0xff] %v1519_v11   ;;  %v744_v19 = vmax.f32 %v616_v12, 0.0  ;;  %v618_v20 = vadd.f32 %v1916_v6, %v486_v13  ;;  %v488_v21 = vmul.f32 %v1908_v0, %v1255_v14  ;;  %v1259_v22 = vunpack.c.l.bf16 %v1748_v10 }
  0x4b   : > { %v1524_v24 = vpack.c.bf16 %v743_v15, %v742_v7  ;;  %v745_v25 = vmax.f32 %v617_v16, 0.0  ;;  %v619_v26 = vadd.f32 %v1916_v6, %v487_v17  ;;  %v489_v27 = vmul.f32 %v1908_v0, %v1256_v18 }
  0x4c   : > { %v746_v28 = vmax.f32 %v618_v20, 0.0  ;;  %v620_v29 = vadd.f32 %v1916_v6, %v488_v21  ;;  %v1260_v30 = vunpack.c.h.bf16 %v1748_v10  ;;  %v490_v31 = vmul.f32 %v1908_v0, %v1259_v22  ;;  %v1754_v10 = vld [vmem:[%s1903_s18 + $0x110] sm:$0xff]  }
  0x4d   : > { %1807 = vst [vmem:[%s1942_s25 + $0xc0] sm:$0xff] %v1524_v24   ;;  %v1529_v33 = vpack.c.bf16 %v745_v25, %v744_v19  ;;  %v747_v34 = vmax.f32 %v619_v26, 0.0  ;;  %v621_v35 = vadd.f32 %v1916_v6, %v489_v27  ;;  %v1263_v36 = vunpack.c.l.bf16 %v1749_v23  ;;  %v1755_v19 = vld [vmem:[%s1903_s18 + $0x118] sm:$0xff]  }
  0x4e   : > { %v748_v37 = vmax.f32 %v620_v29, 0.0  ;;  %v491_v38 = vmul.f32 %v1908_v0, %v1260_v30  ;;  %v622_v39 = vadd.f32 %v1916_v6, %v490_v31  ;;  %v1264_v40 = vunpack.c.h.bf16 %v1749_v23 }
  0x4f   : > { %1808 = vst [vmem:[%s1942_s25 + $0xc8] sm:$0xff] %v1529_v33   ;;  %v1534_v42 = vpack.c.bf16 %v747_v34, %v746_v28  ;;  %v749_v43 = vmax.f32 %v621_v35, 0.0  ;;  %v492_v44 = vmul.f32 %v1908_v0, %v1263_v36  ;;  %v1267_v45 = vunpack.c.l.bf16 %v1750_v32  ;;  %v1756_v28 = vld [vmem:[%s1903_s18 + $0x120] sm:$0xff]  }
  0x50   : > { %v623_v46 = vadd.f32 %v1916_v6, %v491_v38  ;;  %v750_v47 = vmax.f32 %v622_v39, 0.0  ;;  %v493_v48 = vmul.f32 %v1908_v0, %v1264_v40  ;;  %v1268_v49 = vunpack.c.h.bf16 %v1750_v32 }
  0x51   : > { %1809 = vst [vmem:[%s1942_s25 + $0xd0] sm:$0xff] %v1534_v42   ;;  %v1539_v51 = vpack.c.bf16 %v749_v43, %v748_v37  ;;  %v624_v52 = vadd.f32 %v1916_v6, %v492_v44  ;;  %v494_v53 = vmul.f32 %v1908_v0, %v1267_v45  ;;  %v1271_v54 = vunpack.c.l.bf16 %v1751_v41 }
  0x52   : > { %v751_v55 = vmax.f32 %v623_v46, 0.0  ;;  %v625_v56 = vadd.f32 %v1916_v6, %v493_v48  ;;  %v495_v57 = vmul.f32 %v1908_v0, %v1268_v49  ;;  %v1272_v58 = vunpack.c.h.bf16 %v1751_v41  ;;  %v1757_v41 = vld [vmem:[%s1903_s18 + $0x128] sm:$0xff]  }
  0x53   : > { %1810 = vst [vmem:[%s1942_s25 + $0xd8] sm:$0xff] %v1539_v51   ;;  %v752_v59 = vmax.f32 %v624_v52, 0.0  ;;  %v626_v60 = vadd.f32 %v1916_v6, %v494_v53  ;;  %v496_v61 = vmul.f32 %v1908_v0, %v1271_v54  ;;  %v1275_v62 = vunpack.c.l.bf16 %v1752_v50 }
  0x54   : > { %v1544_v1 = vpack.c.bf16 %v751_v55, %v750_v47  ;;  %v753_v2 = vmax.f32 %v625_v56, 0.0  ;;  %v627_v3 = vadd.f32 %v1916_v6, %v495_v57  ;;  %v497_v4 = vmul.f32 %v1908_v0, %v1272_v58 }
  0x55   : > { %v754_v5 = vmax.f32 %v626_v60, 0.0  ;;  %v628_v7 = vadd.f32 %v1916_v6, %v496_v61  ;;  %v1276_v8 = vunpack.c.h.bf16 %v1752_v50  ;;  %v498_v9 = vmul.f32 %v1908_v0, %v1275_v62  ;;  %v1758_v50 = vld [vmem:[%s1903_s18 + $0x130] sm:$0xff]  }
  0x56   : > { %1811 = vst [vmem:[%s1942_s25 + $0xe0] sm:$0xff] %v1544_v1   ;;  %v1549_v11 = vpack.c.bf16 %v753_v2, %v752_v59  ;;  %v755_v12 = vmax.f32 %v627_v3, 0.0  ;;  %v629_v13 = vadd.f32 %v1916_v6, %v497_v4  ;;  %v1279_v14 = vunpack.c.l.bf16 %v1753_v63  ;;  %v1759_v59 = vld [vmem:[%s1903_s18 + $0x138] sm:$0xff]  }
  0x57   : > { %v756_v15 = vmax.f32 %v628_v7, 0.0  ;;  %v499_v16 = vmul.f32 %v1908_v0, %v1276_v8  ;;  %v630_v17 = vadd.f32 %v1916_v6, %v498_v9  ;;  %v1280_v18 = vunpack.c.h.bf16 %v1753_v63 }
  0x58   : > { %1812 = vst [vmem:[%s1942_s25 + $0xe8] sm:$0xff] %v1549_v11   ;;  %v1554_v20 = vpack.c.bf16 %v755_v12, %v754_v5  ;;  %v757_v21 = vmax.f32 %v629_v13, 0.0  ;;  %v500_v22 = vmul.f32 %v1908_v0, %v1279_v14  ;;  %v1283_v23 = vunpack.c.l.bf16 %v1754_v10  ;;  %v1760_v5 = vld [vmem:[%s1903_s18 + $0x140] sm:$0xff]  }
  0x59   : > { %v631_v24 = vadd.f32 %v1916_v6, %v499_v16  ;;  %v758_v25 = vmax.f32 %v630_v17, 0.0  ;;  %v501_v26 = vmul.f32 %v1908_v0, %v1280_v18  ;;  %v1284_v27 = vunpack.c.h.bf16 %v1754_v10 }
  0x5a   : > { %1813 = vst [vmem:[%s1942_s25 + $0xf0] sm:$0xff] %v1554_v20   ;;  %v1559_v29 = vpack.c.bf16 %v757_v21, %v756_v15  ;;  %v632_v30 = vadd.f32 %v1916_v6, %v500_v22  ;;  %v502_v31 = vmul.f32 %v1908_v0, %v1283_v23  ;;  %v1287_v32 = vunpack.c.l.bf16 %v1755_v19 }
  0x5b   : > { %v759_v33 = vmax.f32 %v631_v24, 0.0  ;;  %v633_v34 = vadd.f32 %v1916_v6, %v501_v26  ;;  %v503_v35 = vmul.f32 %v1908_v0, %v1284_v27  ;;  %v1288_v36 = vunpack.c.h.bf16 %v1755_v19  ;;  %v1761_v19 = vld [vmem:[%s1903_s18 + $0x148] sm:$0xff]  }
  0x5c   : > { %1814 = vst [vmem:[%s1942_s25 + $0xf8] sm:$0xff] %v1559_v29   ;;  %v760_v37 = vmax.f32 %v632_v30, 0.0  ;;  %v634_v38 = vadd.f32 %v1916_v6, %v502_v31  ;;  %v504_v39 = vmul.f32 %v1908_v0, %v1287_v32  ;;  %v1291_v40 = vunpack.c.l.bf16 %v1756_v28 }
  0x5d   : > { %v1564_v42 = vpack.c.bf16 %v759_v33, %v758_v25  ;;  %v761_v43 = vmax.f32 %v633_v34, 0.0  ;;  %v635_v44 = vadd.f32 %v1916_v6, %v503_v35  ;;  %v505_v45 = vmul.f32 %v1908_v0, %v1288_v36 }
  0x5e   : > { %v762_v46 = vmax.f32 %v634_v38, 0.0  ;;  %v636_v47 = vadd.f32 %v1916_v6, %v504_v39  ;;  %v1292_v48 = vunpack.c.h.bf16 %v1756_v28  ;;  %v506_v49 = vmul.f32 %v1908_v0, %v1291_v40  ;;  %v1762_v28 = vld [vmem:[%s1903_s18 + $0x150] sm:$0xff]  }
  0x5f   : > { %1815 = vst [vmem:[%s1942_s25 + $0x100] sm:$0xff] %v1564_v42   ;;  %v1569_v51 = vpack.c.bf16 %v761_v43, %v760_v37  ;;  %v763_v52 = vmax.f32 %v635_v44, 0.0  ;;  %v637_v53 = vadd.f32 %v1916_v6, %v505_v45  ;;  %v1295_v54 = vunpack.c.l.bf16 %v1757_v41  ;;  %v1763_v37 = vld [vmem:[%s1903_s18 + $0x158] sm:$0xff]  }
  0x60   : > { %v764_v55 = vmax.f32 %v636_v47, 0.0  ;;  %v507_v56 = vmul.f32 %v1908_v0, %v1292_v48  ;;  %v638_v57 = vadd.f32 %v1916_v6, %v506_v49  ;;  %v1296_v58 = vunpack.c.h.bf16 %v1757_v41 }
  0x61   : > { %1816 = vst [vmem:[%s1942_s25 + $0x108] sm:$0xff] %v1569_v51   ;;  %v1574_v60 = vpack.c.bf16 %v763_v52, %v762_v46  ;;  %v765_v61 = vmax.f32 %v637_v53, 0.0  ;;  %v508_v62 = vmul.f32 %v1908_v0, %v1295_v54  ;;  %v1299_v63 = vunpack.c.l.bf16 %v1758_v50  ;;  %v1764_v46 = vld [vmem:[%s1903_s18 + $0x160] sm:$0xff]  }
  0x62   : > { %v639_v1 = vadd.f32 %v1916_v6, %v507_v56  ;;  %v766_v2 = vmax.f32 %v638_v57, 0.0  ;;  %v509_v3 = vmul.f32 %v1908_v0, %v1296_v58  ;;  %v1300_v4 = vunpack.c.h.bf16 %v1758_v50 }
  0x63   : > { %1817 = vst [vmem:[%s1942_s25 + $0x110] sm:$0xff] %v1574_v60   ;;  %v1579_v7 = vpack.c.bf16 %v765_v61, %v764_v55  ;;  %v640_v8 = vadd.f32 %v1916_v6, %v508_v62  ;;  %v510_v9 = vmul.f32 %v1908_v0, %v1299_v63  ;;  %v1303_v10 = vunpack.c.l.bf16 %v1759_v59 }
  0x64   : > { %v767_v11 = vmax.f32 %v639_v1, 0.0  ;;  %v641_v12 = vadd.f32 %v1916_v6, %v509_v3  ;;  %v511_v13 = vmul.f32 %v1908_v0, %v1300_v4  ;;  %v1304_v14 = vunpack.c.h.bf16 %v1759_v59  ;;  %v1765_v59 = vld [vmem:[%s1903_s18 + $0x168] sm:$0xff]  }
  0x65   : > { %1818 = vst [vmem:[%s1942_s25 + $0x118] sm:$0xff] %v1579_v7   ;;  %v768_v15 = vmax.f32 %v640_v8, 0.0  ;;  %v642_v16 = vadd.f32 %v1916_v6, %v510_v9  ;;  %v512_v17 = vmul.f32 %v1908_v0, %v1303_v10  ;;  %v1307_v18 = vunpack.c.l.bf16 %v1760_v5 }
  0x66   : > { %v1584_v20 = vpack.c.bf16 %v767_v11, %v766_v2  ;;  %v769_v21 = vmax.f32 %v641_v12, 0.0  ;;  %v643_v22 = vadd.f32 %v1916_v6, %v511_v13  ;;  %v513_v23 = vmul.f32 %v1908_v0, %v1304_v14 }
  0x67   : > { %v770_v24 = vmax.f32 %v642_v16, 0.0  ;;  %v644_v25 = vadd.f32 %v1916_v6, %v512_v17  ;;  %v1308_v26 = vunpack.c.h.bf16 %v1760_v5  ;;  %v514_v27 = vmul.f32 %v1908_v0, %v1307_v18  ;;  %v1766_v5 = vld [vmem:[%s1903_s18 + $0x170] sm:$0xff]  }
  0x68   : > { %1819 = vst [vmem:[%s1942_s25 + $0x120] sm:$0xff] %v1584_v20   ;;  %v1589_v29 = vpack.c.bf16 %v769_v21, %v768_v15  ;;  %v771_v30 = vmax.f32 %v643_v22, 0.0  ;;  %v645_v31 = vadd.f32 %v1916_v6, %v513_v23  ;;  %v1311_v32 = vunpack.c.l.bf16 %v1761_v19  ;;  %v1767_v15 = vld [vmem:[%s1903_s18 + $0x178] sm:$0xff]  }
  0x69   : > { %v772_v33 = vmax.f32 %v644_v25, 0.0  ;;  %v515_v34 = vmul.f32 %v1908_v0, %v1308_v26  ;;  %v646_v35 = vadd.f32 %v1916_v6, %v514_v27  ;;  %v1312_v36 = vunpack.c.h.bf16 %v1761_v19 }
  0x6a   : > { %1820 = vst [vmem:[%s1942_s25 + $0x128] sm:$0xff] %v1589_v29   ;;  %v1594_v38 = vpack.c.bf16 %v771_v30, %v770_v24  ;;  %v773_v39 = vmax.f32 %v645_v31, 0.0  ;;  %v516_v40 = vmul.f32 %v1908_v0, %v1311_v32  ;;  %v1315_v41 = vunpack.c.l.bf16 %v1762_v28  ;;  %v1768_v24 = vld [vmem:[%s1903_s18 + $0x180] sm:$0xff]  }
  0x6b   : > { %v647_v42 = vadd.f32 %v1916_v6, %v515_v34  ;;  %v774_v43 = vmax.f32 %v646_v35, 0.0  ;;  %v517_v44 = vmul.f32 %v1908_v0, %v1312_v36  ;;  %v1316_v45 = vunpack.c.h.bf16 %v1762_v28  ;;  %v2205_v35 = vld [vmem:[%s2320_s1] ss:$0 sm:$0xff] }
  0x6c   : > { %1821 = vst [vmem:[%s1942_s25 + $0x130] sm:$0xff] %v1594_v38   ;;  %v1599_v47 = vpack.c.bf16 %v773_v39, %v772_v33  ;;  %v648_v48 = vadd.f32 %v1916_v6, %v516_v40  ;;  %v518_v49 = vmul.f32 %v1908_v0, %v1315_v41  ;;  %v1319_v50 = vunpack.c.l.bf16 %v1763_v37  ;;  %v1769_v38 = vld [vmem:[%s1903_s18 + $0x188] sm:$0xff]  }
  0x6d   : > { %v775_v51 = vmax.f32 %v647_v42, 0.0  ;;  %v649_v52 = vadd.f32 %v1916_v6, %v517_v44  ;;  %v519_v53 = vmul.f32 %v1908_v0, %v1316_v45  ;;  %v1320_v54 = vunpack.c.h.bf16 %v1763_v37 }
  0x6e   : > { %1822 = vst [vmem:[%s1942_s25 + $0x138] sm:$0xff] %v1599_v47   ;;  %v776_v55 = vmax.f32 %v648_v48, 0.0  ;;  %v650_v56 = vadd.f32 %v1916_v6, %v518_v49  ;;  %v520_v57 = vmul.f32 %v1908_v0, %v1319_v50  ;;  %v1323_v58 = vunpack.c.l.bf16 %v1764_v46 }
  0x6f   : > { %v1604_v60 = vpack.c.bf16 %v775_v51, %v774_v43  ;;  %v777_v61 = vmax.f32 %v649_v52, 0.0  ;;  %v651_v62 = vadd.f32 %v1916_v6, %v519_v53  ;;  %v521_v63 = vmul.f32 %v1908_v0, %v1320_v54 }
  0x70   : > { %v778_v1 = vmax.f32 %v650_v56, 0.0  ;;  %v652_v2 = vadd.f32 %v1916_v6, %v520_v57  ;;  %v1324_v3 = vunpack.c.h.bf16 %v1764_v46  ;;  %v522_v4 = vmul.f32 %v1908_v0, %v1323_v58  ;;  %v1770_v46 = vld [vmem:[%s1903_s18 + $0x190] sm:$0xff]  }
  0x71   : > { %1823 = vst [vmem:[%s1942_s25 + $0x140] sm:$0xff] %v1604_v60   ;;  %v1609_v7 = vpack.c.bf16 %v777_v61, %v776_v55  ;;  %v779_v8 = vmax.f32 %v651_v62, 0.0  ;;  %v653_v9 = vadd.f32 %v1916_v6, %v521_v63  ;;  %v1327_v10 = vunpack.c.l.bf16 %v1765_v59  ;;  %v1771_v55 = vld [vmem:[%s1903_s18 + $0x198] sm:$0xff]  }
  0x72   : > { %v780_v11 = vmax.f32 %v652_v2, 0.0  ;;  %v523_v12 = vmul.f32 %v1908_v0, %v1324_v3  ;;  %v654_v13 = vadd.f32 %v1916_v6, %v522_v4  ;;  %v1328_v14 = vunpack.c.h.bf16 %v1765_v59 }
  0x73   : > { %1824 = vst [vmem:[%s1942_s25 + $0x148] sm:$0xff] %v1609_v7   ;;  %v1614_v16 = vpack.c.bf16 %v779_v8, %v778_v1  ;;  %v781_v17 = vmax.f32 %v653_v9, 0.0  ;;  %v524_v18 = vmul.f32 %v1908_v0, %v1327_v10  ;;  %v1331_v19 = vunpack.c.l.bf16 %v1766_v5  ;;  %v1772_v1 = vld [vmem:[%s1903_s18 + $0x1a0] sm:$0xff]  }
  0x74   : > { %v655_v20 = vadd.f32 %v1916_v6, %v523_v12  ;;  %v782_v21 = vmax.f32 %v654_v13, 0.0  ;;  %v525_v22 = vmul.f32 %v1908_v0, %v1328_v14  ;;  %v1332_v23 = vunpack.c.h.bf16 %v1766_v5 }
  0x75   : > { %1825 = vst [vmem:[%s1942_s25 + $0x150] sm:$0xff] %v1614_v16   ;;  %v1619_v25 = vpack.c.bf16 %v781_v17, %v780_v11  ;;  %v656_v26 = vadd.f32 %v1916_v6, %v524_v18  ;;  %v526_v27 = vmul.f32 %v1908_v0, %v1331_v19  ;;  %v1335_v28 = vunpack.c.l.bf16 %v1767_v15 }
  0x76   : > { %v783_v29 = vmax.f32 %v655_v20, 0.0  ;;  %v657_v30 = vadd.f32 %v1916_v6, %v525_v22  ;;  %v527_v31 = vmul.f32 %v1908_v0, %v1332_v23  ;;  %v1336_v32 = vunpack.c.h.bf16 %v1767_v15  ;;  %v2212_v0 = vld [vmem:[%s2321_s2] ss:$0 sm:$0xff]  ;;  %v1773_v15 = vld [vmem:[%s1903_s18 + $0x1a8] sm:$0xff]  }
  0x77   : > { %1826 = vst [vmem:[%s1942_s25 + $0x158] sm:$0xff] %v1619_v25   ;;  %v784_v33 = vmax.f32 %v656_v26, 0.0  ;;  %v658_v34 = vadd.f32 %v1916_v6, %v526_v27  ;;  %v528_v36 = vmul.f32 %v2205_v35, %v1335_v28  ;;  %v1339_v37 = vunpack.c.l.bf16 %v1768_v24 }
  0x78   : > { %v1624_v39 = vpack.c.bf16 %v783_v29, %v782_v21  ;;  %v785_v40 = vmax.f32 %v657_v30, 0.0  ;;  %v659_v41 = vadd.f32 %v2212_v0, %v527_v31  ;;  %v529_v6 = vmul.f32 %v2205_v35, %v1336_v32 }
  0x79   : > { %v786_v42 = vmax.f32 %v658_v34, 0.0  ;;  %v660_v43 = vadd.f32 %v2212_v0, %v528_v36  ;;  %v1340_v44 = vunpack.c.h.bf16 %v1768_v24  ;;  %v530_v45 = vmul.f32 %v2205_v35, %v1339_v37  ;;  %v1774_v24 = vld [vmem:[%s1903_s18 + $0x1b0] sm:$0xff]  }
  0x7a   : > { %1827 = vst [vmem:[%s1942_s25 + $0x160] sm:$0xff] %v1624_v39   ;;  %v1629_v47 = vpack.c.bf16 %v785_v40, %v784_v33  ;;  %v787_v48 = vmax.f32 %v659_v41, 0.0  ;;  %v661_v49 = vadd.f32 %v2212_v0, %v529_v6  ;;  %v1343_v50 = vunpack.c.l.bf16 %v1769_v38  ;;  %v1775_v33 = vld [vmem:[%s1903_s18 + $0x1b8] sm:$0xff]  }
  0x7b   : > { %v788_v51 = vmax.f32 %v660_v43, 0.0  ;;  %v531_v52 = vmul.f32 %v2205_v35, %v1340_v44  ;;  %v662_v53 = vadd.f32 %v2212_v0, %v530_v45  ;;  %v1344_v54 = vunpack.c.h.bf16 %v1769_v38 }
  0x7c   : > { %1828 = vst [vmem:[%s1942_s25 + $0x168] sm:$0xff] %v1629_v47   ;;  %v1634_v56 = vpack.c.bf16 %v787_v48, %v786_v42  ;;  %v789_v57 = vmax.f32 %v661_v49, 0.0  ;;  %v532_v58 = vmul.f32 %v2205_v35, %v1343_v50  ;;  %v1347_v59 = vunpack.c.l.bf16 %v1770_v46  ;;  %v1776_v42 = vld [vmem:[%s1903_s18 + $0x1c0] sm:$0xff]  }
  0x7d   : > { %v663_v60 = vadd.f32 %v2212_v0, %v531_v52  ;;  %v790_v61 = vmax.f32 %v662_v53, 0.0  ;;  %v533_v62 = vmul.f32 %v2205_v35, %v1344_v54  ;;  %v1348_v63 = vunpack.c.h.bf16 %v1770_v46 }
  0x7e   : > { %1829 = vst [vmem:[%s1942_s25 + $0x170] sm:$0xff] %v1634_v56   ;;  %v1639_v2 = vpack.c.bf16 %v789_v57, %v788_v51  ;;  %v664_v3 = vadd.f32 %v2212_v0, %v532_v58  ;;  %v534_v4 = vmul.f32 %v2205_v35, %v1347_v59  ;;  %v1351_v5 = vunpack.c.l.bf16 %v1771_v55 }
  0x7f   : > { %v791_v7 = vmax.f32 %v663_v60, 0.0  ;;  %v665_v8 = vadd.f32 %v2212_v0, %v533_v62  ;;  %v535_v9 = vmul.f32 %v2205_v35, %v1348_v63  ;;  %v1352_v10 = vunpack.c.h.bf16 %v1771_v55  ;;  %v1777_v55 = vld [vmem:[%s1903_s18 + $0x1c8] sm:$0xff]  }
  0x80   : > { %1830 = vst [vmem:[%s1942_s25 + $0x178] sm:$0xff] %v1639_v2   ;;  %v792_v11 = vmax.f32 %v664_v3, 0.0  ;;  %v666_v12 = vadd.f32 %v2212_v0, %v534_v4  ;;  %v536_v13 = vmul.f32 %v2205_v35, %v1351_v5  ;;  %v1355_v14 = vunpack.c.l.bf16 %v1772_v1 }
  0x81   : > { %v1644_v16 = vpack.c.bf16 %v791_v7, %v790_v61  ;;  %v793_v17 = vmax.f32 %v665_v8, 0.0  ;;  %v667_v18 = vadd.f32 %v2212_v0, %v535_v9  ;;  %v537_v19 = vmul.f32 %v2205_v35, %v1352_v10 }
  0x82   : > { %v794_v20 = vmax.f32 %v666_v12, 0.0  ;;  %v668_v21 = vadd.f32 %v2212_v0, %v536_v13  ;;  %v1356_v22 = vunpack.c.h.bf16 %v1772_v1  ;;  %v538_v23 = vmul.f32 %v2205_v35, %v1355_v14  ;;  %v1778_v1 = vld [vmem:[%s1903_s18 + $0x1d0] sm:$0xff]  }
  0x83   : > { %1831 = vst [vmem:[%s1942_s25 + $0x180] sm:$0xff] %v1644_v16   ;;  %v1649_v25 = vpack.c.bf16 %v793_v17, %v792_v11  ;;  %v795_v26 = vmax.f32 %v667_v18, 0.0  ;;  %v669_v27 = vadd.f32 %v2212_v0, %v537_v19  ;;  %v1359_v28 = vunpack.c.l.bf16 %v1773_v15  ;;  %v1779_v11 = vld [vmem:[%s1903_s18 + $0x1d8] sm:$0xff]  }
  0x84   : > { %v796_v29 = vmax.f32 %v668_v21, 0.0  ;;  %v539_v30 = vmul.f32 %v2205_v35, %v1356_v22  ;;  %v670_v31 = vadd.f32 %v2212_v0, %v538_v23  ;;  %v1360_v32 = vunpack.c.h.bf16 %v1773_v15 }
  0x85   : > { %1832 = vst [vmem:[%s1942_s25 + $0x188] sm:$0xff] %v1649_v25   ;;  %v1654_v34 = vpack.c.bf16 %v795_v26, %v794_v20  ;;  %v797_v36 = vmax.f32 %v669_v27, 0.0  ;;  %v540_v37 = vmul.f32 %v2205_v35, %v1359_v28  ;;  %v1363_v38 = vunpack.c.l.bf16 %v1774_v24  ;;  %v1780_v20 = vld [vmem:[%s1903_s18 + $0x1e0] sm:$0xff]  }
  0x86   : > { %v671_v39 = vadd.f32 %v2212_v0, %v539_v30  ;;  %v798_v40 = vmax.f32 %v670_v31, 0.0  ;;  %v541_v41 = vmul.f32 %v2205_v35, %v1360_v32  ;;  %v1364_v6 = vunpack.c.h.bf16 %v1774_v24 }
  0x87   : > { %1833 = vst [vmem:[%s1942_s25 + $0x190] sm:$0xff] %v1654_v34   ;;  %v1659_v43 = vpack.c.bf16 %v797_v36, %v796_v29  ;;  %v672_v44 = vadd.f32 %v2212_v0, %v540_v37  ;;  %v542_v45 = vmul.f32 %v2205_v35, %v1363_v38  ;;  %v1367_v46 = vunpack.c.l.bf16 %v1775_v33 }
  0x88   : > { %v799_v47 = vmax.f32 %v671_v39, 0.0  ;;  %v673_v48 = vadd.f32 %v2212_v0, %v541_v41  ;;  %v543_v49 = vmul.f32 %v2205_v35, %v1364_v6  ;;  %v1368_v50 = vunpack.c.h.bf16 %v1775_v33  ;;  %v1781_v33 = vld [vmem:[%s1903_s18 + $0x1e8] sm:$0xff]  }
  0x89   : > { %1834 = vst [vmem:[%s1942_s25 + $0x198] sm:$0xff] %v1659_v43   ;;  %v800_v51 = vmax.f32 %v672_v44, 0.0  ;;  %v674_v52 = vadd.f32 %v2212_v0, %v542_v45  ;;  %v544_v53 = vmul.f32 %v2205_v35, %v1367_v46  ;;  %v1371_v54 = vunpack.c.l.bf16 %v1776_v42 }
  0x8a   : > { %v1664_v56 = vpack.c.bf16 %v799_v47, %v798_v40  ;;  %v801_v57 = vmax.f32 %v673_v48, 0.0  ;;  %v675_v58 = vadd.f32 %v2212_v0, %v543_v49  ;;  %v545_v59 = vmul.f32 %v2205_v35, %v1368_v50 }
  0x8b   : > { %v802_v60 = vmax.f32 %v674_v52, 0.0  ;;  %v676_v61 = vadd.f32 %v2212_v0, %v544_v53  ;;  %v1372_v62 = vunpack.c.h.bf16 %v1776_v42  ;;  %v546_v63 = vmul.f32 %v2205_v35, %v1371_v54  ;;  %v1782_v42 = vld [vmem:[%s1903_s18 + $0x1f0] sm:$0xff]  }
  0x8c   : > { %1835 = vst [vmem:[%s1942_s25 + $0x1a0] sm:$0xff] %v1664_v56   ;;  %v1669_v2 = vpack.c.bf16 %v801_v57, %v800_v51  ;;  %v803_v3 = vmax.f32 %v675_v58, 0.0  ;;  %v677_v4 = vadd.f32 %v2212_v0, %v545_v59  ;;  %v1375_v5 = vunpack.c.l.bf16 %v1777_v55  ;;  %v1783_v51 = vld [vmem:[%s1903_s18 + $0x1f8] sm:$0xff]  }
  0x8d   : > { %v804_v7 = vmax.f32 %v676_v61, 0.0  ;;  %v547_v8 = vmul.f32 %v2205_v35, %v1372_v62  ;;  %v678_v9 = vadd.f32 %v2212_v0, %v546_v63  ;;  %v1376_v10 = vunpack.c.h.bf16 %v1777_v55 }
  0x8e   : > { %1836 = vst [vmem:[%s1942_s25 + $0x1a8] sm:$0xff] %v1669_v2   ;;  %v1674_v12 = vpack.c.bf16 %v803_v3, %v802_v60  ;;  %v805_v13 = vmax.f32 %v677_v4, 0.0  ;;  %v548_v14 = vmul.f32 %v2205_v35, %v1375_v5  ;;  %v1379_v15 = vunpack.c.l.bf16 %v1778_v1 }
  0x8f   : > { %v679_v16 = vadd.f32 %v2212_v0, %v547_v8  ;;  %v806_v17 = vmax.f32 %v678_v9, 0.0  ;;  %v549_v18 = vmul.f32 %v2205_v35, %v1376_v10  ;;  %v1380_v19 = vunpack.c.h.bf16 %v1778_v1 }
  0x90   : > { %1837 = vst [vmem:[%s1942_s25 + $0x1b0] sm:$0xff] %v1674_v12   ;;  %v1679_v21 = vpack.c.bf16 %v805_v13, %v804_v7  ;;  %v680_v22 = vadd.f32 %v2212_v0, %v548_v14  ;;  %v550_v23 = vmul.f32 %v2205_v35, %v1379_v15  ;;  %v1383_v24 = vunpack.c.l.bf16 %v1779_v11 }
  0x91   : > { %v807_v25 = vmax.f32 %v679_v16, 0.0  ;;  %v681_v26 = vadd.f32 %v2212_v0, %v549_v18  ;;  %v551_v27 = vmul.f32 %v2205_v35, %v1380_v19  ;;  %v1384_v28 = vunpack.c.h.bf16 %v1779_v11 }
  0x92   : > { %1838 = vst [vmem:[%s1942_s25 + $0x1b8] sm:$0xff] %v1679_v21   ;;  %v808_v29 = vmax.f32 %v680_v22, 0.0  ;;  %v682_v30 = vadd.f32 %v2212_v0, %v550_v23  ;;  %v552_v31 = vmul.f32 %v2205_v35, %v1383_v24  ;;  %v1387_v32 = vunpack.c.l.bf16 %v1780_v20 }
  0x93   : > { %v1684_v34 = vpack.c.bf16 %v807_v25, %v806_v17  ;;  %v809_v36 = vmax.f32 %v681_v26, 0.0  ;;  %v683_v37 = vadd.f32 %v2212_v0, %v551_v27  ;;  %v553_v38 = vmul.f32 %v2205_v35, %v1384_v28 }
  0x94   : > { %v810_v39 = vmax.f32 %v682_v30, 0.0  ;;  %v684_v40 = vadd.f32 %v2212_v0, %v552_v31  ;;  %v1388_v41 = vunpack.c.h.bf16 %v1780_v20  ;;  %v554_v6 = vmul.f32 %v2205_v35, %v1387_v32 }
  0x95   : > { %1839 = vst [vmem:[%s1942_s25 + $0x1c0] sm:$0xff] %v1684_v34   ;;  %v1689_v43 = vpack.c.bf16 %v809_v36, %v808_v29  ;;  %v811_v44 = vmax.f32 %v683_v37, 0.0  ;;  %v685_v45 = vadd.f32 %v2212_v0, %v553_v38  ;;  %v1391_v46 = vunpack.c.l.bf16 %v1781_v33 }
  0x96   : > { %v812_v47 = vmax.f32 %v684_v40, 0.0  ;;  %v555_v48 = vmul.f32 %v2205_v35, %v1388_v41  ;;  %v686_v49 = vadd.f32 %v2212_v0, %v554_v6  ;;  %v1392_v50 = vunpack.c.h.bf16 %v1781_v33 }
  0x97   : > { %1840 = vst [vmem:[%s1942_s25 + $0x1c8] sm:$0xff] %v1689_v43   ;;  %v1694_v52 = vpack.c.bf16 %v811_v44, %v810_v39  ;;  %v813_v53 = vmax.f32 %v685_v45, 0.0  ;;  %v556_v54 = vmul.f32 %v2205_v35, %v1391_v46  ;;  %v1395_v55 = vunpack.c.l.bf16 %v1782_v42 }
  0x98   : > { %v687_v56 = vadd.f32 %v2212_v0, %v555_v48  ;;  %v814_v57 = vmax.f32 %v686_v49, 0.0  ;;  %v557_v58 = vmul.f32 %v2205_v35, %v1392_v50  ;;  %v1396_v59 = vunpack.c.h.bf16 %v1782_v42 }
  0x99   : > { %1841 = vst [vmem:[%s1942_s25 + $0x1d0] sm:$0xff] %v1694_v52   ;;  %v1699_v60 = vpack.c.bf16 %v813_v53, %v812_v47  ;;  %v688_v61 = vadd.f32 %v2212_v0, %v556_v54  ;;  %v558_v62 = vmul.f32 %v2205_v35, %v1395_v55  ;;  %v1399_v63 = vunpack.c.l.bf16 %v1783_v51 }
  0x9a   : > { %v815_v1 = vmax.f32 %v687_v56, 0.0  ;;  %v689_v2 = vadd.f32 %v2212_v0, %v557_v58  ;;  %v559_v3 = vmul.f32 %v2205_v35, %v1396_v59  ;;  %v1400_v4 = vunpack.c.h.bf16 %v1783_v51 }
  0x9b   : > { %1842 = vst [vmem:[%s1942_s25 + $0x1d8] sm:$0xff] %v1699_v60   ;;  %v816_v5 = vmax.f32 %v688_v61, 0.0  ;;  %v690_v7 = vadd.f32 %v2212_v0, %v558_v62  ;;  %v560_v8 = vmul.f32 %v2205_v35, %v1399_v63 }
  0x9c   : > { %v1704_v9 = vpack.c.bf16 %v815_v1, %v814_v57  ;;  %v817_v10 = vmax.f32 %v689_v2, 0.0  ;;  %v691_v11 = vadd.f32 %v2212_v0, %v559_v3  ;;  %v561_v12 = vmul.f32 %v2205_v35, %v1400_v4 }
  0x9d   : > { %v818_v13 = vmax.f32 %v690_v7, 0.0  ;;  %v692_v14 = vadd.f32 %v2212_v0, %v560_v8 }
  0x9e   : > { %1843 = vst [vmem:[%s1942_s25 + $0x1e0] sm:$0xff] %v1704_v9   ;;  %v1709_v15 = vpack.c.bf16 %v817_v10, %v816_v5  ;;  %v819_v16 = vmax.f32 %v691_v11, 0.0  ;;  %v693_v17 = vadd.f32 %v2212_v0, %v561_v12 }
  0x9f   : > { %v820_v18 = vmax.f32 %v692_v14, 0.0 }
  0xa0   : > { %1844 = vst [vmem:[%s1942_s25 + $0x1e8] sm:$0xff] %v1709_v15   ;;  %v1714_v19 = vpack.c.bf16 %v819_v16, %v818_v13  ;;  %v821_v20 = vmax.f32 %v693_v17, 0.0 }
  0xa2   : > { %1845 = vst [vmem:[%s1942_s25 + $0x1f0] sm:$0xff] %v1714_v19   ;;  %v1719_v21 = vpack.c.bf16 %v821_v20, %v820_v18 }
  0xa4   : > { %1846 = vst [vmem:[%s1942_s25 + $0x1f8] sm:$0xff] %v1719_v21  }
  0xa5 PF: > { %s13_s12 = sadd.s32 1, %s1865_s12  }
  0xa6   : > { %p10_p4 = scmp.ge.s32.totalorder %s13_s12, 4  }
  0xa8   :  { %12 = sbr.rel (!%p10_p4) target bundleno = 1 (0x1), region = 62 }

// kernel: residual_block_forward.7
= control target key start
LH: loop header
LB: loop body
LE: loop exit
PB: predicated region body
PF: predicated region fallthrough
CT: control target
= control target key end

     0   :  { %s1831_s15 = smov 0   ;;  %s2580_s0 = inlined_call_operand.vmem [shape: bf16[2048,128], index: 0, kind: input, shape index: {}]   ;;  %s2581_s1 = inlined_call_operand.vmem [shape: f32[1,128], index: 1, kind: input, shape index: {}]   ;;  %s2582_s2 = inlined_call_operand.vmem [shape: f32[1,128], index: 2, kind: input, shape index: {}]   ;;  %s2583_s3 = inlined_call_operand.vmem [shape: f32[2048,8], index: 3, kind: input, shape index: {}]   ;;  %s2584_s4 = inlined_call_operand.vmem [shape: f32[2048,128], index: 4, kind: output, shape index: {}]  }
   0x1 LB: > { %s1452_s16 = sadd.s32 4294967295, %s1804_s15   ;;  %p1456_p0 = scmp.ge.s32.totalorder %s1804_s15, 1  ;;  %s1804_s15 = sphi %s1831_s15, %s14_s15  }
   0x2   : > { %p174_p1 = scmp.lt.s32.totalorder %s1804_s15, 3 }
   0x4   : > { %p175_p2 = pnand %p1456_p0, %p174_p1 }
   0x5   : > { %s1457_s17 = sshll.u32 (!%p175_p2), %s1452_s16, 7 }
   0x6   : > { %178 = sbr.rel (%p175_p2) target bundleno = 213 (0xd5), region = 36  ;;  %p206_p3 = scmp.lt.s32.totalorder (!%p175_p2), %s1457_s17, 255 }
   0xb   : > { %s2586_s17 = smov (!%p206_p3, %s1457_s17), 255  ;;  %vm871_vm0 = vcmask 64512   ;;  %v1858_v0 = vld [vmem:[%s2581_s1] ss:$0 sm:$0xff] }
   0xc   : > { %s1458_s18 = sshll.u32 %s2586_s17, 2  ;;  %s1460_s19 = sshll.u32 %s2586_s17, 3  ;;  %v1863_v1 = vld [vmem:[%s2582_s2] ss:$0 sm:$0xff] }
   0xd   : > { %s1846_s22 = scalar_lea.vmem %s2580_s0, %s1458_s18  ;;  %s1853_s25 = scalar_lea.vmem %s2583_s3, %s1460_s19 }
   0xe   : > { %v1466_v2 = vld [vmem:[%s1846_s22] sm:$0xff]   ;;  %v744_v4 = vld [vmem:[%s1853_s25 + $0x8] sm:$0xff]  ;;  %v745_v10 = vld [vmem:[%s1853_s25 + $0x10] sm:$0xff]  ;;  %s1900_s6 = scalar_lea.vmem %s2584_s4, %s1460_s19 }
   0xf   : > { %v743_v3 = vld [vmem:[%s1853_s25] sm:$0xff]  ;;  %v1467_v5 = vunpack.c.l.bf16 %v1466_v2  ;;  %v1468_v7 = vunpack.c.h.bf16 %v1466_v2  ;;  %v873_v8 = vsel %vm871_vm0, %v744_v4, 0.0  ;;  %v1721_v9 = vld [vmem:[%s1846_s22 + $0x8] sm:$0xff]   ;;  %v746_v11 = vld [vmem:[%s1853_s25 + $0x18] sm:$0xff]  ;;  %v874_v13 = vsel %vm871_vm0, %v745_v10, 0.0 }
  0x10   : > { %v872_v6 = vsel %vm871_vm0, %v743_v3, 0.0  ;;  %v1471_v12 = vunpack.c.l.bf16 %v1721_v9  ;;  %v1472_v14 = vunpack.c.h.bf16 %v1721_v9  ;;  %v875_v15 = vsel %vm871_vm0, %v746_v11, 0.0  ;;  %v1722_v16 = vld [vmem:[%s1846_s22 + $0x10] sm:$0xff]   ;;  %v747_v17 = vld [vmem:[%s1853_s25 + $0x20] sm:$0xff]  ;;  %v748_v18 = vld [vmem:[%s1853_s25 + $0x28] sm:$0xff] }
  0x11   : > { %v483_v19 = vmul.f32 %v1858_v0, %v1467_v5  ;;  %v484_v20 = vmul.f32 %v1858_v0, %v1468_v7  ;;  %v1475_v21 = vunpack.c.l.bf16 %v1722_v16  ;;  %v876_v22 = vsel %vm871_vm0, %v747_v17, 0.0  ;;  %v1723_v23 = vld [vmem:[%s1846_s22 + $0x18] sm:$0xff]   ;;  %v749_v24 = vld [vmem:[%s1853_s25 + $0x30] sm:$0xff]  ;;  %v1724_v46 = vld [vmem:[%s1846_s22 + $0x20] sm:$0xff]  }
  0x12   : > { %v485_v25 = vmul.f32 %v1858_v0, %v1471_v12  ;;  %v486_v26 = vmul.f32 %v1858_v0, %v1472_v14  ;;  %v1476_v27 = vunpack.c.h.bf16 %v1722_v16  ;;  %v877_v28 = vsel %vm871_vm0, %v748_v18, 0.0  ;;  %v750_v45 = vld [vmem:[%s1853_s25 + $0x38] sm:$0xff]  ;;  %v751_v51 = vld [vmem:[%s1853_s25 + $0x40] sm:$0xff]  ;;  %v752_v56 = vld [vmem:[%s1853_s25 + $0x48] sm:$0xff] }
  0x13   : > { %v615_v29 = vadd.f32 %v1863_v1, %v483_v19  ;;  %v616_v30 = vadd.f32 %v1863_v1, %v484_v20  ;;  %v487_v31 = vmul.f32 %v1858_v0, %v1475_v21  ;;  %v1479_v32 = vunpack.c.l.bf16 %v1723_v23  ;;  %v1725_v57 = vld [vmem:[%s1846_s22 + $0x28] sm:$0xff]   ;;  %v753_v62 = vld [vmem:[%s1853_s25 + $0x50] sm:$0xff]  ;;  %v754_v5 = vld [vmem:[%s1853_s25 + $0x58] sm:$0xff] }
  0x14   : > { %v617_v33 = vadd.f32 %v1863_v1, %v485_v25  ;;  %v618_v34 = vadd.f32 %v1863_v1, %v486_v26  ;;  %v488_v35 = vmul.f32 %v1858_v0, %v1476_v27  ;;  %v878_v36 = vsel %vm871_vm0, %v749_v24, 0.0  ;;  %v755_v11 = vld [vmem:[%s1853_s25 + $0x60] sm:$0xff]  ;;  %v756_v20 = vld [vmem:[%s1853_s25 + $0x68] sm:$0xff]  ;;  %v1727_v21 = vld [vmem:[%s1846_s22 + $0x38] sm:$0xff]  }
  0x15   : > { %v1000_v37 = vadd.f32 %v872_v6, %v615_v29  ;;  %v1001_v38 = vadd.f32 %v873_v8, %v616_v30  ;;  %v619_v39 = vadd.f32 %v1863_v1, %v487_v31  ;;  %v489_v40 = vmul.f32 %v1858_v0, %v1479_v32  ;;  %v1726_v6 = vld [vmem:[%s1846_s22 + $0x30] sm:$0xff]  }
  0x16   : > { %v1002_v41 = vadd.f32 %v874_v13, %v617_v33  ;;  %v1003_v42 = vadd.f32 %v875_v15, %v618_v34  ;;  %v620_v43 = vadd.f32 %v1863_v1, %v488_v35  ;;  %v1480_v44 = vunpack.c.h.bf16 %v1723_v23  ;;  %v757_v30 = vld [vmem:[%s1853_s25 + $0x70] sm:$0xff] }
  0x17   : > { %v1128_v47 = vmax.f32 %v1000_v37, 0.0  ;;  %v1129_v48 = vmax.f32 %v1001_v38, 0.0  ;;  %v1004_v49 = vadd.f32 %v876_v22, %v619_v39  ;;  %v621_v50 = vadd.f32 %v1863_v1, %v489_v40  ;;  %v1728_v39 = vld [vmem:[%s1846_s22 + $0x40] sm:$0xff]  }
  0x18   : > { %v1130_v52 = vmax.f32 %v1002_v41, 0.0  ;;  %v1131_v53 = vmax.f32 %v1003_v42, 0.0  ;;  %v1005_v54 = vadd.f32 %v877_v28, %v620_v43  ;;  %v490_v55 = vmul.f32 %v1858_v0, %v1480_v44  ;;  %v758_v44 = vld [vmem:[%s1853_s25 + $0x78] sm:$0xff] }
  0x19   : > { %1256 = vst [vmem:[%s1900_s6] sm:$0xff] %v1128_v47  ;;  %v1132_v58 = vmax.f32 %v1004_v49, 0.0  ;;  %v1006_v59 = vadd.f32 %v878_v36, %v621_v50  ;;  %v879_v60 = vsel %vm871_vm0, %v750_v45, 0.0  ;;  %v1483_v61 = vunpack.c.l.bf16 %v1724_v46  ;;  %v759_v49 = vld [vmem:[%s1853_s25 + $0x80] sm:$0xff] }
  0x1a   : > { %1257 = vst [vmem:[%s1900_s6 + $0x8] sm:$0xff] %v1129_v48  ;;  %v1133_v63 = vmax.f32 %v1005_v54, 0.0  ;;  %v622_v2 = vadd.f32 %v1863_v1, %v490_v55  ;;  %v880_v3 = vsel %vm871_vm0, %v751_v51, 0.0  ;;  %v1484_v4 = vunpack.c.h.bf16 %v1724_v46  ;;  %v1729_v54 = vld [vmem:[%s1846_s22 + $0x48] sm:$0xff]  }
  0x1b   : > { %1258 = vst [vmem:[%s1900_s6 + $0x10] sm:$0xff] %v1130_v52  ;;  %v1134_v7 = vmax.f32 %v1006_v59, 0.0  ;;  %v491_v8 = vmul.f32 %v1858_v0, %v1483_v61  ;;  %v881_v9 = vsel %vm871_vm0, %v752_v56, 0.0  ;;  %v1487_v10 = vunpack.c.l.bf16 %v1725_v57 }
  0x1c   : > { %1259 = vst [vmem:[%s1900_s6 + $0x18] sm:$0xff] %v1131_v53  ;;  %v1007_v12 = vadd.f32 %v879_v60, %v622_v2  ;;  %v492_v13 = vmul.f32 %v1858_v0, %v1484_v4  ;;  %v882_v14 = vsel %vm871_vm0, %v753_v62, 0.0  ;;  %v1488_v15 = vunpack.c.h.bf16 %v1725_v57  ;;  %v760_v53 = vld [vmem:[%s1853_s25 + $0x88] sm:$0xff]  ;;  %v1730_v2 = vld [vmem:[%s1846_s22 + $0x50] sm:$0xff]  }
  0x1d   : > { %1260 = vst [vmem:[%s1900_s6 + $0x20] sm:$0xff] %v1132_v58  ;;  %v623_v16 = vadd.f32 %v1863_v1, %v491_v8  ;;  %v493_v17 = vmul.f32 %v1858_v0, %v1487_v10  ;;  %v883_v18 = vsel %vm871_vm0, %v754_v5, 0.0  ;;  %v1491_v19 = vunpack.c.l.bf16 %v1726_v6 }
  0x1e   : > { %1261 = vst [vmem:[%s1900_s6 + $0x28] sm:$0xff] %v1133_v63  ;;  %v1135_v22 = vmax.f32 %v1007_v12, 0.0  ;;  %v624_v23 = vadd.f32 %v1863_v1, %v492_v13  ;;  %v494_v24 = vmul.f32 %v1858_v0, %v1488_v15  ;;  %v884_v25 = vsel %vm871_vm0, %v755_v11, 0.0  ;;  %v761_v63 = vld [vmem:[%s1853_s25 + $0x90] sm:$0xff] }
  0x1f   : > { %1262 = vst [vmem:[%s1900_s6 + $0x30] sm:$0xff] %v1134_v7  ;;  %v1008_v26 = vadd.f32 %v880_v3, %v623_v16  ;;  %v625_v27 = vadd.f32 %v1863_v1, %v493_v17  ;;  %v495_v28 = vmul.f32 %v1858_v0, %v1491_v19  ;;  %v1492_v29 = vunpack.c.h.bf16 %v1726_v6  ;;  %v762_v7 = vld [vmem:[%s1853_s25 + $0x98] sm:$0xff]  ;;  %v763_v16 = vld [vmem:[%s1853_s25 + $0xa0] sm:$0xff] }
  0x20   : > { %1263 = vst [vmem:[%s1900_s6 + $0x38] sm:$0xff] %v1135_v22  ;;  %v1009_v31 = vadd.f32 %v881_v9, %v624_v23  ;;  %v626_v32 = vadd.f32 %v1863_v1, %v494_v24  ;;  %v885_v33 = vsel %vm871_vm0, %v756_v20, 0.0  ;;  %v1495_v34 = vunpack.c.l.bf16 %v1727_v21 }
  0x21   : > { %v1136_v35 = vmax.f32 %v1008_v26, 0.0  ;;  %v1010_v36 = vadd.f32 %v882_v14, %v625_v27  ;;  %v627_v37 = vadd.f32 %v1863_v1, %v495_v28  ;;  %v496_v38 = vmul.f32 %v1858_v0, %v1492_v29  ;;  %v764_v26 = vld [vmem:[%s1853_s25 + $0xa8] sm:$0xff] }
  0x22   : > { %v1137_v40 = vmax.f32 %v1009_v31, 0.0  ;;  %v1011_v41 = vadd.f32 %v883_v18, %v626_v32  ;;  %v497_v42 = vmul.f32 %v1858_v0, %v1495_v34  ;;  %v886_v43 = vsel %vm871_vm0, %v757_v30, 0.0 }
  0x23   : > { %1264 = vst [vmem:[%s1900_s6 + $0x40] sm:$0xff] %v1136_v35  ;;  %v1138_v45 = vmax.f32 %v1010_v36, 0.0  ;;  %v1012_v46 = vadd.f32 %v884_v25, %v627_v37  ;;  %v628_v47 = vadd.f32 %v1863_v1, %v496_v38  ;;  %v1496_v48 = vunpack.c.h.bf16 %v1727_v21  ;;  %v1731_v21 = vld [vmem:[%s1846_s22 + $0x58] sm:$0xff]   ;;  %v765_v35 = vld [vmem:[%s1853_s25 + $0xb0] sm:$0xff]  ;;  %v1732_v36 = vld [vmem:[%s1846_s22 + $0x60] sm:$0xff]  }
  0x24   : > { %1265 = vst [vmem:[%s1900_s6 + $0x48] sm:$0xff] %v1137_v40  ;;  %v1139_v50 = vmax.f32 %v1011_v41, 0.0  ;;  %v629_v51 = vadd.f32 %v1863_v1, %v497_v42  ;;  %v1499_v52 = vunpack.c.l.bf16 %v1728_v39  ;;  %v887_v58 = vsel %vm871_vm0, %v758_v44, 0.0  ;;  %v766_v41 = vld [vmem:[%s1853_s25 + $0xb8] sm:$0xff] }
  0x25   : > { %1266 = vst [vmem:[%s1900_s6 + $0x50] sm:$0xff] %v1138_v45  ;;  %v1140_v55 = vmax.f32 %v1012_v46, 0.0  ;;  %v1013_v56 = vadd.f32 %v885_v33, %v628_v47  ;;  %v498_v57 = vmul.f32 %v1858_v0, %v1496_v48  ;;  %v888_v61 = vsel %vm871_vm0, %v759_v49, 0.0  ;;  %v767_v46 = vld [vmem:[%s1853_s25 + $0xc0] sm:$0xff] }
  0x26   : > { %1267 = vst [vmem:[%s1900_s6 + $0x58] sm:$0xff] %v1139_v50  ;;  %v1014_v59 = vadd.f32 %v886_v43, %v629_v51  ;;  %v499_v60 = vmul.f32 %v1858_v0, %v1499_v52  ;;  %v1500_v62 = vunpack.c.h.bf16 %v1728_v39  ;;  %v889_v5 = vsel %vm871_vm0, %v760_v53, 0.0  ;;  %v768_v51 = vld [vmem:[%s1853_s25 + $0xc8] sm:$0xff] }
  0x27   : > { %1268 = vst [vmem:[%s1900_s6 + $0x60] sm:$0xff] %v1140_v55  ;;  %v1141_v3 = vmax.f32 %v1013_v56, 0.0  ;;  %v630_v4 = vadd.f32 %v1863_v1, %v498_v57  ;;  %v1503_v6 = vunpack.c.l.bf16 %v1729_v54  ;;  %v1504_v11 = vunpack.c.h.bf16 %v1729_v54  ;;  %v1733_v52 = vld [vmem:[%s1846_s22 + $0x68] sm:$0xff]  }
  0x28   : > { %v1142_v8 = vmax.f32 %v1014_v59, 0.0  ;;  %v631_v9 = vadd.f32 %v1863_v1, %v499_v60  ;;  %v500_v10 = vmul.f32 %v1858_v0, %v1500_v62  ;;  %v890_v14 = vsel %vm871_vm0, %v761_v63, 0.0  ;;  %v1734_v62 = vld [vmem:[%s1846_s22 + $0x70] sm:$0xff]  }
  0x29   : > { %1269 = vst [vmem:[%s1900_s6 + $0x68] sm:$0xff] %v1141_v3  ;;  %v1015_v12 = vadd.f32 %v887_v58, %v630_v4  ;;  %v501_v13 = vmul.f32 %v1858_v0, %v1503_v6  ;;  %v1507_v15 = vunpack.c.l.bf16 %v1730_v2  ;;  %v502_v19 = vmul.f32 %v1858_v0, %v1504_v11 }
  0x2a   : > { %1270 = vst [vmem:[%s1900_s6 + $0x70] sm:$0xff] %v1142_v8  ;;  %v1016_v17 = vadd.f32 %v888_v61, %v631_v9  ;;  %v632_v18 = vadd.f32 %v1863_v1, %v500_v10  ;;  %v891_v20 = vsel %vm871_vm0, %v762_v7, 0.0  ;;  %v1508_v25 = vunpack.c.h.bf16 %v1730_v2  ;;  %v769_v61 = vld [vmem:[%s1853_s25 + $0xd0] sm:$0xff]  ;;  %v770_v9 = vld [vmem:[%s1853_s25 + $0xd8] sm:$0xff] }
  0x2b   : > { %v1143_v22 = vmax.f32 %v1015_v12, 0.0  ;;  %v633_v23 = vadd.f32 %v1863_v1, %v501_v13  ;;  %v503_v24 = vmul.f32 %v1858_v0, %v1507_v15  ;;  %v634_v29 = vadd.f32 %v1863_v1, %v502_v19  ;;  %v1735_v19 = vld [vmem:[%s1846_s22 + $0x78] sm:$0xff]  }
  0x2c   : > { %v1144_v27 = vmax.f32 %v1016_v17, 0.0  ;;  %v1017_v28 = vadd.f32 %v889_v5, %v632_v18  ;;  %v892_v30 = vsel %vm871_vm0, %v763_v16, 0.0  ;;  %v504_v33 = vmul.f32 %v1858_v0, %v1508_v25 }
  0x2d   : > { %1271 = vst [vmem:[%s1900_s6 + $0x78] sm:$0xff] %v1143_v22  ;;  %v1018_v31 = vadd.f32 %v890_v14, %v633_v23  ;;  %v635_v32 = vadd.f32 %v1863_v1, %v503_v24  ;;  %v1511_v34 = vunpack.c.l.bf16 %v1731_v21  ;;  %v1019_v38 = vadd.f32 %v891_v20, %v634_v29  ;;  %v771_v14 = vld [vmem:[%s1853_s25 + $0xe0] sm:$0xff]  ;;  %v772_v24 = vld [vmem:[%s1853_s25 + $0xe8] sm:$0xff] }
  0x2e   : > { %1272 = vst [vmem:[%s1900_s6 + $0x80] sm:$0xff] %v1144_v27  ;;  %v1145_v37 = vmax.f32 %v1017_v28, 0.0  ;;  %v893_v39 = vsel %vm871_vm0, %v764_v26, 0.0  ;;  %v1512_v40 = vunpack.c.h.bf16 %v1731_v21  ;;  %v636_v44 = vadd.f32 %v1863_v1, %v504_v33  ;;  %v773_v33 = vld [vmem:[%s1853_s25 + $0xf0] sm:$0xff] }
  0x2f   : > { %v1146_v42 = vmax.f32 %v1018_v31, 0.0  ;;  %v1020_v43 = vadd.f32 %v892_v30, %v635_v32  ;;  %v505_v45 = vmul.f32 %v1858_v0, %v1511_v34  ;;  %v1147_v47 = vmax.f32 %v1019_v38, 0.0  ;;  %v1736_v34 = vld [vmem:[%s1846_s22 + $0x80] sm:$0xff]  }
  0x30   : > { %1273 = vst [vmem:[%s1900_s6 + $0x88] sm:$0xff] %v1145_v37  ;;  %v894_v48 = vsel %vm871_vm0, %v765_v35, 0.0  ;;  %v506_v49 = vmul.f32 %v1858_v0, %v1512_v40  ;;  %v1515_v50 = vunpack.c.l.bf16 %v1732_v36  ;;  %v1021_v54 = vadd.f32 %v893_v39, %v636_v44  ;;  %v774_v39 = vld [vmem:[%s1853_s25 + $0xf8] sm:$0xff]  ;;  %v775_v44 = vld [vmem:[%s1853_s25 + $0x100] sm:$0xff] }
  0x31   : > { %1274 = vst [vmem:[%s1900_s6 + $0x90] sm:$0xff] %v1146_v42  ;;  %v1148_v53 = vmax.f32 %v1020_v43, 0.0  ;;  %v637_v55 = vadd.f32 %v1863_v1, %v505_v45  ;;  %v895_v56 = vsel %vm871_vm0, %v766_v41, 0.0  ;;  %v896_v59 = vsel %vm871_vm0, %v767_v46, 0.0 }
  0x32   : > { %1275 = vst [vmem:[%s1900_s6 + $0x98] sm:$0xff] %v1147_v47  ;;  %v638_v57 = vadd.f32 %v1863_v1, %v506_v49  ;;  %v507_v58 = vmul.f32 %v1858_v0, %v1515_v50  ;;  %v1516_v60 = vunpack.c.h.bf16 %v1732_v36  ;;  %v1149_v63 = vmax.f32 %v1021_v54, 0.0  ;;  %v776_v49 = vld [vmem:[%s1853_s25 + $0x108] sm:$0xff] }
  0x33   : > { %1276 = vst [vmem:[%s1900_s6 + $0xa0] sm:$0xff] %v1148_v53  ;;  %v1022_v2 = vadd.f32 %v894_v48, %v637_v55  ;;  %v897_v3 = vsel %vm871_vm0, %v768_v51, 0.0  ;;  %v1519_v4 = vunpack.c.l.bf16 %v1733_v52  ;;  %v1520_v8 = vunpack.c.h.bf16 %v1733_v52  ;;  %v1737_v50 = vld [vmem:[%s1846_s22 + $0x88] sm:$0xff]  }
  0x34   : > { %v1023_v5 = vadd.f32 %v895_v56, %v638_v57  ;;  %v639_v6 = vadd.f32 %v1863_v1, %v507_v58  ;;  %v508_v7 = vmul.f32 %v1858_v0, %v1516_v60  ;;  %1277 = vst [vmem:[%s1900_s6 + $0xa8] sm:$0xff] %v1149_v63  ;;  %v898_v12 = vsel %vm871_vm0, %v769_v61, 0.0  ;;  %v1738_v60 = vld [vmem:[%s1846_s22 + $0x90] sm:$0xff]  }
  0x35   : > { %v1150_v10 = vmax.f32 %v1022_v2, 0.0  ;;  %v509_v11 = vmul.f32 %v1858_v0, %v1519_v4  ;;  %v1523_v13 = vunpack.c.l.bf16 %v1734_v62  ;;  %v510_v18 = vmul.f32 %v1858_v0, %v1520_v8 }
  0x36   : > { %v1151_v15 = vmax.f32 %v1023_v5, 0.0  ;;  %v1024_v16 = vadd.f32 %v896_v59, %v639_v6  ;;  %v640_v17 = vadd.f32 %v1863_v1, %v508_v7  ;;  %v899_v21 = vsel %vm871_vm0, %v770_v9, 0.0  ;;  %v777_v59 = vld [vmem:[%s1853_s25 + $0x110] sm:$0xff]  ;;  %v778_v7 = vld [vmem:[%s1853_s25 + $0x118] sm:$0xff] }
  0x37   : > { %1278 = vst [vmem:[%s1900_s6 + $0xb0] sm:$0xff] %v1150_v10  ;;  %v641_v20 = vadd.f32 %v1863_v1, %v509_v11  ;;  %v511_v22 = vmul.f32 %v1858_v0, %v1523_v13  ;;  %v1524_v23 = vunpack.c.h.bf16 %v1734_v62  ;;  %v642_v27 = vadd.f32 %v1863_v1, %v510_v18 }
  0x38   : > { %1279 = vst [vmem:[%s1900_s6 + $0xb8] sm:$0xff] %v1151_v15  ;;  %v1152_v25 = vmax.f32 %v1024_v16, 0.0  ;;  %v1025_v26 = vadd.f32 %v897_v3, %v640_v17  ;;  %v900_v28 = vsel %vm871_vm0, %v771_v14, 0.0  ;;  %v1527_v32 = vunpack.c.l.bf16 %v1735_v19  ;;  %v1739_v17 = vld [vmem:[%s1846_s22 + $0x98] sm:$0xff]  }
  0x39   : > { %v1026_v29 = vadd.f32 %v898_v12, %v641_v20  ;;  %v643_v30 = vadd.f32 %v1863_v1, %v511_v22  ;;  %v512_v31 = vmul.f32 %v1858_v0, %v1524_v23  ;;  %v1027_v36 = vadd.f32 %v899_v21, %v642_v27  ;;  %v779_v12 = vld [vmem:[%s1853_s25 + $0x120] sm:$0xff]  ;;  %v780_v22 = vld [vmem:[%s1853_s25 + $0x128] sm:$0xff] }
  0x3a   : > { %1280 = vst [vmem:[%s1900_s6 + $0xc0] sm:$0xff] %v1152_v25  ;;  %v1153_v35 = vmax.f32 %v1025_v26, 0.0  ;;  %v901_v37 = vsel %vm871_vm0, %v772_v24, 0.0  ;;  %v1528_v38 = vunpack.c.h.bf16 %v1735_v19  ;;  %v513_v43 = vmul.f32 %v1858_v0, %v1527_v32  ;;  %v1740_v32 = vld [vmem:[%s1846_s22 + $0xa0] sm:$0xff]  }
  0x3b   : > { %v1154_v40 = vmax.f32 %v1026_v29, 0.0  ;;  %v1028_v41 = vadd.f32 %v900_v28, %v643_v30  ;;  %v644_v42 = vadd.f32 %v1863_v1, %v512_v31  ;;  %v1155_v45 = vmax.f32 %v1027_v36, 0.0  ;;  %v781_v31 = vld [vmem:[%s1853_s25 + $0x130] sm:$0xff] }
  0x3c   : > { %1281 = vst [vmem:[%s1900_s6 + $0xc8] sm:$0xff] %v1153_v35  ;;  %v902_v46 = vsel %vm871_vm0, %v773_v33, 0.0  ;;  %v514_v47 = vmul.f32 %v1858_v0, %v1528_v38  ;;  %v1531_v48 = vunpack.c.l.bf16 %v1736_v34  ;;  %v645_v53 = vadd.f32 %v1863_v1, %v513_v43 }
  0x3d   : > { %1282 = vst [vmem:[%s1900_s6 + $0xd0] sm:$0xff] %v1154_v40  ;;  %v1156_v51 = vmax.f32 %v1028_v41, 0.0  ;;  %v1029_v52 = vadd.f32 %v901_v37, %v644_v42  ;;  %v903_v54 = vsel %vm871_vm0, %v774_v39, 0.0  ;;  %v904_v57 = vsel %vm871_vm0, %v775_v44, 0.0  ;;  %v782_v37 = vld [vmem:[%s1853_s25 + $0x138] sm:$0xff]  ;;  %v783_v42 = vld [vmem:[%s1853_s25 + $0x140] sm:$0xff] }
  0x3e   : > { %1283 = vst [vmem:[%s1900_s6 + $0xd8] sm:$0xff] %v1155_v45  ;;  %v646_v55 = vadd.f32 %v1863_v1, %v514_v47  ;;  %v515_v56 = vmul.f32 %v1858_v0, %v1531_v48  ;;  %v1532_v58 = vunpack.c.h.bf16 %v1736_v34  ;;  %v1030_v62 = vadd.f32 %v902_v46, %v645_v53  ;;  %v784_v47 = vld [vmem:[%s1853_s25 + $0x148] sm:$0xff] }
  0x3f   : > { %1284 = vst [vmem:[%s1900_s6 + $0xe0] sm:$0xff] %v1156_v51  ;;  %v1157_v61 = vmax.f32 %v1029_v52, 0.0  ;;  %v905_v63 = vsel %vm871_vm0, %v776_v49, 0.0  ;;  %v1535_v2 = vunpack.c.l.bf16 %v1737_v50  ;;  %v1536_v6 = vunpack.c.h.bf16 %v1737_v50  ;;  %v1741_v48 = vld [vmem:[%s1846_s22 + $0xa8] sm:$0xff]  }
  0x40   : > { %v1031_v3 = vadd.f32 %v903_v54, %v646_v55  ;;  %v647_v4 = vadd.f32 %v1863_v1, %v515_v56  ;;  %v516_v5 = vmul.f32 %v1858_v0, %v1532_v58  ;;  %v1158_v8 = vmax.f32 %v1030_v62, 0.0  ;;  %v1742_v58 = vld [vmem:[%s1846_s22 + $0xb0] sm:$0xff]  }
  0x41   : > { %1285 = vst [vmem:[%s1900_s6 + $0xe8] sm:$0xff] %v1157_v61  ;;  %v517_v9 = vmul.f32 %v1858_v0, %v1535_v2  ;;  %v906_v10 = vsel %vm871_vm0, %v777_v59, 0.0  ;;  %v1539_v11 = vunpack.c.l.bf16 %v1738_v60  ;;  %v518_v16 = vmul.f32 %v1858_v0, %v1536_v6 }
  0x42   : > { %v1159_v13 = vmax.f32 %v1031_v3, 0.0  ;;  %v1032_v14 = vadd.f32 %v904_v57, %v647_v4  ;;  %v648_v15 = vadd.f32 %v1863_v1, %v516_v5  ;;  %1286 = vst [vmem:[%s1900_s6 + $0xf0] sm:$0xff] %v1158_v8  ;;  %v907_v19 = vsel %vm871_vm0, %v778_v7, 0.0  ;;  %v785_v57 = vld [vmem:[%s1853_s25 + $0x150] sm:$0xff]  ;;  %v786_v5 = vld [vmem:[%s1853_s25 + $0x158] sm:$0xff] }
  0x43   : > { %v649_v18 = vadd.f32 %v1863_v1, %v517_v9  ;;  %v519_v20 = vmul.f32 %v1858_v0, %v1539_v11  ;;  %v1540_v21 = vunpack.c.h.bf16 %v1738_v60  ;;  %v650_v25 = vadd.f32 %v1863_v1, %v518_v16 }
  0x44   : > { %1287 = vst [vmem:[%s1900_s6 + $0xf8] sm:$0xff] %v1159_v13  ;;  %v1160_v23 = vmax.f32 %v1032_v14, 0.0  ;;  %v1033_v24 = vadd.f32 %v905_v63, %v648_v15  ;;  %v908_v26 = vsel %vm871_vm0, %v779_v12, 0.0  ;;  %v1543_v30 = vunpack.c.l.bf16 %v1739_v17  ;;  %v1743_v15 = vld [vmem:[%s1846_s22 + $0xb8] sm:$0xff]  }
  0x45   : > { %v1034_v27 = vadd.f32 %v906_v10, %v649_v18  ;;  %v651_v28 = vadd.f32 %v1863_v1, %v519_v20  ;;  %v520_v29 = vmul.f32 %v1858_v0, %v1540_v21  ;;  %v1035_v34 = vadd.f32 %v907_v19, %v650_v25  ;;  %v787_v10 = vld [vmem:[%s1853_s25 + $0x160] sm:$0xff]  ;;  %v788_v20 = vld [vmem:[%s1853_s25 + $0x168] sm:$0xff] }
  0x46   : > { %1288 = vst [vmem:[%s1900_s6 + $0x100] sm:$0xff] %v1160_v23  ;;  %v1161_v33 = vmax.f32 %v1033_v24, 0.0  ;;  %v909_v35 = vsel %vm871_vm0, %v780_v22, 0.0  ;;  %v1544_v36 = vunpack.c.h.bf16 %v1739_v17  ;;  %v521_v41 = vmul.f32 %v1858_v0, %v1543_v30  ;;  %v1744_v30 = vld [vmem:[%s1846_s22 + $0xc0] sm:$0xff]  }
  0x47   : > { %v1162_v38 = vmax.f32 %v1034_v27, 0.0  ;;  %v1036_v39 = vadd.f32 %v908_v26, %v651_v28  ;;  %v652_v40 = vadd.f32 %v1863_v1, %v520_v29  ;;  %v1163_v43 = vmax.f32 %v1035_v34, 0.0  ;;  %v789_v29 = vld [vmem:[%s1853_s25 + $0x170] sm:$0xff] }
  0x48   : > { %1289 = vst [vmem:[%s1900_s6 + $0x108] sm:$0xff] %v1161_v33  ;;  %v910_v44 = vsel %vm871_vm0, %v781_v31, 0.0  ;;  %v522_v45 = vmul.f32 %v1858_v0, %v1544_v36  ;;  %v1547_v46 = vunpack.c.l.bf16 %v1740_v32  ;;  %v653_v51 = vadd.f32 %v1863_v1, %v521_v41 }
  0x49   : > { %1290 = vst [vmem:[%s1900_s6 + $0x110] sm:$0xff] %v1162_v38  ;;  %v1164_v49 = vmax.f32 %v1036_v39, 0.0  ;;  %v1037_v50 = vadd.f32 %v909_v35, %v652_v40  ;;  %v911_v52 = vsel %vm871_vm0, %v782_v37, 0.0  ;;  %v912_v55 = vsel %vm871_vm0, %v783_v42, 0.0  ;;  %v790_v35 = vld [vmem:[%s1853_s25 + $0x178] sm:$0xff]  ;;  %v791_v40 = vld [vmem:[%s1853_s25 + $0x180] sm:$0xff] }
  0x4a   : > { %1291 = vst [vmem:[%s1900_s6 + $0x118] sm:$0xff] %v1163_v43  ;;  %v654_v53 = vadd.f32 %v1863_v1, %v522_v45  ;;  %v523_v54 = vmul.f32 %v1858_v0, %v1547_v46  ;;  %v1548_v56 = vunpack.c.h.bf16 %v1740_v32  ;;  %v1038_v60 = vadd.f32 %v910_v44, %v653_v51  ;;  %v792_v45 = vld [vmem:[%s1853_s25 + $0x188] sm:$0xff] }
  0x4b   : > { %1292 = vst [vmem:[%s1900_s6 + $0x120] sm:$0xff] %v1164_v49  ;;  %v1165_v59 = vmax.f32 %v1037_v50, 0.0  ;;  %v913_v61 = vsel %vm871_vm0, %v784_v47, 0.0  ;;  %v1551_v62 = vunpack.c.l.bf16 %v1741_v48  ;;  %v1552_v4 = vunpack.c.h.bf16 %v1741_v48  ;;  %v1745_v46 = vld [vmem:[%s1846_s22 + $0xc8] sm:$0xff]  }
  0x4c   : > { %v1039_v63 = vadd.f32 %v911_v52, %v654_v53  ;;  %v655_v2 = vadd.f32 %v1863_v1, %v523_v54  ;;  %v524_v3 = vmul.f32 %v1858_v0, %v1548_v56  ;;  %v1166_v6 = vmax.f32 %v1038_v60, 0.0  ;;  %v1746_v56 = vld [vmem:[%s1846_s22 + $0xd0] sm:$0xff]  }
  0x4d   : > { %1293 = vst [vmem:[%s1900_s6 + $0x128] sm:$0xff] %v1165_v59  ;;  %v525_v7 = vmul.f32 %v1858_v0, %v1551_v62  ;;  %v914_v8 = vsel %vm871_vm0, %v785_v57, 0.0  ;;  %v1555_v9 = vunpack.c.l.bf16 %v1742_v58  ;;  %v526_v14 = vmul.f32 %v1858_v0, %v1552_v4 }
  0x4e   : > { %v1167_v11 = vmax.f32 %v1039_v63, 0.0  ;;  %v1040_v12 = vadd.f32 %v912_v55, %v655_v2  ;;  %v656_v13 = vadd.f32 %v1863_v1, %v524_v3  ;;  %1294 = vst [vmem:[%s1900_s6 + $0x130] sm:$0xff] %v1166_v6  ;;  %v915_v17 = vsel %vm871_vm0, %v786_v5, 0.0  ;;  %v793_v55 = vld [vmem:[%s1853_s25 + $0x190] sm:$0xff]  ;;  %v794_v3 = vld [vmem:[%s1853_s25 + $0x198] sm:$0xff] }
  0x4f   : > { %v657_v16 = vadd.f32 %v1863_v1, %v525_v7  ;;  %v527_v18 = vmul.f32 %v1858_v0, %v1555_v9  ;;  %v1556_v19 = vunpack.c.h.bf16 %v1742_v58  ;;  %v658_v23 = vadd.f32 %v1863_v1, %v526_v14 }
  0x50   : > { %1295 = vst [vmem:[%s1900_s6 + $0x138] sm:$0xff] %v1167_v11  ;;  %v1168_v21 = vmax.f32 %v1040_v12, 0.0  ;;  %v1041_v22 = vadd.f32 %v913_v61, %v656_v13  ;;  %v916_v24 = vsel %vm871_vm0, %v787_v10, 0.0  ;;  %v1559_v28 = vunpack.c.l.bf16 %v1743_v15  ;;  %v1747_v13 = vld [vmem:[%s1846_s22 + $0xd8] sm:$0xff]  }
  0x51   : > { %v1042_v25 = vadd.f32 %v914_v8, %v657_v16  ;;  %v659_v26 = vadd.f32 %v1863_v1, %v527_v18  ;;  %v528_v27 = vmul.f32 %v1858_v0, %v1556_v19  ;;  %v1043_v32 = vadd.f32 %v915_v17, %v658_v23  ;;  %v795_v8 = vld [vmem:[%s1853_s25 + $0x1a0] sm:$0xff]  ;;  %v796_v18 = vld [vmem:[%s1853_s25 + $0x1a8] sm:$0xff] }
  0x52   : > { %1296 = vst [vmem:[%s1900_s6 + $0x140] sm:$0xff] %v1168_v21  ;;  %v1169_v31 = vmax.f32 %v1041_v22, 0.0  ;;  %v917_v33 = vsel %vm871_vm0, %v788_v20, 0.0  ;;  %v1560_v34 = vunpack.c.h.bf16 %v1743_v15  ;;  %v529_v39 = vmul.f32 %v1858_v0, %v1559_v28  ;;  %v1748_v28 = vld [vmem:[%s1846_s22 + $0xe0] sm:$0xff]  }
  0x53   : > { %v1170_v36 = vmax.f32 %v1042_v25, 0.0  ;;  %v1044_v37 = vadd.f32 %v916_v24, %v659_v26  ;;  %v660_v38 = vadd.f32 %v1863_v1, %v528_v27  ;;  %v1171_v41 = vmax.f32 %v1043_v32, 0.0  ;;  %v797_v27 = vld [vmem:[%s1853_s25 + $0x1b0] sm:$0xff] }
  0x54   : > { %1297 = vst [vmem:[%s1900_s6 + $0x148] sm:$0xff] %v1169_v31  ;;  %v918_v42 = vsel %vm871_vm0, %v789_v29, 0.0  ;;  %v530_v43 = vmul.f32 %v1858_v0, %v1560_v34  ;;  %v1563_v44 = vunpack.c.l.bf16 %v1744_v30  ;;  %v661_v49 = vadd.f32 %v1863_v1, %v529_v39 }
  0x55   : > { %1298 = vst [vmem:[%s1900_s6 + $0x150] sm:$0xff] %v1170_v36  ;;  %v1172_v47 = vmax.f32 %v1044_v37, 0.0  ;;  %v1045_v48 = vadd.f32 %v917_v33, %v660_v38  ;;  %v919_v50 = vsel %vm871_vm0, %v790_v35, 0.0  ;;  %v920_v53 = vsel %vm871_vm0, %v791_v40, 0.0  ;;  %v798_v33 = vld [vmem:[%s1853_s25 + $0x1b8] sm:$0xff]  ;;  %v799_v38 = vld [vmem:[%s1853_s25 + $0x1c0] sm:$0xff] }
  0x56   : > { %1299 = vst [vmem:[%s1900_s6 + $0x158] sm:$0xff] %v1171_v41  ;;  %v662_v51 = vadd.f32 %v1863_v1, %v530_v43  ;;  %v531_v52 = vmul.f32 %v1858_v0, %v1563_v44  ;;  %v1564_v54 = vunpack.c.h.bf16 %v1744_v30  ;;  %v1046_v58 = vadd.f32 %v918_v42, %v661_v49  ;;  %v800_v43 = vld [vmem:[%s1853_s25 + $0x1c8] sm:$0xff] }
  0x57   : > { %1300 = vst [vmem:[%s1900_s6 + $0x160] sm:$0xff] %v1172_v47  ;;  %v1173_v57 = vmax.f32 %v1045_v48, 0.0  ;;  %v921_v59 = vsel %vm871_vm0, %v792_v45, 0.0  ;;  %v1567_v60 = vunpack.c.l.bf16 %v1745_v46  ;;  %v1568_v2 = vunpack.c.h.bf16 %v1745_v46  ;;  %v1749_v44 = vld [vmem:[%s1846_s22 + $0xe8] sm:$0xff]  }
  0x58   : > { %v1047_v61 = vadd.f32 %v919_v50, %v662_v51  ;;  %v663_v62 = vadd.f32 %v1863_v1, %v531_v52  ;;  %v532_v63 = vmul.f32 %v1858_v0, %v1564_v54  ;;  %v1174_v4 = vmax.f32 %v1046_v58, 0.0  ;;  %v1750_v54 = vld [vmem:[%s1846_s22 + $0xf0] sm:$0xff]  }
  0x59   : > { %1301 = vst [vmem:[%s1900_s6 + $0x168] sm:$0xff] %v1173_v57  ;;  %v533_v5 = vmul.f32 %v1858_v0, %v1567_v60  ;;  %v922_v6 = vsel %vm871_vm0, %v793_v55, 0.0  ;;  %v1571_v7 = vunpack.c.l.bf16 %v1746_v56  ;;  %v534_v12 = vmul.f32 %v1858_v0, %v1568_v2 }
  0x5a   : > { %v1175_v9 = vmax.f32 %v1047_v61, 0.0  ;;  %v1048_v10 = vadd.f32 %v920_v53, %v663_v62  ;;  %v664_v11 = vadd.f32 %v1863_v1, %v532_v63  ;;  %1302 = vst [vmem:[%s1900_s6 + $0x170] sm:$0xff] %v1174_v4  ;;  %v923_v15 = vsel %vm871_vm0, %v794_v3, 0.0  ;;  %v801_v53 = vld [vmem:[%s1853_s25 + $0x1d0] sm:$0xff]  ;;  %v802_v63 = vld [vmem:[%s1853_s25 + $0x1d8] sm:$0xff] }
  0x5b   : > { %v665_v14 = vadd.f32 %v1863_v1, %v533_v5  ;;  %v535_v16 = vmul.f32 %v1858_v0, %v1571_v7  ;;  %v1572_v17 = vunpack.c.h.bf16 %v1746_v56  ;;  %v666_v21 = vadd.f32 %v1863_v1, %v534_v12 }
  0x5c   : > { %1303 = vst [vmem:[%s1900_s6 + $0x178] sm:$0xff] %v1175_v9  ;;  %v1176_v19 = vmax.f32 %v1048_v10, 0.0  ;;  %v1049_v20 = vadd.f32 %v921_v59, %v664_v11  ;;  %v924_v22 = vsel %vm871_vm0, %v795_v8, 0.0  ;;  %v1575_v26 = vunpack.c.l.bf16 %v1747_v13  ;;  %v1751_v11 = vld [vmem:[%s1846_s22 + $0xf8] sm:$0xff]  }
  0x5d   : > { %v1050_v23 = vadd.f32 %v922_v6, %v665_v14  ;;  %v667_v24 = vadd.f32 %v1863_v1, %v535_v16  ;;  %v536_v25 = vmul.f32 %v1858_v0, %v1572_v17  ;;  %v1051_v30 = vadd.f32 %v923_v15, %v666_v21  ;;  %v803_v6 = vld [vmem:[%s1853_s25 + $0x1e0] sm:$0xff]  ;;  %v804_v16 = vld [vmem:[%s1853_s25 + $0x1e8] sm:$0xff] }
  0x5e   : > { %1304 = vst [vmem:[%s1900_s6 + $0x180] sm:$0xff] %v1176_v19  ;;  %v1177_v29 = vmax.f32 %v1049_v20, 0.0  ;;  %v925_v31 = vsel %vm871_vm0, %v796_v18, 0.0  ;;  %v1576_v32 = vunpack.c.h.bf16 %v1747_v13  ;;  %v537_v37 = vmul.f32 %v1858_v0, %v1575_v26  ;;  %v1752_v26 = vld [vmem:[%s1846_s22 + $0x100] sm:$0xff]  }
  0x5f   : > { %v1178_v34 = vmax.f32 %v1050_v23, 0.0  ;;  %v1052_v35 = vadd.f32 %v924_v22, %v667_v24  ;;  %v668_v36 = vadd.f32 %v1863_v1, %v536_v25  ;;  %v1179_v39 = vmax.f32 %v1051_v30, 0.0  ;;  %v2207_v22 = vld [vmem:[%s2582_s2] ss:$0 sm:$0xff]  ;;  %v805_v25 = vld [vmem:[%s1853_s25 + $0x1f0] sm:$0xff] }
  0x60   : > { %1305 = vst [vmem:[%s1900_s6 + $0x188] sm:$0xff] %v1177_v29  ;;  %v926_v40 = vsel %vm871_vm0, %v797_v27, 0.0  ;;  %v538_v41 = vmul.f32 %v1858_v0, %v1576_v32  ;;  %v1579_v42 = vunpack.c.l.bf16 %v1748_v28  ;;  %v669_v47 = vadd.f32 %v1863_v1, %v537_v37 }
  0x61   : > { %1306 = vst [vmem:[%s1900_s6 + $0x190] sm:$0xff] %v1178_v34  ;;  %v1180_v45 = vmax.f32 %v1052_v35, 0.0  ;;  %v1053_v46 = vadd.f32 %v925_v31, %v668_v36  ;;  %v927_v48 = vsel %vm871_vm0, %v798_v33, 0.0  ;;  %v928_v51 = vsel %vm871_vm0, %v799_v38, 0.0  ;;  %v806_v31 = vld [vmem:[%s1853_s25 + $0x1f8] sm:$0xff]  ;;  %v807_v36 = vld [vmem:[%s1853_s25 + $0x200] sm:$0xff] }
  0x62   : > { %1307 = vst [vmem:[%s1900_s6 + $0x198] sm:$0xff] %v1179_v39  ;;  %v670_v49 = vadd.f32 %v1863_v1, %v538_v41  ;;  %v539_v50 = vmul.f32 %v1858_v0, %v1579_v42  ;;  %v1580_v52 = vunpack.c.h.bf16 %v1748_v28  ;;  %v1054_v56 = vadd.f32 %v926_v40, %v669_v47  ;;  %v808_v41 = vld [vmem:[%s1853_s25 + $0x208] sm:$0xff] }
  0x63   : > { %1308 = vst [vmem:[%s1900_s6 + $0x1a0] sm:$0xff] %v1180_v45  ;;  %v1181_v55 = vmax.f32 %v1053_v46, 0.0  ;;  %v929_v57 = vsel %vm871_vm0, %v800_v43, 0.0  ;;  %v1583_v58 = vunpack.c.l.bf16 %v1749_v44  ;;  %v1584_v62 = vunpack.c.h.bf16 %v1749_v44  ;;  %v1753_v42 = vld [vmem:[%s1846_s22 + $0x108] sm:$0xff]  }
  0x64   : > { %v1055_v59 = vadd.f32 %v927_v48, %v670_v49  ;;  %v671_v60 = vadd.f32 %v1863_v1, %v539_v50  ;;  %v540_v61 = vmul.f32 %v1858_v0, %v1580_v52  ;;  %v1182_v2 = vmax.f32 %v1054_v56, 0.0  ;;  %v1754_v52 = vld [vmem:[%s1846_s22 + $0x110] sm:$0xff]  }
  0x65   : > { %1309 = vst [vmem:[%s1900_s6 + $0x1a8] sm:$0xff] %v1181_v55  ;;  %v541_v3 = vmul.f32 %v1858_v0, %v1583_v58  ;;  %v930_v4 = vsel %vm871_vm0, %v801_v53, 0.0  ;;  %v1587_v5 = vunpack.c.l.bf16 %v1750_v54  ;;  %v542_v10 = vmul.f32 %v1858_v0, %v1584_v62 }
  0x66   : > { %v1183_v7 = vmax.f32 %v1055_v59, 0.0  ;;  %v1056_v8 = vadd.f32 %v928_v51, %v671_v60  ;;  %v672_v9 = vadd.f32 %v1863_v1, %v540_v61  ;;  %1310 = vst [vmem:[%s1900_s6 + $0x1b0] sm:$0xff] %v1182_v2  ;;  %v931_v13 = vsel %vm871_vm0, %v802_v63, 0.0  ;;  %v809_v51 = vld [vmem:[%s1853_s25 + $0x210] sm:$0xff]  ;;  %v810_v61 = vld [vmem:[%s1853_s25 + $0x218] sm:$0xff] }
  0x67   : > { %v673_v12 = vadd.f32 %v1863_v1, %v541_v3  ;;  %v543_v14 = vmul.f32 %v1858_v0, %v1587_v5  ;;  %v1588_v15 = vunpack.c.h.bf16 %v1750_v54  ;;  %v674_v19 = vadd.f32 %v1863_v1, %v542_v10  ;;  %v2213_v0 = vld [vmem:[%s2581_s1] ss:$0 sm:$0xff] }
  0x68   : > { %1311 = vst [vmem:[%s1900_s6 + $0x1b8] sm:$0xff] %v1183_v7  ;;  %v1184_v17 = vmax.f32 %v1056_v8, 0.0  ;;  %v1057_v18 = vadd.f32 %v929_v57, %v672_v9  ;;  %v932_v20 = vsel %vm871_vm0, %v803_v6, 0.0  ;;  %v1591_v1 = vunpack.c.l.bf16 %v1751_v11  ;;  %v1755_v9 = vld [vmem:[%s1846_s22 + $0x118] sm:$0xff]  }
  0x69   : > { %v1058_v21 = vadd.f32 %v930_v4, %v673_v12  ;;  %v675_v23 = vadd.f32 %v2207_v22, %v543_v14  ;;  %v544_v24 = vmul.f32 %v2213_v0, %v1588_v15  ;;  %v1059_v28 = vadd.f32 %v931_v13, %v674_v19  ;;  %v811_v4 = vld [vmem:[%s1853_s25 + $0x220] sm:$0xff]  ;;  %v812_v14 = vld [vmem:[%s1853_s25 + $0x228] sm:$0xff] }
  0x6a   : > { %1312 = vst [vmem:[%s1900_s6 + $0x1c0] sm:$0xff] %v1184_v17  ;;  %v1185_v27 = vmax.f32 %v1057_v18, 0.0  ;;  %v933_v29 = vsel %vm871_vm0, %v804_v16, 0.0  ;;  %v1592_v30 = vunpack.c.h.bf16 %v1751_v11  ;;  %v545_v35 = vmul.f32 %v2213_v0, %v1591_v1  ;;  %v1756_v1 = vld [vmem:[%s1846_s22 + $0x120] sm:$0xff]  }
  0x6b   : > { %v1186_v32 = vmax.f32 %v1058_v21, 0.0  ;;  %v1060_v33 = vadd.f32 %v932_v20, %v675_v23  ;;  %v676_v34 = vadd.f32 %v2207_v22, %v544_v24  ;;  %v1187_v37 = vmax.f32 %v1059_v28, 0.0  ;;  %v813_v24 = vld [vmem:[%s1853_s25 + $0x230] sm:$0xff] }
  0x6c   : > { %1313 = vst [vmem:[%s1900_s6 + $0x1c8] sm:$0xff] %v1185_v27  ;;  %v934_v38 = vsel %vm871_vm0, %v805_v25, 0.0  ;;  %v546_v39 = vmul.f32 %v2213_v0, %v1592_v30  ;;  %v1595_v40 = vunpack.c.l.bf16 %v1752_v26  ;;  %v677_v45 = vadd.f32 %v2207_v22, %v545_v35 }
  0x6d   : > { %1314 = vst [vmem:[%s1900_s6 + $0x1d0] sm:$0xff] %v1186_v32  ;;  %v1188_v43 = vmax.f32 %v1060_v33, 0.0  ;;  %v1061_v44 = vadd.f32 %v933_v29, %v676_v34  ;;  %v935_v46 = vsel %vm871_vm0, %v806_v31, 0.0  ;;  %v936_v49 = vsel %vm871_vm0, %v807_v36, 0.0  ;;  %v814_v29 = vld [vmem:[%s1853_s25 + $0x238] sm:$0xff]  ;;  %v815_v34 = vld [vmem:[%s1853_s25 + $0x240] sm:$0xff] }
  0x6e   : > { %1315 = vst [vmem:[%s1900_s6 + $0x1d8] sm:$0xff] %v1187_v37  ;;  %v678_v47 = vadd.f32 %v2207_v22, %v546_v39  ;;  %v547_v48 = vmul.f32 %v2213_v0, %v1595_v40  ;;  %v1596_v50 = vunpack.c.h.bf16 %v1752_v26  ;;  %v1062_v54 = vadd.f32 %v934_v38, %v677_v45  ;;  %v816_v39 = vld [vmem:[%s1853_s25 + $0x248] sm:$0xff] }
  0x6f   : > { %1316 = vst [vmem:[%s1900_s6 + $0x1e0] sm:$0xff] %v1188_v43  ;;  %v1189_v53 = vmax.f32 %v1061_v44, 0.0  ;;  %v937_v55 = vsel %vm871_vm0, %v808_v41, 0.0  ;;  %v1599_v56 = vunpack.c.l.bf16 %v1753_v42  ;;  %v1600_v60 = vunpack.c.h.bf16 %v1753_v42  ;;  %v1757_v40 = vld [vmem:[%s1846_s22 + $0x128] sm:$0xff]  }
  0x70   : > { %v1063_v57 = vadd.f32 %v935_v46, %v678_v47  ;;  %v679_v58 = vadd.f32 %v2207_v22, %v547_v48  ;;  %v548_v59 = vmul.f32 %v2213_v0, %v1596_v50  ;;  %v1190_v62 = vmax.f32 %v1062_v54, 0.0  ;;  %v1758_v50 = vld [vmem:[%s1846_s22 + $0x130] sm:$0xff]  }
  0x71   : > { %1317 = vst [vmem:[%s1900_s6 + $0x1e8] sm:$0xff] %v1189_v53  ;;  %v549_v63 = vmul.f32 %v2213_v0, %v1599_v56  ;;  %v938_v2 = vsel %vm871_vm0, %v809_v51, 0.0  ;;  %v1603_v3 = vunpack.c.l.bf16 %v1754_v52  ;;  %v550_v8 = vmul.f32 %v2213_v0, %v1600_v60 }
  0x72   : > { %v1191_v5 = vmax.f32 %v1063_v57, 0.0  ;;  %v1064_v6 = vadd.f32 %v936_v49, %v679_v58  ;;  %v680_v7 = vadd.f32 %v2207_v22, %v548_v59  ;;  %1318 = vst [vmem:[%s1900_s6 + $0x1f0] sm:$0xff] %v1190_v62  ;;  %v939_v11 = vsel %vm871_vm0, %v810_v61, 0.0  ;;  %v817_v49 = vld [vmem:[%s1853_s25 + $0x250] sm:$0xff]  ;;  %v818_v59 = vld [vmem:[%s1853_s25 + $0x258] sm:$0xff] }
  0x73   : > { %v681_v10 = vadd.f32 %v2207_v22, %v549_v63  ;;  %v551_v12 = vmul.f32 %v2213_v0, %v1603_v3  ;;  %v1604_v13 = vunpack.c.h.bf16 %v1754_v52  ;;  %v682_v17 = vadd.f32 %v2207_v22, %v550_v8 }
  0x74   : > { %1319 = vst [vmem:[%s1900_s6 + $0x1f8] sm:$0xff] %v1191_v5  ;;  %v1192_v15 = vmax.f32 %v1064_v6, 0.0  ;;  %v1065_v16 = vadd.f32 %v937_v55, %v680_v7  ;;  %v940_v18 = vsel %vm871_vm0, %v811_v4, 0.0  ;;  %v1607_v23 = vunpack.c.l.bf16 %v1755_v9  ;;  %v1759_v7 = vld [vmem:[%s1846_s22 + $0x138] sm:$0xff]  }
  0x75   : > { %v1066_v19 = vadd.f32 %v938_v2, %v681_v10  ;;  %v683_v20 = vadd.f32 %v2207_v22, %v551_v12  ;;  %v552_v21 = vmul.f32 %v2213_v0, %v1604_v13  ;;  %v1067_v26 = vadd.f32 %v939_v11, %v682_v17  ;;  %v819_v2 = vld [vmem:[%s1853_s25 + $0x260] sm:$0xff]  ;;  %v820_v12 = vld [vmem:[%s1853_s25 + $0x268] sm:$0xff] }
  0x76   : > { %1320 = vst [vmem:[%s1900_s6 + $0x200] sm:$0xff] %v1192_v15  ;;  %v1193_v25 = vmax.f32 %v1065_v16, 0.0  ;;  %v941_v27 = vsel %vm871_vm0, %v812_v14, 0.0  ;;  %v1608_v28 = vunpack.c.h.bf16 %v1755_v9  ;;  %v553_v33 = vmul.f32 %v2213_v0, %v1607_v23  ;;  %v1760_v23 = vld [vmem:[%s1846_s22 + $0x140] sm:$0xff]  }
  0x77   : > { %v1194_v30 = vmax.f32 %v1066_v19, 0.0  ;;  %v1068_v31 = vadd.f32 %v940_v18, %v683_v20  ;;  %v684_v32 = vadd.f32 %v2207_v22, %v552_v21  ;;  %v1195_v35 = vmax.f32 %v1067_v26, 0.0  ;;  %v821_v21 = vld [vmem:[%s1853_s25 + $0x270] sm:$0xff] }
  0x78   : > { %1321 = vst [vmem:[%s1900_s6 + $0x208] sm:$0xff] %v1193_v25  ;;  %v942_v36 = vsel %vm871_vm0, %v813_v24, 0.0  ;;  %v554_v37 = vmul.f32 %v2213_v0, %v1608_v28  ;;  %v1611_v38 = vunpack.c.l.bf16 %v1756_v1  ;;  %v685_v43 = vadd.f32 %v2207_v22, %v553_v33 }
  0x79   : > { %1322 = vst [vmem:[%s1900_s6 + $0x210] sm:$0xff] %v1194_v30  ;;  %v1196_v41 = vmax.f32 %v1068_v31, 0.0  ;;  %v1069_v42 = vadd.f32 %v941_v27, %v684_v32  ;;  %v943_v44 = vsel %vm871_vm0, %v814_v29, 0.0  ;;  %v944_v47 = vsel %vm871_vm0, %v815_v34, 0.0  ;;  %v822_v27 = vld [vmem:[%s1853_s25 + $0x278] sm:$0xff]  ;;  %v823_v32 = vld [vmem:[%s1853_s25 + $0x280] sm:$0xff] }
  0x7a   : > { %1323 = vst [vmem:[%s1900_s6 + $0x218] sm:$0xff] %v1195_v35  ;;  %v686_v45 = vadd.f32 %v2207_v22, %v554_v37  ;;  %v555_v46 = vmul.f32 %v2213_v0, %v1611_v38  ;;  %v1612_v48 = vunpack.c.h.bf16 %v1756_v1  ;;  %v1070_v52 = vadd.f32 %v942_v36, %v685_v43  ;;  %v824_v37 = vld [vmem:[%s1853_s25 + $0x288] sm:$0xff] }
  0x7b   : > { %1324 = vst [vmem:[%s1900_s6 + $0x220] sm:$0xff] %v1196_v41  ;;  %v1197_v51 = vmax.f32 %v1069_v42, 0.0  ;;  %v945_v53 = vsel %vm871_vm0, %v816_v39, 0.0  ;;  %v1615_v54 = vunpack.c.l.bf16 %v1757_v40  ;;  %v1616_v58 = vunpack.c.h.bf16 %v1757_v40  ;;  %v1761_v38 = vld [vmem:[%s1846_s22 + $0x148] sm:$0xff]  }
  0x7c   : > { %v1071_v55 = vadd.f32 %v943_v44, %v686_v45  ;;  %v687_v56 = vadd.f32 %v2207_v22, %v555_v46  ;;  %v556_v57 = vmul.f32 %v2213_v0, %v1612_v48  ;;  %v1198_v60 = vmax.f32 %v1070_v52, 0.0  ;;  %v1762_v48 = vld [vmem:[%s1846_s22 + $0x150] sm:$0xff]  }
  0x7d   : > { %1325 = vst [vmem:[%s1900_s6 + $0x228] sm:$0xff] %v1197_v51  ;;  %v557_v61 = vmul.f32 %v2213_v0, %v1615_v54  ;;  %v946_v62 = vsel %vm871_vm0, %v817_v49, 0.0  ;;  %v1619_v63 = vunpack.c.l.bf16 %v1758_v50  ;;  %v558_v6 = vmul.f32 %v2213_v0, %v1616_v58 }
  0x7e   : > { %v1199_v3 = vmax.f32 %v1071_v55, 0.0  ;;  %v1072_v4 = vadd.f32 %v944_v47, %v687_v56  ;;  %v688_v5 = vadd.f32 %v2207_v22, %v556_v57  ;;  %1326 = vst [vmem:[%s1900_s6 + $0x230] sm:$0xff] %v1198_v60  ;;  %v947_v9 = vsel %vm871_vm0, %v818_v59, 0.0  ;;  %v825_v47 = vld [vmem:[%s1853_s25 + $0x290] sm:$0xff]  ;;  %v826_v57 = vld [vmem:[%s1853_s25 + $0x298] sm:$0xff] }
  0x7f   : > { %v689_v8 = vadd.f32 %v2207_v22, %v557_v61  ;;  %v559_v10 = vmul.f32 %v2213_v0, %v1619_v63  ;;  %v1620_v11 = vunpack.c.h.bf16 %v1758_v50  ;;  %v690_v15 = vadd.f32 %v2207_v22, %v558_v6 }
  0x80   : > { %1327 = vst [vmem:[%s1900_s6 + $0x238] sm:$0xff] %v1199_v3  ;;  %v1200_v13 = vmax.f32 %v1072_v4, 0.0  ;;  %v1073_v14 = vadd.f32 %v945_v53, %v688_v5  ;;  %v948_v16 = vsel %vm871_vm0, %v819_v2, 0.0  ;;  %v1623_v20 = vunpack.c.l.bf16 %v1759_v7  ;;  %v1763_v5 = vld [vmem:[%s1846_s22 + $0x158] sm:$0xff]  }
  0x81   : > { %v1074_v17 = vadd.f32 %v946_v62, %v689_v8  ;;  %v691_v18 = vadd.f32 %v2207_v22, %v559_v10  ;;  %v560_v19 = vmul.f32 %v2213_v0, %v1620_v11  ;;  %v1075_v1 = vadd.f32 %v947_v9, %v690_v15  ;;  %v827_v62 = vld [vmem:[%s1853_s25 + $0x2a0] sm:$0xff]  ;;  %v828_v10 = vld [vmem:[%s1853_s25 + $0x2a8] sm:$0xff] }
  0x82   : > { %1328 = vst [vmem:[%s1900_s6 + $0x240] sm:$0xff] %v1200_v13  ;;  %v1201_v24 = vmax.f32 %v1073_v14, 0.0  ;;  %v949_v25 = vsel %vm871_vm0, %v820_v12, 0.0  ;;  %v1624_v26 = vunpack.c.h.bf16 %v1759_v7  ;;  %v561_v31 = vmul.f32 %v2213_v0, %v1623_v20  ;;  %v1764_v20 = vld [vmem:[%s1846_s22 + $0x160] sm:$0xff]  }
  0x83   : > { %v1202_v28 = vmax.f32 %v1074_v17, 0.0  ;;  %v1076_v29 = vadd.f32 %v948_v16, %v691_v18  ;;  %v692_v30 = vadd.f32 %v2207_v22, %v560_v19  ;;  %v1203_v33 = vmax.f32 %v1075_v1, 0.0  ;;  %v829_v19 = vld [vmem:[%s1853_s25 + $0x2b0] sm:$0xff] }
  0x84   : > { %1329 = vst [vmem:[%s1900_s6 + $0x248] sm:$0xff] %v1201_v24  ;;  %v950_v34 = vsel %vm871_vm0, %v821_v21, 0.0  ;;  %v562_v35 = vmul.f32 %v2213_v0, %v1624_v26  ;;  %v1627_v36 = vunpack.c.l.bf16 %v1760_v23  ;;  %v693_v41 = vadd.f32 %v2207_v22, %v561_v31 }
  0x85   : > { %1330 = vst [vmem:[%s1900_s6 + $0x250] sm:$0xff] %v1202_v28  ;;  %v1204_v39 = vmax.f32 %v1076_v29, 0.0  ;;  %v1077_v40 = vadd.f32 %v949_v25, %v692_v30  ;;  %v951_v42 = vsel %vm871_vm0, %v822_v27, 0.0  ;;  %v952_v45 = vsel %vm871_vm0, %v823_v32, 0.0  ;;  %v830_v25 = vld [vmem:[%s1853_s25 + $0x2b8] sm:$0xff]  ;;  %v831_v30 = vld [vmem:[%s1853_s25 + $0x2c0] sm:$0xff] }
  0x86   : > { %1331 = vst [vmem:[%s1900_s6 + $0x258] sm:$0xff] %v1203_v33  ;;  %v694_v43 = vadd.f32 %v2207_v22, %v562_v35  ;;  %v563_v44 = vmul.f32 %v2213_v0, %v1627_v36  ;;  %v1628_v46 = vunpack.c.h.bf16 %v1760_v23  ;;  %v1078_v50 = vadd.f32 %v950_v34, %v693_v41  ;;  %v832_v35 = vld [vmem:[%s1853_s25 + $0x2c8] sm:$0xff] }
  0x87   : > { %1332 = vst [vmem:[%s1900_s6 + $0x260] sm:$0xff] %v1204_v39  ;;  %v1205_v49 = vmax.f32 %v1077_v40, 0.0  ;;  %v953_v51 = vsel %vm871_vm0, %v824_v37, 0.0  ;;  %v1631_v52 = vunpack.c.l.bf16 %v1761_v38  ;;  %v1632_v56 = vunpack.c.h.bf16 %v1761_v38  ;;  %v1765_v36 = vld [vmem:[%s1846_s22 + $0x168] sm:$0xff]  }
  0x88   : > { %v1079_v53 = vadd.f32 %v951_v42, %v694_v43  ;;  %v695_v54 = vadd.f32 %v2207_v22, %v563_v44  ;;  %v564_v55 = vmul.f32 %v2213_v0, %v1628_v46  ;;  %v1206_v58 = vmax.f32 %v1078_v50, 0.0  ;;  %v1766_v46 = vld [vmem:[%s1846_s22 + $0x170] sm:$0xff]  }
  0x89   : > { %1333 = vst [vmem:[%s1900_s6 + $0x268] sm:$0xff] %v1205_v49  ;;  %v565_v59 = vmul.f32 %v2213_v0, %v1631_v52  ;;  %v954_v60 = vsel %vm871_vm0, %v825_v47, 0.0  ;;  %v1635_v61 = vunpack.c.l.bf16 %v1762_v48  ;;  %v566_v4 = vmul.f32 %v2213_v0, %v1632_v56 }
  0x8a   : > { %v1207_v63 = vmax.f32 %v1079_v53, 0.0  ;;  %v1080_v2 = vadd.f32 %v952_v45, %v695_v54  ;;  %v696_v3 = vadd.f32 %v2207_v22, %v564_v55  ;;  %1334 = vst [vmem:[%s1900_s6 + $0x270] sm:$0xff] %v1206_v58  ;;  %v955_v7 = vsel %vm871_vm0, %v826_v57, 0.0  ;;  %v833_v45 = vld [vmem:[%s1853_s25 + $0x2d0] sm:$0xff]  ;;  %v834_v55 = vld [vmem:[%s1853_s25 + $0x2d8] sm:$0xff] }
  0x8b   : > { %v697_v6 = vadd.f32 %v2207_v22, %v565_v59  ;;  %v567_v8 = vmul.f32 %v2213_v0, %v1635_v61  ;;  %v1636_v9 = vunpack.c.h.bf16 %v1762_v48  ;;  %v698_v13 = vadd.f32 %v2207_v22, %v566_v4 }
  0x8c   : > { %1335 = vst [vmem:[%s1900_s6 + $0x278] sm:$0xff] %v1207_v63  ;;  %v1208_v11 = vmax.f32 %v1080_v2, 0.0  ;;  %v1081_v12 = vadd.f32 %v953_v51, %v696_v3  ;;  %v956_v14 = vsel %vm871_vm0, %v827_v62, 0.0  ;;  %v1639_v18 = vunpack.c.l.bf16 %v1763_v5  ;;  %v1767_v3 = vld [vmem:[%s1846_s22 + $0x178] sm:$0xff]  }
  0x8d   : > { %v1082_v15 = vadd.f32 %v954_v60, %v697_v6  ;;  %v699_v16 = vadd.f32 %v2207_v22, %v567_v8  ;;  %v568_v17 = vmul.f32 %v2213_v0, %v1636_v9  ;;  %v1083_v23 = vadd.f32 %v955_v7, %v698_v13  ;;  %v835_v60 = vld [vmem:[%s1853_s25 + $0x2e0] sm:$0xff]  ;;  %v836_v8 = vld [vmem:[%s1853_s25 + $0x2e8] sm:$0xff] }
  0x8e   : > { %1336 = vst [vmem:[%s1900_s6 + $0x280] sm:$0xff] %v1208_v11  ;;  %v1209_v21 = vmax.f32 %v1081_v12, 0.0  ;;  %v957_v24 = vsel %vm871_vm0, %v828_v10, 0.0  ;;  %v1640_v1 = vunpack.c.h.bf16 %v1763_v5  ;;  %v569_v29 = vmul.f32 %v2213_v0, %v1639_v18  ;;  %v1768_v18 = vld [vmem:[%s1846_s22 + $0x180] sm:$0xff]  }
  0x8f   : > { %v1210_v26 = vmax.f32 %v1082_v15, 0.0  ;;  %v1084_v27 = vadd.f32 %v956_v14, %v699_v16  ;;  %v700_v28 = vadd.f32 %v2207_v22, %v568_v17  ;;  %v1211_v31 = vmax.f32 %v1083_v23, 0.0  ;;  %v837_v17 = vld [vmem:[%s1853_s25 + $0x2f0] sm:$0xff] }
  0x90   : > { %1337 = vst [vmem:[%s1900_s6 + $0x288] sm:$0xff] %v1209_v21  ;;  %v958_v32 = vsel %vm871_vm0, %v829_v19, 0.0  ;;  %v570_v33 = vmul.f32 %v2213_v0, %v1640_v1  ;;  %v1643_v34 = vunpack.c.l.bf16 %v1764_v20  ;;  %v701_v39 = vadd.f32 %v2207_v22, %v569_v29 }
  0x91   : > { %1338 = vst [vmem:[%s1900_s6 + $0x290] sm:$0xff] %v1210_v26  ;;  %v1212_v37 = vmax.f32 %v1084_v27, 0.0  ;;  %v1085_v38 = vadd.f32 %v957_v24, %v700_v28  ;;  %v959_v40 = vsel %vm871_vm0, %v830_v25, 0.0  ;;  %v960_v43 = vsel %vm871_vm0, %v831_v30, 0.0  ;;  %v838_v24 = vld [vmem:[%s1853_s25 + $0x2f8] sm:$0xff]  ;;  %v839_v28 = vld [vmem:[%s1853_s25 + $0x300] sm:$0xff] }
  0x92   : > { %1339 = vst [vmem:[%s1900_s6 + $0x298] sm:$0xff] %v1211_v31  ;;  %v702_v41 = vadd.f32 %v2207_v22, %v570_v33  ;;  %v571_v42 = vmul.f32 %v2213_v0, %v1643_v34  ;;  %v1644_v44 = vunpack.c.h.bf16 %v1764_v20  ;;  %v1086_v48 = vadd.f32 %v958_v32, %v701_v39  ;;  %v840_v33 = vld [vmem:[%s1853_s25 + $0x308] sm:$0xff] }
  0x93   : > { %1340 = vst [vmem:[%s1900_s6 + $0x2a0] sm:$0xff] %v1212_v37  ;;  %v1213_v47 = vmax.f32 %v1085_v38, 0.0  ;;  %v961_v49 = vsel %vm871_vm0, %v832_v35, 0.0  ;;  %v1647_v50 = vunpack.c.l.bf16 %v1765_v36  ;;  %v1648_v54 = vunpack.c.h.bf16 %v1765_v36  ;;  %v1769_v34 = vld [vmem:[%s1846_s22 + $0x188] sm:$0xff]  }
  0x94   : > { %v1087_v51 = vadd.f32 %v959_v40, %v702_v41  ;;  %v703_v52 = vadd.f32 %v2207_v22, %v571_v42  ;;  %v572_v53 = vmul.f32 %v2213_v0, %v1644_v44  ;;  %v1214_v56 = vmax.f32 %v1086_v48, 0.0  ;;  %v1770_v44 = vld [vmem:[%s1846_s22 + $0x190] sm:$0xff]  }
  0x95   : > { %1341 = vst [vmem:[%s1900_s6 + $0x2a8] sm:$0xff] %v1213_v47  ;;  %v573_v57 = vmul.f32 %v2213_v0, %v1647_v50  ;;  %v962_v58 = vsel %vm871_vm0, %v833_v45, 0.0  ;;  %v1651_v59 = vunpack.c.l.bf16 %v1766_v46  ;;  %v574_v2 = vmul.f32 %v2213_v0, %v1648_v54 }
  0x96   : > { %v1215_v61 = vmax.f32 %v1087_v51, 0.0  ;;  %v1088_v62 = vadd.f32 %v960_v43, %v703_v52  ;;  %v704_v63 = vadd.f32 %v2207_v22, %v572_v53  ;;  %1342 = vst [vmem:[%s1900_s6 + $0x2b0] sm:$0xff] %v1214_v56  ;;  %v963_v5 = vsel %vm871_vm0, %v834_v55, 0.0  ;;  %v841_v43 = vld [vmem:[%s1853_s25 + $0x310] sm:$0xff]  ;;  %v842_v53 = vld [vmem:[%s1853_s25 + $0x318] sm:$0xff] }
  0x97   : > { %v705_v4 = vadd.f32 %v2207_v22, %v573_v57  ;;  %v575_v6 = vmul.f32 %v2213_v0, %v1651_v59  ;;  %v1652_v7 = vunpack.c.h.bf16 %v1766_v46  ;;  %v706_v11 = vadd.f32 %v2207_v22, %v574_v2 }
  0x98   : > { %1343 = vst [vmem:[%s1900_s6 + $0x2b8] sm:$0xff] %v1215_v61  ;;  %v1216_v9 = vmax.f32 %v1088_v62, 0.0  ;;  %v1089_v10 = vadd.f32 %v961_v49, %v704_v63  ;;  %v964_v12 = vsel %vm871_vm0, %v835_v60, 0.0  ;;  %v1655_v16 = vunpack.c.l.bf16 %v1767_v3  ;;  %v1771_v63 = vld [vmem:[%s1846_s22 + $0x198] sm:$0xff]  }
  0x99   : > { %v1090_v13 = vadd.f32 %v962_v58, %v705_v4  ;;  %v707_v14 = vadd.f32 %v2207_v22, %v575_v6  ;;  %v576_v15 = vmul.f32 %v2213_v0, %v1652_v7  ;;  %v1091_v20 = vadd.f32 %v963_v5, %v706_v11  ;;  %v843_v58 = vld [vmem:[%s1853_s25 + $0x320] sm:$0xff]  ;;  %v844_v6 = vld [vmem:[%s1853_s25 + $0x328] sm:$0xff] }
  0x9a   : > { %1344 = vst [vmem:[%s1900_s6 + $0x2c0] sm:$0xff] %v1216_v9  ;;  %v1217_v19 = vmax.f32 %v1089_v10, 0.0  ;;  %v965_v21 = vsel %vm871_vm0, %v836_v8, 0.0  ;;  %v1656_v23 = vunpack.c.h.bf16 %v1767_v3  ;;  %v577_v27 = vmul.f32 %v2213_v0, %v1655_v16  ;;  %v1772_v16 = vld [vmem:[%s1846_s22 + $0x1a0] sm:$0xff]  }
  0x9b   : > { %v1218_v1 = vmax.f32 %v1090_v13, 0.0  ;;  %v1092_v25 = vadd.f32 %v964_v12, %v707_v14  ;;  %v708_v26 = vadd.f32 %v2207_v22, %v576_v15  ;;  %v1219_v29 = vmax.f32 %v1091_v20, 0.0  ;;  %v845_v15 = vld [vmem:[%s1853_s25 + $0x330] sm:$0xff] }
  0x9c   : > { %1345 = vst [vmem:[%s1900_s6 + $0x2c8] sm:$0xff] %v1217_v19  ;;  %v966_v30 = vsel %vm871_vm0, %v837_v17, 0.0  ;;  %v578_v31 = vmul.f32 %v2213_v0, %v1656_v23  ;;  %v1659_v32 = vunpack.c.l.bf16 %v1768_v18  ;;  %v709_v37 = vadd.f32 %v2207_v22, %v577_v27 }
  0x9d   : > { %1346 = vst [vmem:[%s1900_s6 + $0x2d0] sm:$0xff] %v1218_v1  ;;  %v1220_v35 = vmax.f32 %v1092_v25, 0.0  ;;  %v1093_v36 = vadd.f32 %v965_v21, %v708_v26  ;;  %v967_v38 = vsel %vm871_vm0, %v838_v24, 0.0  ;;  %v968_v41 = vsel %vm871_vm0, %v839_v28, 0.0  ;;  %v846_v21 = vld [vmem:[%s1853_s25 + $0x338] sm:$0xff]  ;;  %v847_v26 = vld [vmem:[%s1853_s25 + $0x340] sm:$0xff] }
  0x9e   : > { %1347 = vst [vmem:[%s1900_s6 + $0x2d8] sm:$0xff] %v1219_v29  ;;  %v710_v39 = vadd.f32 %v2207_v22, %v578_v31  ;;  %v579_v40 = vmul.f32 %v2213_v0, %v1659_v32  ;;  %v1660_v42 = vunpack.c.h.bf16 %v1768_v18  ;;  %v1094_v46 = vadd.f32 %v966_v30, %v709_v37  ;;  %v848_v31 = vld [vmem:[%s1853_s25 + $0x348] sm:$0xff] }
  0x9f   : > { %1348 = vst [vmem:[%s1900_s6 + $0x2e0] sm:$0xff] %v1220_v35  ;;  %v1221_v45 = vmax.f32 %v1093_v36, 0.0  ;;  %v969_v47 = vsel %vm871_vm0, %v840_v33, 0.0  ;;  %v1663_v48 = vunpack.c.l.bf16 %v1769_v34  ;;  %v1664_v52 = vunpack.c.h.bf16 %v1769_v34  ;;  %v1773_v32 = vld [vmem:[%s1846_s22 + $0x1a8] sm:$0xff]  }
  0xa0   : > { %v1095_v49 = vadd.f32 %v967_v38, %v710_v39  ;;  %v711_v50 = vadd.f32 %v2207_v22, %v579_v40  ;;  %v580_v51 = vmul.f32 %v2213_v0, %v1660_v42  ;;  %v1222_v54 = vmax.f32 %v1094_v46, 0.0  ;;  %v1774_v42 = vld [vmem:[%s1846_s22 + $0x1b0] sm:$0xff]  }
  0xa1   : > { %1349 = vst [vmem:[%s1900_s6 + $0x2e8] sm:$0xff] %v1221_v45  ;;  %v581_v55 = vmul.f32 %v2213_v0, %v1663_v48  ;;  %v970_v56 = vsel %vm871_vm0, %v841_v43, 0.0  ;;  %v1667_v57 = vunpack.c.l.bf16 %v1770_v44  ;;  %v582_v62 = vmul.f32 %v2213_v0, %v1664_v52 }
  0xa2   : > { %v1223_v59 = vmax.f32 %v1095_v49, 0.0  ;;  %v1096_v60 = vadd.f32 %v968_v41, %v711_v50  ;;  %v712_v61 = vadd.f32 %v2207_v22, %v580_v51  ;;  %1350 = vst [vmem:[%s1900_s6 + $0x2f0] sm:$0xff] %v1222_v54  ;;  %v971_v3 = vsel %vm871_vm0, %v842_v53, 0.0  ;;  %v849_v41 = vld [vmem:[%s1853_s25 + $0x350] sm:$0xff]  ;;  %v850_v51 = vld [vmem:[%s1853_s25 + $0x358] sm:$0xff] }
  0xa3   : > { %v713_v2 = vadd.f32 %v2207_v22, %v581_v55  ;;  %v583_v4 = vmul.f32 %v2213_v0, %v1667_v57  ;;  %v1668_v5 = vunpack.c.h.bf16 %v1770_v44  ;;  %v714_v9 = vadd.f32 %v2207_v22, %v582_v62 }
  0xa4   : > { %1351 = vst [vmem:[%s1900_s6 + $0x2f8] sm:$0xff] %v1223_v59  ;;  %v1224_v7 = vmax.f32 %v1096_v60, 0.0  ;;  %v1097_v8 = vadd.f32 %v969_v47, %v712_v61  ;;  %v972_v10 = vsel %vm871_vm0, %v843_v58, 0.0  ;;  %v1671_v14 = vunpack.c.l.bf16 %v1771_v63  ;;  %v1775_v61 = vld [vmem:[%s1846_s22 + $0x1b8] sm:$0xff]  }
  0xa5   : > { %v1098_v11 = vadd.f32 %v970_v56, %v713_v2  ;;  %v715_v12 = vadd.f32 %v2207_v22, %v583_v4  ;;  %v584_v13 = vmul.f32 %v2213_v0, %v1668_v5  ;;  %v1099_v18 = vadd.f32 %v971_v3, %v714_v9  ;;  %v851_v56 = vld [vmem:[%s1853_s25 + $0x360] sm:$0xff]  ;;  %v852_v4 = vld [vmem:[%s1853_s25 + $0x368] sm:$0xff] }
  0xa6   : > { %1352 = vst [vmem:[%s1900_s6 + $0x300] sm:$0xff] %v1224_v7  ;;  %v1225_v17 = vmax.f32 %v1097_v8, 0.0  ;;  %v973_v19 = vsel %vm871_vm0, %v844_v6, 0.0  ;;  %v1672_v20 = vunpack.c.h.bf16 %v1771_v63  ;;  %v585_v25 = vmul.f32 %v2213_v0, %v1671_v14  ;;  %v1776_v14 = vld [vmem:[%s1846_s22 + $0x1c0] sm:$0xff]  }
  0xa7   : > { %v1226_v23 = vmax.f32 %v1098_v11, 0.0  ;;  %v1100_v24 = vadd.f32 %v972_v10, %v715_v12  ;;  %v716_v1 = vadd.f32 %v2207_v22, %v584_v13  ;;  %v1227_v27 = vmax.f32 %v1099_v18, 0.0  ;;  %v853_v13 = vld [vmem:[%s1853_s25 + $0x370] sm:$0xff] }
  0xa8   : > { %1353 = vst [vmem:[%s1900_s6 + $0x308] sm:$0xff] %v1225_v17  ;;  %v974_v28 = vsel %vm871_vm0, %v845_v15, 0.0  ;;  %v586_v29 = vmul.f32 %v2213_v0, %v1672_v20  ;;  %v1675_v30 = vunpack.c.l.bf16 %v1772_v16  ;;  %v717_v35 = vadd.f32 %v2207_v22, %v585_v25 }
  0xa9   : > { %1354 = vst [vmem:[%s1900_s6 + $0x310] sm:$0xff] %v1226_v23  ;;  %v1228_v33 = vmax.f32 %v1100_v24, 0.0  ;;  %v1101_v34 = vadd.f32 %v973_v19, %v716_v1  ;;  %v975_v36 = vsel %vm871_vm0, %v846_v21, 0.0  ;;  %v976_v39 = vsel %vm871_vm0, %v847_v26, 0.0  ;;  %v854_v19 = vld [vmem:[%s1853_s25 + $0x378] sm:$0xff]  ;;  %v855_v1 = vld [vmem:[%s1853_s25 + $0x380] sm:$0xff] }
  0xaa   : > { %1355 = vst [vmem:[%s1900_s6 + $0x318] sm:$0xff] %v1227_v27  ;;  %v718_v37 = vadd.f32 %v2207_v22, %v586_v29  ;;  %v587_v38 = vmul.f32 %v2213_v0, %v1675_v30  ;;  %v1676_v40 = vunpack.c.h.bf16 %v1772_v16  ;;  %v1102_v44 = vadd.f32 %v974_v28, %v717_v35  ;;  %v856_v29 = vld [vmem:[%s1853_s25 + $0x388] sm:$0xff] }
  0xab   : > { %1356 = vst [vmem:[%s1900_s6 + $0x320] sm:$0xff] %v1228_v33  ;;  %v1229_v43 = vmax.f32 %v1101_v34, 0.0  ;;  %v977_v45 = vsel %vm871_vm0, %v848_v31, 0.0  ;;  %v1679_v46 = vunpack.c.l.bf16 %v1773_v32  ;;  %v1680_v50 = vunpack.c.h.bf16 %v1773_v32  ;;  %v1777_v30 = vld [vmem:[%s1846_s22 + $0x1c8] sm:$0xff]  }
  0xac   : > { %v1103_v47 = vadd.f32 %v975_v36, %v718_v37  ;;  %v719_v48 = vadd.f32 %v2207_v22, %v587_v38  ;;  %v588_v49 = vmul.f32 %v2213_v0, %v1676_v40  ;;  %v1230_v52 = vmax.f32 %v1102_v44, 0.0  ;;  %v1778_v40 = vld [vmem:[%s1846_s22 + $0x1d0] sm:$0xff]  }
  0xad   : > { %1357 = vst [vmem:[%s1900_s6 + $0x328] sm:$0xff] %v1229_v43  ;;  %v589_v53 = vmul.f32 %v2213_v0, %v1679_v46  ;;  %v978_v54 = vsel %vm871_vm0, %v849_v41, 0.0  ;;  %v1683_v55 = vunpack.c.l.bf16 %v1774_v42  ;;  %v590_v60 = vmul.f32 %v2213_v0, %v1680_v50 }
  0xae   : > { %v1231_v57 = vmax.f32 %v1103_v47, 0.0  ;;  %v1104_v58 = vadd.f32 %v976_v39, %v719_v48  ;;  %v720_v59 = vadd.f32 %v2207_v22, %v588_v49  ;;  %1358 = vst [vmem:[%s1900_s6 + $0x330] sm:$0xff] %v1230_v52  ;;  %v979_v63 = vsel %vm871_vm0, %v850_v51, 0.0  ;;  %v857_v39 = vld [vmem:[%s1853_s25 + $0x390] sm:$0xff]  ;;  %v858_v49 = vld [vmem:[%s1853_s25 + $0x398] sm:$0xff] }
  0xaf   : > { %v721_v62 = vadd.f32 %v2207_v22, %v589_v53  ;;  %v591_v2 = vmul.f32 %v2213_v0, %v1683_v55  ;;  %v1684_v3 = vunpack.c.h.bf16 %v1774_v42  ;;  %v722_v7 = vadd.f32 %v2207_v22, %v590_v60 }
  0xb0   : > { %1359 = vst [vmem:[%s1900_s6 + $0x338] sm:$0xff] %v1231_v57  ;;  %v1232_v5 = vmax.f32 %v1104_v58, 0.0  ;;  %v1105_v6 = vadd.f32 %v977_v45, %v720_v59  ;;  %v980_v8 = vsel %vm871_vm0, %v851_v56, 0.0  ;;  %v1687_v12 = vunpack.c.l.bf16 %v1775_v61  ;;  %v1779_v59 = vld [vmem:[%s1846_s22 + $0x1d8] sm:$0xff]  }
  0xb1   : > { %v1106_v9 = vadd.f32 %v978_v54, %v721_v62  ;;  %v723_v10 = vadd.f32 %v2207_v22, %v591_v2  ;;  %v592_v11 = vmul.f32 %v2213_v0, %v1684_v3  ;;  %v1107_v16 = vadd.f32 %v979_v63, %v722_v7  ;;  %v859_v54 = vld [vmem:[%s1853_s25 + $0x3a0] sm:$0xff]  ;;  %v860_v2 = vld [vmem:[%s1853_s25 + $0x3a8] sm:$0xff] }
  0xb2   : > { %1360 = vst [vmem:[%s1900_s6 + $0x340] sm:$0xff] %v1232_v5  ;;  %v1233_v15 = vmax.f32 %v1105_v6, 0.0  ;;  %v981_v17 = vsel %vm871_vm0, %v852_v4, 0.0  ;;  %v1688_v18 = vunpack.c.h.bf16 %v1775_v61  ;;  %v593_v24 = vmul.f32 %v2213_v0, %v1687_v12  ;;  %v1780_v12 = vld [vmem:[%s1846_s22 + $0x1e0] sm:$0xff]  }
  0xb3   : > { %v1234_v20 = vmax.f32 %v1106_v9, 0.0  ;;  %v1108_v21 = vadd.f32 %v980_v8, %v723_v10  ;;  %v724_v23 = vadd.f32 %v2207_v22, %v592_v11  ;;  %v1235_v25 = vmax.f32 %v1107_v16, 0.0  ;;  %v861_v11 = vld [vmem:[%s1853_s25 + $0x3b0] sm:$0xff] }
  0xb4   : > { %1361 = vst [vmem:[%s1900_s6 + $0x348] sm:$0xff] %v1233_v15  ;;  %v982_v26 = vsel %vm871_vm0, %v853_v13, 0.0  ;;  %v594_v27 = vmul.f32 %v2213_v0, %v1688_v18  ;;  %v1691_v28 = vunpack.c.l.bf16 %v1776_v14  ;;  %v725_v33 = vadd.f32 %v2207_v22, %v593_v24 }
  0xb5   : > { %1362 = vst [vmem:[%s1900_s6 + $0x350] sm:$0xff] %v1234_v20  ;;  %v1236_v31 = vmax.f32 %v1108_v21, 0.0  ;;  %v1109_v32 = vadd.f32 %v981_v17, %v724_v23  ;;  %v983_v34 = vsel %vm871_vm0, %v854_v19, 0.0  ;;  %v984_v37 = vsel %vm871_vm0, %v855_v1, 0.0  ;;  %v862_v17 = vld [vmem:[%s1853_s25 + $0x3b8] sm:$0xff]  ;;  %v863_v23 = vld [vmem:[%s1853_s25 + $0x3c0] sm:$0xff] }
  0xb6   : > { %1363 = vst [vmem:[%s1900_s6 + $0x358] sm:$0xff] %v1235_v25  ;;  %v726_v35 = vadd.f32 %v2207_v22, %v594_v27  ;;  %v595_v36 = vmul.f32 %v2213_v0, %v1691_v28  ;;  %v1692_v38 = vunpack.c.h.bf16 %v1776_v14  ;;  %v1110_v42 = vadd.f32 %v982_v26, %v725_v33  ;;  %v864_v27 = vld [vmem:[%s1853_s25 + $0x3c8] sm:$0xff] }
  0xb7   : > { %1364 = vst [vmem:[%s1900_s6 + $0x360] sm:$0xff] %v1236_v31  ;;  %v1237_v41 = vmax.f32 %v1109_v32, 0.0  ;;  %v985_v43 = vsel %vm871_vm0, %v856_v29, 0.0  ;;  %v1695_v44 = vunpack.c.l.bf16 %v1777_v30  ;;  %v1696_v48 = vunpack.c.h.bf16 %v1777_v30  ;;  %v1781_v28 = vld [vmem:[%s1846_s22 + $0x1e8] sm:$0xff]  }
  0xb8   : > { %v1111_v45 = vadd.f32 %v983_v34, %v726_v35  ;;  %v727_v46 = vadd.f32 %v2207_v22, %v595_v36  ;;  %v596_v47 = vmul.f32 %v2213_v0, %v1692_v38  ;;  %v1238_v50 = vmax.f32 %v1110_v42, 0.0  ;;  %v1782_v38 = vld [vmem:[%s1846_s22 + $0x1f0] sm:$0xff]  }
  0xb9   : > { %1365 = vst [vmem:[%s1900_s6 + $0x368] sm:$0xff] %v1237_v41  ;;  %v597_v51 = vmul.f32 %v2213_v0, %v1695_v44  ;;  %v986_v52 = vsel %vm871_vm0, %v857_v39, 0.0  ;;  %v1699_v53 = vunpack.c.l.bf16 %v1778_v40  ;;  %v598_v58 = vmul.f32 %v2213_v0, %v1696_v48  ;;  %v1797_v44 = vld [vmem:[%s2581_s1] ss:$0 sm:$0xff] }
  0xba   : > { %v1239_v55 = vmax.f32 %v1111_v45, 0.0  ;;  %v1112_v56 = vadd.f32 %v984_v37, %v727_v46  ;;  %v728_v57 = vadd.f32 %v2207_v22, %v596_v47  ;;  %1366 = vst [vmem:[%s1900_s6 + $0x370] sm:$0xff] %v1238_v50  ;;  %v987_v61 = vsel %vm871_vm0, %v858_v49, 0.0  ;;  %v865_v37 = vld [vmem:[%s1853_s25 + $0x3d0] sm:$0xff]  ;;  %v866_v47 = vld [vmem:[%s1853_s25 + $0x3d8] sm:$0xff] }
  0xbb   : > { %v729_v60 = vadd.f32 %v2207_v22, %v597_v51  ;;  %v599_v62 = vmul.f32 %v2213_v0, %v1699_v53  ;;  %v1700_v63 = vunpack.c.h.bf16 %v1778_v40  ;;  %v730_v5 = vadd.f32 %v2207_v22, %v598_v58 }
  0xbc   : > { %1367 = vst [vmem:[%s1900_s6 + $0x378] sm:$0xff] %v1239_v55  ;;  %v1240_v3 = vmax.f32 %v1112_v56, 0.0  ;;  %v1113_v4 = vadd.f32 %v985_v43, %v728_v57  ;;  %v988_v6 = vsel %vm871_vm0, %v859_v54, 0.0  ;;  %v1703_v10 = vunpack.c.l.bf16 %v1779_v59  ;;  %v1783_v57 = vld [vmem:[%s1846_s22 + $0x1f8] sm:$0xff]  }
  0xbd   : > { %v1114_v7 = vadd.f32 %v986_v52, %v729_v60  ;;  %v731_v8 = vadd.f32 %v2207_v22, %v599_v62  ;;  %v600_v9 = vmul.f32 %v2213_v0, %v1700_v63  ;;  %v1115_v14 = vadd.f32 %v987_v61, %v730_v5  ;;  %v867_v52 = vld [vmem:[%s1853_s25 + $0x3e0] sm:$0xff]  ;;  %v868_v62 = vld [vmem:[%s1853_s25 + $0x3e8] sm:$0xff] }
  0xbe   : > { %1368 = vst [vmem:[%s1900_s6 + $0x380] sm:$0xff] %v1240_v3  ;;  %v1241_v13 = vmax.f32 %v1113_v4, 0.0  ;;  %v989_v15 = vsel %vm871_vm0, %v860_v2, 0.0  ;;  %v1704_v16 = vunpack.c.h.bf16 %v1779_v59  ;;  %v601_v21 = vmul.f32 %v2213_v0, %v1703_v10 }
  0xbf   : > { %v1242_v18 = vmax.f32 %v1114_v7, 0.0  ;;  %v1116_v19 = vadd.f32 %v988_v6, %v731_v8  ;;  %v732_v20 = vadd.f32 %v2207_v22, %v600_v9  ;;  %v1243_v24 = vmax.f32 %v1115_v14, 0.0  ;;  %v869_v9 = vld [vmem:[%s1853_s25 + $0x3f0] sm:$0xff]  ;;  %v870_v14 = vld [vmem:[%s1853_s25 + $0x3f8] sm:$0xff] }
  0xc0   : > { %1369 = vst [vmem:[%s1900_s6 + $0x388] sm:$0xff] %v1241_v13  ;;  %v990_v1 = vsel %vm871_vm0, %v861_v11, 0.0  ;;  %v602_v25 = vmul.f32 %v2213_v0, %v1704_v16  ;;  %v1707_v26 = vunpack.c.l.bf16 %v1780_v12  ;;  %v733_v31 = vadd.f32 %v2207_v22, %v601_v21 }
  0xc1   : > { %1370 = vst [vmem:[%s1900_s6 + $0x390] sm:$0xff] %v1242_v18  ;;  %v1244_v29 = vmax.f32 %v1116_v19, 0.0  ;;  %v1117_v30 = vadd.f32 %v989_v15, %v732_v20  ;;  %v991_v32 = vsel %vm871_vm0, %v862_v17, 0.0  ;;  %v992_v35 = vsel %vm871_vm0, %v863_v23, 0.0 }
  0xc2   : > { %1371 = vst [vmem:[%s1900_s6 + $0x398] sm:$0xff] %v1243_v24  ;;  %v734_v33 = vadd.f32 %v2207_v22, %v602_v25  ;;  %v603_v34 = vmul.f32 %v2213_v0, %v1707_v26  ;;  %v1708_v36 = vunpack.c.h.bf16 %v1780_v12  ;;  %v1118_v40 = vadd.f32 %v990_v1, %v733_v31  ;;  %v1796_v22 = vld [vmem:[%s2582_s2] ss:$0 sm:$0xff] }
  0xc3   : > { %1372 = vst [vmem:[%s1900_s6 + $0x3a0] sm:$0xff] %v1244_v29  ;;  %v1245_v39 = vmax.f32 %v1117_v30, 0.0  ;;  %v993_v41 = vsel %vm871_vm0, %v864_v27, 0.0  ;;  %v1711_v42 = vunpack.c.l.bf16 %v1781_v28  ;;  %v1712_v46 = vunpack.c.h.bf16 %v1781_v28 }
  0xc4   : > { %v1119_v43 = vadd.f32 %v991_v32, %v734_v33  ;;  %v735_v0 = vadd.f32 %v1796_v22, %v603_v34  ;;  %v604_v45 = vmul.f32 %v1797_v44, %v1708_v36  ;;  %v1246_v48 = vmax.f32 %v1118_v40, 0.0 }
  0xc5   : > { %1373 = vst [vmem:[%s1900_s6 + $0x3a8] sm:$0xff] %v1245_v39  ;;  %v605_v49 = vmul.f32 %v1797_v44, %v1711_v42  ;;  %v994_v50 = vsel %vm871_vm0, %v865_v37, 0.0  ;;  %v1715_v51 = vunpack.c.l.bf16 %v1782_v38  ;;  %v606_v56 = vmul.f32 %v1797_v44, %v1712_v46 }
  0xc6   : > { %v1247_v53 = vmax.f32 %v1119_v43, 0.0  ;;  %v1120_v54 = vadd.f32 %v992_v35, %v735_v0  ;;  %v736_v55 = vadd.f32 %v1796_v22, %v604_v45  ;;  %1374 = vst [vmem:[%s1900_s6 + $0x3b0] sm:$0xff] %v1246_v48  ;;  %v995_v59 = vsel %vm871_vm0, %v866_v47, 0.0 }
  0xc7   : > { %v737_v58 = vadd.f32 %v1796_v22, %v605_v49  ;;  %v607_v60 = vmul.f32 %v1797_v44, %v1715_v51  ;;  %v1716_v61 = vunpack.c.h.bf16 %v1782_v38  ;;  %v738_v3 = vadd.f32 %v1796_v22, %v606_v56 }
  0xc8   : > { %1375 = vst [vmem:[%s1900_s6 + $0x3b8] sm:$0xff] %v1247_v53  ;;  %v1248_v63 = vmax.f32 %v1120_v54, 0.0  ;;  %v1121_v2 = vadd.f32 %v993_v41, %v736_v55  ;;  %v996_v4 = vsel %vm871_vm0, %v867_v52, 0.0  ;;  %v1719_v8 = vunpack.c.l.bf16 %v1783_v57 }
  0xc9   : > { %v1122_v5 = vadd.f32 %v994_v50, %v737_v58  ;;  %v739_v6 = vadd.f32 %v1796_v22, %v607_v60  ;;  %v608_v7 = vmul.f32 %v1797_v44, %v1716_v61  ;;  %v1123_v11 = vadd.f32 %v995_v59, %v738_v3 }
  0xca   : > { %1376 = vst [vmem:[%s1900_s6 + $0x3c0] sm:$0xff] %v1248_v63  ;;  %v1249_v10 = vmax.f32 %v1121_v2, 0.0  ;;  %v997_v12 = vsel %vm871_vm0, %v868_v62, 0.0  ;;  %v1720_v13 = vunpack.c.h.bf16 %v1783_v57  ;;  %v609_v18 = vmul.f32 %v1797_v44, %v1719_v8 }
  0xcb   : > { %v1250_v15 = vmax.f32 %v1122_v5, 0.0  ;;  %v1124_v16 = vadd.f32 %v996_v4, %v739_v6  ;;  %v740_v17 = vadd.f32 %v1796_v22, %v608_v7  ;;  %v1251_v19 = vmax.f32 %v1123_v11, 0.0 }
  0xcc   : > { %1377 = vst [vmem:[%s1900_s6 + $0x3c8] sm:$0xff] %v1249_v10  ;;  %v998_v20 = vsel %vm871_vm0, %v869_v9, 0.0  ;;  %v610_v21 = vmul.f32 %v1797_v44, %v1720_v13  ;;  %v741_v1 = vadd.f32 %v1796_v22, %v609_v18  ;;  %v999_v25 = vsel %vm871_vm0, %v870_v14, 0.0 }
  0xcd   : > { %1378 = vst [vmem:[%s1900_s6 + $0x3d0] sm:$0xff] %v1250_v15  ;;  %v1252_v23 = vmax.f32 %v1124_v16, 0.0  ;;  %v1125_v24 = vadd.f32 %v997_v12, %v740_v17 }
  0xce   : > { %1379 = vst [vmem:[%s1900_s6 + $0x3d8] sm:$0xff] %v1251_v19  ;;  %v742_v26 = vadd.f32 %v1796_v22, %v610_v21  ;;  %v1126_v28 = vadd.f32 %v998_v20, %v741_v1 }
  0xcf   : > { %1380 = vst [vmem:[%s1900_s6 + $0x3e0] sm:$0xff] %v1252_v23  ;;  %v1253_v27 = vmax.f32 %v1125_v24, 0.0 }
  0xd0   : > { %v1127_v29 = vadd.f32 %v999_v25, %v742_v26  ;;  %v1254_v30 = vmax.f32 %v1126_v28, 0.0 }
  0xd1   : > { %1381 = vst [vmem:[%s1900_s6 + $0x3e8] sm:$0xff] %v1253_v27 }
  0xd2   : > { %v1255_v31 = vmax.f32 %v1127_v29, 0.0  ;;  %1382 = vst [vmem:[%s1900_s6 + $0x3f0] sm:$0xff] %v1254_v30 }
  0xd4   : > { %1383 = vst [vmem:[%s1900_s6 + $0x3f8] sm:$0xff] %v1255_v31 }
  0xd5 PF: > { %s14_s15 = sadd.s32 1, %s1804_s15  }
  0xd6   : > { %p11_p4 = scmp.ge.s32.totalorder %s14_s15, 4  }
  0xd8   :  { %13 = sbr.rel (!%p11_p4) target bundleno = 1 (0x1), region = 69 }

// kernel: residual_block_forward.4
= control target key start
LH: loop header
LB: loop body
LE: loop exit
PB: predicated region body
PF: predicated region fallthrough
CT: control target
= control target key end

     0   :  { %s5568_s15 = smov 0   ;;  %s5570_s16 = smov 0   ;;  %s7432_s0 = inlined_call_operand.vmem [shape: bf16[2,34,34,8], index: 0, kind: input, shape index: {}]   ;;  %s7433_s1 = inlined_call_operand.vmem [shape: bf16[9,8,128], index: 1, kind: input, shape index: {}]   ;;  %s7434_s2 = inlined_call_operand.vmem [shape: bf16[2,1024,128], index: 2, kind: output, shape index: {0}]   ;;  %s7435_s3 = inlined_call_operand.vmem [shape: f32[2,2,8,128], index: 3, kind: output, shape index: {1}]   ;;  %s7436_s4 = inlined_call_operand.vmem [shape: f32[2,2,8,128], index: 4, kind: output, shape index: {2}]  }
   0x1   :  { %s5572_s17 = smov 0   ;;  %s5574_s18 = smov 0  }
   0x2   :  { %s5576_s19 = smov 0  }
   0x3 LB: > { %s24_s20 = sadd.s32 1, %s5533_s17  ;;  %s27_s21 = sadd.s32 1, %s5537_s18  ;;  %s5541_s19 = sphi %s5576_s19, %s15_s19   ;;  %s5537_s18 = sphi %s5574_s18, %s7739_s18   ;;  %s5533_s17 = sphi %s5572_s17, %s7738_s17   ;;  %s5529_s16 = sphi %s5570_s16, %s7737_s16   ;;  %s5525_s15 = sphi %s5568_s15, %s7736_s15  }
   0x4   : > { %p25_p0 = scmp.ge.s32.totalorder %s24_s20, 2  ;;  %p4658_p1 = scmp.ge.s32.totalorder %s5541_s19, 1 }
   0x5   : > { %p185_p2 = scmp.lt.s32.totalorder %s5541_s19, 5 }
   0x6   : > { %s7741_s20 = smov (%p25_p0, %s24_s20), 0  ;;  %s7743_s21 = smov (!%p25_p0, %s27_s21), %s5537_s18 }
   0x7   : > { %p186_p3 = pnand %p4658_p1, %p185_p2  ;;  %p29_p4 = scmp.ge.s32.totalorder %s7743_s21, 2 }
   0x9   : > { %s7745_s21 = smov (%p29_p4, %s7743_s21), 0  ;;  %189 = sbr.rel (%p186_p3) target bundleno = 1354 (0x54a), region = 28 }
   0xe   : > { %v4670_v0 = vld [vmem:[%s7433_s1 + $0x4] sm:$0xf]  ;;  %vm1260_vm0 = vcmask 1043456   ;;  %p231_p5 = scmp.lt.s32.totalorder %s5529_s16, 1  ;;  %v4879_v2 = vld [vmem:[%s7433_s1 + $0x8] sm:$0xf] }
   0xf   : > { %v1262_v1 = vsel %vm1260_vm0, %v4670_v0, 0  ;;  %s5130_s26 = smul.u32 320, %s5525_s15  ;;  %v2283_v3 = vsel %vm1260_vm0, %v4879_v2, 0  ;;  %v4912_v4 = vld [vmem:[%s7433_s1 + $0xc] sm:$0xf]  ;;  %vm1163_vm3 = vcmask 64512  }
  0x10   : > { %5358 = vmatpush.bf16.msra.mxu1 %v1262_v1  ;;  %5359 = vmatpush.bf16.msra.mxu2 %v1262_v1  ;;  %s7747_s16 = smov (!%p231_p5, %s5529_s16), 1  ;;  %v357_v5 = vld [vmem:[%s7433_s1] sm:$0xf]  ;;  %v2537_v6 = vsel %vm1260_vm0, %v4912_v4, 0  ;;  %v4953_v8 = vld [vmem:[%s7433_s1 + $0x10] sm:$0xf] }
  0x11   : > { %5360 = vmatpush.bf16.msra.mxu3 %v1262_v1  ;;  %1271 = vmatpush.bf16.msra.mxu0 %v1262_v1  ;;  %s5361_s27 = smul.u32 680, %s7747_s16  ;;  %v1690_v7 = vsel %vm1260_vm0, %v357_v5, 0  ;;  %v2831_v9 = vsel %vm1260_vm0, %v4953_v8, 0  ;;  %vm358_vm1 = vsmask.f32 3328  ;;  %v7498_v36 = vmov 0 }
  0x12   : > { %vm359_vm2 = vsmask.f32 7440  ;;  %vm1877_vm5 = vcmask 1042432   ;;  %vm1878_vm6 = vcmask 1046532   ;;  %s4661_s28 = sshll.u32 %s7747_s16, 7  ;;  %p248_p7 = scmp.lt.s32.totalorder %s5525_s15, 1 }
  0x13   : > { %s235_s10 = scalar_lea.vmem %s7432_s0, %s5361_s27  ;;  %vm5647_vm4 = vmor %vm358_vm1, %vm359_vm2  ;;  %s4660_s27 = sshll.u32 %s5525_s15, 6 }
  0x14   : > { %2292 = vmatpush.bf16.msrb.mxu2 %v2283_v3  ;;  %1699 = vmatpush.bf16.msrb.mxu1 %v1690_v7  ;;  %s5627_s11 = scalar_lea.vmem %s235_s10, %s5130_s26  ;;  %v7499_v36 = vsel %vm5647_vm4, 4294967295, %v7498_v36  ;;  %vm6150_vm7 = vmor %vm1877_vm5, %vm1878_vm6  ;;  %p239_p6 = scmp.lt.s32.totalorder %s4660_s27, 127 }
  0x15   : > { %2546 = vmatpush.bf16.msrb.mxu3 %v2537_v6  ;;  %2840 = vmatpush.bf16.msrb.mxu0 %v2831_v9  ;;  %v287_v10 = vld [vmem:[%s5627_s11 + $0x50] sm:$0xf]  ;;  %v288_v11 = vld [vmem:[%s5627_s11 + $0x54] sm:$0xf]  ;;  %v5632_v12 = vld [vmem:[%s5627_s11 + $0x58] sm:$0xf] }
  0x16   : > { %v538_v13 = vshrl.u32 %v287_v10, 16  ;;  %v541_v14 = vshll.u32 %v287_v10, 16  ;;  %v547_v15 = vshll.u32 %v288_v11, 16  ;;  %v551_v16 = vshrl.u32 %v288_v11, 16  ;;  %v307_v17 = vld [vmem:[%s5627_s11 + $0xa0] sm:$0xf] }
  0x17   : > { %v557_v18 = vshll.u32 %v5632_v12, 16  ;;  %v308_v19 = vld [vmem:[%s5627_s11 + $0xa4] sm:$0xf]  ;;  %v5638_v20 = vld [vmem:[%s5627_s11 + $0xa8] sm:$0xf]  ;;  %v714_v21 = vshrl.u32 %v307_v17, 16 }
  0x18   : > { %v540_v22 = vrot.slane %v538_v13, 4  ;;  %v543_v23 = vrot.slane %v541_v14, 5  ;;  %v549_v24 = vrot.slane %v547_v15, 5  ;;  %v553_v25 = vrot.slane %v551_v16, 4  ;;  %v327_v26 = vld [vmem:[%s5627_s11 + $0xf0] sm:$0xf] }
  0x19   : > { %v5641_v27 = vrot.slane %v557_v18, 5  ;;  %v716_v28 = vrot.slane %v714_v21, 4  ;;  %v717_v29 = vshll.u32 %v307_v17, 16  ;;  %v723_v30 = vshll.u32 %v308_v19, 16  ;;  %v328_v35 = vld [vmem:[%s5627_s11 + $0xf4] sm:$0xf] }
  0x1a   : > { %v544_v31 = vor.u32 %v543_v23, %v540_v22  ;;  %v554_v32 = vor.u32 %v553_v25, %v549_v24  ;;  %v727_v33 = vshrl.u32 %v308_v19, 16  ;;  %v733_v34 = vshll.u32 %v5638_v20, 16  ;;  %7500 = vst [vmem:[#allocation2_spill] sm:$0xff] %v7499_v36  ;;  %v5654_v46 = vld [vmem:[%s5627_s11 + $0xf8] sm:$0xf]  ;;  %s7749_s27 = smov (!%p239_p6, %s4660_s27), 127 }
  0x1b   : > { %v719_v37 = vrot.slane %v717_v29, 5  ;;  %v725_v38 = vrot.slane %v723_v30, 5  ;;  %v890_v39 = vshrl.u32 %v327_v26, 16  ;;  %v893_v40 = vshll.u32 %v327_v26, 16  ;;  %v267_v54 = vld [vmem:[%s5627_s11] sm:$0xf]  ;;  %s242_s29 = sadd.s32 %s4661_s28, %s7749_s27 }
  0x1c   : > { %v545_v41 = vrot.slane %v544_v31, 4  ;;  %v555_v42 = vrot.slane %v554_v32, 4  ;;  %v729_v43 = vrot.slane %v727_v33, 4  ;;  %v5651_v44 = vrot.slane %v733_v34, 5  ;;  %v268_v2 = vld [vmem:[%s5627_s11 + $0x4] sm:$0xf] }
  0x1d   : > { %v720_v45 = vor.u32 %v719_v37, %v716_v28  ;;  %v892_v47 = vrot.slane %v890_v39, 4  ;;  %v895_v48 = vrot.slane %v893_v40, 5  ;;  %v899_v49 = vshll.u32 %v328_v35, 16  ;;  %v5674_v8 = vld [vmem:[%s5627_s11 + $0x8] sm:$0xf]  ;;  %s4662_s30 = sshll.u32 %s242_s29, 2 }
  0x1e   : > { %v550_v50 = vsel %vm5647_vm4, %v545_v41, %v549_v24  ;;  %v560_v51 = vsel %vm5647_vm4, %v555_v42, %v5641_v27  ;;  %v730_v52 = vor.u32 %v729_v43, %v725_v38  ;;  %v903_v53 = vshrl.u32 %v328_v35, 16  ;;  %v290_v14 = vld [vmem:[%s5627_s11 + $0x5c] sm:$0xf]  ;;  %v291_v23 = vld [vmem:[%s5627_s11 + $0x60] sm:$0x1]  ;;  %s7079_s7 = scalar_lea.vmem %s7434_s2, %s4662_s30  ;;  %s7751_s15 = smov (!%p248_p7, %s5525_s15), 1 }
  0x1f   : > { %v1083_v55 = vunpack.c.l.b16 %v550_v50  ;;  %v1084_v56 = vunpack.c.l.b16 %v560_v51  ;;  %v721_v57 = vrot.slane %v720_v45, 4  ;;  %v896_v58 = vor.u32 %v895_v48, %v892_v47  ;;  %v311_v50 = vld [vmem:[%s5627_s11 + $0xb0] sm:$0x1]  ;;  %s4663_s8 = sshll.u32 %s7747_s16, 1 }
  0x20   : > { %v731_v59 = vrot.slane %v730_v52, 4  ;;  %v901_v60 = vrot.slane %v899_v49, 5  ;;  %v905_v61 = vrot.slane %v903_v53, 4  ;;  %v909_v62 = vshll.u32 %v5654_v46, 16  ;;  %s251_s9 = sadd.s32 %s4663_s8, %s7751_s15 }
  0x21   : > { %v5663_v63 = vpack.c.b16 %v1084_v56, %v1083_v55  ;;  %v726_v0 = vsel %vm5647_vm4, %v721_v57, %v725_v38  ;;  %v897_v1 = vrot.slane %v896_v58, 4  ;;  %v362_v3 = vshrl.u32 %v267_v54, 16  ;;  %v310_v38 = vld [vmem:[%s5627_s11 + $0xac] sm:$0xf]  ;;  %s4664_s10 = sshll.u32 %s251_s9, 3 }
  0x22   : > { %v736_v4 = vsel %vm5647_vm4, %v731_v59, %v5651_v44  ;;  %v1099_v5 = vunpack.c.l.b16 %v726_v0  ;;  %v906_v6 = vor.u32 %v905_v61, %v901_v60  ;;  %v5671_v7 = vrot.slane %v909_v62, 5  ;;  %v330_v59 = vld [vmem:[%s5627_s11 + $0xfc] sm:$0xf]  ;;  %s253_s13 = scalar_lea.vmem %s7435_s3, %s4664_s10  ;;  %s261_s22 = scalar_lea.vmem %s7436_s4, %s4664_s10 }
  0x23   : > { %7501 = vst [vmem:[#allocation3_spill] sm:$0xff] %v5663_v63  ;;  %4679 = vmatmul.msk.bf16.vlgmr.msra.gmra.mxu1 %vm1163_vm3, %v5663_v63  ;;  %v1100_v9 = vunpack.c.l.b16 %v736_v4  ;;  %v902_v10 = vsel %vm5647_vm4, %v897_v1, %v901_v60  ;;  %v364_v11 = vrot.slane %v362_v3, 4  ;;  %v365_v13 = vshll.u32 %v267_v54, 16  ;;  %v331_v3 = vld [vmem:[%s5627_s11 + $0x100] sm:$0x1] }
  0x24   : > { %v907_v15 = vrot.slane %v906_v6, 4  ;;  %v1115_v16 = vunpack.c.l.b16 %v902_v10  ;;  %v371_v17 = vshll.u32 %v268_v2, 16  ;;  %v375_v18 = vshrl.u32 %v268_v2, 16 }
  0x25   : > { %v5681_v19 = vpack.c.b16 %v1100_v9, %v1099_v5  ;;  %v367_v21 = vrot.slane %v365_v13, 5  ;;  %v381_v22 = vshll.u32 %v5674_v8, 16  ;;  %v561_v24 = vshrl.u32 %v5632_v12, 16 }
  0x26   : > { %v912_v25 = vsel %vm5647_vm4, %v907_v15, %v5671_v7  ;;  %v373_v26 = vrot.slane %v371_v17, 5  ;;  %v377_v28 = vrot.slane %v375_v18, 4  ;;  %v567_v29 = vshll.u32 %v290_v14, 16  ;;  %v270_v18 = vld [vmem:[%s5627_s11 + $0xc] sm:$0xf] }
  0x27   : > { %4687 = vmatmul.msk.bf16.vlgmr.msra.gmra.mxu2 %vm1163_vm3, %v5681_v19  ;;  %v1116_v30 = vunpack.c.l.b16 %v912_v25  ;;  %v368_v31 = vor.u32 %v367_v21, %v364_v11  ;;  %v5691_v32 = vrot.slane %v381_v22, 5  ;;  %v563_v33 = vrot.slane %v561_v24, 4  ;;  %v292_v25 = vld [vmem:[%s5627_s11 + $0x64] sm:$0xf] }
  0x28   : > { %v378_v34 = vor.u32 %v377_v28, %v373_v26  ;;  %v569_v35 = vrot.slane %v567_v29, 5  ;;  %v571_v37 = vshrl.u32 %v290_v14, 16  ;;  %v577_v12 = vshll.u32 %v291_v23, 16 }
  0x29   : > { %v5694_v39 = vpack.c.b16 %v1116_v30, %v1115_v16  ;;  %v369_v40 = vrot.slane %v368_v31, 4  ;;  %v564_v41 = vor.u32 %v563_v33, %v5641_v27  ;;  %v737_v47 = vshrl.u32 %v5638_v20, 16 }
  0x2a   : > { %v379_v42 = vrot.slane %v378_v34, 4  ;;  %v573_v43 = vrot.slane %v571_v37, 4  ;;  %v579_v45 = vrot.slane %v577_v12, 5  ;;  %v743_v51 = vshll.u32 %v310_v38, 16 }
  0x2b   : > { %7502 = vst [vmem:[#allocation4_spill] sm:$0xff] %v5694_v39  ;;  %4695 = vmatmul.msk.bf16.vlgmr.msra.gmra.mxu3 %vm1163_vm3, %v5694_v39  ;;  %v374_v48 = vsel %vm5647_vm4, %v369_v40, %v373_v26  ;;  %v565_v49 = vrot.slane %v564_v41, 4  ;;  %v747_v52 = vshrl.u32 %v310_v38, 16  ;;  %v739_v55 = vrot.slane %v737_v47, 4  ;;  %v293_v40 = vld [vmem:[%s5627_s11 + $0x68] sm:$0xf] }
  0x2c   : > { %v384_v27 = vsel %vm5647_vm4, %v379_v42, %v5691_v32  ;;  %v1067_v53 = vunpack.c.l.b16 %v374_v48  ;;  %v574_v54 = vor.u32 %v573_v43, %v569_v35  ;;  %v745_v57 = vrot.slane %v743_v51, 5  ;;  %v312_v47 = vld [vmem:[%s5627_s11 + $0xb4] sm:$0xf] }
  0x2d   : > { %v1068_v56 = vunpack.c.l.b16 %v384_v27  ;;  %v570_v20 = vsel %vm5647_vm4, %v565_v49, %v569_v35  ;;  %v749_v58 = vrot.slane %v747_v52, 4  ;;  %v740_v61 = vor.u32 %v739_v55, %v5651_v44 }
  0x2e   : > { %v575_v60 = vrot.slane %v574_v54, 4  ;;  %v753_v62 = vshll.u32 %v311_v50, 16  ;;  %v1085_v1 = vunpack.c.l.b16 %v570_v20  ;;  %v913_v4 = vshrl.u32 %v5654_v46, 16  ;;  %v271_v46 = vld [vmem:[%s5627_s11 + $0x10] sm:$0x1] }
  0x2f   : > { %v1131_v0 = vpack.c.b16 %v1068_v56, %v1067_v53  ;;  %v750_v2 = vor.u32 %v749_v58, %v745_v57  ;;  %v741_v6 = vrot.slane %v740_v61, 4  ;;  %v919_v10 = vshll.u32 %v330_v59, 16 }
  0x30   : > { %v580_v5 = vsel %vm5647_vm4, %v575_v60, %v579_v45  ;;  %v755_v9 = vrot.slane %v753_v62, 5  ;;  %v915_v13 = vrot.slane %v913_v4, 4  ;;  %v923_v14 = vshrl.u32 %v330_v59, 16 }
  0x31   : > { %4671 = vmatmul.msk.bf16.vlgmr.msra.gmra.mxu0 %vm1163_vm3, %v1131_v0  ;;  %v1086_v11 = vunpack.c.l.b16 %v580_v5  ;;  %v751_v44 = vrot.slane %v750_v2, 4  ;;  %v746_v15 = vsel %vm5647_vm4, %v741_v6, %v745_v57  ;;  %v921_v16 = vrot.slane %v919_v10, 5  ;;  %v313_v57 = vld [vmem:[%s5627_s11 + $0xb8] sm:$0xf]  ;;  %v332_v0 = vld [vmem:[%s5627_s11 + $0x104] sm:$0xf] }
  0x32   : > { %v929_v17 = vshll.u32 %v331_v3, 16  ;;  %v1101_v23 = vunpack.c.l.b16 %v746_v15  ;;  %v916_v24 = vor.u32 %v915_v13, %v5671_v7  ;;  %v925_v28 = vrot.slane %v923_v14, 4  ;;  %v5732_v7 = vld [vmem:[%s5627_s11 + $0x6c] sm:$0xf]  ;;  %v5750_v3 = vld [vmem:[%s5627_s11 + $0xbc] sm:$0xf] }
  0x33   : > { %v5719_v21 = vpack.c.b16 %v1086_v11, %v1085_v1  ;;  %v756_v22 = vsel %vm5647_vm4, %v751_v44, %v755_v9  ;;  %v385_v30 = vshrl.u32 %v5674_v8, 16  ;;  %v391_v33 = vshll.u32 %v270_v18, 16 }
  0x34   : > { %v1102_v26 = vunpack.c.l.b16 %v756_v22  ;;  %v931_v29 = vrot.slane %v929_v17, 5  ;;  %v917_v31 = vrot.slane %v916_v24, 4  ;;  %v395_v34 = vshrl.u32 %v270_v18, 16  ;;  %v333_v18 = vld [vmem:[%s5627_s11 + $0x108] sm:$0xf] }
  0x35   : > { %7503 = vst [vmem:[#allocation5_spill] sm:$0xff] %v5719_v21  ;;  %4680 = vmatmul.msk.bf16.gmra.mxu1 %vm1163_vm3, %v5719_v21  ;;  %v401_v35 = vshll.u32 %v271_v46, 16  ;;  %v926_v12 = vor.u32 %v925_v28, %v921_v16  ;;  %v387_v38 = vrot.slane %v385_v30, 4  ;;  %v582_v41 = vshrl.u32 %v292_v25, 16 }
  0x36   : > { %v5728_v37 = vpack.c.b16 %v1102_v26, %v1101_v23  ;;  %v922_v42 = vsel %vm5647_vm4, %v917_v31, %v921_v16  ;;  %v393_v8 = vrot.slane %v391_v33, 5  ;;  %v397_v43 = vrot.slane %v395_v34, 4  ;;  %v5761_v26 = vld [vmem:[%s5627_s11 + $0x10c] sm:$0xf]  ;;  %v272_v33 = vld [vmem:[%s5627_s11 + $0x14] sm:$0xf] }
  0x37   : > { %v403_v45 = vrot.slane %v401_v35, 5  ;;  %v927_v48 = vrot.slane %v926_v12, 4  ;;  %v1117_v49 = vunpack.c.l.b16 %v922_v42  ;;  %v388_v50 = vor.u32 %v387_v38, %v5691_v32 }
  0x38   : > { %4688 = vmatmul.msk.bf16.gmra.mxu2 %vm1163_vm3, %v5728_v37  ;;  %v584_v51 = vrot.slane %v582_v41, 4  ;;  %v398_v52 = vor.u32 %v397_v43, %v393_v8  ;;  %v585_v27 = vshll.u32 %v292_v25, 16  ;;  %v591_v53 = vshll.u32 %v293_v40, 16 }
  0x39   : > { %v595_v54 = vshrl.u32 %v293_v40, 16  ;;  %v932_v55 = vsel %vm5647_vm4, %v927_v48, %v931_v29  ;;  %v389_v56 = vrot.slane %v388_v50, 4  ;;  %v601_v20 = vshll.u32 %v5732_v7, 16 }
  0x3a   : > { %v758_v58 = vshrl.u32 %v312_v47, 16  ;;  %v1118_v59 = vunpack.c.l.b16 %v932_v55  ;;  %v399_v60 = vrot.slane %v398_v52, 4  ;;  %v587_v61 = vrot.slane %v585_v27, 5  ;;  %v273_v27 = vld [vmem:[%s5627_s11 + $0x18] sm:$0xf] }
  0x3b   : > { %v593_v62 = vrot.slane %v591_v53, 5  ;;  %v394_v32 = vsel %vm5647_vm4, %v389_v56, %v393_v8  ;;  %v597_v1 = vrot.slane %v595_v54, 4  ;;  %v5747_v2 = vrot.slane %v601_v20, 5  ;;  %v5781_v56 = vld [vmem:[%s5627_s11 + $0x1c] sm:$0xf] }
  0x3c   : > { %v760_v4 = vrot.slane %v758_v58, 4  ;;  %v5752_v5 = vpack.c.b16 %v1118_v59, %v1117_v49  ;;  %v404_v6 = vsel %vm5647_vm4, %v399_v60, %v403_v45  ;;  %v1069_v9 = vunpack.c.l.b16 %v394_v32 }
  0x3d   : > { %v588_v10 = vor.u32 %v587_v61, %v584_v51  ;;  %v1070_v11 = vunpack.c.l.b16 %v404_v6  ;;  %v598_v44 = vor.u32 %v597_v1, %v593_v62  ;;  %v761_v13 = vshll.u32 %v312_v47, 16 }
  0x3e   : > { %7504 = vst [vmem:[#allocation6_spill] sm:$0xff] %v5752_v5  ;;  %v767_v14 = vshll.u32 %v313_v57, 16  ;;  %4696 = vmatmul.msk.bf16.gmra.mxu3 %vm1163_vm3, %v5752_v5  ;;  %v771_v16 = vshrl.u32 %v313_v57, 16  ;;  %v777_v17 = vshll.u32 %v5750_v3, 16  ;;  %v934_v46 = vshrl.u32 %v332_v0, 16 }
  0x3f   : > { %v589_v15 = vrot.slane %v588_v10, 4  ;;  %v1132_v22 = vpack.c.b16 %v1070_v11, %v1069_v9  ;;  %v599_v23 = vrot.slane %v598_v44, 4  ;;  %v763_v24 = vrot.slane %v761_v13, 5  ;;  %v295_v9 = vld [vmem:[%s5627_s11 + $0x70] sm:$0xf] }
  0x40   : > { %v769_v25 = vrot.slane %v767_v14, 5  ;;  %v773_v29 = vrot.slane %v771_v16, 4  ;;  %v5765_v30 = vrot.slane %v777_v17, 5  ;;  %v936_v31 = vrot.slane %v934_v46, 4 }
  0x41   : > { %v594_v28 = vsel %vm5647_vm4, %v589_v15, %v593_v62  ;;  %4672 = vmatmul.msk.bf16.gmra.mxu0 %vm1163_vm3, %v1132_v22  ;;  %v604_v34 = vsel %vm5647_vm4, %v599_v23, %v5747_v2  ;;  %v764_v12 = vor.u32 %v763_v24, %v760_v4  ;;  %v937_v38 = vshll.u32 %v332_v0, 16  ;;  %v296_v15 = vld [vmem:[%s5627_s11 + $0x74] sm:$0x1] }
  0x42   : > { %v1087_v35 = vunpack.c.l.b16 %v594_v28  ;;  %v1088_v40 = vunpack.c.l.b16 %v604_v34  ;;  %v774_v41 = vor.u32 %v773_v29, %v769_v25  ;;  %v943_v42 = vshll.u32 %v333_v18, 16 }
  0x43   : > { %v947_v8 = vshrl.u32 %v333_v18, 16  ;;  %v765_v43 = vrot.slane %v764_v12, 4  ;;  %v939_v45 = vrot.slane %v937_v38, 5  ;;  %v953_v47 = vshll.u32 %v5761_v26, 16 }
  0x44   : > { %v406_v48 = vshrl.u32 %v272_v33, 16  ;;  %v5773_v49 = vpack.c.b16 %v1088_v40, %v1087_v35  ;;  %v775_v50 = vrot.slane %v774_v41, 4  ;;  %v945_v51 = vrot.slane %v943_v42, 5  ;;  %v316_v42 = vld [vmem:[%s5627_s11 + $0xc4] sm:$0x1] }
  0x45   : > { %v949_v52 = vrot.slane %v947_v8, 4  ;;  %v770_v53 = vsel %vm5647_vm4, %v765_v43, %v769_v25  ;;  %v940_v54 = vor.u32 %v939_v45, %v936_v31  ;;  %v5778_v55 = vrot.slane %v953_v47, 5  ;;  %v315_v31 = vld [vmem:[%s5627_s11 + $0xc0] sm:$0xf] }
  0x46   : > { %7505 = vst [vmem:[#allocation7_spill] sm:$0xff] %v5773_v49  ;;  %v408_v20 = vrot.slane %v406_v48, 4  ;;  %4681 = vmatmul.msk.bf16.gmra.mxu1 %vm1163_vm3, %v5773_v49  ;;  %v780_v57 = vsel %vm5647_vm4, %v775_v50, %v5765_v30  ;;  %v1103_v58 = vunpack.c.l.b16 %v770_v53  ;;  %v409_v60 = vshll.u32 %v272_v33, 16 }
  0x47   : > { %v950_v59 = vor.u32 %v949_v52, %v945_v51  ;;  %v1104_v61 = vunpack.c.l.b16 %v780_v57  ;;  %v941_v62 = vrot.slane %v940_v54, 4  ;;  %v415_v0 = vshll.u32 %v273_v27, 16 }
  0x48   : > { %v419_v32 = vshrl.u32 %v273_v27, 16  ;;  %v411_v4 = vrot.slane %v409_v60, 5  ;;  %v425_v6 = vshll.u32 %v5781_v56, 16  ;;  %v605_v10 = vshrl.u32 %v5732_v7, 16  ;;  %v335_v27 = vld [vmem:[%s5627_s11 + $0x110] sm:$0xf] }
  0x49   : > { %v951_v1 = vrot.slane %v950_v59, 4  ;;  %v5791_v11 = vpack.c.b16 %v1104_v61, %v1103_v58  ;;  %v946_v44 = vsel %vm5647_vm4, %v941_v62, %v945_v51  ;;  %v417_v13 = vrot.slane %v415_v0, 5 }
  0x4a   : > { %v421_v14 = vrot.slane %v419_v32, 4  ;;  %v1119_v17 = vunpack.c.l.b16 %v946_v44  ;;  %v412_v18 = vor.u32 %v411_v4, %v408_v20  ;;  %v5799_v46 = vrot.slane %v425_v6, 5  ;;  %v336_v20 = vld [vmem:[%s5627_s11 + $0x114] sm:$0x1] }
  0x4b   : > { %v956_v16 = vsel %vm5647_vm4, %v951_v1, %v5778_v55  ;;  %4689 = vmatmul.msk.bf16.gmra.mxu2 %vm1163_vm3, %v5791_v11  ;;  %v607_v23 = vrot.slane %v605_v10, 4  ;;  %v611_v24 = vshll.u32 %v295_v9, 16  ;;  %v615_v28 = vshrl.u32 %v295_v9, 16 }
  0x4c   : > { %v1120_v7 = vunpack.c.l.b16 %v956_v16  ;;  %v422_v22 = vor.u32 %v421_v14, %v417_v13  ;;  %v413_v25 = vrot.slane %v412_v18, 4  ;;  %v621_v29 = vshll.u32 %v296_v15, 16  ;;  %v5829_v14 = vld [vmem:[%s5627_s11 + $0x20] sm:$0xf]  ;;  %v297_v18 = vld [vmem:[%s5627_s11 + $0x78] sm:$0xf] }
  0x4d   : > { %v608_v35 = vor.u32 %v607_v23, %v5747_v2  ;;  %v613_v12 = vrot.slane %v611_v24, 5  ;;  %v617_v40 = vrot.slane %v615_v28, 4  ;;  %v781_v8 = vshrl.u32 %v5750_v3, 16 }
  0x4e   : > { %v5804_v33 = vpack.c.b16 %v1120_v7, %v1119_v17  ;;  %v423_v34 = vrot.slane %v422_v22, 4  ;;  %v418_v38 = vsel %vm5647_vm4, %v413_v25, %v417_v13  ;;  %v623_v41 = vrot.slane %v621_v29, 5  ;;  %v5834_v17 = vld [vmem:[%s5627_s11 + $0x24] sm:$0x1] }
  0x4f   : > { %v1071_v45 = vunpack.c.l.b16 %v418_v38  ;;  %v609_v2 = vrot.slane %v608_v35, 4  ;;  %v787_v47 = vshll.u32 %v315_v31, 16  ;;  %v618_v50 = vor.u32 %v617_v40, %v613_v12  ;;  %v298_v38 = vld [vmem:[%s5627_s11 + $0x7c] sm:$0xf] }
  0x50   : > { %7506 = vst [vmem:[#allocation8_spill] sm:$0xff] %v5804_v33  ;;  %4697 = vmatmul.msk.bf16.gmra.mxu3 %vm1163_vm3, %v5804_v33  ;;  %v428_v43 = vsel %vm5647_vm4, %v423_v34, %v5799_v46  ;;  %v783_v51 = vrot.slane %v781_v8, 4  ;;  %v791_v52 = vshrl.u32 %v315_v31, 16  ;;  %v797_v3 = vshll.u32 %v316_v42, 16  ;;  %v5850_v8 = vld [vmem:[%s5627_s11 + $0x80] sm:$0xf] }
  0x51   : > { %v1072_v48 = vunpack.c.l.b16 %v428_v43  ;;  %v614_v53 = vsel %vm5647_vm4, %v609_v2, %v613_v12  ;;  %v789_v54 = vrot.slane %v787_v47, 5  ;;  %v619_v58 = vrot.slane %v618_v50, 4 }
  0x52   : > { %v1089_v59 = vunpack.c.l.b16 %v614_v53  ;;  %v784_v60 = vor.u32 %v783_v51, %v5765_v30  ;;  %v793_v61 = vrot.slane %v791_v52, 4  ;;  %v799_v62 = vrot.slane %v797_v3, 5 }
  0x53   : > { %v5820_v57 = vpack.c.b16 %v1072_v48, %v1071_v45  ;;  %v957_v0 = vshrl.u32 %v5761_v26, 16  ;;  %v963_v32 = vshll.u32 %v335_v27, 16  ;;  %v624_v1 = vsel %vm5647_vm4, %v619_v58, %v623_v41  ;;  %v317_v48 = vld [vmem:[%s5627_s11 + $0xc8] sm:$0xf] }
  0x54   : > { %v785_v4 = vrot.slane %v784_v60, 4  ;;  %v967_v6 = vshrl.u32 %v335_v27, 16  ;;  %v973_v9 = vshll.u32 %v336_v20, 16  ;;  %v1090_v10 = vunpack.c.l.b16 %v624_v1 }
  0x55   : > { %4673 = vmatmul.msk.bf16.gmra.mxu0 %vm1163_vm3, %v5820_v57  ;;  %v794_v44 = vor.u32 %v793_v61, %v789_v54  ;;  %v959_v13 = vrot.slane %v957_v0, 4  ;;  %v965_v30 = vrot.slane %v963_v32, 5  ;;  %v429_v28 = vshrl.u32 %v5781_v56, 16  ;;  %v318_v61 = vld [vmem:[%s5627_s11 + $0xcc] sm:$0xf] }
  0x56   : > { %v790_v26 = vsel %vm5647_vm4, %v785_v4, %v789_v54  ;;  %v969_v15 = vrot.slane %v967_v6, 4  ;;  %v975_v16 = vrot.slane %v973_v9, 5  ;;  %v5837_v7 = vpack.c.b16 %v1090_v10, %v1089_v59 }
  0x57   : > { %v795_v22 = vrot.slane %v794_v44, 4  ;;  %v1105_v23 = vunpack.c.l.b16 %v790_v26  ;;  %v960_v24 = vor.u32 %v959_v13, %v5778_v55  ;;  %v435_v29 = vshll.u32 %v5829_v14, 16  ;;  %v5872_v44 = vld [vmem:[%s5627_s11 + $0xd0] sm:$0xf] }
  0x58   : > { %7507 = vst [vmem:[#allocation9_spill] sm:$0xff] %v5837_v7  ;;  %v970_v25 = vor.u32 %v969_v15, %v965_v30  ;;  %v439_v31 = vshrl.u32 %v5829_v14, 16  ;;  %4682 = vmatmul.msk.bf16.gmra.mxu1 %vm1163_vm3, %v5837_v7  ;;  %v445_v12 = vshll.u32 %v5834_v17, 16  ;;  %v626_v40 = vshrl.u32 %v297_v18, 16 }
  0x59   : > { %v800_v34 = vsel %vm5647_vm4, %v795_v22, %v799_v62  ;;  %v961_v35 = vrot.slane %v960_v24, 4  ;;  %v431_v42 = vrot.slane %v429_v28, 4  ;;  %v437_v56 = vrot.slane %v435_v29, 5 }
  0x5a   : > { %v1106_v55 = vunpack.c.l.b16 %v800_v34  ;;  %v971_v41 = vrot.slane %v970_v25, 4  ;;  %v441_v45 = vrot.slane %v439_v31, 4  ;;  %v447_v2 = vrot.slane %v445_v12, 5 }
  0x5b   : > { %v966_v43 = vsel %vm5647_vm4, %v961_v35, %v965_v30  ;;  %v628_v47 = vrot.slane %v626_v40, 4  ;;  %v432_v27 = vor.u32 %v431_v42, %v5799_v46  ;;  %v629_v3 = vshll.u32 %v297_v18, 16  ;;  %v337_v46 = vld [vmem:[%s5627_s11 + $0x118] sm:$0xf]  ;;  %v338_v40 = vld [vmem:[%s5627_s11 + $0x11c] sm:$0xf] }
  0x5c   : > { %v5855_v50 = vpack.c.b16 %v1106_v55, %v1105_v23  ;;  %v976_v51 = vsel %vm5647_vm4, %v971_v41, %v975_v16  ;;  %v1121_v52 = vunpack.c.l.b16 %v966_v43  ;;  %v442_v54 = vor.u32 %v441_v45, %v437_v56  ;;  %v5890_v45 = vld [vmem:[%s5627_s11 + $0x28] sm:$0xf] }
  0x5d   : > { %v1122_v53 = vunpack.c.l.b16 %v976_v51  ;;  %v635_v20 = vshll.u32 %v298_v38, 16  ;;  %v433_v58 = vrot.slane %v432_v27, 4  ;;  %v639_v59 = vshrl.u32 %v298_v38, 16 }
  0x5e   : > { %4690 = vmatmul.msk.bf16.gmra.mxu2 %vm1163_vm3, %v5855_v50  ;;  %v645_v60 = vshll.u32 %v5850_v8, 16  ;;  %v802_v62 = vshrl.u32 %v317_v48, 16  ;;  %v443_v32 = vrot.slane %v442_v54, 4  ;;  %v631_v1 = vrot.slane %v629_v3, 5 }
  0x5f   : > { %v5864_v0 = vpack.c.b16 %v1122_v53, %v1121_v52  ;;  %v637_v4 = vrot.slane %v635_v20, 5  ;;  %v438_v6 = vsel %vm5647_vm4, %v433_v58, %v437_v56  ;;  %v641_v9 = vrot.slane %v639_v59, 4  ;;  %v5887_v56 = vld [vmem:[%s5627_s11 + $0x120] sm:$0xf] }
  0x60   : > { %v5869_v10 = vrot.slane %v645_v60, 5  ;;  %v804_v13 = vrot.slane %v802_v62, 4  ;;  %v448_v30 = vsel %vm5647_vm4, %v443_v32, %v447_v2  ;;  %v1073_v26 = vunpack.c.l.b16 %v438_v6 }
  0x61   : > { %7508 = vst [vmem:[#allocation10_spill] sm:$0xff] %v5864_v0  ;;  %4698 = vmatmul.msk.bf16.gmra.mxu3 %vm1163_vm3, %v5864_v0  ;;  %v632_v15 = vor.u32 %v631_v1, %v628_v47  ;;  %v805_v16 = vshll.u32 %v317_v48, 16  ;;  %v1074_v18 = vunpack.c.l.b16 %v448_v30  ;;  %v642_v22 = vor.u32 %v641_v9, %v637_v4  ;;  %v5904_v1 = vld [vmem:[%s5627_s11 + $0x2c] sm:$0xf] }
  0x62   : > { %v811_v23 = vshll.u32 %v318_v61, 16  ;;  %v815_v24 = vshrl.u32 %v318_v61, 16  ;;  %v821_v29 = vshll.u32 %v5872_v44, 16  ;;  %v978_v31 = vshrl.u32 %v337_v46, 16 }
  0x63   : > { %v633_v25 = vrot.slane %v632_v15, 4  ;;  %v807_v28 = vrot.slane %v805_v16, 5  ;;  %v5879_v34 = vpack.c.b16 %v1074_v18, %v1073_v26  ;;  %v643_v35 = vrot.slane %v642_v22, 4 }
  0x64   : > { %v813_v12 = vrot.slane %v811_v23, 5  ;;  %v817_v38 = vrot.slane %v815_v24, 4  ;;  %v5884_v42 = vrot.slane %v821_v29, 5  ;;  %v980_v43 = vrot.slane %v978_v31, 4  ;;  %v300_v31 = vld [vmem:[%s5627_s11 + $0x84] sm:$0xf] }
  0x65   : > { %v638_v55 = vsel %vm5647_vm4, %v633_v25, %v637_v4  ;;  %v808_v41 = vor.u32 %v807_v28, %v804_v13  ;;  %4674 = vmatmul.msk.bf16.gmra.mxu0 %vm1163_vm3, %v5879_v34  ;;  %v648_v2 = vsel %vm5647_vm4, %v643_v35, %v5869_v10  ;;  %v981_v51 = vshll.u32 %v337_v46, 16  ;;  %v5907_v4 = vld [vmem:[%s5627_s11 + $0x30] sm:$0xf] }
  0x66   : > { %v1091_v47 = vunpack.c.l.b16 %v638_v55  ;;  %v818_v48 = vor.u32 %v817_v38, %v813_v12  ;;  %v1092_v52 = vunpack.c.l.b16 %v648_v2  ;;  %v987_v53 = vshll.u32 %v338_v40, 16 }
  0x67   : > { %v809_v27 = vrot.slane %v808_v41, 4  ;;  %v991_v54 = vshrl.u32 %v338_v40, 16  ;;  %v983_v20 = vrot.slane %v981_v51, 5  ;;  %v997_v58 = vshll.u32 %v5887_v56, 16  ;;  %v301_v41 = vld [vmem:[%s5627_s11 + $0x88] sm:$0x1] }
  0x68   : > { %v819_v3 = vrot.slane %v818_v48, 4  ;;  %v450_v59 = vshrl.u32 %v5890_v45, 16  ;;  %v5899_v60 = vpack.c.b16 %v1092_v52, %v1091_v47  ;;  %v989_v62 = vrot.slane %v987_v53, 5 }
  0x69   : > { %v814_v61 = vsel %vm5647_vm4, %v809_v27, %v813_v12  ;;  %v993_v32 = vrot.slane %v991_v54, 4  ;;  %v984_v9 = vor.u32 %v983_v20, %v980_v43  ;;  %v5912_v13 = vrot.slane %v997_v58, 5  ;;  %v320_v20 = vld [vmem:[%s5627_s11 + $0xd4] sm:$0xf] }
  0x6a   : > { %v824_v46 = vsel %vm5647_vm4, %v819_v3, %v5884_v42  ;;  %v1107_v6 = vunpack.c.l.b16 %v814_v61  ;;  %4683 = vmatmul.msk.bf16.gmra.mxu1 %vm1163_vm3, %v5899_v60  ;;  %v452_v15 = vrot.slane %v450_v59, 4  ;;  %v453_v16 = vshll.u32 %v5890_v45, 16 }
  0x6b   : > { %v1108_v30 = vunpack.c.l.b16 %v824_v46  ;;  %v994_v26 = vor.u32 %v993_v32, %v989_v62  ;;  %v985_v18 = vrot.slane %v984_v9, 4  ;;  %v459_v22 = vshll.u32 %v5904_v1, 16  ;;  %v321_v9 = vld [vmem:[%s5627_s11 + $0xd8] sm:$0x1] }
  0x6c   : > { %v463_v23 = vshrl.u32 %v5904_v1, 16  ;;  %v469_v24 = vshll.u32 %v5907_v4, 16  ;;  %v455_v29 = vrot.slane %v453_v16, 5  ;;  %v649_v35 = vshrl.u32 %v5850_v8, 16 }
  0x6d   : > { %v5920_v25 = vpack.c.b16 %v1108_v30, %v1107_v6  ;;  %v995_v28 = vrot.slane %v994_v26, 4  ;;  %v990_v12 = vsel %vm5647_vm4, %v985_v18, %v989_v62  ;;  %v461_v38 = vrot.slane %v459_v22, 5 }
  0x6e   : > { %v465_v40 = vrot.slane %v463_v23, 4  ;;  %v5926_v55 = vrot.slane %v469_v24, 5  ;;  %v1123_v2 = vunpack.c.l.b16 %v990_v12  ;;  %v456_v47 = vor.u32 %v455_v29, %v452_v15 }
  0x6f   : > { %4691 = vmatmul.msk.bf16.gmra.mxu2 %vm1163_vm3, %v5920_v25  ;;  %v1000_v43 = vsel %vm5647_vm4, %v995_v28, %v5912_v13  ;;  %v651_v48 = vrot.slane %v649_v35, 4  ;;  %v655_v52 = vshll.u32 %v300_v31, 16  ;;  %v659_v27 = vshrl.u32 %v300_v31, 16  ;;  %v340_v28 = vld [vmem:[%s5627_s11 + $0x124] sm:$0xf] }
  0x70   : > { %v1124_v8 = vunpack.c.l.b16 %v1000_v43  ;;  %v466_v51 = vor.u32 %v465_v40, %v461_v38  ;;  %v457_v53 = vrot.slane %v456_v47, 4  ;;  %v665_v3 = vshll.u32 %v301_v41, 16  ;;  %v341_v41 = vld [vmem:[%s5627_s11 + $0x128] sm:$0x1] }
  0x71   : > { %v652_v54 = vor.u32 %v651_v48, %v5869_v10  ;;  %v657_v61 = vrot.slane %v655_v52, 5  ;;  %v661_v62 = vrot.slane %v659_v27, 4  ;;  %v825_v30 = vshrl.u32 %v5872_v44, 16 }
  0x72   : > { %v5936_v58 = vpack.c.b16 %v1124_v8, %v1123_v2  ;;  %v467_v59 = vrot.slane %v466_v51, 4  ;;  %v462_v32 = vsel %vm5647_vm4, %v457_v53, %v461_v38  ;;  %v667_v6 = vrot.slane %v665_v3, 5  ;;  %v5960_v3 = vld [vmem:[%s5627_s11 + $0x34] sm:$0xf] }
  0x73   : > { %v653_v46 = vrot.slane %v652_v54, 4  ;;  %v1075_v26 = vunpack.c.l.b16 %v462_v32  ;;  %v662_v15 = vor.u32 %v661_v62, %v657_v61  ;;  %v831_v16 = vshll.u32 %v320_v20, 16  ;;  %v5967_v62 = vld [vmem:[%s5627_s11 + $0x38] sm:$0x1] }
  0x74   : > { %7509 = vst [vmem:[#allocation11_spill] sm:$0xff] %v5936_v58  ;;  %4699 = vmatmul.msk.bf16.gmra.mxu3 %vm1163_vm3, %v5936_v58  ;;  %v472_v10 = vsel %vm5647_vm4, %v467_v59, %v5926_v55  ;;  %v827_v23 = vrot.slane %v825_v30, 4  ;;  %v835_v24 = vshrl.u32 %v320_v20, 16  ;;  %v841_v31 = vshll.u32 %v321_v9, 16 }
  0x75   : > { %v1076_v18 = vunpack.c.l.b16 %v472_v10  ;;  %v658_v22 = vsel %vm5647_vm4, %v653_v46, %v657_v61  ;;  %v663_v29 = vrot.slane %v662_v15, 4  ;;  %v833_v44 = vrot.slane %v831_v16, 5 }
  0x76   : > { %v1093_v12 = vunpack.c.l.b16 %v658_v22  ;;  %v828_v38 = vor.u32 %v827_v23, %v5884_v42  ;;  %v837_v40 = vrot.slane %v835_v24, 4  ;;  %v843_v2 = vrot.slane %v841_v31, 5  ;;  %v302_v23 = vld [vmem:[%s5627_s11 + $0x8c] sm:$0xf] }
  0x77   : > { %v5950_v35 = vpack.c.b16 %v1076_v18, %v1075_v26  ;;  %v668_v43 = vsel %vm5647_vm4, %v663_v29, %v667_v6  ;;  %v1001_v47 = vshrl.u32 %v5887_v56, 16  ;;  %v1007_v48 = vshll.u32 %v340_v28, 16 }
  0x78   : > { %v1094_v8 = vunpack.c.l.b16 %v668_v43  ;;  %v829_v51 = vrot.slane %v828_v38, 4  ;;  %v838_v52 = vor.u32 %v837_v40, %v833_v44  ;;  %v1011_v27 = vshrl.u32 %v340_v28, 16 }
  0x79   : > { %7510 = vst [vmem:[#allocation12_spill] sm:$0xff] %v5950_v35  ;;  %4675 = vmatmul.msk.bf16.gmra.mxu0 %vm1163_vm3, %v5950_v35  ;;  %v1003_v53 = vrot.slane %v1001_v47, 4  ;;  %v1009_v54 = vrot.slane %v1007_v48, 5  ;;  %v1017_v42 = vshll.u32 %v341_v41, 16  ;;  %v473_v9 = vshrl.u32 %v5907_v4, 16 }
  0x7a   : > { %v5962_v20 = vpack.c.b16 %v1094_v8, %v1093_v12  ;;  %v834_v59 = vsel %vm5647_vm4, %v829_v51, %v833_v44  ;;  %v839_v61 = vrot.slane %v838_v52, 4  ;;  %v1013_v56 = vrot.slane %v1011_v27, 4  ;;  %v303_v44 = vld [vmem:[%s5627_s11 + $0x90] sm:$0xf]  ;;  %v5986_v41 = vld [vmem:[%s5627_s11 + $0x94] sm:$0xf] }
  0x7b   : > { %v1109_v32 = vunpack.c.l.b16 %v834_v59  ;;  %v1004_v46 = vor.u32 %v1003_v53, %v5912_v13  ;;  %v1019_v6 = vrot.slane %v1017_v42, 5  ;;  %v479_v26 = vshll.u32 %v5960_v3, 16  ;;  %v322_v59 = vld [vmem:[%s5627_s11 + $0xdc] sm:$0xf] }
  0x7c   : > { %4684 = vmatmul.msk.bf16.gmra.mxu1 %vm1163_vm3, %v5962_v20  ;;  %v844_v30 = vsel %vm5647_vm4, %v839_v61, %v843_v2  ;;  %v1014_v10 = vor.u32 %v1013_v56, %v1009_v54  ;;  %v483_v15 = vshrl.u32 %v5960_v3, 16  ;;  %v475_v22 = vrot.slane %v473_v9, 4  ;;  %v6000_v9 = vld [vmem:[%s5627_s11 + $0xe4] sm:$0xf] }
  0x7d   : > { %v1110_v16 = vunpack.c.l.b16 %v844_v30  ;;  %v1005_v18 = vrot.slane %v1004_v46, 4  ;;  %v489_v13 = vshll.u32 %v5967_v62, 16  ;;  %v481_v28 = vrot.slane %v479_v26, 5 }
  0x7e   : > { %v1015_v24 = vrot.slane %v1014_v10, 4  ;;  %v485_v29 = vrot.slane %v483_v15, 4  ;;  %v476_v38 = vor.u32 %v475_v22, %v5926_v55  ;;  %v670_v48 = vshrl.u32 %v302_v23, 16 }
  0x7f   : > { %v5980_v31 = vpack.c.b16 %v1110_v16, %v1109_v32  ;;  %v1010_v12 = vsel %vm5647_vm4, %v1005_v18, %v1009_v54  ;;  %v491_v40 = vrot.slane %v489_v13, 5  ;;  %v673_v52 = vshll.u32 %v302_v23, 16 }
  0x80   : > { %v1020_v43 = vsel %vm5647_vm4, %v1015_v24, %v1019_v6  ;;  %v1125_v2 = vunpack.c.l.b16 %v1010_v12  ;;  %v486_v47 = vor.u32 %v485_v29, %v481_v28  ;;  %v477_v51 = vrot.slane %v476_v38, 4  ;;  %v323_v6 = vld [vmem:[%s5627_s11 + $0xe0] sm:$0xf] }
  0x81   : > { %7511 = vst [vmem:[#allocation13_spill] sm:$0xff] %v5980_v31  ;;  %4692 = vmatmul.msk.bf16.gmra.mxu2 %vm1163_vm3, %v5980_v31  ;;  %v1126_v8 = vunpack.c.l.b16 %v1020_v43  ;;  %v679_v27 = vshll.u32 %v303_v44, 16  ;;  %v672_v53 = vrot.slane %v670_v48, 4  ;;  %v683_v54 = vshrl.u32 %v303_v44, 16  ;;  %v342_v44 = vld [vmem:[%s5627_s11 + $0x12c] sm:$0xf] }
  0x82   : > { %v487_v55 = vrot.slane %v486_v47, 4  ;;  %v689_v42 = vshll.u32 %v5986_v41, 16  ;;  %v482_v56 = vsel %vm5647_vm4, %v477_v51, %v481_v28  ;;  %v675_v32 = vrot.slane %v673_v52, 5 }
  0x83   : > { %v5994_v61 = vpack.c.b16 %v1126_v8, %v1125_v2  ;;  %v681_v46 = vrot.slane %v679_v27, 5  ;;  %v1077_v10 = vunpack.c.l.b16 %v482_v56  ;;  %v685_v26 = vrot.slane %v683_v54, 4  ;;  %v343_v2 = vld [vmem:[%s5627_s11 + $0x130] sm:$0xf] }
  0x84   : > { %v492_v30 = vsel %vm5647_vm4, %v487_v55, %v491_v40  ;;  %v6004_v15 = vrot.slane %v689_v42, 5  ;;  %v676_v18 = vor.u32 %v675_v32, %v672_v53  ;;  %v846_v22 = vshrl.u32 %v322_v59, 16  ;;  %v6020_v55 = vld [vmem:[%s5627_s11 + $0x134] sm:$0xf] }
  0x85   : > { %7512 = vst [vmem:[#allocation14_spill] sm:$0xff] %v5994_v61  ;;  %4700 = vmatmul.msk.bf16.gmra.mxu3 %vm1163_vm3, %v5994_v61  ;;  %v1078_v16 = vunpack.c.l.b16 %v492_v30  ;;  %v849_v13 = vshll.u32 %v322_v59, 16  ;;  %v686_v23 = vor.u32 %v685_v26, %v681_v46  ;;  %v855_v24 = vshll.u32 %v323_v6, 16 }
  0x86   : > { %v859_v28 = vshrl.u32 %v323_v6, 16  ;;  %v865_v29 = vshll.u32 %v6000_v9, 16  ;;  %v677_v38 = vrot.slane %v676_v18, 4  ;;  %v848_v40 = vrot.slane %v846_v22, 4  ;;  %v6026_v6 = vld [vmem:[%s5627_s11 + $0x3c] sm:$0xf] }
  0x87   : > { %v6010_v12 = vpack.c.b16 %v1078_v16, %v1077_v10  ;;  %v851_v43 = vrot.slane %v849_v13, 5  ;;  %v687_v47 = vrot.slane %v686_v23, 4  ;;  %v857_v48 = vrot.slane %v855_v24, 5 }
  0x88   : > { %v861_v8 = vrot.slane %v859_v28, 4  ;;  %v6013_v51 = vrot.slane %v865_v29, 5  ;;  %v682_v52 = vsel %vm5647_vm4, %v677_v38, %v681_v46  ;;  %v1022_v53 = vshrl.u32 %v342_v44, 16  ;;  %v6034_v29 = vld [vmem:[%s5627_s11 + $0x40] sm:$0xf] }
  0x89   : > { %7513 = vst [vmem:[#allocation15_spill] sm:$0xff] %v6010_v12  ;;  %4676 = vmatmul.msk.bf16.gmra.mxu0 %vm1163_vm3, %v6010_v12  ;;  %v852_v27 = vor.u32 %v851_v43, %v848_v40  ;;  %v1025_v54 = vshll.u32 %v342_v44, 16  ;;  %v692_v42 = vsel %vm5647_vm4, %v687_v47, %v6004_v15  ;;  %v1095_v59 = vunpack.c.l.b16 %v682_v52  ;;  %v6037_v44 = vld [vmem:[%s5627_s11 + $0x44] sm:$0xf] }
  0x8a   : > { %v862_v56 = vor.u32 %v861_v8, %v857_v48  ;;  %v1031_v32 = vshll.u32 %v343_v2, 16  ;;  %v1096_v30 = vunpack.c.l.b16 %v692_v42  ;;  %v1024_v26 = vrot.slane %v1022_v53, 4 }
  0x8b   : > { %v853_v10 = vrot.slane %v852_v27, 4  ;;  %v1027_v46 = vrot.slane %v1025_v54, 5  ;;  %v1035_v22 = vshrl.u32 %v343_v2, 16  ;;  %v1041_v13 = vshll.u32 %v6020_v55, 16 }
  0x8c   : > { %v863_v16 = vrot.slane %v862_v56, 4  ;;  %v1033_v18 = vrot.slane %v1031_v32, 5  ;;  %v6029_v23 = vpack.c.b16 %v1096_v30, %v1095_v59  ;;  %v494_v38 = vshrl.u32 %v6026_v6, 16  ;;  %v6052_v56 = vld [vmem:[%s5627_s11 + $0x98] sm:$0xf] }
  0x8d   : > { %v858_v24 = vsel %vm5647_vm4, %v853_v10, %v857_v48  ;;  %v1028_v28 = vor.u32 %v1027_v46, %v1024_v26  ;;  %v1037_v2 = vrot.slane %v1035_v22, 4  ;;  %v6043_v47 = vrot.slane %v1041_v13, 5  ;;  %v6059_v26 = vld [vmem:[%s5627_s11 + $0x9c] sm:$0x1] }
  0x8e   : > { %v868_v40 = vsel %vm5647_vm4, %v863_v16, %v6013_v51  ;;  %v1111_v43 = vunpack.c.l.b16 %v858_v24  ;;  %4685 = vmatmul.msk.bf16.gmra.mxu1 %vm1163_vm3, %v6029_v23  ;;  %v496_v52 = vrot.slane %v494_v38, 4  ;;  %v497_v27 = vshll.u32 %v6026_v6, 16 }
  0x8f   : > { %v1112_v48 = vunpack.c.l.b16 %v868_v40  ;;  %v1029_v8 = vrot.slane %v1028_v28, 4  ;;  %v1038_v53 = vor.u32 %v1037_v2, %v1033_v18  ;;  %v503_v54 = vshll.u32 %v6034_v29, 16 }
  0x90   : > { %v507_v42 = vshrl.u32 %v6034_v29, 16  ;;  %v513_v59 = vshll.u32 %v6037_v44, 16  ;;  %v499_v10 = vrot.slane %v497_v27, 5  ;;  %v693_v46 = vshrl.u32 %v5986_v41, 16 }
  0x91   : > { %v6054_v32 = vpack.c.b16 %v1112_v48, %v1111_v43  ;;  %v1034_v30 = vsel %vm5647_vm4, %v1029_v8, %v1033_v18  ;;  %v1039_v16 = vrot.slane %v1038_v53, 4  ;;  %v505_v13 = vrot.slane %v503_v54, 5  ;;  %v325_v54 = vld [vmem:[%s5627_s11 + $0xe8] sm:$0xf] }
  0x92   : > { %v1127_v22 = vunpack.c.l.b16 %v1034_v30  ;;  %v509_v24 = vrot.slane %v507_v42, 4  ;;  %v500_v28 = vor.u32 %v499_v10, %v496_v52  ;;  %v6064_v38 = vrot.slane %v513_v59, 5 }
  0x93   : > { %7514 = vst [vmem:[#allocation16_spill] sm:$0xff] %v6054_v32  ;;  %4693 = vmatmul.msk.bf16.gmra.mxu2 %vm1163_vm3, %v6054_v32  ;;  %v695_v40 = vrot.slane %v693_v46, 4  ;;  %v699_v43 = vshll.u32 %v6052_v56, 16  ;;  %v1044_v18 = vsel %vm5647_vm4, %v1039_v16, %v6043_v47  ;;  %v703_v2 = vshrl.u32 %v6052_v56, 16 }
  0x94   : > { %v510_v41 = vor.u32 %v509_v24, %v505_v13  ;;  %v709_v48 = vshll.u32 %v6059_v26, 16  ;;  %v1128_v8 = vunpack.c.l.b16 %v1044_v18  ;;  %v501_v27 = vrot.slane %v500_v28, 4  ;;  %v326_v24 = vld [vmem:[%s5627_s11 + $0xec] sm:$0x1] }
  0x95   : > { %v696_v53 = vor.u32 %v695_v40, %v6004_v15  ;;  %v701_v52 = vrot.slane %v699_v43, 5  ;;  %v705_v59 = vrot.slane %v703_v2, 4  ;;  %v869_v61 = vshrl.u32 %v6000_v9, 16  ;;  %v345_v2 = vld [vmem:[%s5627_s11 + $0x138] sm:$0xf] }
  0x96   : > { %v511_v42 = vrot.slane %v510_v41, 4  ;;  %v711_v30 = vrot.slane %v709_v48, 5  ;;  %v6074_v10 = vpack.c.b16 %v1128_v8, %v1127_v22  ;;  %v506_v46 = vsel %vm5647_vm4, %v501_v27, %v505_v13 }
  0x97   : > { %v697_v16 = vrot.slane %v696_v53, 4  ;;  %v1079_v15 = vunpack.c.l.b16 %v506_v46  ;;  %v706_v40 = vor.u32 %v705_v59, %v701_v52  ;;  %v875_v43 = vshll.u32 %v325_v54, 16  ;;  %v346_v46 = vld [vmem:[%s5627_s11 + $0x13c] sm:$0x1] }
  0x98   : > { %7515 = vst [vmem:[#allocation17_spill] sm:$0xff] %v6074_v10  ;;  %v516_v28 = vsel %vm5647_vm4, %v511_v42, %v6064_v38  ;;  %4701 = vmatmul.msk.bf16.gmra.mxu3 %vm1163_vm3, %v6074_v10  ;;  %v871_v13 = vrot.slane %v869_v61, 4  ;;  %v879_v41 = vshrl.u32 %v325_v54, 16  ;;  %v885_v8 = vshll.u32 %v326_v24, 16 }
  0x99   : > { %v1080_v22 = vunpack.c.l.b16 %v516_v28  ;;  %v702_v18 = vsel %vm5647_vm4, %v697_v16, %v701_v52  ;;  %v707_v48 = vrot.slane %v706_v40, 4  ;;  %v877_v9 = vrot.slane %v875_v43, 5 }
  0x9a   : > { %v1097_v53 = vunpack.c.l.b16 %v702_v18  ;;  %v872_v42 = vor.u32 %v871_v13, %v6013_v51  ;;  %v881_v59 = vrot.slane %v879_v41, 4  ;;  %v887_v10 = vrot.slane %v885_v8, 5 }
  0x9b   : > { %v6088_v27 = vpack.c.b16 %v1080_v22, %v1079_v15  ;;  %v712_v28 = vsel %vm5647_vm4, %v707_v48, %v711_v30  ;;  %v1045_v52 = vshrl.u32 %v6020_v55, 16  ;;  %v1051_v61 = vshll.u32 %v345_v2, 16  ;;  %v6098_v22 = vld [vmem:[%s5627_s11 + $0x48] sm:$0xf]  ;;  %v6107_v48 = vld [vmem:[%s5627_s11 + $0x4c] sm:$0x1] }
  0x9c   : > { %v1098_v54 = vunpack.c.l.b16 %v712_v28  ;;  %v873_v16 = vrot.slane %v872_v42, 4  ;;  %v882_v24 = vor.u32 %v881_v59, %v877_v9  ;;  %v1055_v15 = vshrl.u32 %v345_v2, 16 }
  0x9d   : > { %7516 = vst [vmem:[#allocation18_spill] sm:$0xff] %v6088_v27  ;;  %4677 = vmatmul.msk.bf16.gmra.mxu0 %vm1163_vm3, %v6088_v27  ;;  %v1047_v40 = vrot.slane %v1045_v52, 4  ;;  %v1053_v43 = vrot.slane %v1051_v61, 5  ;;  %v1061_v51 = vshll.u32 %v346_v46, 16  ;;  %v517_v59 = vshrl.u32 %v6037_v44, 16 }
  0x9e   : > { %v6102_v30 = vpack.c.b16 %v1098_v54, %v1097_v53  ;;  %v878_v55 = vsel %vm5647_vm4, %v873_v16, %v877_v9  ;;  %v883_v13 = vrot.slane %v882_v24, 4  ;;  %v1057_v41 = vrot.slane %v1055_v15, 4 }
  0x9f   : > { %v1113_v8 = vunpack.c.l.b16 %v878_v55  ;;  %v1048_v42 = vor.u32 %v1047_v40, %v6043_v47  ;;  %v1063_v2 = vrot.slane %v1061_v51, 5  ;;  %v523_v28 = vshll.u32 %v6098_v22, 16 }
  0xa0   : > { %v6100_v18 = vpop.f32.mrf.mxu1  ;;  %4686 = vmatmul.msk.bf16.gmra.mxu1 %vm1163_vm3, %v6102_v30  ;;  %v888_v53 = vsel %vm5647_vm4, %v883_v13, %v887_v10  ;;  %v1058_v46 = vor.u32 %v1057_v41, %v1053_v43  ;;  %v527_v9 = vshrl.u32 %v6098_v22, 16  ;;  %v519_v54 = vrot.slane %v517_v59, 4  ;;  %v5020_v13 = vld [vmem:[%s7433_s1 + $0x18] sm:$0xf] }
  0xa1   : > { %v1114_v52 = vunpack.c.l.b16 %v888_v53  ;;  %v1049_v61 = vrot.slane %v1048_v42, 4  ;;  %v533_v16 = vshll.u32 %v6107_v48, 16  ;;  %v525_v24 = vrot.slane %v523_v28, 5 }
  0xa2   : > { %v1059_v47 = vrot.slane %v1058_v46, 4  ;;  %v529_v15 = vrot.slane %v527_v9, 4  ;;  %v520_v10 = vor.u32 %v519_v54, %v6064_v38  ;;  %v4987_v38 = vld [vmem:[%s7433_s1 + $0x14] sm:$0xf]  ;;  %v5402_v46 = vld [vmem:[%s5627_s11] sm:$0xf] }
  0xa3   : > { %v6118_v40 = vpack.c.b16 %v1114_v52, %v1113_v8  ;;  %v1054_v51 = vsel %vm5647_vm4, %v1049_v61, %v1053_v43  ;;  %v535_v55 = vrot.slane %v533_v16, 5  ;;  %v5061_v8 = vld [vmem:[%s7433_s1 + $0x1c] sm:$0xf]  ;;  %v5403_v52 = vld [vmem:[%s5627_s11 + $0x4] sm:$0xf] }
  0xa4   : > { %v1064_v41 = vsel %vm5647_vm4, %v1059_v47, %v1063_v2  ;;  %v1129_v42 = vunpack.c.l.b16 %v1054_v51  ;;  %v530_v59 = vor.u32 %v529_v15, %v525_v24  ;;  %v521_v53 = vrot.slane %v520_v10, 4  ;;  %v5404_v54 = vld [vmem:[%s5627_s11 + $0x8] sm:$0xf]  ;;  %v5095_v15 = vld [vmem:[%s7433_s1 + $0x20] sm:$0xf] }
  0xa5   : > { %7517 = vst [vmem:[#allocation19_spill] sm:$0xff] %v6118_v40  ;;  %4694 = vmatmul.msk.bf16.gmra.mxu2 %vm1163_vm3, %v6118_v40  ;;  %v1130_v43 = vunpack.c.l.b16 %v1064_v41  ;;  %v4863_v2 = vrot.slane %v5402_v46, 9  ;;  %v1882_v61 = vrot.slane %v5403_v52, 5  ;;  %v1885_v16 = vrot.slane %v5404_v54, 5 }
  0xa6   : > { %v531_v9 = vrot.slane %v530_v59, 4  ;;  %v3349_v47 = vsel %vm1260_vm0, %v5020_v13, 0  ;;  %v526_v10 = vsel %vm5647_vm4, %v521_v53, %v525_v24  ;;  %v3643_v59 = vsel %vm1260_vm0, %v5061_v8, 0 }
  0xa7   : > { %v6145_v51 = vpack.c.b16 %v1130_v43, %v1129_v42  ;;  %3358 = vmatpush.bf16.msra.mxu2 %v3349_v47  ;;  %v3095_v13 = vsel %vm1260_vm0, %v4987_v38, 0  ;;  %v1081_v43 = vunpack.c.l.b16 %v526_v10  ;;  %v1884_v52 = vrot.slane %v1882_v61, 4  ;;  %3652 = vmatpush.bf16.msra.mxu3 %v3643_v59  ;;  %v5131_v47 = vld [vmem:[%s5627_s11] sm:$0xff] }
  0xa8   : > { %v6137_v28 = vpop.f32.mrf.mxu1  ;;  %v536_v42 = vsel %vm5647_vm4, %v531_v9, %v535_v55  ;;  %3104 = vmatpush.bf16.msra.mxu1 %v3095_v13  ;;  %v3907_v53 = vsel %vm1260_vm0, %v5095_v15, 0  ;;  %v1883_v8 = vsel %vm6150_vm7, %v4863_v2, %v1882_v61  ;;  %v5405_v13 = vld [vmem:[%s5627_s11 + $0xc] sm:$0xf] }
  0xa9   : > { %7518 = vst [vmem:[#allocation20_spill] sm:$0xff] %v6145_v51  ;;  %4702 = vmatmul.msk.bf16.gmra.mxu3 %vm1163_vm3, %v6145_v51  ;;  %v1082_v24 = vunpack.c.l.b16 %v536_v42  ;;  %v1886_v38 = vsel %vm6150_vm7, %v1884_v52, %v1885_v16  ;;  %3916 = vmatpush.bf16.msra.mxu0 %v3907_v53  ;;  %v2090_v15 = vunpack.c.l.b16 %v1883_v8  ;;  %v1888_v42 = vrot.slane %v5405_v13, 5  ;;  %v5133_v52 = vld [vmem:[%s5627_s11 + $0x14] sm:$0xff] }
  0xaa   : > { %v6155_v46 = vpop.f32.mrf.mxu2  ;;  %v2091_v10 = vunpack.c.l.b16 %v1886_v38  ;;  %v1887_v53 = vrot.slane %v1885_v16, 4  ;;  %v5406_v38 = vld [vmem:[%s5627_s11 + $0x10] sm:$0x1]  ;;  %v5132_v16 = vld [vmem:[%s5627_s11 + $0x8] sm:$0xff] }
  0xab   : > { %7521 = vst [vmem:[#allocation21_spill] sm:$0xff] %v6155_v46  ;;  %v6167_v55 = vpack.c.b16 %v1082_v24, %v1081_v43  ;;  %v1890_v8 = vrot.slane %v1888_v42, 4 }
  0xac   : > { %v2154_v61 = vpack.c.b16 %v2091_v10, %v2090_v15 }
  0xad   : > { %7522 = vst [vmem:[#allocation22_spill] sm:$0xff] %v6167_v55  ;;  %4678 = vmatmul.msk.bf16.gmra.mxu0 %vm1163_vm3, %v6167_v55 }
  0xae   : > { %v6169_v9 = vpop.f32.mrf.mxu0  ;;  %v6171_v54 = vpop.f32.mrf.mxu3 }
  0xaf   : > { %7523 = vst [vmem:[#allocation23_spill] sm:$0xff] %v6171_v54  ;;  %v1891_v54 = vrot.slane %v5406_v38, 5 }
  0xb0   : > { %4831 = vmatmul.msk.bf16.vlgmr.msrb.gmra.mxu1 %vm1163_vm3, %v5131_v47  ;;  %v1889_v47 = vsel %vm6150_vm7, %v1887_v53, %v1888_v42 }
  0xb1   : > { %v1892_v15 = vsel %vm6150_vm7, %v1890_v8, %v1891_v54  ;;  %v5407_v54 = vld [vmem:[%s5627_s11 + $0x18] sm:$0xf]  ;;  %v5134_v8 = vld [vmem:[%s5627_s11 + $0x1c] sm:$0xff] }
  0xb2   : > { %v6176_v59 = vpop.f32.mrf.mxu2  ;;  %v6178_v2 = vpop.f32.mrf.mxu1  ;;  %v2093_v13 = vunpack.c.l.b16 %v1892_v15  ;;  %v1895_v53 = vrot.slane %v5407_v54, 5  ;;  %v5409_v15 = vld [vmem:[%s5627_s11 + $0x1c] sm:$0xf] }
  0xb3   : > { %7524 = vst [vmem:[#allocation24_spill] sm:$0xff] %v6176_v59  ;;  %v1898_v59 = vrot.slane %v5409_v15, 5 }
  0xb5   : > { %4880 = vmatmul.msk.bf16.vlgmr.msrb.gmra.mxu2 %vm1163_vm3, %v2154_v61  ;;  %v2092_v61 = vunpack.c.l.b16 %v1889_v47  ;;  %v1897_v47 = vrot.slane %v1895_v53, 4 }
  0xb6   : > { %v6182_v43 = vpop.f32.mrf.mxu0  ;;  %v6186_v24 = vpop.f32.mrf.mxu3 }
  0xb7   : > { %7525 = vst [vmem:[#allocation25_spill] sm:$0xff] %v6186_v24  ;;  %v2155_v24 = vpack.c.b16 %v2093_v13, %v2092_v61  ;;  %v1899_v61 = vsel %vm6150_vm7, %v1897_v47, %v1898_v59  ;;  %v5135_v47 = vld [vmem:[%s5627_s11 + $0x28] sm:$0xff] }
  0xb9   : > { %4921 = vmatmul.msk.bf16.vlgmr.msrb.gmra.mxu3 %vm1163_vm3, %v5133_v52 }
  0xba   : > { %v6189_v36 = vpop.f32.mrf.mxu1 }
  0xbb   : > { %v6191_v51 = vpop.f32.mrf.mxu2 }
  0xbc   : > { %7526 = vst [vmem:[#allocation26_spill] sm:$0xff] %v6191_v51 }
  0xbd   : > { %4954 = vmatmul.msk.bf16.vlgmr.msrb.gmra.mxu0 %vm1163_vm3, %v5820_v57  ;;  %v5408_v57 = vld [vmem:[%s5627_s11 + $0x14] sm:$0xf] }
  0xbe   : > { %v6198_v10 = vpop.f32.mrf.mxu0  ;;  %v4864_v51 = vrot.slane %v5408_v57, 9  ;;  %v2095_v57 = vunpack.c.l.b16 %v1899_v61  ;;  %v1904_v61 = vrot.slane %v5834_v17, 5 }
  0xc0   : > { %4832 = vmatmul.msk.bf16.gmra.mxu1 %vm1163_vm3, %v5132_v16  ;;  %v1896_v16 = vsel %vm6150_vm7, %v4864_v51, %v1895_v53  ;;  %v1901_v51 = vrot.slane %v5829_v14, 5 }
  0xc1   : > { %v6203_v38 = vpop.f32.mrf.mxu3  ;;  %v2094_v54 = vunpack.c.l.b16 %v1896_v16 }
  0xc2   : > { %7527 = vst [vmem:[#allocation27_spill] sm:$0xff] %v6203_v38  ;;  %v1903_v16 = vrot.slane %v1901_v51, 4 }
  0xc3   : > { %v6206_v58 = vpop.f32.mrf.mxu1  ;;  %v6208_v42 = vpop.f32.mrf.mxu2 }
  0xc4   : > { %7528 = vst [vmem:[#allocation28_spill] sm:$0xff] %v6208_v42  ;;  %v6235_v42 = vpack.c.b16 %v2095_v57, %v2094_v54  ;;  %v1905_v54 = vsel %vm6150_vm7, %v1903_v16, %v1904_v61  ;;  %v4865_v61 = vrot.slane %v5890_v45, 9 }
  0xc5   : > { %4881 = vmatmul.msk.bf16.gmra.mxu2 %vm1163_vm3, %v2155_v24  ;;  %v2097_v17 = vunpack.c.l.b16 %v1905_v54  ;;  %v1911_v54 = vrot.slane %v5907_v4, 5 }
  0xc6   : > { %v6213_v0 = vpop.f32.mrf.mxu0  ;;  %7532 = vst [vmem:[#allocation32_spill] sm:$0xff] %v6235_v42 }
  0xc9   : > { %v6217_v38 = vpop.f32.mrf.mxu3  ;;  %4922 = vmatmul.msk.bf16.gmra.mxu3 %vm1163_vm3, %v5134_v8 }
  0xca   : > { %7529 = vst [vmem:[#allocation29_spill] sm:$0xff] %v6217_v38 }
  0xcb   : > { %v6224_v24 = vpop.f32.mrf.mxu1 }
  0xcd   : > { %4955 = vmatmul.msk.bf16.gmra.mxu0 %vm1163_vm3, %v5879_v34  ;;  %v1900_v34 = vrot.slane %v1898_v59, 4 }
  0xce   : > { %v6226_v13 = vpop.f32.mrf.mxu2 }
  0xcf   : > { %7530 = vst [vmem:[#allocation30_spill] sm:$0xff] %v6226_v13  ;;  %v1902_v14 = vsel %vm6150_vm7, %v1900_v34, %v1901_v51  ;;  %v1908_v51 = vrot.slane %v5904_v1, 5  ;;  %v5136_v34 = vld [vmem:[%s5627_s11 + $0x30] sm:$0xff] }
  0xd0   : > { %4833 = vmatmul.msk.bf16.gmra.mxu1 %vm1163_vm3, %v5133_v52  ;;  %v2096_v59 = vunpack.c.l.b16 %v1902_v14 }
  0xd1   : > { %v1910_v14 = vrot.slane %v1908_v51, 4  ;;  %v1909_v1 = vsel %vm6150_vm7, %v4865_v61, %v1908_v51  ;;  %v1914_v51 = vrot.slane %v5960_v3, 5 }
  0xd2   : > { %v6230_v15 = vpop.f32.mrf.mxu0  ;;  %v2098_v45 = vunpack.c.l.b16 %v1909_v1  ;;  %v1917_v1 = vrot.slane %v5967_v62, 5 }
  0xd3   : > { %v6233_v38 = vpop.f32.mrf.mxu3 }
  0xd4   : > { %7531 = vst [vmem:[#allocation31_spill] sm:$0xff] %v6233_v38 }
  0xd5   : > { %v6238_v53 = vpop.f32.mrf.mxu1  ;;  %4882 = vmatmul.msk.bf16.gmra.mxu2 %vm1163_vm3, %v6235_v42  ;;  %v6264_v42 = vpack.c.b16 %v2097_v17, %v2096_v59  ;;  %v1912_v17 = vsel %vm6150_vm7, %v1910_v14, %v1911_v54  ;;  %v5137_v14 = vld [vmem:[%s5627_s11 + $0x3c] sm:$0xff] }
  0xd6   : > { %v6243_v13 = vpop.f32.mrf.mxu2  ;;  %v2099_v4 = vunpack.c.l.b16 %v1912_v17  ;;  %v1913_v17 = vrot.slane %v1911_v54, 4 }
  0xd7   : > { %7533 = vst [vmem:[#allocation33_spill] sm:$0xff] %v6243_v13 }
  0xd8   : > { %7536 = vst [vmem:[#allocation36_spill] sm:$0xff] %v6264_v42  ;;  %v1915_v3 = vsel %vm6150_vm7, %v1913_v17, %v1914_v51 }
  0xd9   : > { %4923 = vmatmul.msk.bf16.gmra.mxu3 %vm1163_vm3, %v5135_v47  ;;  %v2100_v54 = vunpack.c.l.b16 %v1915_v3 }
  0xda   : > { %v6246_v33 = vpop.f32.mrf.mxu0 }
  0xdb   : > { %v6248_v52 = vpop.f32.mrf.mxu3 }
  0xdc   : > { %7534 = vst [vmem:[#allocation34_spill] sm:$0xff] %v6248_v52 }
  0xdd   : > { %v6255_v57 = vpop.f32.mrf.mxu1  ;;  %4956 = vmatmul.msk.bf16.gmra.mxu0 %vm1163_vm3, %v5950_v35 }
  0xe0   : > { %4834 = vmatmul.msk.bf16.gmra.mxu1 %vm1163_vm3, %v5134_v8 }
  0xe1   : > { %v6259_v38 = vpop.f32.mrf.mxu2 }
  0xe2   : > { %7535 = vst [vmem:[#allocation35_spill] sm:$0xff] %v6259_v38  ;;  %v6262_v52 = vpop.f32.mrf.mxu0 }
  0xe4   : > { %v6266_v13 = vpop.f32.mrf.mxu3 }
  0xe5   : > { %7537 = vst [vmem:[#allocation37_spill] sm:$0xff] %v6266_v13  ;;  %4883 = vmatmul.msk.bf16.gmra.mxu2 %vm1163_vm3, %v6264_v42 }
  0xe7   : > { %v6272_v16 = vpop.f32.mrf.mxu1 }
  0xe9   : > { %v6276_v8 = vpop.f32.mrf.mxu2  ;;  %4924 = vmatmul.msk.bf16.gmra.mxu3 %vm1163_vm3, %v5136_v34 }
  0xea   : > { %7538 = vst [vmem:[#allocation38_spill] sm:$0xff] %v6276_v8  ;;  %v6279_v59 = vpop.f32.mrf.mxu0  ;;  %v6294_v8 = vpack.c.b16 %v2099_v4, %v2098_v45 }
  0xec   : > { %v6285_v13 = vpop.f32.mrf.mxu3  ;;  %7541 = vst [vmem:[#allocation41_spill] sm:$0xff] %v6294_v8 }
  0xed   : > { %7539 = vst [vmem:[#allocation39_spill] sm:$0xff] %v6285_v13  ;;  %4957 = vmatmul.msk.bf16.gmra.mxu0 %vm1163_vm3, %v6010_v12  ;;  %v1916_v12 = vrot.slane %v1914_v51, 4  ;;  %v1921_v51 = vrot.slane %v6034_v29, 5 }
  0xef   : > { %v6289_v42 = vpop.f32.mrf.mxu1  ;;  %v1918_v45 = vsel %vm6150_vm7, %v1916_v12, %v1917_v1  ;;  %v5138_v1 = vld [vmem:[%s5627_s11 + $0x44] sm:$0xff]  ;;  %v1923_v3 = vrot.slane %v1921_v51, 4 }
  0xf0   : > { %4835 = vmatmul.msk.bf16.gmra.mxu1 %vm1163_vm3, %v5135_v47 }
  0xf2   : > { %v6292_v35 = vpop.f32.mrf.mxu2 }
  0xf3   : > { %7540 = vst [vmem:[#allocation40_spill] sm:$0xff] %v6292_v35 }
  0xf5   : > { %4884 = vmatmul.msk.bf16.gmra.mxu2 %vm1163_vm3, %v6294_v8 }
  0xf6   : > { %v6297_v61 = vpop.f32.mrf.mxu0 }
  0xf7   : > { %v6302_v13 = vpop.f32.mrf.mxu3 }
  0xf8   : > { %7542 = vst [vmem:[#allocation42_spill] sm:$0xff] %v6302_v13  ;;  %v2101_v13 = vunpack.c.l.b16 %v1918_v45  ;;  %v1924_v45 = vrot.slane %v6037_v44, 5 }
  0xf9   : > { %v6305_v38 = vpop.f32.mrf.mxu1  ;;  %4925 = vmatmul.msk.bf16.gmra.mxu3 %vm1163_vm3, %v5137_v14 }
  0xfa   : > { %v6308_v47 = vpop.f32.mrf.mxu2  ;;  %v6321_v8 = vpack.c.b16 %v2101_v13, %v2100_v54  ;;  %v1925_v13 = vsel %vm6150_vm7, %v1923_v3, %v1924_v45  ;;  %v5139_v3 = vld [vmem:[%s5627_s11 + $0x50] sm:$0xff] }
  0xfb   : > { %7543 = vst [vmem:[#allocation43_spill] sm:$0xff] %v6308_v47  ;;  %v2103_v44 = vunpack.c.l.b16 %v1925_v13  ;;  %v1926_v13 = vrot.slane %v1924_v45, 4 }
  0xfc   : > { %7545 = vst [vmem:[#allocation45_spill] sm:$0xff] %v6321_v8 }
  0xfd   : > { %4958 = vmatmul.msk.bf16.gmra.mxu0 %vm1163_vm3, %v6088_v27 }
  0xfe   : > { %v6314_v4 = vpop.f32.mrf.mxu0 }
  0xff   : > { %v6318_v62 = vpop.f32.mrf.mxu3 }
 0x100   : > { %7544 = vst [vmem:[#allocation44_spill] sm:$0xff] %v6318_v62  ;;  %4836 = vmatmul.msk.bf16.gmra.mxu1 %vm1163_vm3, %v5136_v34  ;;  %v4866_v62 = vrot.slane %v6026_v6, 9 }
 0x101   : > { %v6323_v47 = vpop.f32.mrf.mxu1 }
 0x102   : > { %v1922_v29 = vsel %vm6150_vm7, %v4866_v62, %v1921_v51  ;;  %v1927_v62 = vrot.slane %v6098_v22, 5 }
 0x103   : > { %v2102_v6 = vunpack.c.l.b16 %v1922_v29  ;;  %v1930_v29 = vrot.slane %v6107_v48, 5 }
 0x104   : > { %v6326_v17 = vpop.f32.mrf.mxu2  ;;  %v1928_v22 = vsel %vm6150_vm7, %v1926_v13, %v1927_v62 }
 0x105   : > { %7546 = vst [vmem:[#allocation46_spill] sm:$0xff] %v6326_v17  ;;  %4885 = vmatmul.msk.bf16.gmra.mxu2 %vm1163_vm3, %v6321_v8  ;;  %v6353_v17 = vpack.c.b16 %v2103_v44, %v2102_v6  ;;  %v2104_v45 = vunpack.c.l.b16 %v1928_v22  ;;  %v5411_v22 = vld [vmem:[%s5627_s11 + $0x50] sm:$0xf] }
 0x106   : > { %v6328_v12 = vpop.f32.mrf.mxu0 }
 0x107   : > { %7550 = vst [vmem:[#allocation50_spill] sm:$0xff] %v6353_v17 }
 0x108   : > { %v6335_v34 = vpop.f32.mrf.mxu3 }
 0x109   : > { %7547 = vst [vmem:[#allocation47_spill] sm:$0xff] %v6335_v34  ;;  %4926 = vmatmul.msk.bf16.gmra.mxu3 %vm1163_vm3, %v5138_v1 }
 0x10b   : > { %v6344_v27 = vpop.f32.mrf.mxu1 }
 0x10c   : > { %v6342_v54 = vpop.f32.mrf.mxu2 }
 0x10d   : > { %7548 = vst [vmem:[#allocation48_spill] sm:$0xff] %v6342_v54  ;;  %4959 = vmatmul.msk.bf16.gmra.mxu0 %vm1163_vm3, %v6167_v55  ;;  %v1929_v55 = vrot.slane %v1927_v62, 4 }
 0x10e   : > { %v6348_v8 = vpop.f32.mrf.mxu0 }
 0x10f   : > { %v1931_v6 = vsel %vm6150_vm7, %v1929_v55, %v1930_v29  ;;  %v5410_v55 = vld [vmem:[%s5627_s11 + $0x54] sm:$0xf] }
 0x110   : > { %4837 = vmatmul.msk.bf16.gmra.mxu1 %vm1163_vm3, %v5137_v14  ;;  %v6351_v34 = vpop.f32.mrf.mxu3  ;;  %v1934_v29 = vrot.slane %v5410_v55, 5 }
 0x111   : > { %7549 = vst [vmem:[#allocation49_spill] sm:$0xff] %v6351_v34  ;;  %v2105_v34 = vunpack.c.l.b16 %v1931_v6  ;;  %v4867_v6 = vrot.slane %v5411_v22, 9 }
 0x112   : > { %v1936_v35 = vrot.slane %v1934_v29, 4 }
 0x113   : > { %v6356_v51 = vpop.f32.mrf.mxu1  ;;  %v6382_v62 = vpack.c.b16 %v2105_v34, %v2104_v45  ;;  %v1935_v45 = vsel %vm6150_vm7, %v4867_v6, %v1934_v29  ;;  %v5413_v29 = vld [vmem:[%s5627_s11 + $0x5c] sm:$0xf] }
 0x114   : > { %7551 = vst [vmem:[#allocation51_spill] sm:$0xff] %v6356_v51  ;;  %v2106_v22 = vunpack.c.l.b16 %v1935_v45  ;;  %v1940_v6 = vrot.slane %v5413_v29, 5 }
 0x115   : > { %4886 = vmatmul.msk.bf16.gmra.mxu2 %vm1163_vm3, %v6353_v17  ;;  %7556 = vst [vmem:[#allocation56_spill] sm:$0xff] %v6382_v62 }
 0x116   : > { %v6361_v54 = vpop.f32.mrf.mxu2  ;;  %v1942_v51 = vrot.slane %v1940_v6, 4 }
 0x117   : > { %7552 = vst [vmem:[#allocation52_spill] sm:$0xff] %v6361_v54 }
 0x119   : > { %4927 = vmatmul.msk.bf16.gmra.mxu3 %vm1163_vm3, %v5139_v3 }
 0x11a   : > { %v6364_v14 = vpop.f32.mrf.mxu0 }
 0x11b   : > { %v6371_v44 = vpop.f32.mrf.mxu3 }
 0x11c   : > { %7553 = vst [vmem:[#allocation53_spill] sm:$0xff] %v6371_v44  ;;  %v5140_v44 = vld [vmem:[%s5627_s11 + $0x58] sm:$0xff] }
 0x11d   : > { %4960 = vmatmul.msk.bf16.gmra.mxu0 %vm1163_vm3, %v5663_v63  ;;  %v6375_v48 = vpop.f32.mrf.mxu1 }
 0x11e   : > { %7554 = vst [vmem:[#allocation54_spill] sm:$0xff] %v6375_v48  ;;  %v6377_v17 = vpop.f32.mrf.mxu2  ;;  %v5414_v48 = vld [vmem:[%s5627_s11 + $0x60] sm:$0x1] }
 0x11f   : > { %7555 = vst [vmem:[#allocation55_spill] sm:$0xff] %v6377_v17  ;;  %v5412_v17 = vld [vmem:[%s5627_s11 + $0x58] sm:$0xf]  ;;  %v1943_v45 = vrot.slane %v5414_v48, 5 }
 0x120   : > { %4838 = vmatmul.msk.bf16.gmra.mxu1 %vm1163_vm3, %v5138_v1  ;;  %v1937_v1 = vrot.slane %v5412_v17, 5 }
 0x122   : > { %v6380_v54 = vpop.f32.mrf.mxu0  ;;  %v1938_v55 = vsel %vm6150_vm7, %v1936_v35, %v1937_v1 }
 0x123   : > { %v6385_v13 = vpop.f32.mrf.mxu3 }
 0x124   : > { %7557 = vst [vmem:[#allocation57_spill] sm:$0xff] %v6385_v13 }
 0x125   : > { %4887 = vmatmul.msk.bf16.gmra.mxu2 %vm1163_vm3, %v6382_v62  ;;  %v6390_v63 = vpop.f32.mrf.mxu1  ;;  %v2107_v62 = vunpack.c.l.b16 %v1938_v55  ;;  %v1939_v55 = vrot.slane %v1937_v1, 4 }
 0x126   : > { %7558 = vst [vmem:[#allocation58_spill] sm:$0xff] %v6390_v63 }
 0x127   : > { %v6410_v63 = vpack.c.b16 %v2107_v62, %v2106_v22  ;;  %v1941_v29 = vsel %vm6150_vm7, %v1939_v55, %v1940_v6  ;;  %v5415_v55 = vld [vmem:[%s5627_s11 + $0x68] sm:$0xf] }
 0x128   : > { %v6394_v46 = vpop.f32.mrf.mxu2 }
 0x129   : > { %7559 = vst [vmem:[#allocation59_spill] sm:$0xff] %v6394_v46  ;;  %4928 = vmatmul.msk.bf16.gmra.mxu3 %vm1163_vm3, %v5140_v44 }
 0x12a   : > { %v6397_v34 = vpop.f32.mrf.mxu0  ;;  %7562 = vst [vmem:[#allocation62_spill] sm:$0xff] %v6410_v63 }
 0x12c   : > { %v6403_v13 = vpop.f32.mrf.mxu3 }
 0x12d   : > { %7560 = vst [vmem:[#allocation60_spill] sm:$0xff] %v6403_v13  ;;  %4961 = vmatmul.msk.bf16.gmra.mxu0 %vm1163_vm3, %v5719_v21  ;;  %v1701_v17 = vpop.f32.mrf.mxu1  ;;  %v5141_v13 = vld [vmem:[%s5627_s11 + $0x64] sm:$0xff] }
 0x130   : > { %v6407_v46 = vpop.f32.mrf.mxu2  ;;  %4839 = vmatmul.msk.bf16.gmra.mxu1 %vm1163_vm3, %v5139_v3 }
 0x131   : > { %7561 = vst [vmem:[#allocation61_spill] sm:$0xff] %v6407_v46  ;;  %v1702_v46 = vadd.f32 %v1701_v17, %v6169_v9  ;;  %v2108_v9 = vunpack.c.l.b16 %v1941_v29 }
 0x132   : > { %v6412_v5 = vpop.f32.mrf.mxu0 }
 0x134   : > { %v6415_v35 = vpop.f32.mrf.mxu3 }
 0x135   : > { %7563 = vst [vmem:[#allocation63_spill] sm:$0xff] %v6415_v35  ;;  %4888 = vmatmul.msk.bf16.gmra.mxu2 %vm1163_vm3, %v6410_v63  ;;  %v1703_v21 = vpop.f32.mrf.mxu1  ;;  %v1944_v35 = vsel %vm6150_vm7, %v1942_v51, %v1943_v45 }
 0x136   : > { %v2109_v17 = vunpack.c.l.b16 %v1944_v35  ;;  %v5142_v35 = vld [vmem:[%s5627_s11 + $0x6c] sm:$0xff] }
 0x138   : > { %v2294_v3 = vpop.f32.mrf.mxu2  ;;  %v6433_v51 = vpack.c.b16 %v2109_v17, %v2108_v9 }
 0x139   : > { %4929 = vmatmul.msk.bf16.gmra.mxu3 %vm1163_vm3, %v5141_v13  ;;  %v2454_v62 = vadd.f32 %v2294_v3, %v1702_v46  ;;  %v1704_v46 = vadd.f32 %v1703_v21, %v6182_v43  ;;  %v5416_v21 = vld [vmem:[%s5627_s11 + $0x64] sm:$0xf] }
 0x13a   : > { %v2842_v22 = vpop.f32.mrf.mxu0  ;;  %v4868_v43 = vrot.slane %v5416_v21, 9 }
 0x13c   : > { %v2548_v63 = vpop.f32.mrf.mxu3 }
 0x13d   : > { %4962 = vmatmul.msk.bf16.gmra.mxu0 %vm1163_vm3, %v5773_v49  ;;  %v2708_v48 = vadd.f32 %v2548_v63, %v2454_v62  ;;  %v1706_v1 = vpop.f32.mrf.mxu1  ;;  %v1947_v49 = vrot.slane %v5415_v55, 5 }
 0x13f   : > { %v6430_v3 = vadd.f32 %v2842_v22, %v2708_v48  ;;  %v1949_v22 = vrot.slane %v1947_v49, 4  ;;  %v5417_v48 = vld [vmem:[%s5627_s11 + $0x6c] sm:$0xf] }
 0x140   : > { %v2296_v39 = vpop.f32.mrf.mxu2  ;;  %4840 = vmatmul.msk.bf16.gmra.mxu1 %vm1163_vm3, %v5140_v44  ;;  %v1707_v44 = vadd.f32 %v1706_v1, %v6198_v10 }
 0x141   : > { %7564 = vst [vmem:[#allocation64_spill] sm:$0xff] %v6430_v3  ;;  %v2455_v6 = vadd.f32 %v2296_v39, %v1704_v46  ;;  %v1950_v3 = vrot.slane %v5417_v48, 5 }
 0x142   : > { %v2844_v45 = vpop.f32.mrf.mxu0 }
 0x143   : > { %v1951_v55 = vsel %vm6150_vm7, %v1949_v22, %v1950_v3 }
 0x144   : > { %v2550_v63 = vpop.f32.mrf.mxu3 }
 0x145   : > { %v2709_v62 = vadd.f32 %v2550_v63, %v2455_v6  ;;  %4889 = vmatmul.msk.bf16.gmra.mxu2 %vm1163_vm3, %v6433_v51  ;;  %v1708_v29 = vpop.f32.mrf.mxu1  ;;  %v1948_v6 = vsel %vm6150_vm7, %v4868_v43, %v1947_v49 }
 0x146   : > { %v2110_v1 = vunpack.c.l.b16 %v1948_v6  ;;  %v5143_v6 = vld [vmem:[%s5627_s11 + $0x78] sm:$0xff] }
 0x147   : > { %v6442_v39 = vadd.f32 %v2844_v45, %v2709_v62  ;;  %v2111_v45 = vunpack.c.l.b16 %v1951_v55  ;;  %v1709_v62 = vadd.f32 %v1708_v29, %v6213_v0  ;;  %v1952_v29 = vrot.slane %v1950_v3, 4 }
 0x148   : > { %v2299_v9 = vpop.f32.mrf.mxu2 }
 0x149   : > { %7565 = vst [vmem:[#allocation65_spill] sm:$0xff] %v6442_v39  ;;  %4930 = vmatmul.msk.bf16.gmra.mxu3 %vm1163_vm3, %v5142_v35  ;;  %v2456_v17 = vadd.f32 %v2299_v9, %v1707_v44  ;;  %v6455_v43 = vpack.c.b16 %v2111_v45, %v2110_v1  ;;  %v5418_v9 = vld [vmem:[%s5627_s11 + $0x70] sm:$0xf] }
 0x14a   : > { %v2847_v46 = vpop.f32.mrf.mxu0  ;;  %v1953_v39 = vrot.slane %v5418_v9, 5 }
 0x14c   : > { %v2553_v63 = vpop.f32.mrf.mxu3 }
 0x14d   : > { %4963 = vmatmul.msk.bf16.gmra.mxu0 %vm1163_vm3, %v5837_v7  ;;  %v2710_v21 = vadd.f32 %v2553_v63, %v2456_v17  ;;  %v1711_v10 = vpop.f32.mrf.mxu1  ;;  %v5419_v63 = vld [vmem:[%s5627_s11 + $0x74] sm:$0x1] }
 0x14e   : > { %v1956_v0 = vrot.slane %v5419_v63, 5 }
 0x14f   : > { %v6452_v48 = vadd.f32 %v2847_v46, %v2710_v21  ;;  %v1955_v46 = vrot.slane %v1953_v39, 4  ;;  %v1712_v21 = vadd.f32 %v1711_v10, %v6230_v15 }
 0x150   : > { %v2301_v44 = vpop.f32.mrf.mxu2  ;;  %4841 = vmatmul.msk.bf16.gmra.mxu1 %vm1163_vm3, %v5141_v13 }
 0x151   : > { %v2457_v49 = vadd.f32 %v2301_v44, %v1709_v62  ;;  %v1957_v44 = vsel %vm6150_vm7, %v1955_v46, %v1956_v0  ;;  %v5420_v46 = vld [vmem:[%s5627_s11 + $0x7c] sm:$0xf] }
 0x152   : > { %v2849_v22 = vpop.f32.mrf.mxu0 }
 0x154   : > { %v2555_v7 = vpop.f32.mrf.mxu3 }
 0x155   : > { %v2711_v17 = vadd.f32 %v2555_v7, %v2457_v49  ;;  %4890 = vmatmul.msk.bf16.gmra.mxu2 %vm1163_vm3, %v6455_v43  ;;  %v1713_v55 = vpop.f32.mrf.mxu1  ;;  %v1954_v7 = vsel %vm6150_vm7, %v1952_v29, %v1953_v39 }
 0x156   : > { %v2112_v10 = vunpack.c.l.b16 %v1954_v7  ;;  %v1714_v9 = vadd.f32 %v1713_v55, %v6246_v33  ;;  %v5144_v7 = vld [vmem:[%s5627_s11 + $0x80] sm:$0xff]  ;;  %v5421_v33 = vld [vmem:[%s5627_s11 + $0x78] sm:$0xf] }
 0x157   : > { %v6463_v13 = vadd.f32 %v2849_v22, %v2711_v17  ;;  %v2113_v22 = vunpack.c.l.b16 %v1957_v44  ;;  %v4869_v55 = vrot.slane %v5421_v33, 9 }
 0x158   : > { %v2304_v1 = vpop.f32.mrf.mxu2 }
 0x159   : > { %4931 = vmatmul.msk.bf16.gmra.mxu3 %vm1163_vm3, %v5143_v6  ;;  %v2458_v45 = vadd.f32 %v2304_v1, %v1712_v21  ;;  %v6476_v0 = vpack.c.b16 %v2113_v22, %v2112_v10  ;;  %v1960_v21 = vrot.slane %v5420_v46, 5 }
 0x15a   : > { %v2852_v62 = vpop.f32.mrf.mxu0 }
 0x15c   : > { %v2558_v49 = vpop.f32.mrf.mxu3 }
 0x15d   : > { %4964 = vmatmul.msk.bf16.gmra.mxu0 %vm1163_vm3, %v5899_v60  ;;  %v2712_v3 = vadd.f32 %v2558_v49, %v2458_v45  ;;  %v1716_v15 = vpop.f32.mrf.mxu1  ;;  %v5422_v49 = vld [vmem:[%s5627_s11 + $0x80] sm:$0xf] }
 0x15f   : > { %v6473_v17 = vadd.f32 %v2852_v62, %v2712_v3  ;;  %v1962_v62 = vrot.slane %v1960_v21, 4  ;;  %v1963_v3 = vrot.slane %v5422_v49, 5 }
 0x160   : > { %v2306_v63 = vpop.f32.mrf.mxu2  ;;  %4842 = vmatmul.msk.bf16.gmra.mxu1 %vm1163_vm3, %v5142_v35  ;;  %v1717_v35 = vadd.f32 %v1716_v15, %v6262_v52 }
 0x161   : > { %7566 = vst [vmem:[#allocation66_spill] sm:$0xff] %v6473_v17  ;;  %v2459_v39 = vadd.f32 %v2306_v63, %v1714_v9  ;;  %v1964_v46 = vsel %vm6150_vm7, %v1962_v62, %v1963_v3 }
 0x162   : > { %v2854_v29 = vpop.f32.mrf.mxu0 }
 0x164   : > { %v2560_v1 = vpop.f32.mrf.mxu3 }
 0x165   : > { %v2713_v45 = vadd.f32 %v2560_v1, %v2459_v39  ;;  %4891 = vmatmul.msk.bf16.gmra.mxu2 %vm1163_vm3, %v6476_v0  ;;  %v1718_v44 = vpop.f32.mrf.mxu1  ;;  %v1961_v39 = vsel %vm6150_vm7, %v4869_v55, %v1960_v21 }
 0x166   : > { %v2114_v15 = vunpack.c.l.b16 %v1961_v39  ;;  %v5145_v39 = vld [vmem:[%s5627_s11 + $0x8c] sm:$0xff] }
 0x167   : > { %v6485_v9 = vadd.f32 %v2854_v29, %v2713_v45  ;;  %v2115_v29 = vunpack.c.l.b16 %v1964_v46  ;;  %v1719_v45 = vadd.f32 %v1718_v44, %v6279_v59  ;;  %v1965_v44 = vrot.slane %v1963_v3, 4 }
 0x168   : > { %v2309_v10 = vpop.f32.mrf.mxu2 }
 0x169   : > { %7567 = vst [vmem:[#allocation67_spill] sm:$0xff] %v6485_v9  ;;  %4932 = vmatmul.msk.bf16.gmra.mxu3 %vm1163_vm3, %v5144_v7  ;;  %v2460_v22 = vadd.f32 %v2309_v10, %v1717_v35  ;;  %v6498_v55 = vpack.c.b16 %v2115_v29, %v2114_v15  ;;  %v5423_v10 = vld [vmem:[%s5627_s11 + $0x84] sm:$0xf] }
 0x16a   : > { %v2857_v63 = vpop.f32.mrf.mxu0  ;;  %v1966_v9 = vrot.slane %v5423_v10, 5 }
 0x16c   : > { %v2563_v1 = vpop.f32.mrf.mxu3 }
 0x16d   : > { %4965 = vmatmul.msk.bf16.gmra.mxu0 %vm1163_vm3, %v5962_v20  ;;  %v2714_v33 = vadd.f32 %v2563_v1, %v2460_v22  ;;  %v1721_v52 = vpop.f32.mrf.mxu1  ;;  %v5424_v1 = vld [vmem:[%s5627_s11 + $0x88] sm:$0x1] }
 0x16e   : > { %v1969_v59 = vrot.slane %v5424_v1, 5 }
 0x16f   : > { %v6495_v49 = vadd.f32 %v2857_v63, %v2714_v33  ;;  %v1968_v63 = vrot.slane %v1966_v9, 4  ;;  %v1722_v33 = vadd.f32 %v1721_v52, %v6297_v61 }
 0x170   : > { %v2311_v35 = vpop.f32.mrf.mxu2  ;;  %4843 = vmatmul.msk.bf16.gmra.mxu1 %vm1163_vm3, %v5143_v6 }
 0x171   : > { %v2461_v21 = vadd.f32 %v2311_v35, %v1719_v45  ;;  %v1970_v35 = vsel %vm6150_vm7, %v1968_v63, %v1969_v59  ;;  %v5425_v63 = vld [vmem:[%s5627_s11 + $0x90] sm:$0xf] }
 0x172   : > { %v2859_v62 = vpop.f32.mrf.mxu0 }
 0x174   : > { %v2565_v17 = vpop.f32.mrf.mxu3 }
 0x175   : > { %v2715_v22 = vadd.f32 %v2565_v17, %v2461_v21  ;;  %4892 = vmatmul.msk.bf16.gmra.mxu2 %vm1163_vm3, %v6498_v55  ;;  %v1723_v46 = vpop.f32.mrf.mxu1  ;;  %v1967_v17 = vsel %vm6150_vm7, %v1965_v44, %v1966_v9 }
 0x176   : > { %v2116_v52 = vunpack.c.l.b16 %v1967_v17  ;;  %v1724_v10 = vadd.f32 %v1723_v46, %v6314_v4  ;;  %v5146_v17 = vld [vmem:[%s5627_s11 + $0x94] sm:$0xff]  ;;  %v5426_v4 = vld [vmem:[%s5627_s11 + $0x8c] sm:$0xf] }
 0x177   : > { %v6506_v6 = vadd.f32 %v2859_v62, %v2715_v22  ;;  %v2117_v62 = vunpack.c.l.b16 %v1970_v35  ;;  %v4870_v46 = vrot.slane %v5426_v4, 9 }
 0x178   : > { %v2314_v15 = vpop.f32.mrf.mxu2 }
 0x179   : > { %4933 = vmatmul.msk.bf16.gmra.mxu3 %vm1163_vm3, %v5145_v39  ;;  %v2462_v29 = vadd.f32 %v2314_v15, %v1722_v33  ;;  %v6519_v59 = vpack.c.b16 %v2117_v62, %v2116_v52  ;;  %v1973_v33 = vrot.slane %v5425_v63, 5 }
 0x17a   : > { %v2862_v45 = vpop.f32.mrf.mxu0 }
 0x17c   : > { %v2568_v21 = vpop.f32.mrf.mxu3 }
 0x17d   : > { %4966 = vmatmul.msk.bf16.gmra.mxu0 %vm1163_vm3, %v6029_v23  ;;  %v2716_v3 = vadd.f32 %v2568_v21, %v2462_v29  ;;  %v1726_v61 = vpop.f32.mrf.mxu1  ;;  %v5427_v21 = vld [vmem:[%s5627_s11 + $0x94] sm:$0xf] }
 0x17f   : > { %v6516_v22 = vadd.f32 %v2862_v45, %v2716_v3  ;;  %v1975_v45 = vrot.slane %v1973_v33, 4  ;;  %v1976_v3 = vrot.slane %v5427_v21, 5 }
 0x180   : > { %v2316_v1 = vpop.f32.mrf.mxu2  ;;  %4844 = vmatmul.msk.bf16.gmra.mxu1 %vm1163_vm3, %v5144_v7  ;;  %v1727_v7 = vadd.f32 %v1726_v61, %v6328_v12 }
 0x181   : > { %7568 = vst [vmem:[#allocation68_spill] sm:$0xff] %v6516_v22  ;;  %v2463_v9 = vadd.f32 %v2316_v1, %v1724_v10  ;;  %v1977_v63 = vsel %vm6150_vm7, %v1975_v45, %v1976_v3 }
 0x182   : > { %v2864_v44 = vpop.f32.mrf.mxu0 }
 0x184   : > { %v2570_v15 = vpop.f32.mrf.mxu3 }
 0x185   : > { %v2717_v29 = vadd.f32 %v2570_v15, %v2463_v9  ;;  %4893 = vmatmul.msk.bf16.gmra.mxu2 %vm1163_vm3, %v6519_v59  ;;  %v1728_v35 = vpop.f32.mrf.mxu1  ;;  %v1974_v9 = vsel %vm6150_vm7, %v4870_v46, %v1973_v33 }
 0x186   : > { %v2118_v61 = vunpack.c.l.b16 %v1974_v9 }
 0x187   : > { %v6528_v10 = vadd.f32 %v2864_v44, %v2717_v29  ;;  %v2119_v44 = vunpack.c.l.b16 %v1977_v63  ;;  %v1729_v29 = vadd.f32 %v1728_v35, %v6348_v8  ;;  %v1982_v8 = vrot.slane %v6059_v26, 5 }
 0x188   : > { %v2319_v52 = vpop.f32.mrf.mxu2  ;;  %v1978_v35 = vrot.slane %v1976_v3, 4 }
 0x189   : > { %7569 = vst [vmem:[#allocation69_spill] sm:$0xff] %v6528_v10  ;;  %4934 = vmatmul.msk.bf16.gmra.mxu3 %vm1163_vm3, %v5146_v17  ;;  %v2464_v62 = vadd.f32 %v2319_v52, %v1727_v7  ;;  %v6541_v46 = vpack.c.b16 %v2119_v44, %v2118_v61  ;;  %v1979_v52 = vrot.slane %v6052_v56, 5 }
 0x18a   : > { %v2867_v1 = vpop.f32.mrf.mxu0 }
 0x18c   : > { %v2573_v15 = vpop.f32.mrf.mxu3 }
 0x18d   : > { %4967 = vmatmul.msk.bf16.gmra.mxu0 %vm1163_vm3, %v6102_v30  ;;  %v2718_v4 = vadd.f32 %v2573_v15, %v2464_v62  ;;  %v1731_v12 = vpop.f32.mrf.mxu1  ;;  %v5147_v62 = vld [vmem:[%s5627_s11 + $0xa0] sm:$0xff] }
 0x18e   : > { %v1732_v63 = vadd.f32 %v1731_v12, %v6364_v14 }
 0x18f   : > { %v6538_v21 = vadd.f32 %v2867_v1, %v2718_v4  ;;  %v1981_v1 = vrot.slane %v1979_v52, 4 }
 0x190   : > { %v2321_v7 = vpop.f32.mrf.mxu2  ;;  %4845 = vmatmul.msk.bf16.gmra.mxu1 %vm1163_vm3, %v5145_v39 }
 0x191   : > { %v2465_v33 = vadd.f32 %v2321_v7, %v1729_v29  ;;  %v1983_v61 = vsel %vm6150_vm7, %v1981_v1, %v1982_v8  ;;  %v5428_v8 = vld [vmem:[%s5627_s11 + $0xa4] sm:$0xf] }
 0x192   : > { %v2869_v45 = vpop.f32.mrf.mxu0  ;;  %v2121_v3 = vunpack.c.l.b16 %v1983_v61 }
 0x194   : > { %v2575_v10 = vpop.f32.mrf.mxu3 }
 0x195   : > { %v2719_v22 = vadd.f32 %v2575_v10, %v2465_v33  ;;  %4894 = vmatmul.msk.bf16.gmra.mxu2 %vm1163_vm3, %v6541_v46  ;;  %v1733_v9 = vpop.f32.mrf.mxu1  ;;  %v1980_v10 = vsel %vm6150_vm7, %v1978_v35, %v1979_v52  ;;  %v1986_v35 = vrot.slane %v5428_v8, 5 }
 0x196   : > { %v1734_v12 = vadd.f32 %v1733_v9, %v6380_v54  ;;  %v5429_v54 = vld [vmem:[%s5627_s11 + $0xa0] sm:$0xf] }
 0x197   : > { %v6549_v39 = vadd.f32 %v2869_v45, %v2719_v22  ;;  %v2120_v22 = vunpack.c.l.b16 %v1980_v10  ;;  %v4871_v9 = vrot.slane %v5429_v54, 9  ;;  %v5430_v10 = vld [vmem:[%s5627_s11 + $0xa8] sm:$0xf] }
 0x198   : > { %v2324_v15 = vpop.f32.mrf.mxu2  ;;  %v1989_v61 = vrot.slane %v5430_v10, 5  ;;  %v5431_v10 = vld [vmem:[%s5627_s11 + $0xac] sm:$0xf] }
 0x199   : > { %4935 = vmatmul.msk.bf16.gmra.mxu3 %vm1163_vm3, %v5147_v62  ;;  %v2466_v4 = vadd.f32 %v2324_v15, %v1732_v63  ;;  %v6562_v45 = vpack.c.b16 %v2121_v3, %v2120_v22  ;;  %v5148_v15 = vld [vmem:[%s5627_s11 + $0xa8] sm:$0xff] }
 0x19a   : > { %v2872_v56 = vpop.f32.mrf.mxu0 }
 0x19c   : > { %v2578_v44 = vpop.f32.mrf.mxu3 }
 0x19d   : > { %4968 = vmatmul.msk.bf16.gmra.mxu0 %vm1163_vm3, %v5681_v19  ;;  %v2720_v26 = vadd.f32 %v2578_v44, %v2466_v4  ;;  %v1736_v14 = vpop.f32.mrf.mxu1 }
 0x19f   : > { %v6559_v29 = vadd.f32 %v2872_v56, %v2720_v26  ;;  %v1988_v56 = vrot.slane %v1986_v35, 4 }
 0x1a0   : > { %v2326_v7 = vpop.f32.mrf.mxu2  ;;  %4846 = vmatmul.msk.bf16.gmra.mxu1 %vm1163_vm3, %v5146_v17  ;;  %v1737_v17 = vadd.f32 %v1736_v14, %v6397_v34 }
 0x1a1   : > { %v2467_v33 = vadd.f32 %v2326_v7, %v1734_v12  ;;  %v1987_v12 = vsel %vm6150_vm7, %v4871_v9, %v1986_v35  ;;  %v1990_v7 = vsel %vm6150_vm7, %v1988_v56, %v1989_v61 }
 0x1a2   : > { %v2874_v52 = vpop.f32.mrf.mxu0  ;;  %v2122_v14 = vunpack.c.l.b16 %v1987_v12  ;;  %v5149_v12 = vld [vmem:[%s5627_s11 + $0xb4] sm:$0xff] }
 0x1a4   : > { %v2580_v1 = vpop.f32.mrf.mxu3 }
 0x1a5   : > { %v2721_v63 = vadd.f32 %v2580_v1, %v2467_v33  ;;  %4895 = vmatmul.msk.bf16.gmra.mxu2 %vm1163_vm3, %v6562_v45  ;;  %v1738_v4 = vpop.f32.mrf.mxu1 }
 0x1a6   : > { %v1739_v1 = vadd.f32 %v1738_v4, %v6412_v5  ;;  %v1991_v4 = vrot.slane %v1989_v61, 4 }
 0x1a7   : > { %v6571_v44 = vadd.f32 %v2874_v52, %v2721_v63  ;;  %v2123_v52 = vunpack.c.l.b16 %v1990_v7 }
 0x1a8   : > { %v2329_v26 = vpop.f32.mrf.mxu2 }
 0x1a9   : > { %4936 = vmatmul.msk.bf16.gmra.mxu3 %vm1163_vm3, %v5148_v15  ;;  %v2468_v22 = vadd.f32 %v2329_v26, %v1737_v17  ;;  %v6584_v9 = vpack.c.b16 %v2123_v52, %v2122_v14  ;;  %v1992_v17 = vrot.slane %v5431_v10, 5 }
 0x1aa   : > { %v2877_v3 = vpop.f32.mrf.mxu0 }
 0x1ac   : > { %v2583_v33 = vpop.f32.mrf.mxu3 }
 0x1ad   : > { %4969 = vmatmul.msk.bf16.gmra.mxu0 %vm1163_vm3, %v5728_v37  ;;  %v2722_v8 = vadd.f32 %v2583_v33, %v2468_v22  ;;  %v1741_v34 = vpop.f32.mrf.mxu1  ;;  %v5432_v33 = vld [vmem:[%s5627_s11 + $0xb0] sm:$0x1] }
 0x1ae   : > { %v1995_v5 = vrot.slane %v5432_v33, 5 }
 0x1af   : > { %v6581_v63 = vadd.f32 %v2877_v3, %v2722_v8  ;;  %v1994_v3 = vrot.slane %v1992_v17, 4  ;;  %v1742_v8 = vadd.f32 %v1741_v34, %v6100_v18 }
 0x1b0   : > { %v2331_v54 = vpop.f32.mrf.mxu2  ;;  %4847 = vmatmul.msk.bf16.gmra.mxu1 %vm1163_vm3, %v5147_v62 }
 0x1b1   : > { %v2469_v35 = vadd.f32 %v2331_v54, %v1739_v1  ;;  %v1993_v54 = vsel %vm6150_vm7, %v1991_v4, %v1992_v17 }
 0x1b2   : > { %v2879_v56 = vpop.f32.mrf.mxu0  ;;  %v2124_v34 = vunpack.c.l.b16 %v1993_v54  ;;  %v5150_v54 = vld [vmem:[%s5627_s11 + $0xbc] sm:$0xff] }
 0x1b4   : > { %v2585_v26 = vpop.f32.mrf.mxu3 }
 0x1b5   : > { %v2723_v22 = vadd.f32 %v2585_v26, %v2469_v35  ;;  %4896 = vmatmul.msk.bf16.gmra.mxu2 %vm1163_vm3, %v6584_v9  ;;  %v1743_v7 = vpop.f32.mrf.mxu1  ;;  %v1996_v35 = vsel %vm6150_vm7, %v1994_v3, %v1995_v5  ;;  %v5433_v3 = vld [vmem:[%s5627_s11 + $0xb8] sm:$0xf] }
 0x1b6   : > { %v1744_v26 = vadd.f32 %v1743_v7, %v6137_v28  ;;  %v5434_v28 = vld [vmem:[%s5627_s11 + $0xb4] sm:$0xf] }
 0x1b7   : > { %v6592_v62 = vadd.f32 %v2879_v56, %v2723_v22  ;;  %v2125_v56 = vunpack.c.l.b16 %v1996_v35  ;;  %v4872_v7 = vrot.slane %v5434_v28, 9 }
 0x1b8   : > { %v2334_v14 = vpop.f32.mrf.mxu2 }
 0x1b9   : > { %4937 = vmatmul.msk.bf16.gmra.mxu3 %vm1163_vm3, %v5149_v12  ;;  %v2470_v52 = vadd.f32 %v2334_v14, %v1742_v8  ;;  %v6605_v5 = vpack.c.b16 %v2125_v56, %v2124_v34  ;;  %v1999_v8 = vrot.slane %v5433_v3, 5 }
 0x1ba   : > { %v2882_v1 = vpop.f32.mrf.mxu0 }
 0x1bc   : > { %v2588_v10 = vpop.f32.mrf.mxu3 }
 0x1bd   : > { %4970 = vmatmul.msk.bf16.gmra.mxu0 %vm1163_vm3, %v5791_v11  ;;  %v2724_v61 = vadd.f32 %v2588_v10, %v2470_v52  ;;  %v1746_v18 = vpop.f32.mrf.mxu1  ;;  %v5435_v10 = vld [vmem:[%s5627_s11 + $0xbc] sm:$0xf] }
 0x1bf   : > { %v6602_v22 = vadd.f32 %v2882_v1, %v2724_v61  ;;  %v2001_v1 = vrot.slane %v1999_v8, 4  ;;  %v2002_v61 = vrot.slane %v5435_v10, 5 }
 0x1c0   : > { %v2336_v33 = vpop.f32.mrf.mxu2  ;;  %4848 = vmatmul.msk.bf16.gmra.mxu1 %vm1163_vm3, %v5148_v15  ;;  %v1747_v15 = vadd.f32 %v1746_v18, %v6178_v2 }
 0x1c1   : > { %7570 = vst [vmem:[#allocation70_spill] sm:$0xff] %v6602_v22  ;;  %v2471_v17 = vadd.f32 %v2336_v33, %v1744_v26  ;;  %v2003_v3 = vsel %vm6150_vm7, %v2001_v1, %v2002_v61 }
 0x1c2   : > { %v2884_v4 = vpop.f32.mrf.mxu0 }
 0x1c4   : > { %v2590_v14 = vpop.f32.mrf.mxu3 }
 0x1c5   : > { %v2725_v52 = vadd.f32 %v2590_v14, %v2471_v17  ;;  %4897 = vmatmul.msk.bf16.gmra.mxu2 %vm1163_vm3, %v6605_v5  ;;  %v1748_v35 = vpop.f32.mrf.mxu1  ;;  %v2000_v17 = vsel %vm6150_vm7, %v4872_v7, %v1999_v8 }
 0x1c6   : > { %v2126_v18 = vunpack.c.l.b16 %v2000_v17  ;;  %v5151_v17 = vld [vmem:[%s5627_s11 + $0xc8] sm:$0xff] }
 0x1c7   : > { %v6614_v26 = vadd.f32 %v2884_v4, %v2725_v52  ;;  %v2127_v4 = vunpack.c.l.b16 %v2003_v3  ;;  %v1749_v52 = vadd.f32 %v1748_v35, %v6189_v36  ;;  %v2004_v35 = vrot.slane %v2002_v61, 4 }
 0x1c8   : > { %v2339_v34 = vpop.f32.mrf.mxu2 }
 0x1c9   : > { %7571 = vst [vmem:[#allocation71_spill] sm:$0xff] %v6614_v26  ;;  %4938 = vmatmul.msk.bf16.gmra.mxu3 %vm1163_vm3, %v5150_v54  ;;  %v2472_v56 = vadd.f32 %v2339_v34, %v1747_v15  ;;  %v6627_v7 = vpack.c.b16 %v2127_v4, %v2126_v18  ;;  %v5436_v34 = vld [vmem:[%s5627_s11 + $0xc0] sm:$0xf] }
 0x1ca   : > { %v2887_v33 = vpop.f32.mrf.mxu0  ;;  %v2005_v26 = vrot.slane %v5436_v34, 5 }
 0x1cc   : > { %v2593_v14 = vpop.f32.mrf.mxu3 }
 0x1cd   : > { %4971 = vmatmul.msk.bf16.gmra.mxu0 %vm1163_vm3, %v5855_v50  ;;  %v2726_v28 = vadd.f32 %v2593_v14, %v2472_v56  ;;  %v1751_v2 = vpop.f32.mrf.mxu1  ;;  %v5437_v14 = vld [vmem:[%s5627_s11 + $0xc4] sm:$0x1] }
 0x1ce   : > { %v2008_v36 = vrot.slane %v5437_v14, 5 }
 0x1cf   : > { %v6624_v10 = vadd.f32 %v2887_v33, %v2726_v28  ;;  %v2007_v33 = vrot.slane %v2005_v26, 4  ;;  %v1752_v28 = vadd.f32 %v1751_v2, %v6206_v58 }
 0x1d0   : > { %v2341_v15 = vpop.f32.mrf.mxu2  ;;  %4849 = vmatmul.msk.bf16.gmra.mxu1 %vm1163_vm3, %v5149_v12 }
 0x1d1   : > { %v2473_v8 = vadd.f32 %v2341_v15, %v1749_v52  ;;  %v2009_v15 = vsel %vm6150_vm7, %v2007_v33, %v2008_v36  ;;  %v5438_v33 = vld [vmem:[%s5627_s11 + $0xcc] sm:$0xf] }
 0x1d2   : > { %v2889_v1 = vpop.f32.mrf.mxu0 }
 0x1d4   : > { %v2595_v22 = vpop.f32.mrf.mxu3 }
 0x1d5   : > { %v2727_v56 = vadd.f32 %v2595_v22, %v2473_v8  ;;  %4898 = vmatmul.msk.bf16.gmra.mxu2 %vm1163_vm3, %v6627_v7  ;;  %v1753_v3 = vpop.f32.mrf.mxu1  ;;  %v2006_v22 = vsel %vm6150_vm7, %v2004_v35, %v2005_v26 }
 0x1d6   : > { %v2128_v2 = vunpack.c.l.b16 %v2006_v22  ;;  %v1754_v34 = vadd.f32 %v1753_v3, %v6224_v24  ;;  %v5152_v22 = vld [vmem:[%s5627_s11 + $0xd0] sm:$0xff]  ;;  %v5439_v24 = vld [vmem:[%s5627_s11 + $0xc8] sm:$0xf] }
 0x1d7   : > { %v6635_v12 = vadd.f32 %v2889_v1, %v2727_v56  ;;  %v2129_v1 = vunpack.c.l.b16 %v2009_v15  ;;  %v4873_v3 = vrot.slane %v5439_v24, 9 }
 0x1d8   : > { %v2344_v18 = vpop.f32.mrf.mxu2 }
 0x1d9   : > { %7572 = vst [vmem:[#allocation72_spill] sm:$0xff] %v6635_v12  ;;  %4939 = vmatmul.msk.bf16.gmra.mxu3 %vm1163_vm3, %v5151_v17  ;;  %v2474_v4 = vadd.f32 %v2344_v18, %v1752_v28  ;;  %v6648_v36 = vpack.c.b16 %v2129_v1, %v2128_v2  ;;  %v2012_v28 = vrot.slane %v5438_v33, 5 }
 0x1da   : > { %v2892_v52 = vpop.f32.mrf.mxu0 }
 0x1dc   : > { %v2598_v8 = vpop.f32.mrf.mxu3 }
 0x1dd   : > { %4972 = vmatmul.msk.bf16.gmra.mxu0 %vm1163_vm3, %v5920_v25  ;;  %v2728_v61 = vadd.f32 %v2598_v8, %v2474_v4  ;;  %v1756_v58 = vpop.f32.mrf.mxu1  ;;  %v5440_v8 = vld [vmem:[%s5627_s11 + $0xd0] sm:$0xf] }
 0x1df   : > { %v6645_v56 = vadd.f32 %v2892_v52, %v2728_v61  ;;  %v2014_v52 = vrot.slane %v2012_v28, 4  ;;  %v2015_v61 = vrot.slane %v5440_v8, 5 }
 0x1e0   : > { %v2346_v14 = vpop.f32.mrf.mxu2  ;;  %4850 = vmatmul.msk.bf16.gmra.mxu1 %vm1163_vm3, %v5150_v54  ;;  %v1757_v54 = vadd.f32 %v1756_v58, %v6238_v53 }
 0x1e1   : > { %7573 = vst [vmem:[#allocation73_spill] sm:$0xff] %v6645_v56  ;;  %v2475_v26 = vadd.f32 %v2346_v14, %v1754_v34  ;;  %v2016_v33 = vsel %vm6150_vm7, %v2014_v52, %v2015_v61 }
 0x1e2   : > { %v2894_v35 = vpop.f32.mrf.mxu0 }
 0x1e4   : > { %v2600_v18 = vpop.f32.mrf.mxu3 }
 0x1e5   : > { %v2729_v4 = vadd.f32 %v2600_v18, %v2475_v26  ;;  %4899 = vmatmul.msk.bf16.gmra.mxu2 %vm1163_vm3, %v6648_v36  ;;  %v1758_v15 = vpop.f32.mrf.mxu1  ;;  %v2013_v26 = vsel %vm6150_vm7, %v4873_v3, %v2012_v28 }
 0x1e6   : > { %v2130_v58 = vunpack.c.l.b16 %v2013_v26  ;;  %v5153_v26 = vld [vmem:[%s5627_s11 + $0xdc] sm:$0xff] }
 0x1e7   : > { %v6657_v34 = vadd.f32 %v2894_v35, %v2729_v4  ;;  %v2131_v35 = vunpack.c.l.b16 %v2016_v33  ;;  %v1759_v4 = vadd.f32 %v1758_v15, %v6255_v57  ;;  %v2017_v15 = vrot.slane %v2015_v61, 4 }
 0x1e8   : > { %v2349_v2 = vpop.f32.mrf.mxu2 }
 0x1e9   : > { %7574 = vst [vmem:[#allocation74_spill] sm:$0xff] %v6657_v34  ;;  %4940 = vmatmul.msk.bf16.gmra.mxu3 %vm1163_vm3, %v5152_v22  ;;  %v2476_v1 = vadd.f32 %v2349_v2, %v1757_v54  ;;  %v6670_v3 = vpack.c.b16 %v2131_v35, %v2130_v58  ;;  %v5441_v2 = vld [vmem:[%s5627_s11 + $0xd4] sm:$0xf] }
 0x1ea   : > { %v2897_v14 = vpop.f32.mrf.mxu0  ;;  %v2018_v34 = vrot.slane %v5441_v2, 5 }
 0x1ec   : > { %v2603_v18 = vpop.f32.mrf.mxu3 }
 0x1ed   : > { %4973 = vmatmul.msk.bf16.gmra.mxu0 %vm1163_vm3, %v5980_v31  ;;  %v2730_v24 = vadd.f32 %v2603_v18, %v2476_v1  ;;  %v1761_v53 = vpop.f32.mrf.mxu1  ;;  %v5442_v18 = vld [vmem:[%s5627_s11 + $0xd8] sm:$0x1] }
 0x1ee   : > { %v2021_v57 = vrot.slane %v5442_v18, 5 }
 0x1ef   : > { %v6667_v8 = vadd.f32 %v2897_v14, %v2730_v24  ;;  %v2020_v14 = vrot.slane %v2018_v34, 4  ;;  %v1762_v24 = vadd.f32 %v1761_v53, %v6272_v16 }
 0x1f0   : > { %v2351_v54 = vpop.f32.mrf.mxu2  ;;  %4851 = vmatmul.msk.bf16.gmra.mxu1 %vm1163_vm3, %v5151_v17 }
 0x1f1   : > { %7575 = vst [vmem:[#allocation75_spill] sm:$0xff] %v6667_v8  ;;  %v2477_v28 = vadd.f32 %v2351_v54, %v1759_v4  ;;  %v2022_v54 = vsel %vm6150_vm7, %v2020_v14, %v2021_v57  ;;  %v5443_v14 = vld [vmem:[%s5627_s11 + $0xe0] sm:$0xf]  ;;  %v349_v8 = vld [vmem:[%s5627_s11 + $0x148] sm:$0xf] }
 0x1f2   : > { %v2899_v52 = vpop.f32.mrf.mxu0 }
 0x1f4   : > { %v2605_v56 = vpop.f32.mrf.mxu3 }
 0x1f5   : > { %v2731_v1 = vadd.f32 %v2605_v56, %v2477_v28  ;;  %4900 = vmatmul.msk.bf16.gmra.mxu2 %vm1163_vm3, %v6670_v3  ;;  %v1763_v33 = vpop.f32.mrf.mxu1  ;;  %v2019_v56 = vsel %vm6150_vm7, %v2017_v15, %v2018_v34 }
 0x1f6   : > { %v2132_v53 = vunpack.c.l.b16 %v2019_v56  ;;  %v1764_v2 = vadd.f32 %v1763_v33, %v6289_v42  ;;  %v5154_v56 = vld [vmem:[%s5627_s11 + $0xe4] sm:$0xff]  ;;  %v5444_v42 = vld [vmem:[%s5627_s11 + $0xdc] sm:$0xf] }
 0x1f7   : > { %v6678_v17 = vadd.f32 %v2899_v52, %v2731_v1  ;;  %v2133_v52 = vunpack.c.l.b16 %v2022_v54  ;;  %v4874_v33 = vrot.slane %v5444_v42, 9 }
 0x1f8   : > { %v2354_v58 = vpop.f32.mrf.mxu2 }
 0x1f9   : > { %7576 = vst [vmem:[#allocation76_spill] sm:$0xff] %v6678_v17  ;;  %4941 = vmatmul.msk.bf16.gmra.mxu3 %vm1163_vm3, %v5153_v26  ;;  %v2478_v35 = vadd.f32 %v2354_v58, %v1762_v24  ;;  %v6691_v57 = vpack.c.b16 %v2133_v52, %v2132_v53  ;;  %v2025_v24 = vrot.slane %v5443_v14, 5 }
 0x1fa   : > { %v2902_v4 = vpop.f32.mrf.mxu0 }
 0x1fb   : > { %7578 = vst [vmem:[#allocation78_spill] sm:$0xff] %v6691_v57 }
 0x1fc   : > { %v2608_v28 = vpop.f32.mrf.mxu3 }
 0x1fd   : > { %4974 = vmatmul.msk.bf16.gmra.mxu0 %vm1163_vm3, %v6054_v32  ;;  %v2732_v61 = vadd.f32 %v2608_v28, %v2478_v35  ;;  %v1766_v16 = vpop.f32.mrf.mxu1  ;;  %v5445_v28 = vld [vmem:[%s5627_s11 + $0xe4] sm:$0xf] }
 0x1ff   : > { %v6688_v1 = vadd.f32 %v2902_v4, %v2732_v61  ;;  %v2027_v4 = vrot.slane %v2025_v24, 4  ;;  %v2028_v61 = vrot.slane %v5445_v28, 5 }
 0x200   : > { %v2356_v18 = vpop.f32.mrf.mxu2  ;;  %4852 = vmatmul.msk.bf16.gmra.mxu1 %vm1163_vm3, %v5152_v22  ;;  %v1767_v22 = vadd.f32 %v1766_v16, %v6305_v38 }
 0x201   : > { %7577 = vst [vmem:[#allocation77_spill] sm:$0xff] %v6688_v1  ;;  %v2479_v34 = vadd.f32 %v2356_v18, %v1764_v2  ;;  %v2029_v14 = vsel %vm6150_vm7, %v2027_v4, %v2028_v61 }
 0x202   : > { %v2904_v15 = vpop.f32.mrf.mxu0 }
 0x204   : > { %v2610_v58 = vpop.f32.mrf.mxu3 }
 0x205   : > { %v2733_v35 = vadd.f32 %v2610_v58, %v2479_v34  ;;  %4901 = vmatmul.msk.bf16.gmra.mxu2 %vm1163_vm3, %v6691_v57  ;;  %v1768_v54 = vpop.f32.mrf.mxu1  ;;  %v2026_v34 = vsel %vm6150_vm7, %v4874_v33, %v2025_v24 }
 0x206   : > { %v2134_v16 = vunpack.c.l.b16 %v2026_v34  ;;  %v5155_v34 = vld [vmem:[%s5627_s11 + $0xf0] sm:$0xff] }
 0x207   : > { %v6700_v2 = vadd.f32 %v2904_v15, %v2733_v35  ;;  %v2135_v15 = vunpack.c.l.b16 %v2029_v14  ;;  %v1769_v35 = vadd.f32 %v1768_v54, %v6323_v47  ;;  %v2030_v54 = vrot.slane %v2028_v61, 4 }
 0x208   : > { %v2359_v53 = vpop.f32.mrf.mxu2 }
 0x209   : > { %7579 = vst [vmem:[#allocation79_spill] sm:$0xff] %v6700_v2  ;;  %4942 = vmatmul.msk.bf16.gmra.mxu3 %vm1163_vm3, %v5154_v56  ;;  %v2480_v52 = vadd.f32 %v2359_v53, %v1767_v22  ;;  %v6713_v33 = vpack.c.b16 %v2135_v15, %v2134_v16  ;;  %v5446_v53 = vld [vmem:[%s5627_s11 + $0xe8] sm:$0xf] }
 0x20a   : > { %v2907_v18 = vpop.f32.mrf.mxu0  ;;  %v2031_v2 = vrot.slane %v5446_v53, 5  ;;  %v7583_v53 = vld [vmem:[#allocation4_spill] sm:$0xff] }
 0x20b   : > { %7581 = vst [vmem:[#allocation81_spill] sm:$0xff] %v6713_v33 }
 0x20c   : > { %v2613_v58 = vpop.f32.mrf.mxu3 }
 0x20d   : > { %4975 = vmatmul.msk.bf16.gmra.mxu0 %vm1163_vm3, %v6118_v40  ;;  %v2734_v42 = vadd.f32 %v2613_v58, %v2480_v52  ;;  %v1771_v38 = vpop.f32.mrf.mxu1  ;;  %v5447_v58 = vld [vmem:[%s5627_s11 + $0xec] sm:$0x1] }
 0x20e   : > { %v2034_v47 = vrot.slane %v5447_v58, 5 }
 0x20f   : > { %v6710_v28 = vadd.f32 %v2907_v18, %v2734_v42  ;;  %v2033_v18 = vrot.slane %v2031_v2, 4  ;;  %v1772_v42 = vadd.f32 %v1771_v38, %v6344_v27 }
 0x210   : > { %v2361_v22 = vpop.f32.mrf.mxu2  ;;  %4853 = vmatmul.msk.bf16.gmra.mxu1 %vm1163_vm3, %v5153_v26 }
 0x211   : > { %7580 = vst [vmem:[#allocation80_spill] sm:$0xff] %v6710_v28  ;;  %v2481_v24 = vadd.f32 %v2361_v22, %v1769_v35  ;;  %v2035_v22 = vsel %vm6150_vm7, %v2033_v18, %v2034_v47  ;;  %v5448_v18 = vld [vmem:[%s5627_s11 + $0xf4] sm:$0xf]  ;;  %v7587_v28 = vld [vmem:[#allocation54_spill] sm:$0xff] }
 0x212   : > { %v2909_v4 = vpop.f32.mrf.mxu0 }
 0x214   : > { %v2615_v1 = vpop.f32.mrf.mxu3 }
 0x215   : > { %v2735_v52 = vadd.f32 %v2615_v1, %v2481_v24  ;;  %4902 = vmatmul.msk.bf16.gmra.mxu2 %vm1163_vm3, %v6713_v33  ;;  %v1773_v14 = vpop.f32.mrf.mxu1  ;;  %v2032_v1 = vsel %vm6150_vm7, %v2030_v54, %v2031_v2 }
 0x216   : > { %v2136_v38 = vunpack.c.l.b16 %v2032_v1  ;;  %v5156_v1 = vld [vmem:[%s5627_s11 + $0xf8] sm:$0xff] }
 0x217   : > { %v6721_v26 = vadd.f32 %v2909_v4, %v2735_v52  ;;  %v2137_v4 = vunpack.c.l.b16 %v2035_v22  ;;  %v7584_v52 = vld [vmem:[#allocation51_spill] sm:$0xff] }
 0x218   : > { %v2364_v16 = vpop.f32.mrf.mxu2  ;;  %v1774_v58 = vadd.f32 %v1773_v14, %v7584_v52  ;;  %v5449_v14 = vld [vmem:[%s5627_s11 + $0xf0] sm:$0xf]  ;;  %v5450_v52 = vld [vmem:[%s5627_s11 + $0xf8] sm:$0xf] }
 0x219   : > { %7582 = vst [vmem:[#allocation82_spill] sm:$0xff] %v6721_v26  ;;  %4943 = vmatmul.msk.bf16.gmra.mxu3 %vm1163_vm3, %v5155_v34  ;;  %v2482_v15 = vadd.f32 %v2364_v16, %v1772_v42  ;;  %v6734_v47 = vpack.c.b16 %v2137_v4, %v2136_v38  ;;  %v2038_v26 = vrot.slane %v5448_v18, 5 }
 0x21a   : > { %v2912_v35 = vpop.f32.mrf.mxu0 }
 0x21b   : > { %7586 = vst [vmem:[#allocation83_spill] sm:$0xff] %v6734_v47 }
 0x21c   : > { %v2618_v24 = vpop.f32.mrf.mxu3 }
 0x21d   : > { %4976 = vmatmul.msk.bf16.gmra.mxu0 %vm1163_vm3, %v7583_v53  ;;  %v2736_v61 = vadd.f32 %v2618_v24, %v2482_v15  ;;  %v1776_v27 = vpop.f32.mrf.mxu1  ;;  %v5451_v53 = vld [vmem:[%s5627_s11 + $0xfc] sm:$0xf] }
 0x21e   : > { %v2044_v17 = vrot.slane %v5451_v53, 5 }
 0x21f   : > { %v6731_v42 = vadd.f32 %v2912_v35, %v2736_v61  ;;  %v4875_v35 = vrot.slane %v5449_v14, 9  ;;  %v2040_v61 = vrot.slane %v2038_v26, 4  ;;  %v7589_v14 = vld [vmem:[#allocation6_spill] sm:$0xff] }
 0x220   : > { %v2366_v16 = vpop.f32.mrf.mxu2  ;;  %4854 = vmatmul.msk.bf16.gmra.mxu1 %vm1163_vm3, %v5154_v56  ;;  %v1777_v56 = vadd.f32 %v1776_v27, %v7587_v28 }
 0x221   : > { %7585 = vst [vmem:[#allocation51_spill] sm:$0xff] %v6731_v42  ;;  %v2483_v2 = vadd.f32 %v2366_v16, %v1774_v58  ;;  %v2041_v42 = vrot.slane %v5450_v52, 5 }
 0x222   : > { %v2914_v54 = vpop.f32.mrf.mxu0 }
 0x223   : > { %v2042_v18 = vsel %vm6150_vm7, %v2040_v61, %v2041_v42 }
 0x224   : > { %v2620_v15 = vpop.f32.mrf.mxu3 }
 0x225   : > { %v2737_v24 = vadd.f32 %v2620_v15, %v2483_v2  ;;  %4903 = vmatmul.msk.bf16.gmra.mxu2 %vm1163_vm3, %v6734_v47  ;;  %v1778_v22 = vpop.f32.mrf.mxu1  ;;  %v2039_v2 = vsel %vm6150_vm7, %v4875_v35, %v2038_v26 }
 0x226   : > { %v2138_v27 = vunpack.c.l.b16 %v2039_v2  ;;  %v5157_v2 = vld [vmem:[%s5627_s11 + $0x104] sm:$0xff] }
 0x227   : > { %v6743_v58 = vadd.f32 %v2914_v54, %v2737_v24  ;;  %v2139_v54 = vunpack.c.l.b16 %v2042_v18  ;;  %v7590_v24 = vld [vmem:[#allocation58_spill] sm:$0xff] }
 0x228   : > { %v2369_v38 = vpop.f32.mrf.mxu2 }
 0x229   : > { %7588 = vst [vmem:[#allocation54_spill] sm:$0xff] %v6743_v58  ;;  %4944 = vmatmul.msk.bf16.gmra.mxu3 %vm1163_vm3, %v5156_v1  ;;  %v2484_v4 = vadd.f32 %v2369_v38, %v1777_v56  ;;  %v1779_v56 = vadd.f32 %v1778_v22, %v7590_v24  ;;  %v6756_v35 = vpack.c.b16 %v2139_v54, %v2138_v27  ;;  %v7593_v24 = vld [vmem:[#allocation21_spill] sm:$0xff] }
 0x22a   : > { %v2917_v16 = vpop.f32.mrf.mxu0 }
 0x22b   : > { %7592 = vst [vmem:[#allocation84_spill] sm:$0xff] %v6756_v35 }
 0x22c   : > { %v2623_v15 = vpop.f32.mrf.mxu3 }
 0x22d   : > { %4977 = vmatmul.msk.bf16.gmra.mxu0 %vm1163_vm3, %v7589_v14  ;;  %v2738_v52 = vadd.f32 %v2623_v15, %v2484_v4  ;;  %v1781_v28 = vpop.f32.mrf.mxu1  ;;  %v5452_v15 = vld [vmem:[%s5627_s11 + $0x100] sm:$0x1] }
 0x22e   : > { %v2047_v22 = vrot.slane %v5452_v15, 5  ;;  %v7596_v15 = vld [vmem:[#allocation24_spill] sm:$0xff] }
 0x22f   : > { %v6753_v38 = vadd.f32 %v2917_v16, %v2738_v52  ;;  %v2043_v16 = vrot.slane %v2041_v42, 4  ;;  %v2046_v52 = vrot.slane %v2044_v17, 4 }
 0x230   : > { %v2371_v58 = vpop.f32.mrf.mxu2  ;;  %4855 = vmatmul.msk.bf16.gmra.mxu1 %vm1163_vm3, %v5155_v34 }
 0x231   : > { %7591 = vst [vmem:[#allocation58_spill] sm:$0xff] %v6753_v38  ;;  %v2485_v26 = vadd.f32 %v2371_v58, %v1779_v56  ;;  %v1782_v38 = vadd.f32 %v1781_v28, %v7593_v24  ;;  %v2048_v54 = vsel %vm6150_vm7, %v2046_v52, %v2047_v22  ;;  %v5453_v52 = vld [vmem:[%s5627_s11 + $0x108] sm:$0xf] }
 0x232   : > { %v2919_v61 = vpop.f32.mrf.mxu0 }
 0x234   : > { %v2625_v14 = vpop.f32.mrf.mxu3 }
 0x235   : > { %v2739_v4 = vadd.f32 %v2625_v14, %v2485_v26  ;;  %4904 = vmatmul.msk.bf16.gmra.mxu2 %vm1163_vm3, %v6756_v35  ;;  %v1783_v18 = vpop.f32.mrf.mxu1  ;;  %v2045_v14 = vsel %vm6150_vm7, %v2043_v16, %v2044_v17  ;;  %v7595_v26 = vld [vmem:[#allocation8_spill] sm:$0xff] }
 0x237   : > { %v6764_v34 = vadd.f32 %v2919_v61, %v2739_v4  ;;  %v2140_v61 = vunpack.c.l.b16 %v2045_v14  ;;  %v2141_v4 = vunpack.c.l.b16 %v2048_v54  ;;  %v5158_v14 = vld [vmem:[%s5627_s11 + $0x10c] sm:$0xff] }
 0x238   : > { %v2374_v58 = vpop.f32.mrf.mxu2 }
 0x239   : > { %7594 = vst [vmem:[#allocation21_spill] sm:$0xff] %v6764_v34  ;;  %4945 = vmatmul.msk.bf16.gmra.mxu3 %vm1163_vm3, %v5157_v2  ;;  %v2486_v27 = vadd.f32 %v2374_v58, %v1782_v38  ;;  %v1784_v38 = vadd.f32 %v1783_v18, %v7596_v15  ;;  %v6777_v22 = vpack.c.b16 %v2141_v4, %v2140_v61  ;;  %v2051_v34 = vrot.slane %v5453_v52, 5  ;;  %v5454_v18 = vld [vmem:[%s5627_s11 + $0x104] sm:$0xf]  ;;  %v5455_v15 = vld [vmem:[%s5627_s11 + $0x10c] sm:$0xf] }
 0x23a   : > { %v2922_v53 = vpop.f32.mrf.mxu0 }
 0x23b   : > { %7598 = vst [vmem:[#allocation85_spill] sm:$0xff] %v6777_v22 }
 0x23c   : > { %v2628_v56 = vpop.f32.mrf.mxu3 }
 0x23d   : > { %4978 = vmatmul.msk.bf16.gmra.mxu0 %vm1163_vm3, %v7595_v26  ;;  %v2740_v42 = vadd.f32 %v2628_v56, %v2486_v27  ;;  %v1786_v28 = vpop.f32.mrf.mxu1  ;;  %v7599_v26 = vld [vmem:[#allocation26_spill] sm:$0xff] }
 0x23f   : > { %v6774_v24 = vadd.f32 %v2922_v53, %v2740_v42  ;;  %v4876_v53 = vrot.slane %v5454_v18, 9  ;;  %v2053_v42 = vrot.slane %v2051_v34, 4  ;;  %v7601_v18 = vld [vmem:[#allocation10_spill] sm:$0xff] }
 0x240   : > { %v2376_v58 = vpop.f32.mrf.mxu2  ;;  %4856 = vmatmul.msk.bf16.gmra.mxu1 %vm1163_vm3, %v5156_v1  ;;  %v1787_v1 = vadd.f32 %v1786_v28, %v7599_v26 }
 0x241   : > { %7597 = vst [vmem:[#allocation24_spill] sm:$0xff] %v6774_v24  ;;  %v2487_v17 = vadd.f32 %v2376_v58, %v1784_v38  ;;  %v2054_v24 = vrot.slane %v5455_v15, 5 }
 0x242   : > { %v2924_v16 = vpop.f32.mrf.mxu0 }
 0x243   : > { %v2055_v52 = vsel %vm6150_vm7, %v2053_v42, %v2054_v24 }
 0x244   : > { %v2630_v27 = vpop.f32.mrf.mxu3 }
 0x245   : > { %v2741_v56 = vadd.f32 %v2630_v27, %v2487_v17  ;;  %4905 = vmatmul.msk.bf16.gmra.mxu2 %vm1163_vm3, %v6777_v22  ;;  %v1788_v54 = vpop.f32.mrf.mxu1  ;;  %v2052_v17 = vsel %vm6150_vm7, %v4876_v53, %v2051_v34  ;;  %v5456_v22 = vld [vmem:[%s5627_s11 + $0x110] sm:$0xf] }
 0x246   : > { %v2142_v28 = vunpack.c.l.b16 %v2052_v17  ;;  %v2057_v35 = vrot.slane %v5456_v22, 5  ;;  %v5159_v17 = vld [vmem:[%s5627_s11 + $0x118] sm:$0xff] }
 0x247   : > { %v6786_v38 = vadd.f32 %v2924_v16, %v2741_v56  ;;  %v2143_v16 = vunpack.c.l.b16 %v2055_v52  ;;  %v7602_v56 = vld [vmem:[#allocation28_spill] sm:$0xff] }
 0x248   : > { %v2379_v61 = vpop.f32.mrf.mxu2 }
 0x249   : > { %7600 = vst [vmem:[#allocation26_spill] sm:$0xff] %v6786_v38  ;;  %4946 = vmatmul.msk.bf16.gmra.mxu3 %vm1163_vm3, %v5158_v14  ;;  %v2488_v4 = vadd.f32 %v2379_v61, %v1787_v1  ;;  %v1789_v1 = vadd.f32 %v1788_v54, %v7602_v56  ;;  %v6799_v53 = vpack.c.b16 %v2143_v16, %v2142_v28  ;;  %v7605_v56 = vld [vmem:[#allocation30_spill] sm:$0xff] }
 0x24a   : > { %v2927_v58 = vpop.f32.mrf.mxu0 }
 0x24b   : > { %7604 = vst [vmem:[#allocation86_spill] sm:$0xff] %v6799_v53 }
 0x24c   : > { %v2633_v27 = vpop.f32.mrf.mxu3 }
 0x24d   : > { %4979 = vmatmul.msk.bf16.gmra.mxu0 %vm1163_vm3, %v7601_v18  ;;  %v2742_v15 = vadd.f32 %v2633_v27, %v2488_v4  ;;  %v1791_v26 = vpop.f32.mrf.mxu1  ;;  %v5457_v27 = vld [vmem:[%s5627_s11 + $0x114] sm:$0x1] }
 0x24e   : > { %v2060_v54 = vrot.slane %v5457_v27, 5  ;;  %v7608_v27 = vld [vmem:[#allocation33_spill] sm:$0xff] }
 0x24f   : > { %v6796_v61 = vadd.f32 %v2927_v58, %v2742_v15  ;;  %v2056_v58 = vrot.slane %v2054_v24, 4  ;;  %v2059_v15 = vrot.slane %v2057_v35, 4 }
 0x250   : > { %v2381_v38 = vpop.f32.mrf.mxu2  ;;  %4857 = vmatmul.msk.bf16.gmra.mxu1 %vm1163_vm3, %v5157_v2 }
 0x251   : > { %7603 = vst [vmem:[#allocation28_spill] sm:$0xff] %v6796_v61  ;;  %v2489_v34 = vadd.f32 %v2381_v38, %v1789_v1  ;;  %v1792_v61 = vadd.f32 %v1791_v26, %v7605_v56  ;;  %v2061_v16 = vsel %vm6150_vm7, %v2059_v15, %v2060_v54  ;;  %v5458_v15 = vld [vmem:[%s5627_s11 + $0x11c] sm:$0xf] }
 0x252   : > { %v2929_v42 = vpop.f32.mrf.mxu0 }
 0x254   : > { %v2635_v18 = vpop.f32.mrf.mxu3 }
 0x255   : > { %v2743_v4 = vadd.f32 %v2635_v18, %v2489_v34  ;;  %4906 = vmatmul.msk.bf16.gmra.mxu2 %vm1163_vm3, %v6799_v53  ;;  %v1793_v52 = vpop.f32.mrf.mxu1  ;;  %v2058_v18 = vsel %vm6150_vm7, %v2056_v58, %v2057_v35  ;;  %v7607_v34 = vld [vmem:[#allocation11_spill] sm:$0xff] }
 0x257   : > { %v6807_v2 = vadd.f32 %v2929_v42, %v2743_v4  ;;  %v2144_v42 = vunpack.c.l.b16 %v2058_v18  ;;  %v2145_v4 = vunpack.c.l.b16 %v2061_v16  ;;  %v5160_v18 = vld [vmem:[%s5627_s11 + $0x120] sm:$0xff] }
 0x258   : > { %v2384_v38 = vpop.f32.mrf.mxu2 }
 0x259   : > { %7606 = vst [vmem:[#allocation30_spill] sm:$0xff] %v6807_v2  ;;  %4947 = vmatmul.msk.bf16.gmra.mxu3 %vm1163_vm3, %v5159_v17  ;;  %v2490_v28 = vadd.f32 %v2384_v38, %v1792_v61  ;;  %v1794_v61 = vadd.f32 %v1793_v52, %v7608_v27  ;;  %v6820_v54 = vpack.c.b16 %v2145_v4, %v2144_v42  ;;  %v2064_v2 = vrot.slane %v5458_v15, 5  ;;  %v5459_v52 = vld [vmem:[%s5627_s11 + $0x118] sm:$0xf]  ;;  %v5460_v27 = vld [vmem:[%s5627_s11 + $0x120] sm:$0xf] }
 0x25a   : > { %v2932_v22 = vpop.f32.mrf.mxu0 }
 0x25b   : > { %7610 = vst [vmem:[#allocation87_spill] sm:$0xff] %v6820_v54 }
 0x25c   : > { %v2638_v1 = vpop.f32.mrf.mxu3 }
 0x25d   : > { %4980 = vmatmul.msk.bf16.gmra.mxu0 %vm1163_vm3, %v7607_v34  ;;  %v2744_v24 = vadd.f32 %v2638_v1, %v2490_v28  ;;  %v1796_v26 = vpop.f32.mrf.mxu1  ;;  %v7611_v34 = vld [vmem:[#allocation35_spill] sm:$0xff] }
 0x25f   : > { %v6817_v56 = vadd.f32 %v2932_v22, %v2744_v24  ;;  %v4877_v22 = vrot.slane %v5459_v52, 9  ;;  %v2066_v24 = vrot.slane %v2064_v2, 4  ;;  %v7613_v52 = vld [vmem:[#allocation14_spill] sm:$0xff] }
 0x260   : > { %v2386_v38 = vpop.f32.mrf.mxu2  ;;  %4858 = vmatmul.msk.bf16.gmra.mxu1 %vm1163_vm3, %v5158_v14  ;;  %v1797_v14 = vadd.f32 %v1796_v26, %v7611_v34 }
 0x261   : > { %7609 = vst [vmem:[#allocation33_spill] sm:$0xff] %v6817_v56  ;;  %v2491_v35 = vadd.f32 %v2386_v38, %v1794_v61  ;;  %v2067_v56 = vrot.slane %v5460_v27, 5  ;;  %v7614_v27 = vld [vmem:[#allocation38_spill] sm:$0xff] }
 0x262   : > { %v2934_v58 = vpop.f32.mrf.mxu0 }
 0x263   : > { %v2068_v15 = vsel %vm6150_vm7, %v2066_v24, %v2067_v56  ;;  %v5461_v24 = vld [vmem:[%s5627_s11 + $0x124] sm:$0xf] }
 0x264   : > { %v2640_v28 = vpop.f32.mrf.mxu3 }
 0x265   : > { %v2745_v1 = vadd.f32 %v2640_v28, %v2491_v35  ;;  %4907 = vmatmul.msk.bf16.gmra.mxu2 %vm1163_vm3, %v6820_v54  ;;  %v1798_v16 = vpop.f32.mrf.mxu1  ;;  %v2065_v35 = vsel %vm6150_vm7, %v4877_v22, %v2064_v2  ;;  %v2070_v54 = vrot.slane %v5461_v24, 5  ;;  %v7619_v24 = vld [vmem:[#allocation17_spill] sm:$0xff] }
 0x267   : > { %v6829_v61 = vadd.f32 %v2934_v58, %v2745_v1  ;;  %v2146_v58 = vunpack.c.l.b16 %v2065_v35  ;;  %v2147_v1 = vunpack.c.l.b16 %v2068_v15  ;;  %v6849_v35 = vld [vmem:[%s5627_s11 + $0x12c] sm:$0xff]  ;;  %v2072_v15 = vrot.slane %v2070_v54, 4 }
 0x268   : > { %v2389_v42 = vpop.f32.mrf.mxu2 }
 0x269   : > { %7612 = vst [vmem:[#allocation35_spill] sm:$0xff] %v6829_v61  ;;  %4948 = vmatmul.msk.bf16.gmra.mxu3 %vm1163_vm3, %v5160_v18  ;;  %v2492_v4 = vadd.f32 %v2389_v42, %v1797_v14  ;;  %v1799_v14 = vadd.f32 %v1798_v16, %v7614_v27  ;;  %v6842_v22 = vpack.c.b16 %v2147_v1, %v2146_v58 }
 0x26a   : > { %v2937_v38 = vpop.f32.mrf.mxu0 }
 0x26b   : > { %7616 = vst [vmem:[#allocation88_spill] sm:$0xff] %v6842_v22 }
 0x26c   : > { %v2643_v28 = vpop.f32.mrf.mxu3 }
 0x26d   : > { %4981 = vmatmul.msk.bf16.gmra.mxu0 %vm1163_vm3, %v7613_v52  ;;  %v2746_v34 = vadd.f32 %v2643_v28, %v2492_v4  ;;  %v1801_v26 = vpop.f32.mrf.mxu1  ;;  %v5462_v52 = vld [vmem:[%s5627_s11 + $0x128] sm:$0x1] }
 0x26e   : > { %v2073_v4 = vrot.slane %v5462_v52, 5 }
 0x26f   : > { %v6839_v42 = vadd.f32 %v2937_v38, %v2746_v34  ;;  %v2069_v38 = vrot.slane %v2067_v56, 4 }
 0x270   : > { %v2391_v61 = vpop.f32.mrf.mxu2  ;;  %4859 = vmatmul.msk.bf16.gmra.mxu1 %vm1163_vm3, %v5159_v17  ;;  %v7617_v17 = vld [vmem:[#allocation40_spill] sm:$0xff]  ;;  %v2074_v1 = vsel %vm6150_vm7, %v2072_v15, %v2073_v4 }
 0x271   : > { %7615 = vst [vmem:[#allocation38_spill] sm:$0xff] %v6839_v42  ;;  %v2493_v2 = vadd.f32 %v2391_v61, %v1799_v14  ;;  %v1802_v61 = vadd.f32 %v1801_v26, %v7617_v17  ;;  %v348_v17 = vld [vmem:[%s5627_s11 + $0x144] sm:$0xf] }
 0x272   : > { %v2939_v53 = vpop.f32.mrf.mxu0 }
 0x274   : > { %v2645_v47 = vpop.f32.mrf.mxu3 }
 0x275   : > { %v2747_v28 = vadd.f32 %v2645_v47, %v2493_v2  ;;  %4908 = vmatmul.msk.bf16.gmra.mxu2 %vm1163_vm3, %v6842_v22  ;;  %v1803_v16 = vpop.f32.mrf.mxu1  ;;  %v2071_v47 = vsel %vm6150_vm7, %v2069_v38, %v2070_v54  ;;  %v2149_v2 = vunpack.c.l.b16 %v2074_v1  ;;  %v2782_v1 = vshll.u32 %v348_v17, 16 }
 0x276   : > { %v2148_v14 = vunpack.c.l.b16 %v2071_v47 }
 0x277   : > { %v6852_v58 = vadd.f32 %v2939_v53, %v2747_v28  ;;  %v347_v28 = vld [vmem:[%s5627_s11 + $0x140] sm:$0xf] }
 0x278   : > { %v2394_v34 = vpop.f32.mrf.mxu2  ;;  %v6868_v4 = vpack.c.b16 %v2149_v2, %v2148_v14  ;;  %v2773_v15 = vshrl.u32 %v347_v28, 16  ;;  %v2776_v47 = vshll.u32 %v347_v28, 16 }
 0x279   : > { %7618 = vst [vmem:[#allocation40_spill] sm:$0xff] %v6852_v58  ;;  %4949 = vmatmul.msk.bf16.gmra.mxu3 %vm1163_vm3, %v6849_v35  ;;  %v2494_v52 = vadd.f32 %v2394_v34, %v1802_v61  ;;  %v7620_v58 = vld [vmem:[#allocation43_spill] sm:$0xff] }
 0x27a   : > { %v2942_v27 = vpop.f32.mrf.mxu0  ;;  %v1804_v61 = vadd.f32 %v1803_v16, %v7620_v58  ;;  %7622 = vst [vmem:[#allocation89_spill] sm:$0xff] %v6868_v4  ;;  %v2775_v14 = vrot.slane %v2773_v15, 4  ;;  %v2778_v2 = vrot.slane %v2776_v47, 5 }
 0x27c   : > { %v2648_v56 = vpop.f32.mrf.mxu3 }
 0x27d   : > { %4982 = vmatmul.msk.bf16.gmra.mxu0 %vm1163_vm3, %v7619_v24  ;;  %v2748_v53 = vadd.f32 %v2648_v56, %v2494_v52  ;;  %v1806_v26 = vpop.f32.mrf.mxu1  ;;  %v5463_v56 = vld [vmem:[%s5627_s11 + $0x130] sm:$0xf]  ;;  %v2786_v24 = vshrl.u32 %v348_v17, 16 }
 0x27e   : > { %v2077_v42 = vrot.slane %v5463_v56, 5  ;;  %v7623_v56 = vld [vmem:[#allocation46_spill] sm:$0xff] }
 0x27f   : > { %v6865_v34 = vadd.f32 %v2942_v27, %v2748_v53  ;;  %v6874_v27 = vld [vmem:[%s5627_s11 + $0x134] sm:$0xff]  ;;  %v2784_v53 = vrot.slane %v2782_v1, 5  ;;  %v2788_v40 = vrot.slane %v2786_v24, 4  ;;  %v1807_v17 = vadd.f32 %v1806_v26, %v7623_v56 }
 0x280   : > { %v2396_v54 = vpop.f32.mrf.mxu2  ;;  %4860 = vmatmul.msk.bf16.gmra.mxu1 %vm1163_vm3, %v5160_v18  ;;  %v2792_v1 = vshll.u32 %v349_v8, 16 }
 0x281   : > { %7621 = vst [vmem:[#allocation43_spill] sm:$0xff] %v6865_v34  ;;  %v2495_v38 = vadd.f32 %v2396_v54, %v1804_v61  ;;  %v5464_v61 = vld [vmem:[%s5627_s11 + $0x12c] sm:$0xf]  ;;  %v2079_v54 = vrot.slane %v2077_v42, 4  ;;  %v5465_v34 = vld [vmem:[%s5627_s11 + $0x134] sm:$0xf]  ;;  %v2789_v24 = vor.u32 %v2788_v40, %v2784_v53 }
 0x282   : > { %v2944_v52 = vpop.f32.mrf.mxu0  ;;  %v4878_v28 = vrot.slane %v5464_v61, 9  ;;  %v2080_v22 = vrot.slane %v5465_v34, 5  ;;  %v7625_v61 = vld [vmem:[#allocation20_spill] sm:$0xff] }
 0x284   : > { %v2650_v16 = vpop.f32.mrf.mxu3  ;;  %v2078_v47 = vsel %vm6150_vm7, %v4878_v28, %v2077_v42  ;;  %v2081_v34 = vsel %vm6150_vm7, %v2079_v54, %v2080_v22  ;;  %v350_v28 = vld [vmem:[%s5627_s11 + $0x14c] sm:$0xf] }
 0x285   : > { %v2749_v58 = vadd.f32 %v2650_v16, %v2495_v38  ;;  %4909 = vmatmul.msk.bf16.gmra.mxu2 %vm1163_vm3, %v6868_v4  ;;  %v1808_v18 = vpop.f32.mrf.mxu1  ;;  %v2779_v4 = vor.u32 %v2778_v2, %v2775_v14  ;;  %v2150_v56 = vunpack.c.l.b16 %v2078_v47  ;;  %v2790_v2 = vrot.slane %v2789_v24, 4 }
 0x287   : > { %v6880_v38 = vadd.f32 %v2944_v52, %v2749_v58  ;;  %v2780_v14 = vrot.slane %v2779_v4, 4  ;;  %v2796_v4 = vshrl.u32 %v349_v8, 16 }
 0x288   : > { %v2399_v33 = vpop.f32.mrf.mxu2 }
 0x289   : > { %7624 = vst [vmem:[#allocation46_spill] sm:$0xff] %v6880_v38  ;;  %4950 = vmatmul.msk.bf16.gmra.mxu3 %vm1163_vm3, %v6874_v27  ;;  %v2496_v16 = vadd.f32 %v2399_v33, %v1807_v17  ;;  %v2151_v33 = vunpack.c.l.b16 %v2081_v34  ;;  %v2794_v17 = vrot.slane %v2792_v1, 5  ;;  %v7626_v38 = vld [vmem:[#allocation48_spill] sm:$0xff]  ;;  %v2785_v34 = vsel %vm5647_vm4, %v2780_v14, %v2784_v53 }
 0x28a   : > { %v2947_v15 = vpop.f32.mrf.mxu0  ;;  %v1809_v42 = vadd.f32 %v1808_v18, %v7626_v38  ;;  %v5466_v18 = vld [vmem:[%s5627_s11 + $0x138] sm:$0xf]  ;;  %v2798_v14 = vrot.slane %v2796_v4, 4 }
 0x28b   : > { %v2795_v1 = vsel %vm5647_vm4, %v2790_v2, %v2794_v17  ;;  %v2083_v38 = vrot.slane %v5466_v18, 5  ;;  %v7630_v18 = vld [vmem:[#allocation52_spill] sm:$0xff] }
 0x28c   : > { %v2653_v26 = vpop.f32.mrf.mxu3  ;;  %v2819_v53 = vunpack.c.l.b16 %v2795_v1 }
 0x28d   : > { %4983 = vmatmul.msk.bf16.gmra.mxu0 %vm1163_vm3, %v7625_v61  ;;  %v2750_v52 = vadd.f32 %v2653_v26, %v2496_v16  ;;  %v1811_v58 = vpop.f32.mrf.mxu1  ;;  %v6896_v16 = vpack.c.b16 %v2151_v33, %v2150_v56  ;;  %v2806_v26 = vshrl.u32 %v350_v28, 16  ;;  %v5163_v56 = vld [vmem:[%s5627_s11 + $0x140] sm:$0xff]  ;;  %v2818_v33 = vunpack.c.l.b16 %v2785_v34 }
 0x28e   : > { %v1812_v57 = vadd.f32 %v1811_v58, %v7630_v18 }
 0x28f   : > { %v6892_v32 = vadd.f32 %v2947_v15, %v2750_v52  ;;  %7628 = vst [vmem:[#allocation90_spill] sm:$0xff] %v6896_v16  ;;  %v2802_v15 = vshll.u32 %v350_v28, 16  ;;  %v5467_v52 = vld [vmem:[%s5627_s11 + $0x13c] sm:$0x1]  ;;  %v2808_v12 = vrot.slane %v2806_v26, 4 }
 0x290   : > { %v2401_v40 = vpop.f32.mrf.mxu2  ;;  %4861 = vmatmul.msk.bf16.gmra.mxu1 %vm1163_vm3, %v6849_v35  ;;  %v351_v28 = vld [vmem:[%s5627_s11 + $0x150] sm:$0x1] }
 0x291   : > { %7627 = vst [vmem:[#allocation48_spill] sm:$0xff] %v6892_v32  ;;  %v2497_v54 = vadd.f32 %v2401_v40, %v1809_v42  ;;  %v2086_v32 = vrot.slane %v5467_v52, 5  ;;  %v2082_v42 = vrot.slane %v2080_v22, 4  ;;  %v2085_v40 = vrot.slane %v2083_v38, 4 }
 0x292   : > { %v2949_v24 = vpop.f32.mrf.mxu0  ;;  %v2804_v2 = vrot.slane %v2802_v15, 5  ;;  %v2812_v15 = vshll.u32 %v351_v28, 16 }
 0x293   : > { %v2084_v4 = vsel %vm6150_vm7, %v2082_v42, %v2083_v38  ;;  %v2087_v22 = vsel %vm6150_vm7, %v2085_v40, %v2086_v32 }
 0x294   : > { %v2655_v35 = vpop.f32.mrf.mxu3  ;;  %v2809_v1 = vor.u32 %v2808_v12, %v2804_v2  ;;  %v2152_v26 = vunpack.c.l.b16 %v2084_v4 }
 0x295   : > { %v2751_v61 = vadd.f32 %v2655_v35, %v2497_v54  ;;  %4910 = vmatmul.msk.bf16.gmra.mxu2 %vm1163_vm3, %v6896_v16  ;;  %v1813_v8 = vpop.f32.mrf.mxu1  ;;  %v6912_v54 = vpack.c.b16 %v2819_v53, %v2818_v33  ;;  %v2799_v16 = vor.u32 %v2798_v14, %v2794_v17  ;;  %v2814_v33 = vrot.slane %v2812_v15, 5  ;;  %v7631_v53 = vld [vmem:[#allocation55_spill] sm:$0xff] }
 0x296   : > { %v2810_v17 = vrot.slane %v2809_v1, 4  ;;  %v1814_v14 = vadd.f32 %v1813_v8, %v7631_v53  ;;  %v5164_v8 = vld [vmem:[%s5627_s11 + $0x148] sm:$0xff] }
 0x297   : > { %v6909_v31 = vadd.f32 %v2949_v24, %v2751_v61 }
 0x298   : > { %v2404_v52 = vpop.f32.mrf.mxu2 }
 0x299   : > { %4951 = vmatmul.msk.bf16.gmra.mxu3 %vm1163_vm3, %v5163_v56  ;;  %v2498_v35 = vadd.f32 %v2404_v52, %v1812_v57  ;;  %v2153_v56 = vunpack.c.l.b16 %v2087_v22  ;;  %v2800_v57 = vrot.slane %v2799_v16, 4  ;;  %v2815_v16 = vsel %vm5647_vm4, %v2810_v17, %v2814_v33  ;;  %v7633_v17 = vld [vmem:[#allocation61_spill] sm:$0xff] }
 0x29a   : > { %v2952_v34 = vpop.f32.mrf.mxu0 }
 0x29b   : > { %v6925_v12 = vpack.c.b16 %v2153_v56, %v2152_v26  ;;  %v2805_v18 = vsel %vm5647_vm4, %v2800_v57, %v2804_v2 }
 0x29c   : > { %v2658_v58 = vpop.f32.mrf.mxu3 }
 0x29d   : > { %4984 = vmatmul.msk.bf16.gmra.mxu0 %vm1163_vm3, %v6912_v54  ;;  %v2752_v61 = vadd.f32 %v2658_v58, %v2498_v35  ;;  %v1816_v24 = vpop.f32.mrf.mxu1  ;;  %v2820_v35 = vunpack.c.l.b16 %v2805_v18 }
 0x29f   : > { %v6921_v38 = vadd.f32 %v2952_v34, %v2752_v61  ;;  %v2821_v34 = vunpack.c.l.b16 %v2815_v16  ;;  %v5468_v16 = vld [vmem:[%s5627_s11 + $0x28] sm:$0xff] }
 0x2a0   : > { %v2406_v42 = vpop.f32.mrf.mxu2  ;;  %4862 = vmatmul.msk.bf16.gmra.mxu1 %vm1163_vm3, %v6874_v27  ;;  %v7632_v27 = vld [vmem:[#allocation59_spill] sm:$0xff] }
 0x2a1   : > { %v2499_v32 = vadd.f32 %v2406_v42, %v1814_v14  ;;  %v1817_v22 = vadd.f32 %v1816_v24, %v7632_v27  ;;  %v6938_v2 = vpack.c.b16 %v2821_v34, %v2820_v35  ;;  %v7634_v14 = vld [vmem:[#allocation32_spill] sm:$0xff] }
 0x2a2   : > { %v2954_v40 = vpop.f32.mrf.mxu0 }
 0x2a4   : > { %v2660_v28 = vpop.f32.mrf.mxu3 }
 0x2a5   : > { %v2753_v52 = vadd.f32 %v2660_v28, %v2499_v32  ;;  %4911 = vmatmul.msk.bf16.gmra.mxu2 %vm1163_vm3, %v6925_v12  ;;  %v1818_v4 = vpop.f32.mrf.mxu1 }
 0x2a6   : > { %v1819_v33 = vadd.f32 %v1818_v4, %v7633_v17  ;;  %v7636_v4 = vld [vmem:[#allocation12_spill] sm:$0xff] }
 0x2a7   : > { %v6935_v1 = vadd.f32 %v2954_v40, %v2753_v52  ;;  %v7635_v52 = vld [vmem:[#allocation23_spill] sm:$0xff] }
 0x2a8   : > { %v2409_v15 = vpop.f32.mrf.mxu2 }
 0x2a9   : > { %4952 = vmatmul.msk.bf16.gmra.mxu3 %vm1163_vm3, %v5164_v8  ;;  %v2500_v58 = vadd.f32 %v2409_v15, %v1817_v22 }
 0x2aa   : > { %v2957_v61 = vpop.f32.mrf.mxu0 }
 0x2ac   : > { %v2663_v26 = vpop.f32.mrf.mxu3 }
 0x2ad   : > { %4985 = vmatmul.msk.bf16.gmra.mxu0 %vm1163_vm3, %v6938_v2  ;;  %v2754_v56 = vadd.f32 %v2663_v26, %v2500_v58  ;;  %v1821_v57 = vpop.f32.mrf.mxu1  ;;  %v7637_v58 = vld [vmem:[#allocation41_spill] sm:$0xff] }
 0x2ae   : > { %v1822_v8 = vadd.f32 %v1821_v57, %v7635_v52  ;;  %v7640_v52 = vld [vmem:[#allocation27_spill] sm:$0xff] }
 0x2af   : > { %v6943_v53 = vadd.f32 %v2957_v61, %v2754_v56  ;;  %v7638_v56 = vld [vmem:[#allocation25_spill] sm:$0xff] }
 0x2b0   : > { %v2411_v24 = vpop.f32.mrf.mxu2  ;;  %4988 = vmatmul.msk.bf16.vlgmr.msra.gmra.mxu1 %vm1163_vm3, %v7634_v14 }
 0x2b1   : > { %v2501_v42 = vadd.f32 %v2411_v24, %v1819_v33  ;;  %v7639_v24 = vld [vmem:[#allocation36_spill] sm:$0xff] }
 0x2b2   : > { %v2959_v32 = vpop.f32.mrf.mxu0 }
 0x2b4   : > { %v2665_v40 = vpop.f32.mrf.mxu3 }
 0x2b5   : > { %v2755_v18 = vadd.f32 %v2665_v40, %v2501_v42  ;;  %5029 = vmatmul.msk.bf16.vlgmr.msra.gmra.mxu2 %vm1163_vm3, %v5468_v16  ;;  %v1823_v28 = vpop.f32.mrf.mxu1 }
 0x2b6   : > { %v1824_v17 = vadd.f32 %v1823_v28, %v7638_v56  ;;  %v7641_v28 = vld [vmem:[#allocation15_spill] sm:$0xff] }
 0x2b7   : > { %v6950_v35 = vadd.f32 %v2959_v32, %v2755_v18  ;;  %v5469_v18 = vld [vmem:[%s5627_s11 + $0x30] sm:$0xff] }
 0x2b8   : > { %v2414_v34 = vpop.f32.mrf.mxu2 }
 0x2b9   : > { %5062 = vmatmul.msk.bf16.vlgmr.msra.gmra.mxu3 %vm1163_vm3, %v7636_v4  ;;  %v2502_v27 = vadd.f32 %v2414_v34, %v1822_v8 }
 0x2ba   : > { %v2962_v22 = vpop.f32.mrf.mxu0 }
 0x2bc   : > { %v2668_v15 = vpop.f32.mrf.mxu3 }
 0x2bd   : > { %5096 = vmatmul.msk.bf16.vlgmr.msra.gmra.mxu0 %vm1163_vm3, %v7637_v58  ;;  %v2756_v61 = vadd.f32 %v2668_v15, %v2502_v27  ;;  %v1826_v26 = vpop.f32.mrf.mxu1 }
 0x2be   : > { %v1827_v8 = vadd.f32 %v1826_v26, %v7640_v52  ;;  %v5470_v52 = vld [vmem:[%s5627_s11 + $0x3c] sm:$0xff] }
 0x2bf   : > { %v6957_v33 = vadd.f32 %v2962_v22, %v2756_v61  ;;  %v7642_v61 = vld [vmem:[#allocation45_spill] sm:$0xff] }
 0x2c0   : > { %v2416_v57 = vpop.f32.mrf.mxu2  ;;  %4989 = vmatmul.msk.bf16.gmra.mxu1 %vm1163_vm3, %v7639_v24 }
 0x2c1   : > { %v2503_v14 = vadd.f32 %v2416_v57, %v1824_v17  ;;  %v7643_v57 = vld [vmem:[#allocation29_spill] sm:$0xff] }
 0x2c2   : > { %v2964_v42 = vpop.f32.mrf.mxu0 }
 0x2c4   : > { %v2670_v32 = vpop.f32.mrf.mxu3 }
 0x2c5   : > { %v2757_v40 = vadd.f32 %v2670_v32, %v2503_v14  ;;  %5030 = vmatmul.msk.bf16.gmra.mxu2 %vm1163_vm3, %v5469_v18  ;;  %v1828_v16 = vpop.f32.mrf.mxu1 }
 0x2c6   : > { %v1829_v24 = vadd.f32 %v1828_v16, %v7643_v57  ;;  %v7647_v16 = vld [vmem:[#allocation18_spill] sm:$0xff] }
 0x2c7   : > { %v6964_v34 = vadd.f32 %v2964_v42, %v2757_v40  ;;  %v7648_v57 = vld [vmem:[#allocation50_spill] sm:$0xff] }
 0x2c8   : > { %v2419_v4 = vpop.f32.mrf.mxu2 }
 0x2c9   : > { %5063 = vmatmul.msk.bf16.gmra.mxu3 %vm1163_vm3, %v7641_v28  ;;  %v2504_v27 = vadd.f32 %v2419_v4, %v1827_v8  ;;  %v7645_v4 = vld [vmem:[#allocation31_spill] sm:$0xff] }
 0x2ca   : > { %v2967_v22 = vpop.f32.mrf.mxu0 }
 0x2cc   : > { %v2673_v15 = vpop.f32.mrf.mxu3 }
 0x2cd   : > { %5097 = vmatmul.msk.bf16.gmra.mxu0 %vm1163_vm3, %v7642_v61  ;;  %v2758_v56 = vadd.f32 %v2673_v15, %v2504_v27  ;;  %v1831_v17 = vpop.f32.mrf.mxu1 }
 0x2ce   : > { %v1832_v28 = vadd.f32 %v1831_v17, %v7645_v4 }
 0x2cf   : > { %v6971_v14 = vadd.f32 %v2967_v22, %v2758_v56 }
 0x2d0   : > { %v2421_v26 = vpop.f32.mrf.mxu2  ;;  %4990 = vmatmul.msk.bf16.gmra.mxu1 %vm1163_vm3, %v7637_v58 }
 0x2d1   : > { %7644 = vst [vmem:[#allocation2_spill] sm:$0xff] %v6971_v14  ;;  %v2505_v42 = vadd.f32 %v2421_v26, %v1829_v24 }
 0x2d2   : > { %v2969_v32 = vpop.f32.mrf.mxu0 }
 0x2d4   : > { %v2675_v40 = vpop.f32.mrf.mxu3 }
 0x2d5   : > { %v2759_v18 = vadd.f32 %v2675_v40, %v2505_v42  ;;  %5031 = vmatmul.msk.bf16.gmra.mxu2 %vm1163_vm3, %v5470_v52  ;;  %v1833_v8 = vpop.f32.mrf.mxu1  ;;  %v7649_v42 = vld [vmem:[#allocation34_spill] sm:$0xff] }
 0x2d6   : > { %v1834_v40 = vadd.f32 %v1833_v8, %v7649_v42  ;;  %v7653_v8 = vld [vmem:[#allocation22_spill] sm:$0xff]  ;;  %v7654_v42 = vld [vmem:[#allocation56_spill] sm:$0xff] }
 0x2d7   : > { %v6978_v27 = vadd.f32 %v2969_v32, %v2759_v18 }
 0x2d8   : > { %v2424_v15 = vpop.f32.mrf.mxu2 }
 0x2d9   : > { %7646 = vst [vmem:[#allocation52_spill] sm:$0xff] %v6978_v27  ;;  %5064 = vmatmul.msk.bf16.gmra.mxu3 %vm1163_vm3, %v7647_v16  ;;  %v2506_v22 = vadd.f32 %v2424_v15, %v1832_v28  ;;  %v5471_v28 = vld [vmem:[%s5627_s11 + $0x44] sm:$0xff]  ;;  %v7651_v27 = vld [vmem:[#allocation37_spill] sm:$0xff] }
 0x2da   : > { %v2972_v56 = vpop.f32.mrf.mxu0 }
 0x2dc   : > { %v2678_v58 = vpop.f32.mrf.mxu3 }
 0x2dd   : > { %5098 = vmatmul.msk.bf16.gmra.mxu0 %vm1163_vm3, %v7648_v57  ;;  %v2760_v24 = vadd.f32 %v2678_v58, %v2506_v22  ;;  %v1836_v26 = vpop.f32.mrf.mxu1 }
 0x2de   : > { %v1837_v14 = vadd.f32 %v1836_v26, %v7651_v27 }
 0x2df   : > { %v6985_v52 = vadd.f32 %v2972_v56, %v2760_v24 }
 0x2e0   : > { %v2426_v17 = vpop.f32.mrf.mxu2  ;;  %4991 = vmatmul.msk.bf16.gmra.mxu1 %vm1163_vm3, %v7642_v61 }
 0x2e1   : > { %7650 = vst [vmem:[#allocation55_spill] sm:$0xff] %v6985_v52  ;;  %v2507_v32 = vadd.f32 %v2426_v17, %v1834_v40 }
 0x2e2   : > { %v2974_v18 = vpop.f32.mrf.mxu0 }
 0x2e4   : > { %v2680_v4 = vpop.f32.mrf.mxu3 }
 0x2e5   : > { %v2761_v16 = vadd.f32 %v2680_v4, %v2507_v32  ;;  %5032 = vmatmul.msk.bf16.gmra.mxu2 %vm1163_vm3, %v5471_v28  ;;  %v1838_v15 = vpop.f32.mrf.mxu1  ;;  %v7655_v32 = vld [vmem:[#allocation39_spill] sm:$0xff] }
 0x2e6   : > { %v1839_v4 = vadd.f32 %v1838_v15, %v7655_v32  ;;  %v7659_v15 = vld [vmem:[#allocation3_spill] sm:$0xff]  ;;  %v7660_v32 = vld [vmem:[#allocation62_spill] sm:$0xff] }
 0x2e7   : > { %v6992_v22 = vadd.f32 %v2974_v18, %v2761_v16 }
 0x2e8   : > { %v2429_v58 = vpop.f32.mrf.mxu2 }
 0x2e9   : > { %7652 = vst [vmem:[#allocation59_spill] sm:$0xff] %v6992_v22  ;;  %5065 = vmatmul.msk.bf16.gmra.mxu3 %vm1163_vm3, %v7653_v8  ;;  %v2508_v56 = vadd.f32 %v2429_v58, %v1837_v14  ;;  %v5472_v14 = vld [vmem:[%s5627_s11 + $0x50] sm:$0xff]  ;;  %v7657_v22 = vld [vmem:[#allocation42_spill] sm:$0xff] }
 0x2ea   : > { %v2977_v24 = vpop.f32.mrf.mxu0 }
 0x2ec   : > { %v2683_v61 = vpop.f32.mrf.mxu3 }
 0x2ed   : > { %5099 = vmatmul.msk.bf16.gmra.mxu0 %vm1163_vm3, %v7654_v42  ;;  %v2762_v40 = vadd.f32 %v2683_v61, %v2508_v56  ;;  %v1841_v17 = vpop.f32.mrf.mxu1 }
 0x2ee   : > { %v1842_v52 = vadd.f32 %v1841_v17, %v7657_v22 }
 0x2ef   : > { %v6999_v28 = vadd.f32 %v2977_v24, %v2762_v40 }
 0x2f0   : > { %v2431_v27 = vpop.f32.mrf.mxu2  ;;  %4992 = vmatmul.msk.bf16.gmra.mxu1 %vm1163_vm3, %v7648_v57 }
 0x2f1   : > { %7656 = vst [vmem:[#allocation61_spill] sm:$0xff] %v6999_v28  ;;  %v2509_v26 = vadd.f32 %v2431_v27, %v1839_v4 }
 0x2f2   : > { %v2979_v18 = vpop.f32.mrf.mxu0 }
 0x2f4   : > { %v2685_v16 = vpop.f32.mrf.mxu3 }
 0x2f5   : > { %v2763_v8 = vadd.f32 %v2685_v16, %v2509_v26  ;;  %5033 = vmatmul.msk.bf16.gmra.mxu2 %vm1163_vm3, %v5472_v14  ;;  %v1843_v58 = vpop.f32.mrf.mxu1  ;;  %v7661_v26 = vld [vmem:[#allocation44_spill] sm:$0xff] }
 0x2f6   : > { %v1844_v16 = vadd.f32 %v1843_v58, %v7661_v26  ;;  %v7664_v58 = vld [vmem:[#allocation5_spill] sm:$0xff] }
 0x2f7   : > { %v7006_v56 = vadd.f32 %v2979_v18, %v2763_v8 }
 0x2f8   : > { %v2434_v61 = vpop.f32.mrf.mxu2 }
 0x2f9   : > { %7658 = vst [vmem:[#allocation32_spill] sm:$0xff] %v7006_v56  ;;  %5066 = vmatmul.msk.bf16.gmra.mxu3 %vm1163_vm3, %v7659_v15  ;;  %v2510_v24 = vadd.f32 %v2434_v61, %v1842_v52  ;;  %v5473_v52 = vld [vmem:[%s5627_s11 + $0x58] sm:$0xff]  ;;  %v7662_v56 = vld [vmem:[#allocation47_spill] sm:$0xff] }
 0x2fa   : > { %v2982_v40 = vpop.f32.mrf.mxu0 }
 0x2fc   : > { %v2688_v57 = vpop.f32.mrf.mxu3 }
 0x2fd   : > { %5100 = vmatmul.msk.bf16.gmra.mxu0 %vm1163_vm3, %v7660_v32  ;;  %v2764_v4 = vadd.f32 %v2688_v57, %v2510_v24  ;;  %v1846_v27 = vpop.f32.mrf.mxu1 }
 0x2fe   : > { %v1847_v28 = vadd.f32 %v1846_v27, %v7662_v56 }
 0x2ff   : > { %v7013_v14 = vadd.f32 %v2982_v40, %v2764_v4 }
 0x300   : > { %v2436_v22 = vpop.f32.mrf.mxu2  ;;  %4993 = vmatmul.msk.bf16.gmra.mxu1 %vm1163_vm3, %v7654_v42 }
 0x301   : > { %v2511_v17 = vadd.f32 %v2436_v22, %v1844_v16  ;;  %v7665_v22 = vld [vmem:[#allocation49_spill] sm:$0xff] }
 0x302   : > { %v2984_v18 = vpop.f32.mrf.mxu0 }
 0x304   : > { %v2690_v8 = vpop.f32.mrf.mxu3 }
 0x305   : > { %v2765_v15 = vadd.f32 %v2690_v8, %v2511_v17  ;;  %5034 = vmatmul.msk.bf16.gmra.mxu2 %vm1163_vm3, %v5473_v52  ;;  %v1848_v61 = vpop.f32.mrf.mxu1 }
 0x306   : > { %v1849_v17 = vadd.f32 %v1848_v61, %v7665_v22  ;;  %v7668_v61 = vld [vmem:[#allocation7_spill] sm:$0xff] }
 0x307   : > { %v7020_v24 = vadd.f32 %v2984_v18, %v2765_v15 }
 0x308   : > { %v2439_v57 = vpop.f32.mrf.mxu2 }
 0x309   : > { %7663 = vst [vmem:[#allocation23_spill] sm:$0xff] %v7020_v24  ;;  %5067 = vmatmul.msk.bf16.gmra.mxu3 %vm1163_vm3, %v7664_v58  ;;  %v2512_v40 = vadd.f32 %v2439_v57, %v1847_v28  ;;  %v5474_v28 = vld [vmem:[%s5627_s11 + $0x64] sm:$0xff]  ;;  %v7666_v58 = vld [vmem:[#allocation53_spill] sm:$0xff] }
 0x30a   : > { %v2987_v4 = vpop.f32.mrf.mxu0 }
 0x30c   : > { %v2693_v42 = vpop.f32.mrf.mxu3 }
 0x30d   : > { %5101 = vmatmul.msk.bf16.gmra.mxu0 %vm1163_vm3, %v6433_v51  ;;  %v2766_v26 = vadd.f32 %v2693_v42, %v2512_v40  ;;  %v1851_v16 = vpop.f32.mrf.mxu1 }
 0x30e   : > { %v1852_v24 = vadd.f32 %v1851_v16, %v7666_v58 }
 0x30f   : > { %v7027_v8 = vadd.f32 %v2987_v4, %v2766_v26 }
 0x310   : > { %v2441_v56 = vpop.f32.mrf.mxu2  ;;  %4994 = vmatmul.msk.bf16.gmra.mxu1 %vm1163_vm3, %v7660_v32 }
 0x311   : > { %v2513_v27 = vadd.f32 %v2441_v56, %v1849_v17  ;;  %v7669_v56 = vld [vmem:[#allocation57_spill] sm:$0xff] }
 0x312   : > { %v2989_v18 = vpop.f32.mrf.mxu0 }
 0x314   : > { %v2695_v15 = vpop.f32.mrf.mxu3 }
 0x315   : > { %v2767_v52 = vadd.f32 %v2695_v15, %v2513_v27  ;;  %5035 = vmatmul.msk.bf16.gmra.mxu2 %vm1163_vm3, %v5474_v28  ;;  %v1853_v57 = vpop.f32.mrf.mxu1 }
 0x316   : > { %v1854_v27 = vadd.f32 %v1853_v57, %v7669_v56  ;;  %v7671_v57 = vld [vmem:[#allocation9_spill] sm:$0xff] }
 0x317   : > { %v7034_v40 = vadd.f32 %v2989_v18, %v2767_v52 }
 0x318   : > { %v2444_v42 = vpop.f32.mrf.mxu2 }
 0x319   : > { %7667 = vst [vmem:[#allocation12_spill] sm:$0xff] %v7034_v40  ;;  %5068 = vmatmul.msk.bf16.gmra.mxu3 %vm1163_vm3, %v7668_v61  ;;  %v2514_v4 = vadd.f32 %v2444_v42, %v1852_v24  ;;  %v5475_v24 = vld [vmem:[%s5627_s11 + $0x6c] sm:$0xff] }
 0x31a   : > { %v2992_v26 = vpop.f32.mrf.mxu0  ;;  %v7670_v61 = vld [vmem:[#allocation60_spill] sm:$0xff] }
 0x31c   : > { %v2698_v32 = vpop.f32.mrf.mxu3 }
 0x31d   : > { %5102 = vmatmul.msk.bf16.gmra.mxu0 %vm1163_vm3, %v6455_v43  ;;  %v2768_v22 = vadd.f32 %v2698_v32, %v2514_v4  ;;  %v1856_v17 = vpop.f32.mrf.mxu1 }
 0x31e   : > { %v1857_v40 = vadd.f32 %v1856_v17, %v7670_v61  ;;  %v5476_v61 = vld [vmem:[%s5627_s11 + $0x78] sm:$0xff] }
 0x31f   : > { %v7041_v15 = vadd.f32 %v2992_v26, %v2768_v22 }
 0x320   : > { %v2446_v16 = vpop.f32.mrf.mxu2  ;;  %4995 = vmatmul.msk.bf16.gmra.mxu1 %vm1163_vm3, %v6433_v51 }
 0x321   : > { %v2515_v18 = vadd.f32 %v2446_v16, %v1854_v27  ;;  %v7672_v16 = vld [vmem:[#allocation63_spill] sm:$0xff] }
 0x322   : > { %v2994_v52 = vpop.f32.mrf.mxu0 }
 0x324   : > { %v2700_v28 = vpop.f32.mrf.mxu3 }
 0x325   : > { %v2769_v58 = vadd.f32 %v2700_v28, %v2515_v18  ;;  %5036 = vmatmul.msk.bf16.gmra.mxu2 %vm1163_vm3, %v5475_v24  ;;  %v1858_v42 = vpop.f32.mrf.mxu1 }
 0x326   : > { %v1859_v18 = vadd.f32 %v1858_v42, %v7672_v16  ;;  %v7674_v42 = vld [vmem:[#allocation64_spill] sm:$0xff] }
 0x327   : > { %v7048_v4 = vadd.f32 %v2994_v52, %v2769_v58 }
 0x328   : > { %v2449_v32 = vpop.f32.mrf.mxu2 }
 0x329   : > { %5069 = vmatmul.msk.bf16.gmra.mxu3 %vm1163_vm3, %v7671_v57  ;;  %v2516_v26 = vadd.f32 %v2449_v32, %v1857_v40 }
 0x32a   : > { %v2997_v22 = vpop.f32.mrf.mxu0 }
 0x32c   : > { %v2703_v51 = vpop.f32.mrf.mxu3 }
 0x32d   : > { %5103 = vmatmul.msk.bf16.gmra.mxu0 %vm1163_vm3, %v6476_v0  ;;  %v2770_v56 = vadd.f32 %v2703_v51, %v2516_v26  ;;  %v3106_v27 = vpop.f32.mrf.mxu1 }
 0x32f   : > { %v7055_v28 = vadd.f32 %v2997_v22, %v2770_v56  ;;  %v3266_v22 = vadd.f32 %v3106_v27, %v7674_v42 }
 0x330   : > { %v2451_v17 = vpop.f32.mrf.mxu2  ;;  %4996 = vmatmul.msk.bf16.gmra.mxu1 %vm1163_vm3, %v6455_v43 }
 0x331   : > { %v2517_v52 = vadd.f32 %v2451_v17, %v1859_v18  ;;  %v7675_v18 = vld [vmem:[#allocation65_spill] sm:$0xff] }
 0x332   : > { %v2999_v58 = vpop.f32.mrf.mxu0 }
 0x334   : > { %v2705_v24 = vpop.f32.mrf.mxu3 }
 0x335   : > { %v2771_v40 = vadd.f32 %v2705_v24, %v2517_v52  ;;  %5037 = vmatmul.msk.bf16.gmra.mxu2 %vm1163_vm3, %v5476_v61  ;;  %v3108_v32 = vpop.f32.mrf.mxu1 }
 0x336   : > { %v3267_v17 = vadd.f32 %v3108_v32, %v7675_v18 }
 0x337   : > { %v7062_v57 = vadd.f32 %v2999_v58, %v2771_v40 }
 0x338   : > { %v3360_v26 = vpop.f32.mrf.mxu2 }
 0x339   : > { %7673 = vst [vmem:[#allocation41_spill] sm:$0xff] %v7062_v57  ;;  %5070 = vmatmul.msk.bf16.gmra.mxu3 %vm1163_vm3, %v5899_v60  ;;  %v3520_v43 = vadd.f32 %v3360_v26, %v3266_v22  ;;  %v5477_v26 = vld [vmem:[%s5627_s11 + $0x80] sm:$0xff] }
 0x33a   : > { %v3918_v51 = vpop.f32.mrf.mxu0 }
 0x33c   : > { %v3654_v56 = vpop.f32.mrf.mxu3 }
 0x33d   : > { %5104 = vmatmul.msk.bf16.gmra.mxu0 %vm1163_vm3, %v6498_v55  ;;  %v3111_v16 = vpop.f32.mrf.mxu1  ;;  %v3814_v52 = vadd.f32 %v3654_v56, %v3520_v43 }
 0x33e   : > { %v3268_v32 = vadd.f32 %v3111_v16, %v6452_v48 }
 0x33f   : > { %v4078_v24 = vadd.f32 %v3918_v51, %v3814_v52 }
 0x340   : > { %v3362_v58 = vpop.f32.mrf.mxu2  ;;  %4997 = vmatmul.msk.bf16.gmra.mxu1 %vm1163_vm3, %v6476_v0 }
 0x341   : > { %v3521_v60 = vadd.f32 %v3362_v58, %v3267_v17  ;;  %v4340_v18 = vmul.f32 %v4078_v24, %v4078_v24 }
 0x342   : > { %v3920_v27 = vpop.f32.mrf.mxu0 }
 0x344   : > { %v3656_v40 = vpop.f32.mrf.mxu3 }
 0x345   : > { %v3815_v61 = vadd.f32 %v3656_v40, %v3521_v60  ;;  %5038 = vmatmul.msk.bf16.gmra.mxu2 %vm1163_vm3, %v5477_v26  ;;  %v3113_v42 = vpop.f32.mrf.mxu1 }
 0x346   : > { %v3269_v40 = vadd.f32 %v3113_v42, %v6463_v13 }
 0x347   : > { %v4079_v22 = vadd.f32 %v3920_v27, %v3815_v61 }
 0x348   : > { %v3365_v0 = vpop.f32.mrf.mxu2 }
 0x349   : > { %v5170_v43 = vpack.c.bf16 %v4079_v22, %v4078_v24  ;;  %v4270_v51 = vadd.f32 %v4079_v22, %v4078_v24  ;;  %v4341_v56 = vmul.f32 %v4079_v22, %v4079_v22  ;;  %5071 = vmatmul.msk.bf16.gmra.mxu3 %vm1163_vm3, %v5962_v20  ;;  %v3522_v17 = vadd.f32 %v3365_v0, %v3268_v32 }
 0x34a   : > { %v3923_v52 = vpop.f32.mrf.mxu0 }
 0x34b   : > { %5171 = vst [vmem:[%s7079_s7] sm:$0xff] %v5170_v43   ;;  %v4404_v58 = vadd.f32 %v4341_v56, %v4340_v18  ;;  %v5478_v43 = vld [vmem:[%s5627_s11 + $0x8c] sm:$0xff] }
 0x34c   : > { %v3659_v48 = vpop.f32.mrf.mxu3 }
 0x34d   : > { %5105 = vmatmul.msk.bf16.gmra.mxu0 %vm1163_vm3, %v6519_v59  ;;  %v3816_v16 = vadd.f32 %v3659_v48, %v3522_v17  ;;  %v3116_v60 = vpop.f32.mrf.mxu1 }
 0x34f   : > { %v4080_v27 = vadd.f32 %v3923_v52, %v3816_v16  ;;  %v7676_v52 = vld [vmem:[#allocation66_spill] sm:$0xff] }
 0x350   : > { %v3367_v61 = vpop.f32.mrf.mxu2  ;;  %4998 = vmatmul.msk.bf16.gmra.mxu1 %vm1163_vm3, %v6498_v55  ;;  %v3270_v48 = vadd.f32 %v3116_v60, %v7676_v52  ;;  %v7677_v60 = vld [vmem:[#allocation67_spill] sm:$0xff] }
 0x351   : > { %v4271_v24 = vadd.f32 %v4270_v51, %v4080_v27  ;;  %v4342_v20 = vmul.f32 %v4080_v27, %v4080_v27  ;;  %v3523_v26 = vadd.f32 %v3367_v61, %v3269_v40 }
 0x352   : > { %v3925_v22 = vpop.f32.mrf.mxu0 }
 0x353   : > { %v4405_v32 = vadd.f32 %v4404_v58, %v4342_v20 }
 0x354   : > { %v3661_v18 = vpop.f32.mrf.mxu3 }
 0x355   : > { %v3817_v0 = vadd.f32 %v3661_v18, %v3523_v26  ;;  %5039 = vmatmul.msk.bf16.gmra.mxu2 %vm1163_vm3, %v5478_v43  ;;  %v3118_v56 = vpop.f32.mrf.mxu1 }
 0x357   : > { %v4081_v17 = vadd.f32 %v3925_v22, %v3817_v0  ;;  %v3271_v22 = vadd.f32 %v3118_v56, %v7677_v60 }
 0x358   : > { %v3370_v13 = vpop.f32.mrf.mxu2 }
 0x359   : > { %v5175_v42 = vpack.c.bf16 %v4081_v17, %v4080_v27  ;;  %v4272_v16 = vadd.f32 %v4271_v24, %v4081_v17  ;;  %v4343_v57 = vmul.f32 %v4081_v17, %v4081_v17  ;;  %5072 = vmatmul.msk.bf16.gmra.mxu3 %vm1163_vm3, %v6029_v23  ;;  %v3524_v55 = vadd.f32 %v3370_v13, %v3270_v48  ;;  %v5479_v17 = vld [vmem:[%s5627_s11 + $0x94] sm:$0xff] }
 0x35a   : > { %v3928_v51 = vpop.f32.mrf.mxu0 }
 0x35b   : > { %5327 = vst [vmem:[%s7079_s7 + $0x8] sm:$0xff] %v5175_v42   ;;  %v4406_v58 = vadd.f32 %v4405_v32, %v4343_v57 }
 0x35c   : > { %v3664_v40 = vpop.f32.mrf.mxu3 }
 0x35d   : > { %5106 = vmatmul.msk.bf16.gmra.mxu0 %vm1163_vm3, %v6541_v46  ;;  %v3818_v61 = vadd.f32 %v3664_v40, %v3524_v55  ;;  %v3121_v20 = vpop.f32.mrf.mxu1 }
 0x35e   : > { %v3272_v13 = vadd.f32 %v3121_v20, %v6495_v49 }
 0x35f   : > { %v4082_v26 = vadd.f32 %v3928_v51, %v3818_v61 }
 0x360   : > { %v3372_v27 = vpop.f32.mrf.mxu2  ;;  %4999 = vmatmul.msk.bf16.gmra.mxu1 %vm1163_vm3, %v6519_v59 }
 0x361   : > { %v4273_v24 = vadd.f32 %v4272_v16, %v4082_v26  ;;  %v4344_v23 = vmul.f32 %v4082_v26, %v4082_v26  ;;  %v3525_v18 = vadd.f32 %v3372_v27, %v3271_v22 }
 0x362   : > { %v3930_v0 = vpop.f32.mrf.mxu0 }
 0x363   : > { %v4407_v57 = vadd.f32 %v4406_v58, %v4344_v23 }
 0x364   : > { %v3666_v32 = vpop.f32.mrf.mxu3 }
 0x365   : > { %v3819_v43 = vadd.f32 %v3666_v32, %v3525_v18  ;;  %5040 = vmatmul.msk.bf16.gmra.mxu2 %vm1163_vm3, %v5479_v17  ;;  %v3123_v52 = vpop.f32.mrf.mxu1  ;;  %v7678_v17 = vld [vmem:[#allocation68_spill] sm:$0xff] }
 0x366   : > { %v3273_v49 = vadd.f32 %v3123_v52, %v6506_v6 }
 0x367   : > { %v4083_v48 = vadd.f32 %v3930_v0, %v3819_v43 }
 0x368   : > { %v3375_v56 = vpop.f32.mrf.mxu2 }
 0x369   : > { %v5180_v42 = vpack.c.bf16 %v4083_v48, %v4082_v26  ;;  %v4274_v55 = vadd.f32 %v4273_v24, %v4083_v48  ;;  %v4345_v51 = vmul.f32 %v4083_v48, %v4083_v48  ;;  %5073 = vmatmul.msk.bf16.gmra.mxu3 %vm1163_vm3, %v6102_v30  ;;  %v3526_v59 = vadd.f32 %v3375_v56, %v3272_v13 }
 0x36a   : > { %v3933_v16 = vpop.f32.mrf.mxu0 }
 0x36b   : > { %5328 = vst [vmem:[%s7079_s7 + $0x10] sm:$0xff] %v5180_v42   ;;  %v4408_v58 = vadd.f32 %v4407_v57, %v4345_v51  ;;  %v5480_v57 = vld [vmem:[%s5627_s11 + $0xa0] sm:$0xff] }
 0x36c   : > { %v3669_v40 = vpop.f32.mrf.mxu3 }
 0x36d   : > { %5107 = vmatmul.msk.bf16.gmra.mxu0 %vm1163_vm3, %v6562_v45  ;;  %v3820_v61 = vadd.f32 %v3669_v40, %v3526_v59  ;;  %v3126_v60 = vpop.f32.mrf.mxu1  ;;  %v7679_v40 = vld [vmem:[#allocation69_spill] sm:$0xff] }
 0x36e   : > { %v3274_v48 = vadd.f32 %v3126_v60, %v7678_v17 }
 0x36f   : > { %v4084_v22 = vadd.f32 %v3933_v16, %v3820_v61 }
 0x370   : > { %v3377_v20 = vpop.f32.mrf.mxu2  ;;  %5000 = vmatmul.msk.bf16.gmra.mxu1 %vm1163_vm3, %v6541_v46 }
 0x371   : > { %v4275_v26 = vadd.f32 %v4274_v55, %v4084_v22  ;;  %v4346_v30 = vmul.f32 %v4084_v22, %v4084_v22  ;;  %v3527_v27 = vadd.f32 %v3377_v20, %v3273_v49 }
 0x372   : > { %v3935_v24 = vpop.f32.mrf.mxu0 }
 0x373   : > { %v4409_v23 = vadd.f32 %v4408_v58, %v4346_v30 }
 0x374   : > { %v3671_v18 = vpop.f32.mrf.mxu3 }
 0x375   : > { %v3821_v0 = vadd.f32 %v3671_v18, %v3527_v27  ;;  %5041 = vmatmul.msk.bf16.gmra.mxu2 %vm1163_vm3, %v5480_v57  ;;  %v3128_v32 = vpop.f32.mrf.mxu1 }
 0x376   : > { %v3275_v61 = vadd.f32 %v3128_v32, %v7679_v40 }
 0x377   : > { %v4085_v43 = vadd.f32 %v3935_v24, %v3821_v0  ;;  %v5481_v24 = vld [vmem:[%s5627_s11 + $0xa8] sm:$0xff] }
 0x378   : > { %v3380_v6 = vpop.f32.mrf.mxu2 }
 0x379   : > { %v5185_v52 = vpack.c.bf16 %v4085_v43, %v4084_v22  ;;  %v4276_v13 = vadd.f32 %v4275_v26, %v4085_v43  ;;  %v4347_v56 = vmul.f32 %v4085_v43, %v4085_v43  ;;  %5074 = vmatmul.msk.bf16.gmra.mxu3 %vm1163_vm3, %v5681_v19  ;;  %v3528_v46 = vadd.f32 %v3380_v6, %v3274_v48 }
 0x37a   : > { %v3938_v42 = vpop.f32.mrf.mxu0 }
 0x37b   : > { %5329 = vst [vmem:[%s7079_s7 + $0x18] sm:$0xff] %v5185_v52   ;;  %v4410_v55 = vadd.f32 %v4409_v23, %v4347_v56 }
 0x37c   : > { %v3674_v51 = vpop.f32.mrf.mxu3 }
 0x37d   : > { %5108 = vmatmul.msk.bf16.gmra.mxu0 %vm1163_vm3, %v6584_v9  ;;  %v3822_v59 = vadd.f32 %v3674_v51, %v3528_v46  ;;  %v3131_v16 = vpop.f32.mrf.mxu1 }
 0x37e   : > { %v3276_v0 = vadd.f32 %v3131_v16, %v6538_v21 }
 0x37f   : > { %v4086_v58 = vadd.f32 %v3938_v42, %v3822_v59 }
 0x380   : > { %v3382_v60 = vpop.f32.mrf.mxu2  ;;  %5001 = vmatmul.msk.bf16.gmra.mxu1 %vm1163_vm3, %v6562_v45 }
 0x381   : > { %v4277_v22 = vadd.f32 %v4276_v13, %v4086_v58  ;;  %v4348_v19 = vmul.f32 %v4086_v58, %v4086_v58  ;;  %v3529_v49 = vadd.f32 %v3382_v60, %v3275_v61  ;;  %v5482_v61 = vld [vmem:[%s5627_s11 + $0xb4] sm:$0xff] }
 0x382   : > { %v3940_v20 = vpop.f32.mrf.mxu0 }
 0x383   : > { %v4411_v26 = vadd.f32 %v4410_v55, %v4348_v19 }
 0x384   : > { %v3676_v30 = vpop.f32.mrf.mxu3 }
 0x385   : > { %v3823_v27 = vadd.f32 %v3676_v30, %v3529_v49  ;;  %5042 = vmatmul.msk.bf16.gmra.mxu2 %vm1163_vm3, %v5481_v24  ;;  %v3133_v23 = vpop.f32.mrf.mxu1 }
 0x386   : > { %v3277_v21 = vadd.f32 %v3133_v23, %v6549_v39 }
 0x387   : > { %v4087_v18 = vadd.f32 %v3940_v20, %v3823_v27 }
 0x388   : > { %v3385_v57 = vpop.f32.mrf.mxu2 }
 0x389   : > { %v5190_v32 = vpack.c.bf16 %v4087_v18, %v4086_v58  ;;  %v4278_v43 = vadd.f32 %v4277_v22, %v4087_v18  ;;  %v4349_v17 = vmul.f32 %v4087_v18, %v4087_v18  ;;  %5075 = vmatmul.msk.bf16.gmra.mxu3 %vm1163_vm3, %v5728_v37  ;;  %v3530_v45 = vadd.f32 %v3385_v57, %v3276_v0 }
 0x38a   : > { %v3943_v48 = vpop.f32.mrf.mxu0 }
 0x38b   : > { %5330 = vst [vmem:[%s7079_s7 + $0x20] sm:$0xff] %v5190_v32   ;;  %v4412_v6 = vadd.f32 %v4411_v26, %v4349_v17 }
 0x38c   : > { %v3679_v52 = vpop.f32.mrf.mxu3 }
 0x38d   : > { %5109 = vmatmul.msk.bf16.gmra.mxu0 %vm1163_vm3, %v6605_v5  ;;  %v3824_v13 = vadd.f32 %v3679_v52, %v3530_v45  ;;  %v3136_v56 = vpop.f32.mrf.mxu1  ;;  %v5483_v52 = vld [vmem:[%s5627_s11 + $0xbc] sm:$0xff] }
 0x38e   : > { %v3278_v19 = vadd.f32 %v3136_v56, %v6559_v29 }
 0x38f   : > { %v4088_v46 = vadd.f32 %v3943_v48, %v3824_v13 }
 0x390   : > { %v3387_v42 = vpop.f32.mrf.mxu2  ;;  %5002 = vmatmul.msk.bf16.gmra.mxu1 %vm1163_vm3, %v6584_v9 }
 0x391   : > { %v4279_v55 = vadd.f32 %v4278_v43, %v4088_v46  ;;  %v4350_v37 = vmul.f32 %v4088_v46, %v4088_v46  ;;  %v3531_v51 = vadd.f32 %v3387_v42, %v3277_v21 }
 0x392   : > { %v3945_v59 = vpop.f32.mrf.mxu0 }
 0x393   : > { %v4413_v16 = vadd.f32 %v4412_v6, %v4350_v37 }
 0x394   : > { %v3681_v58 = vpop.f32.mrf.mxu3 }
 0x395   : > { %v3825_v40 = vadd.f32 %v3681_v58, %v3531_v51  ;;  %5043 = vmatmul.msk.bf16.gmra.mxu2 %vm1163_vm3, %v5482_v61  ;;  %v3138_v60 = vpop.f32.mrf.mxu1 }
 0x396   : > { %v3279_v29 = vadd.f32 %v3138_v60, %v6571_v44 }
 0x397   : > { %v4089_v22 = vadd.f32 %v3945_v59, %v3825_v40 }
 0x398   : > { %v3390_v39 = vpop.f32.mrf.mxu2 }
 0x399   : > { %v5195_v49 = vpack.c.bf16 %v4089_v22, %v4088_v46  ;;  %v4280_v20 = vadd.f32 %v4279_v55, %v4089_v22  ;;  %v4351_v26 = vmul.f32 %v4089_v22, %v4089_v22  ;;  %5076 = vmatmul.msk.bf16.gmra.mxu3 %vm1163_vm3, %v5791_v11  ;;  %v3532_v9 = vadd.f32 %v3390_v39, %v3278_v19 }
 0x39a   : > { %v3948_v30 = vpop.f32.mrf.mxu0 }
 0x39b   : > { %5331 = vst [vmem:[%s7079_s7 + $0x28] sm:$0xff] %v5195_v49   ;;  %v4414_v27 = vadd.f32 %v4413_v16, %v4351_v26  ;;  %v5484_v26 = vld [vmem:[%s5627_s11 + $0xc8] sm:$0xff] }
 0x39c   : > { %v3684_v24 = vpop.f32.mrf.mxu3 }
 0x39d   : > { %5110 = vmatmul.msk.bf16.gmra.mxu0 %vm1163_vm3, %v6627_v7  ;;  %v3826_v23 = vadd.f32 %v3684_v24, %v3532_v9  ;;  %v3141_v18 = vpop.f32.mrf.mxu1 }
 0x39e   : > { %v3280_v46 = vadd.f32 %v3141_v18, %v6581_v63 }
 0x39f   : > { %v4090_v0 = vadd.f32 %v3948_v30, %v3826_v23 }
 0x3a0   : > { %v3392_v57 = vpop.f32.mrf.mxu2  ;;  %5003 = vmatmul.msk.bf16.gmra.mxu1 %vm1163_vm3, %v6605_v5 }
 0x3a1   : > { %v4281_v32 = vadd.f32 %v4280_v20, %v4090_v0  ;;  %v4352_v11 = vmul.f32 %v4090_v0, %v4090_v0  ;;  %v3533_v43 = vadd.f32 %v3392_v57, %v3279_v29 }
 0x3a2   : > { %v3950_v17 = vpop.f32.mrf.mxu0 }
 0x3a3   : > { %v4415_v45 = vadd.f32 %v4414_v27, %v4352_v11  ;;  %v7680_v27 = vld [vmem:[#allocation70_spill] sm:$0xff] }
 0x3a4   : > { %v3686_v48 = vpop.f32.mrf.mxu3 }
 0x3a5   : > { %v3827_v6 = vadd.f32 %v3686_v48, %v3533_v43  ;;  %5044 = vmatmul.msk.bf16.gmra.mxu2 %vm1163_vm3, %v5483_v52  ;;  %v3143_v13 = vpop.f32.mrf.mxu1 }
 0x3a6   : > { %v3281_v63 = vadd.f32 %v3143_v13, %v6592_v62 }
 0x3a7   : > { %v4091_v56 = vadd.f32 %v3950_v17, %v3827_v6 }
 0x3a8   : > { %v3395_v44 = vpop.f32.mrf.mxu2 }
 0x3a9   : > { %v5200_v21 = vpack.c.bf16 %v4091_v56, %v4090_v0  ;;  %v4282_v42 = vadd.f32 %v4281_v32, %v4091_v56  ;;  %v4353_v55 = vmul.f32 %v4091_v56, %v4091_v56  ;;  %5077 = vmatmul.msk.bf16.gmra.mxu3 %vm1163_vm3, %v5855_v50  ;;  %v3534_v5 = vadd.f32 %v3395_v44, %v3280_v46 }
 0x3aa   : > { %v3953_v37 = vpop.f32.mrf.mxu0 }
 0x3ab   : > { %5332 = vst [vmem:[%s7079_s7 + $0x30] sm:$0xff] %v5200_v21   ;;  %v4416_v51 = vadd.f32 %v4415_v45, %v4353_v55  ;;  %v7681_v45 = vld [vmem:[#allocation71_spill] sm:$0xff] }
 0x3ac   : > { %v3689_v59 = vpop.f32.mrf.mxu3 }
 0x3ad   : > { %5111 = vmatmul.msk.bf16.gmra.mxu0 %vm1163_vm3, %v6648_v36  ;;  %v3828_v16 = vadd.f32 %v3689_v59, %v3534_v5  ;;  %v3146_v58 = vpop.f32.mrf.mxu1 }
 0x3ae   : > { %v3282_v24 = vadd.f32 %v3146_v58, %v7680_v27 }
 0x3af   : > { %v4092_v40 = vadd.f32 %v3953_v37, %v3828_v16 }
 0x3b0   : > { %v3397_v61 = vpop.f32.mrf.mxu2  ;;  %5004 = vmatmul.msk.bf16.gmra.mxu1 %vm1163_vm3, %v6627_v7 }
 0x3b1   : > { %v4283_v60 = vadd.f32 %v4282_v42, %v4092_v40  ;;  %v4354_v50 = vmul.f32 %v4092_v40, %v4092_v40  ;;  %v3535_v22 = vadd.f32 %v3397_v61, %v3281_v63  ;;  %v5485_v42 = vld [vmem:[%s5627_s11 + $0xd0] sm:$0xff] }
 0x3b2   : > { %v3955_v19 = vpop.f32.mrf.mxu0 }
 0x3b3   : > { %v4417_v39 = vadd.f32 %v4416_v51, %v4354_v50  ;;  %v7683_v50 = vld [vmem:[#allocation78_spill] sm:$0xff] }
 0x3b4   : > { %v3691_v49 = vpop.f32.mrf.mxu3 }
 0x3b5   : > { %v3829_v20 = vadd.f32 %v3691_v49, %v3535_v22  ;;  %5045 = vmatmul.msk.bf16.gmra.mxu2 %vm1163_vm3, %v5484_v26  ;;  %v3148_v9 = vpop.f32.mrf.mxu1 }
 0x3b6   : > { %v3283_v48 = vadd.f32 %v3148_v9, %v7681_v45 }
 0x3b7   : > { %v4093_v30 = vadd.f32 %v3955_v19, %v3829_v20 }
 0x3b8   : > { %v3400_v62 = vpop.f32.mrf.mxu2 }
 0x3b9   : > { %v5205_v23 = vpack.c.bf16 %v4093_v30, %v4092_v40  ;;  %v4284_v18 = vadd.f32 %v4283_v60, %v4093_v30  ;;  %v4355_v0 = vmul.f32 %v4093_v30, %v4093_v30  ;;  %5078 = vmatmul.msk.bf16.gmra.mxu3 %vm1163_vm3, %v5920_v25  ;;  %v3536_v7 = vadd.f32 %v3400_v62, %v3282_v24 }
 0x3ba   : > { %v3958_v29 = vpop.f32.mrf.mxu0 }
 0x3bb   : > { %5333 = vst [vmem:[%s7079_s7 + $0x38] sm:$0xff] %v5205_v23   ;;  %v4418_v57 = vadd.f32 %v4417_v39, %v4355_v0 }
 0x3bc   : > { %v3694_v32 = vpop.f32.mrf.mxu3 }
 0x3bd   : > { %5112 = vmatmul.msk.bf16.gmra.mxu0 %vm1163_vm3, %v6670_v3  ;;  %v3830_v11 = vadd.f32 %v3694_v32, %v3536_v7  ;;  %v3151_v43 = vpop.f32.mrf.mxu1 }
 0x3be   : > { %v3284_v37 = vadd.f32 %v3151_v43, %v6624_v10  ;;  %v7684_v10 = vld [vmem:[#allocation72_spill] sm:$0xff] }
 0x3bf   : > { %v4094_v17 = vadd.f32 %v3958_v29, %v3830_v11  ;;  %v7685_v29 = vld [vmem:[#allocation73_spill] sm:$0xff] }
 0x3c0   : > { %v3402_v6 = vpop.f32.mrf.mxu2  ;;  %5005 = vmatmul.msk.bf16.gmra.mxu1 %vm1163_vm3, %v6648_v36  ;;  %v7682_v36 = vld [vmem:[#allocation13_spill] sm:$0xff] }
 0x3c1   : > { %v4285_v52 = vadd.f32 %v4284_v18, %v4094_v17  ;;  %v4356_v25 = vmul.f32 %v4094_v17, %v4094_v17  ;;  %v3537_v13 = vadd.f32 %v3402_v6, %v3283_v48  ;;  %v5486_v18 = vld [vmem:[%s5627_s11 + $0xdc] sm:$0xff] }
 0x3c2   : > { %v3960_v56 = vpop.f32.mrf.mxu0 }
 0x3c3   : > { %v4419_v46 = vadd.f32 %v4418_v57, %v4356_v25  ;;  %v7687_v25 = vld [vmem:[#allocation81_spill] sm:$0xff] }
 0x3c4   : > { %v3696_v44 = vpop.f32.mrf.mxu3 }
 0x3c5   : > { %v3831_v21 = vadd.f32 %v3696_v44, %v3537_v13  ;;  %5046 = vmatmul.msk.bf16.gmra.mxu2 %vm1163_vm3, %v5485_v42  ;;  %v3153_v55 = vpop.f32.mrf.mxu1  ;;  %v7688_v44 = vld [vmem:[#allocation74_spill] sm:$0xff] }
 0x3c6   : > { %v3285_v49 = vadd.f32 %v3153_v55, %v7684_v10 }
 0x3c7   : > { %v4095_v5 = vadd.f32 %v3960_v56, %v3831_v21 }
 0x3c8   : > { %v3405_v51 = vpop.f32.mrf.mxu2 }
 0x3c9   : > { %v5210_v59 = vpack.c.bf16 %v4095_v5, %v4094_v17  ;;  %v4286_v16 = vadd.f32 %v4285_v52, %v4095_v5  ;;  %v4357_v58 = vmul.f32 %v4095_v5, %v4095_v5  ;;  %5079 = vmatmul.msk.bf16.gmra.mxu3 %vm1163_vm3, %v7682_v36  ;;  %v3538_v40 = vadd.f32 %v3405_v51, %v3284_v37  ;;  %v5487_v36 = vld [vmem:[%s5627_s11 + $0xe4] sm:$0xff] }
 0x3ca   : > { %v3963_v63 = vpop.f32.mrf.mxu0 }
 0x3cb   : > { %5334 = vst [vmem:[%s7079_s7 + $0x40] sm:$0xff] %v5210_v59   ;;  %v4420_v61 = vadd.f32 %v4419_v46, %v4357_v58 }
 0x3cc   : > { %v3699_v60 = vpop.f32.mrf.mxu3 }
 0x3cd   : > { %5113 = vmatmul.msk.bf16.gmra.mxu0 %vm1163_vm3, %v7683_v50  ;;  %v3832_v22 = vadd.f32 %v3699_v60, %v3538_v40  ;;  %v3156_v19 = vpop.f32.mrf.mxu1 }
 0x3ce   : > { %v3286_v57 = vadd.f32 %v3156_v19, %v7685_v29 }
 0x3cf   : > { %v4096_v39 = vadd.f32 %v3963_v63, %v3832_v22 }
 0x3d0   : > { %v3407_v20 = vpop.f32.mrf.mxu2  ;;  %5006 = vmatmul.msk.bf16.gmra.mxu1 %vm1163_vm3, %v6670_v3  ;;  %v7686_v3 = vld [vmem:[#allocation16_spill] sm:$0xff] }
 0x3d1   : > { %v4287_v26 = vadd.f32 %v4286_v16, %v4096_v39  ;;  %v4358_v9 = vmul.f32 %v4096_v39, %v4096_v39  ;;  %v3539_v30 = vadd.f32 %v3407_v20, %v3285_v49 }
 0x3d2   : > { %v3965_v27 = vpop.f32.mrf.mxu0 }
 0x3d3   : > { %v4421_v24 = vadd.f32 %v4420_v61, %v4358_v9  ;;  %v7689_v61 = vld [vmem:[#allocation75_spill] sm:$0xff] }
 0x3d4   : > { %v3701_v62 = vpop.f32.mrf.mxu3 }
 0x3d5   : > { %v3833_v23 = vadd.f32 %v3701_v62, %v3539_v30  ;;  %5047 = vmatmul.msk.bf16.gmra.mxu2 %vm1163_vm3, %v5486_v18  ;;  %v3158_v0 = vpop.f32.mrf.mxu1  ;;  %v7691_v30 = vld [vmem:[#allocation83_spill] sm:$0xff] }
 0x3d6   : > { %v3287_v21 = vadd.f32 %v3158_v0, %v7688_v44 }
 0x3d7   : > { %v4097_v7 = vadd.f32 %v3965_v27, %v3833_v23  ;;  %v7692_v23 = vld [vmem:[#allocation76_spill] sm:$0xff] }
 0x3d8   : > { %v3410_v32 = vpop.f32.mrf.mxu2 }
 0x3d9   : > { %v5215_v11 = vpack.c.bf16 %v4097_v7, %v4096_v39  ;;  %v4288_v43 = vadd.f32 %v4287_v26, %v4097_v7  ;;  %v4359_v17 = vmul.f32 %v4097_v7, %v4097_v7  ;;  %5080 = vmatmul.msk.bf16.gmra.mxu3 %vm1163_vm3, %v7686_v3  ;;  %v3540_v45 = vadd.f32 %v3410_v32, %v3286_v57  ;;  %v5488_v3 = vld [vmem:[%s5627_s11 + $0xf0] sm:$0xff] }
 0x3da   : > { %v3968_v48 = vpop.f32.mrf.mxu0 }
 0x3db   : > { %5335 = vst [vmem:[%s7079_s7 + $0x48] sm:$0xff] %v5215_v11   ;;  %v4422_v6 = vadd.f32 %v4421_v24, %v4359_v17 }
 0x3dc   : > { %v3704_v52 = vpop.f32.mrf.mxu3 }
 0x3dd   : > { %5114 = vmatmul.msk.bf16.gmra.mxu0 %vm1163_vm3, %v7687_v25  ;;  %v3834_v13 = vadd.f32 %v3704_v52, %v3540_v45  ;;  %v3161_v56 = vpop.f32.mrf.mxu1 }
 0x3de   : > { %v3288_v60 = vadd.f32 %v3161_v56, %v7689_v61 }
 0x3df   : > { %v4098_v46 = vadd.f32 %v3968_v48, %v3834_v13 }
 0x3e0   : > { %v3412_v42 = vpop.f32.mrf.mxu2  ;;  %5007 = vmatmul.msk.bf16.gmra.mxu1 %vm1163_vm3, %v7683_v50  ;;  %v7690_v50 = vld [vmem:[#allocation19_spill] sm:$0xff] }
 0x3e1   : > { %v4289_v55 = vadd.f32 %v4288_v43, %v4098_v46  ;;  %v4360_v5 = vmul.f32 %v4098_v46, %v4098_v46  ;;  %v3541_v37 = vadd.f32 %v3412_v42, %v3287_v21 }
 0x3e2   : > { %v3970_v51 = vpop.f32.mrf.mxu0 }
 0x3e3   : > { %v4423_v59 = vadd.f32 %v4422_v6, %v4360_v5  ;;  %v7693_v6 = vld [vmem:[#allocation77_spill] sm:$0xff] }
 0x3e4   : > { %v3706_v16 = vpop.f32.mrf.mxu3 }
 0x3e5   : > { %v3835_v58 = vadd.f32 %v3706_v16, %v3541_v37  ;;  %5048 = vmatmul.msk.bf16.gmra.mxu2 %vm1163_vm3, %v5487_v36  ;;  %v3163_v40 = vpop.f32.mrf.mxu1  ;;  %v7695_v37 = vld [vmem:[#allocation84_spill] sm:$0xff] }
 0x3e6   : > { %v3289_v18 = vadd.f32 %v3163_v40, %v7692_v23 }
 0x3e7   : > { %v4099_v63 = vadd.f32 %v3970_v51, %v3835_v58  ;;  %v7696_v58 = vld [vmem:[#allocation79_spill] sm:$0xff] }
 0x3e8   : > { %v3415_v22 = vpop.f32.mrf.mxu2 }
 0x3e9   : > { %v5220_v19 = vpack.c.bf16 %v4099_v63, %v4098_v46  ;;  %v4290_v39 = vadd.f32 %v4289_v55, %v4099_v63  ;;  %v4361_v10 = vmul.f32 %v4099_v63, %v4099_v63  ;;  %5081 = vmatmul.msk.bf16.gmra.mxu3 %vm1163_vm3, %v7690_v50  ;;  %v3542_v49 = vadd.f32 %v3415_v22, %v3288_v60  ;;  %v5489_v50 = vld [vmem:[%s5627_s11 + $0xf8] sm:$0xff] }
 0x3ea   : > { %v3973_v20 = vpop.f32.mrf.mxu0 }
 0x3eb   : > { %5336 = vst [vmem:[%s7079_s7 + $0x50] sm:$0xff] %v5220_v19   ;;  %v4424_v26 = vadd.f32 %v4423_v59, %v4361_v10 }
 0x3ec   : > { %v3709_v9 = vpop.f32.mrf.mxu3 }
 0x3ed   : > { %5115 = vmatmul.msk.bf16.gmra.mxu0 %vm1163_vm3, %v7691_v30  ;;  %v3836_v27 = vadd.f32 %v3709_v9, %v3542_v49  ;;  %v3166_v24 = vpop.f32.mrf.mxu1 }
 0x3ee   : > { %v3290_v52 = vadd.f32 %v3166_v24, %v7693_v6 }
 0x3ef   : > { %v4100_v62 = vadd.f32 %v3973_v20, %v3836_v27 }
 0x3f0   : > { %v3417_v0 = vpop.f32.mrf.mxu2  ;;  %5008 = vmatmul.msk.bf16.gmra.mxu1 %vm1163_vm3, %v7687_v25  ;;  %v7694_v25 = vld [vmem:[#allocation4_spill] sm:$0xff] }
 0x3f1   : > { %v4291_v7 = vadd.f32 %v4290_v39, %v4100_v62  ;;  %v4362_v29 = vmul.f32 %v4100_v62, %v4100_v62  ;;  %v3543_v57 = vadd.f32 %v3417_v0, %v3289_v18 }
 0x3f2   : > { %v3975_v32 = vpop.f32.mrf.mxu0 }
 0x3f3   : > { %v4425_v11 = vadd.f32 %v4424_v26, %v4362_v29  ;;  %v7697_v26 = vld [vmem:[#allocation80_spill] sm:$0xff] }
 0x3f4   : > { %v3711_v43 = vpop.f32.mrf.mxu3 }
 0x3f5   : > { %v3837_v17 = vadd.f32 %v3711_v43, %v3543_v57  ;;  %5049 = vmatmul.msk.bf16.gmra.mxu2 %vm1163_vm3, %v5488_v3  ;;  %v3168_v45 = vpop.f32.mrf.mxu1  ;;  %v7699_v57 = vld [vmem:[#allocation85_spill] sm:$0xff] }
 0x3f6   : > { %v3291_v36 = vadd.f32 %v3168_v45, %v7696_v58 }
 0x3f7   : > { %v4101_v48 = vadd.f32 %v3975_v32, %v3837_v17  ;;  %v7700_v17 = vld [vmem:[#allocation82_spill] sm:$0xff] }
 0x3f8   : > { %v3420_v13 = vpop.f32.mrf.mxu2 }
 0x3f9   : > { %v5225_v56 = vpack.c.bf16 %v4101_v48, %v4100_v62  ;;  %v4292_v46 = vadd.f32 %v4291_v7, %v4101_v48  ;;  %v4363_v44 = vmul.f32 %v4101_v48, %v4101_v48  ;;  %5082 = vmatmul.msk.bf16.gmra.mxu3 %vm1163_vm3, %v7694_v25  ;;  %v3544_v21 = vadd.f32 %v3420_v13, %v3290_v52  ;;  %v5490_v25 = vld [vmem:[%s5627_s11 + $0x104] sm:$0xff] }
 0x3fa   : > { %v3978_v42 = vpop.f32.mrf.mxu0 }
 0x3fb   : > { %5337 = vst [vmem:[%s7079_s7 + $0x58] sm:$0xff] %v5225_v56   ;;  %v4426_v55 = vadd.f32 %v4425_v11, %v4363_v44 }
 0x3fc   : > { %v3714_v5 = vpop.f32.mrf.mxu3 }
 0x3fd   : > { %5116 = vmatmul.msk.bf16.gmra.mxu0 %vm1163_vm3, %v7695_v37  ;;  %v3838_v51 = vadd.f32 %v3714_v5, %v3544_v21  ;;  %v3171_v59 = vpop.f32.mrf.mxu1 }
 0x3fe   : > { %v3292_v9 = vadd.f32 %v3171_v59, %v7697_v26 }
 0x3ff   : > { %v4102_v16 = vadd.f32 %v3978_v42, %v3838_v51 }
 0x400   : > { %v3422_v40 = vpop.f32.mrf.mxu2  ;;  %5009 = vmatmul.msk.bf16.gmra.mxu1 %vm1163_vm3, %v7691_v30  ;;  %v7698_v30 = vld [vmem:[#allocation6_spill] sm:$0xff] }
 0x401   : > { %v4293_v63 = vadd.f32 %v4292_v46, %v4102_v16  ;;  %v4364_v61 = vmul.f32 %v4102_v16, %v4102_v16  ;;  %v3545_v60 = vadd.f32 %v3422_v40, %v3291_v36 }
 0x402   : > { %v3980_v22 = vpop.f32.mrf.mxu0 }
 0x403   : > { %v4427_v19 = vadd.f32 %v4426_v55, %v4364_v61  ;;  %v7701_v55 = vld [vmem:[#allocation51_spill] sm:$0xff] }
 0x404   : > { %v3716_v39 = vpop.f32.mrf.mxu3 }
 0x405   : > { %v3839_v10 = vadd.f32 %v3716_v39, %v3545_v60  ;;  %5050 = vmatmul.msk.bf16.gmra.mxu2 %vm1163_vm3, %v5489_v50  ;;  %v3173_v49 = vpop.f32.mrf.mxu1  ;;  %v7703_v60 = vld [vmem:[#allocation86_spill] sm:$0xff] }
 0x406   : > { %v3293_v3 = vadd.f32 %v3173_v49, %v7700_v17 }
 0x407   : > { %v4103_v20 = vadd.f32 %v3980_v22, %v3839_v10  ;;  %v7704_v10 = vld [vmem:[#allocation54_spill] sm:$0xff] }
 0x408   : > { %v3425_v27 = vpop.f32.mrf.mxu2 }
 0x409   : > { %v5230_v24 = vpack.c.bf16 %v4103_v20, %v4102_v16  ;;  %v4294_v62 = vadd.f32 %v4293_v63, %v4103_v20  ;;  %v4365_v23 = vmul.f32 %v4103_v20, %v4103_v20  ;;  %5083 = vmatmul.msk.bf16.gmra.mxu3 %vm1163_vm3, %v7698_v30  ;;  %v3546_v18 = vadd.f32 %v3425_v27, %v3292_v9  ;;  %v5491_v30 = vld [vmem:[%s5627_s11 + $0x10c] sm:$0xff] }
 0x40a   : > { %v3983_v0 = vpop.f32.mrf.mxu0 }
 0x40b   : > { %5338 = vst [vmem:[%s7079_s7 + $0x60] sm:$0xff] %v5230_v24   ;;  %v4428_v7 = vadd.f32 %v4427_v19, %v4365_v23 }
 0x40c   : > { %v3719_v29 = vpop.f32.mrf.mxu3 }
 0x40d   : > { %5117 = vmatmul.msk.bf16.gmra.mxu0 %vm1163_vm3, %v7699_v57  ;;  %v3840_v32 = vadd.f32 %v3719_v29, %v3546_v18  ;;  %v3176_v11 = vpop.f32.mrf.mxu1 }
 0x40e   : > { %v3294_v5 = vadd.f32 %v3176_v11, %v7701_v55 }
 0x40f   : > { %v4104_v43 = vadd.f32 %v3983_v0, %v3840_v32 }
 0x410   : > { %v3427_v45 = vpop.f32.mrf.mxu2  ;;  %5010 = vmatmul.msk.bf16.gmra.mxu1 %vm1163_vm3, %v7695_v37  ;;  %v7702_v37 = vld [vmem:[#allocation8_spill] sm:$0xff] }
 0x411   : > { %v4295_v48 = vadd.f32 %v4294_v62, %v4104_v43  ;;  %v4366_v6 = vmul.f32 %v4104_v43, %v4104_v43  ;;  %v3547_v52 = vadd.f32 %v3427_v45, %v3293_v3 }
 0x412   : > { %v3985_v13 = vpop.f32.mrf.mxu0 }
 0x413   : > { %v4429_v56 = vadd.f32 %v4428_v7, %v4366_v6  ;;  %v7705_v7 = vld [vmem:[#allocation58_spill] sm:$0xff] }
 0x414   : > { %v3721_v46 = vpop.f32.mrf.mxu3 }
 0x415   : > { %v3841_v44 = vadd.f32 %v3721_v46, %v3547_v52  ;;  %5051 = vmatmul.msk.bf16.gmra.mxu2 %vm1163_vm3, %v5490_v25  ;;  %v3178_v21 = vpop.f32.mrf.mxu1  ;;  %v7707_v52 = vld [vmem:[#allocation87_spill] sm:$0xff] }
 0x416   : > { %v3295_v50 = vadd.f32 %v3178_v21, %v7704_v10 }
 0x417   : > { %v4105_v42 = vadd.f32 %v3985_v13, %v3841_v44  ;;  %v7708_v44 = vld [vmem:[#allocation21_spill] sm:$0xff] }
 0x418   : > { %v3430_v51 = vpop.f32.mrf.mxu2 }
 0x419   : > { %v5235_v59 = vpack.c.bf16 %v4105_v42, %v4104_v43  ;;  %v4296_v16 = vadd.f32 %v4295_v48, %v4105_v42  ;;  %v4367_v58 = vmul.f32 %v4105_v42, %v4105_v42  ;;  %5084 = vmatmul.msk.bf16.gmra.mxu3 %vm1163_vm3, %v7702_v37  ;;  %v3548_v36 = vadd.f32 %v3430_v51, %v3294_v5  ;;  %v5492_v37 = vld [vmem:[%s5627_s11 + $0x118] sm:$0xff] }
 0x41a   : > { %v3988_v40 = vpop.f32.mrf.mxu0 }
 0x41b   : > { %5339 = vst [vmem:[%s7079_s7 + $0x68] sm:$0xff] %v5235_v59   ;;  %v4430_v63 = vadd.f32 %v4429_v56, %v4367_v58 }
 0x41c   : > { %v3724_v61 = vpop.f32.mrf.mxu3 }
 0x41d   : > { %5118 = vmatmul.msk.bf16.gmra.mxu0 %vm1163_vm3, %v7703_v60  ;;  %v3842_v22 = vadd.f32 %v3724_v61, %v3548_v36  ;;  %v3181_v19 = vpop.f32.mrf.mxu1 }
 0x41e   : > { %v3296_v29 = vadd.f32 %v3181_v19, %v7705_v7 }
 0x41f   : > { %v4106_v39 = vadd.f32 %v3988_v40, %v3842_v22 }
 0x420   : > { %v3432_v49 = vpop.f32.mrf.mxu2  ;;  %5011 = vmatmul.msk.bf16.gmra.mxu1 %vm1163_vm3, %v7699_v57  ;;  %v7706_v57 = vld [vmem:[#allocation10_spill] sm:$0xff] }
 0x421   : > { %v4297_v20 = vadd.f32 %v4296_v16, %v4106_v39  ;;  %v4368_v26 = vmul.f32 %v4106_v39, %v4106_v39  ;;  %v3549_v9 = vadd.f32 %v3432_v49, %v3295_v50 }
 0x422   : > { %v3990_v27 = vpop.f32.mrf.mxu0 }
 0x423   : > { %v4431_v24 = vadd.f32 %v4430_v63, %v4368_v26  ;;  %v7709_v63 = vld [vmem:[#allocation24_spill] sm:$0xff] }
 0x424   : > { %v3726_v62 = vpop.f32.mrf.mxu3 }
 0x425   : > { %v3843_v23 = vadd.f32 %v3726_v62, %v3549_v9  ;;  %5052 = vmatmul.msk.bf16.gmra.mxu2 %vm1163_vm3, %v5491_v30  ;;  %v3183_v18 = vpop.f32.mrf.mxu1  ;;  %v7711_v9 = vld [vmem:[#allocation88_spill] sm:$0xff] }
 0x426   : > { %v3297_v25 = vadd.f32 %v3183_v18, %v7708_v44 }
 0x427   : > { %v4107_v0 = vadd.f32 %v3990_v27, %v3843_v23  ;;  %v7712_v23 = vld [vmem:[#allocation26_spill] sm:$0xff] }
 0x428   : > { %v3435_v32 = vpop.f32.mrf.mxu2 }
 0x429   : > { %v5240_v11 = vpack.c.bf16 %v4107_v0, %v4106_v39  ;;  %v4298_v43 = vadd.f32 %v4297_v20, %v4107_v0  ;;  %v4369_v17 = vmul.f32 %v4107_v0, %v4107_v0  ;;  %5085 = vmatmul.msk.bf16.gmra.mxu3 %vm1163_vm3, %v7706_v57  ;;  %v3550_v3 = vadd.f32 %v3435_v32, %v3296_v29  ;;  %v5493_v57 = vld [vmem:[%s5627_s11 + $0x120] sm:$0xff] }
 0x42a   : > { %v3993_v45 = vpop.f32.mrf.mxu0 }
 0x42b   : > { %5340 = vst [vmem:[%s7079_s7 + $0x70] sm:$0xff] %v5240_v11   ;;  %v4432_v48 = vadd.f32 %v4431_v24, %v4369_v17 }
 0x42c   : > { %v3729_v6 = vpop.f32.mrf.mxu3 }
 0x42d   : > { %5119 = vmatmul.msk.bf16.gmra.mxu0 %vm1163_vm3, %v7707_v52  ;;  %v3844_v13 = vadd.f32 %v3729_v6, %v3550_v3  ;;  %v3186_v56 = vpop.f32.mrf.mxu1 }
 0x42e   : > { %v3298_v61 = vadd.f32 %v3186_v56, %v7709_v63 }
 0x42f   : > { %v4108_v46 = vadd.f32 %v3993_v45, %v3844_v13 }
 0x430   : > { %v3437_v21 = vpop.f32.mrf.mxu2  ;;  %5012 = vmatmul.msk.bf16.gmra.mxu1 %vm1163_vm3, %v7703_v60  ;;  %v7710_v60 = vld [vmem:[#allocation11_spill] sm:$0xff] }
 0x431   : > { %v4299_v42 = vadd.f32 %v4298_v43, %v4108_v46  ;;  %v4370_v55 = vmul.f32 %v4108_v46, %v4108_v46  ;;  %v3551_v5 = vadd.f32 %v3437_v21, %v3297_v25 }
 0x432   : > { %v3995_v51 = vpop.f32.mrf.mxu0 }
 0x433   : > { %v4433_v59 = vadd.f32 %v4432_v48, %v4370_v55  ;;  %v7713_v48 = vld [vmem:[#allocation28_spill] sm:$0xff] }
 0x434   : > { %v3731_v16 = vpop.f32.mrf.mxu3 }
 0x435   : > { %v3845_v58 = vadd.f32 %v3731_v16, %v3551_v5  ;;  %5053 = vmatmul.msk.bf16.gmra.mxu2 %vm1163_vm3, %v5492_v37  ;;  %v3188_v36 = vpop.f32.mrf.mxu1  ;;  %v7715_v5 = vld [vmem:[#allocation89_spill] sm:$0xff] }
 0x436   : > { %v3299_v30 = vadd.f32 %v3188_v36, %v7712_v23 }
 0x437   : > { %v4109_v40 = vadd.f32 %v3995_v51, %v3845_v58  ;;  %v7716_v58 = vld [vmem:[#allocation30_spill] sm:$0xff] }
 0x438   : > { %v3440_v22 = vpop.f32.mrf.mxu2 }
 0x439   : > { %v5245_v19 = vpack.c.bf16 %v4109_v40, %v4108_v46  ;;  %v4300_v39 = vadd.f32 %v4299_v42, %v4109_v40  ;;  %v4371_v10 = vmul.f32 %v4109_v40, %v4109_v40  ;;  %5086 = vmatmul.msk.bf16.gmra.mxu3 %vm1163_vm3, %v7710_v60  ;;  %v3552_v50 = vadd.f32 %v3440_v22, %v3298_v61  ;;  %v5494_v60 = vld [vmem:[%s5627_s11 + $0x12c] sm:$0xff] }
 0x43a   : > { %v3998_v49 = vpop.f32.mrf.mxu0 }
 0x43b   : > { %5341 = vst [vmem:[%s7079_s7 + $0x78] sm:$0xff] %v5245_v19   ;;  %v4434_v20 = vadd.f32 %v4433_v59, %v4371_v10 }
 0x43c   : > { %v3734_v26 = vpop.f32.mrf.mxu3 }
 0x43d   : > { %5120 = vmatmul.msk.bf16.gmra.mxu0 %vm1163_vm3, %v7711_v9  ;;  %v3846_v27 = vadd.f32 %v3734_v26, %v3552_v50  ;;  %v3191_v24 = vpop.f32.mrf.mxu1 }
 0x43e   : > { %v3300_v6 = vadd.f32 %v3191_v24, %v7713_v48 }
 0x43f   : > { %v4110_v62 = vadd.f32 %v3998_v49, %v3846_v27 }
 0x440   : > { %v3442_v18 = vpop.f32.mrf.mxu2  ;;  %5013 = vmatmul.msk.bf16.gmra.mxu1 %vm1163_vm3, %v7707_v52  ;;  %v7714_v52 = vld [vmem:[#allocation14_spill] sm:$0xff] }
 0x441   : > { %v4301_v0 = vadd.f32 %v4300_v39, %v4110_v62  ;;  %v4372_v7 = vmul.f32 %v4110_v62, %v4110_v62  ;;  %v3553_v29 = vadd.f32 %v3442_v18, %v3299_v30 }
 0x442   : > { %v4000_v32 = vpop.f32.mrf.mxu0 }
 0x443   : > { %v4435_v11 = vadd.f32 %v4434_v20, %v4372_v7  ;;  %v7717_v20 = vld [vmem:[#allocation33_spill] sm:$0xff] }
 0x444   : > { %v3736_v43 = vpop.f32.mrf.mxu3 }
 0x445   : > { %v3847_v17 = vadd.f32 %v3736_v43, %v3553_v29  ;;  %5054 = vmatmul.msk.bf16.gmra.mxu2 %vm1163_vm3, %v5493_v57  ;;  %v3193_v3 = vpop.f32.mrf.mxu1  ;;  %v7719_v29 = vld [vmem:[#allocation90_spill] sm:$0xff] }
 0x446   : > { %v3301_v37 = vadd.f32 %v3193_v3, %v7716_v58 }
 0x447   : > { %v4111_v45 = vadd.f32 %v4000_v32, %v3847_v17  ;;  %v7720_v17 = vld [vmem:[#allocation35_spill] sm:$0xff] }
 0x448   : > { %v3445_v13 = vpop.f32.mrf.mxu2 }
 0x449   : > { %v5250_v56 = vpack.c.bf16 %v4111_v45, %v4110_v62  ;;  %v4302_v46 = vadd.f32 %v4301_v0, %v4111_v45  ;;  %v4373_v44 = vmul.f32 %v4111_v45, %v4111_v45  ;;  %5087 = vmatmul.msk.bf16.gmra.mxu3 %vm1163_vm3, %v7714_v52  ;;  %v3554_v25 = vadd.f32 %v3445_v13, %v3300_v6  ;;  %v5495_v52 = vld [vmem:[%s5627_s11 + $0x134] sm:$0xff] }
 0x44a   : > { %v4003_v21 = vpop.f32.mrf.mxu0 }
 0x44b   : > { %5342 = vst [vmem:[%s7079_s7 + $0x80] sm:$0xff] %v5250_v56   ;;  %v4436_v42 = vadd.f32 %v4435_v11, %v4373_v44 }
 0x44c   : > { %v3739_v55 = vpop.f32.mrf.mxu3 }
 0x44d   : > { %5121 = vmatmul.msk.bf16.gmra.mxu0 %vm1163_vm3, %v7715_v5  ;;  %v3848_v51 = vadd.f32 %v3739_v55, %v3554_v25  ;;  %v3196_v59 = vpop.f32.mrf.mxu1 }
 0x44e   : > { %v3302_v26 = vadd.f32 %v3196_v59, %v7717_v20  ;;  %v5496_v59 = vld [vmem:[%s5627_s11 + $0x144] sm:$0xf] }
 0x44f   : > { %v4112_v16 = vadd.f32 %v4003_v21, %v3848_v51 }
 0x450   : > { %v3447_v36 = vpop.f32.mrf.mxu2  ;;  %5014 = vmatmul.msk.bf16.gmra.mxu1 %vm1163_vm3, %v7711_v9  ;;  %v7718_v9 = vld [vmem:[#allocation17_spill] sm:$0xff] }
 0x451   : > { %v4303_v40 = vadd.f32 %v4302_v46, %v4112_v16  ;;  %v4374_v63 = vmul.f32 %v4112_v16, %v4112_v16  ;;  %v3555_v61 = vadd.f32 %v3447_v36, %v3301_v37  ;;  %v7722_v36 = vld [vmem:[#allocation20_spill] sm:$0xff] }
 0x452   : > { %v4005_v22 = vpop.f32.mrf.mxu0 }
 0x453   : > { %v4437_v19 = vadd.f32 %v4436_v42, %v4374_v63  ;;  %v7721_v42 = vld [vmem:[#allocation38_spill] sm:$0xff] }
 0x454   : > { %v3741_v39 = vpop.f32.mrf.mxu3 }
 0x455   : > { %v3849_v10 = vadd.f32 %v3741_v39, %v3555_v61  ;;  %5055 = vmatmul.msk.bf16.gmra.mxu2 %vm1163_vm3, %v5494_v60  ;;  %v3198_v50 = vpop.f32.mrf.mxu1 }
 0x456   : > { %v3303_v57 = vadd.f32 %v3198_v50, %v7720_v17 }
 0x457   : > { %v4113_v49 = vadd.f32 %v4005_v22, %v3849_v10 }
 0x458   : > { %v3450_v27 = vpop.f32.mrf.mxu2 }
 0x459   : > { %v5255_v24 = vpack.c.bf16 %v4113_v49, %v4112_v16  ;;  %v4304_v62 = vadd.f32 %v4303_v40, %v4113_v49  ;;  %v4375_v23 = vmul.f32 %v4113_v49, %v4113_v49  ;;  %5088 = vmatmul.msk.bf16.gmra.mxu3 %vm1163_vm3, %v7718_v9  ;;  %v3556_v30 = vadd.f32 %v3450_v27, %v3302_v26  ;;  %v5498_v49 = vld [vmem:[%s5627_s11 + $0x148] sm:$0xf]  ;;  %v7723_v27 = vld [vmem:[#allocation40_spill] sm:$0xff] }
 0x45a   : > { %v4008_v18 = vpop.f32.mrf.mxu0  ;;  %v3069_v16 = vrot.slane %v5496_v59, 5  ;;  %v3072_v20 = vrot.slane %v5498_v49, 5 }
 0x45b   : > { %5343 = vst [vmem:[%s7079_s7 + $0x88] sm:$0xff] %v5255_v24   ;;  %v4438_v0 = vadd.f32 %v4437_v19, %v4375_v23  ;;  %v5497_v19 = vld [vmem:[%s5627_s11 + $0x140] sm:$0xf] }
 0x45c   : > { %v3744_v7 = vpop.f32.mrf.mxu3  ;;  %v4986_v39 = vrot.slane %v5497_v19, 9  ;;  %v3071_v50 = vrot.slane %v3069_v16, 4 }
 0x45d   : > { %5122 = vmatmul.msk.bf16.gmra.mxu0 %vm1163_vm3, %v7719_v29  ;;  %v3850_v32 = vadd.f32 %v3744_v7, %v3556_v30  ;;  %v3201_v11 = vpop.f32.mrf.mxu1 }
 0x45e   : > { %v3304_v55 = vadd.f32 %v3201_v11, %v7721_v42  ;;  %v3070_v23 = vsel %vm6150_vm7, %v4986_v39, %v3069_v16  ;;  %v7307_v16 = vld [vmem:[%s5627_s11 + $0x158] sm:$0xf] }
 0x45f   : > { %v4114_v43 = vadd.f32 %v4008_v18, %v3850_v32  ;;  %v3594_v19 = vshll.u32 %v7307_v16, 16  ;;  %v3598_v39 = vshrl.u32 %v7307_v16, 16 }
 0x460   : > { %v3452_v3 = vpop.f32.mrf.mxu2  ;;  %5015 = vmatmul.msk.bf16.gmra.mxu1 %vm1163_vm3, %v7715_v5 }
 0x461   : > { %v4305_v45 = vadd.f32 %v4304_v62, %v4114_v43  ;;  %v4376_v48 = vmul.f32 %v4114_v43, %v4114_v43  ;;  %v3557_v6 = vadd.f32 %v3452_v3, %v3303_v57  ;;  %v5499_v3 = vld [vmem:[%s5627_s11 + $0x140] sm:$0xff] }
 0x462   : > { %v4010_v13 = vpop.f32.mrf.mxu0 }
 0x463   : > { %v4439_v56 = vadd.f32 %v4438_v0, %v4376_v48  ;;  %v3073_v0 = vsel %vm6150_vm7, %v3071_v50, %v3072_v20  ;;  %v7724_v48 = vld [vmem:[#allocation43_spill] sm:$0xff] }
 0x464   : > { %v3746_v46 = vpop.f32.mrf.mxu3  ;;  %v3083_v17 = vunpack.c.l.b16 %v3073_v0  ;;  %v3600_v0 = vrot.slane %v3598_v39, 4 }
 0x465   : > { %v3851_v44 = vadd.f32 %v3746_v46, %v3557_v6  ;;  %5056 = vmatmul.msk.bf16.gmra.mxu2 %vm1163_vm3, %v5495_v52  ;;  %v3203_v25 = vpop.f32.mrf.mxu1  ;;  %v5500_v46 = vld [vmem:[%s5627_s11 + $0x14c] sm:$0xf]  ;;  %v7301_v52 = vld [vmem:[%s5627_s11 + $0x154] sm:$0xf] }
 0x466   : > { %v3305_v24 = vadd.f32 %v3203_v25, %v7723_v27 }
 0x467   : > { %v4115_v21 = vadd.f32 %v4010_v13, %v3851_v44  ;;  %v3075_v44 = vrot.slane %v5500_v46, 5 }
 0x468   : > { %v3455_v51 = vpop.f32.mrf.mxu2 }
 0x469   : > { %v5260_v5 = vpack.c.bf16 %v4115_v21, %v4114_v43  ;;  %v4306_v58 = vadd.f32 %v4305_v45, %v4115_v21  ;;  %v4377_v37 = vmul.f32 %v4115_v21, %v4115_v21  ;;  %5089 = vmatmul.msk.bf16.gmra.mxu3 %vm1163_vm3, %v7722_v36  ;;  %v3558_v40 = vadd.f32 %v3455_v51, %v3304_v55 }
 0x46a   : > { %v4013_v63 = vpop.f32.mrf.mxu0  ;;  %v3082_v43 = vunpack.c.l.b16 %v3070_v23  ;;  %v3074_v36 = vrot.slane %v3072_v20, 4 }
 0x46b   : > { %5344 = vst [vmem:[%s7079_s7 + $0x90] sm:$0xff] %v5260_v5   ;;  %v4440_v61 = vadd.f32 %v4439_v56, %v4377_v37  ;;  %v3585_v5 = vshrl.u32 %v7301_v52, 16 }
 0x46c   : > { %v3749_v22 = vpop.f32.mrf.mxu3  ;;  %v7297_v13 = vpack.c.b16 %v3083_v17, %v3082_v43  ;;  %v3076_v20 = vsel %vm6150_vm7, %v3074_v36, %v3075_v44 }
 0x46d   : > { %5123 = vmatmul.msk.bf16.gmra.mxu0 %vm1163_vm3, %v6925_v12  ;;  %v3852_v10 = vadd.f32 %v3749_v22, %v3558_v40  ;;  %v3206_v60 = vpop.f32.mrf.mxu1  ;;  %v5501_v22 = vld [vmem:[%s5627_s11 + $0x150] sm:$0x1]  ;;  %v3587_v49 = vrot.slane %v3585_v5, 4  ;;  %v3084_v17 = vunpack.c.l.b16 %v3076_v20 }
 0x46e   : > { %v3306_v6 = vadd.f32 %v3206_v60, %v7724_v48  ;;  %v7725_v60 = vld [vmem:[#allocation46_spill] sm:$0xff] }
 0x46f   : > { %v4116_v26 = vadd.f32 %v4013_v63, %v3852_v10 }
 0x470   : > { %v3457_v62 = vpop.f32.mrf.mxu2  ;;  %5016 = vmatmul.msk.bf16.gmra.mxu1 %vm1163_vm3, %v7719_v29 }
 0x471   : > { %v4307_v9 = vadd.f32 %v4306_v58, %v4116_v26  ;;  %v4378_v30 = vmul.f32 %v4116_v26, %v4116_v26  ;;  %v3559_v18 = vadd.f32 %v3457_v62, %v3305_v24  ;;  %v3588_v58 = vshll.u32 %v7301_v52, 16 }
 0x472   : > { %v4015_v7 = vpop.f32.mrf.mxu0 }
 0x473   : > { %v4441_v32 = vadd.f32 %v4440_v61, %v4378_v30  ;;  %v3077_v61 = vrot.slane %v3075_v44, 4 }
 0x474   : > { %v3751_v11 = vpop.f32.mrf.mxu3 }
 0x475   : > { %v3853_v57 = vadd.f32 %v3751_v11, %v3559_v18  ;;  %5057 = vmatmul.msk.bf16.gmra.mxu2 %vm1163_vm3, %v5499_v3  ;;  %v3208_v29 = vpop.f32.mrf.mxu1  ;;  %v3596_v18 = vrot.slane %v3594_v19, 5  ;;  %v5502_v3 = vld [vmem:[%s5627_s11 + $0x148] sm:$0xff] }
 0x476   : > { %v3307_v50 = vadd.f32 %v3208_v29, %v7725_v60 }
 0x477   : > { %v4117_v45 = vadd.f32 %v4015_v7, %v3853_v57 }
 0x478   : > { %v3460_v56 = vpop.f32.mrf.mxu2 }
 0x479   : > { %v5265_v25 = vpack.c.bf16 %v4117_v45, %v4116_v26  ;;  %v4308_v21 = vadd.f32 %v4307_v9, %v4117_v45  ;;  %v4379_v42 = vmul.f32 %v4117_v45, %v4117_v45  ;;  %5090 = vmatmul.msk.bf16.gmra.mxu3 %vm1163_vm3, %v6912_v54  ;;  %v3560_v55 = vadd.f32 %v3460_v56, %v3306_v6  ;;  %v7726_v56 = vld [vmem:[#allocation48_spill] sm:$0xff] }
 0x47a   : > { %v4018_v51 = vpop.f32.mrf.mxu0  ;;  %v3078_v54 = vrot.slane %v5501_v22, 5  ;;  %v3590_v26 = vrot.slane %v3588_v58, 5  ;;  %v3601_v45 = vor.u32 %v3600_v0, %v3596_v18  ;;  %v7336_v58 = vld [vmem:[%s5627_s11 + $0x160] sm:$0xf] }
 0x47b   : > { %5345 = vst [vmem:[%s7079_s7 + $0x98] sm:$0xff] %v5265_v25   ;;  %v4442_v59 = vadd.f32 %v4441_v32, %v4379_v42  ;;  %v7324_v32 = vld [vmem:[%s5627_s11 + $0x15c] sm:$0xf]  ;;  %v3881_v25 = vrot.slane %v7307_v16, 5 }
 0x47c   : > { %v3754_v37 = vpop.f32.mrf.mxu3  ;;  %v3079_v9 = vsel %vm6150_vm7, %v3077_v61, %v3078_v54  ;;  %v3591_v11 = vor.u32 %v3590_v26, %v3587_v49  ;;  %v3604_v48 = vshll.u32 %v7324_v32, 16  ;;  %v3602_v36 = vrot.slane %v3601_v45, 4 }
 0x47d   : > { %5124 = vmatmul.msk.bf16.gmra.mxu0 %vm1163_vm3, %v7297_v13  ;;  %v3854_v40 = vadd.f32 %v3754_v37, %v3560_v55  ;;  %v3211_v63 = vpop.f32.mrf.mxu1  ;;  %v5094_v61 = vrot.slane %v7301_v52, 9  ;;  %v3883_v22 = vrot.slane %v3881_v25, 4  ;;  %v3884_v19 = vrot.slane %v7324_v32, 5 }
 0x47e   : > { %v3308_v46 = vadd.f32 %v3211_v63, %v7726_v56  ;;  %v3592_v44 = vrot.slane %v3591_v11, 4  ;;  %v3608_v39 = vshrl.u32 %v7324_v32, 16  ;;  %v5165_v32 = vld [vmem:[%s5627_s11 + $0x154] sm:$0xff] }
 0x47f   : > { %v4118_v10 = vadd.f32 %v4018_v51, %v3854_v40  ;;  %v3606_v40 = vrot.slane %v3604_v48, 5  ;;  %v3882_v20 = vsel %vm6150_vm7, %v5094_v61, %v3881_v25 }
 0x480   : > { %v3462_v27 = vpop.f32.mrf.mxu2  ;;  %5017 = vmatmul.msk.bf16.gmra.mxu1 %vm1163_vm3, %v6925_v12  ;;  %v3085_v12 = vunpack.c.l.b16 %v3079_v9  ;;  %v3597_v16 = vsel %vm5647_vm4, %v3592_v44, %v3596_v18 }
 0x481   : > { %v4309_v24 = vadd.f32 %v4308_v21, %v4118_v10  ;;  %v4380_v62 = vmul.f32 %v4118_v10, %v4118_v10  ;;  %v3561_v23 = vadd.f32 %v3462_v27, %v3307_v50  ;;  %v3607_v49 = vsel %vm5647_vm4, %v3602_v36, %v3606_v40 }
 0x482   : > { %v4020_v30 = vpop.f32.mrf.mxu0  ;;  %v7331_v21 = vpack.c.b16 %v3085_v12, %v3084_v17  ;;  %v3630_v27 = vunpack.c.l.b16 %v3597_v16  ;;  %v3631_v11 = vunpack.c.l.b16 %v3607_v49  ;;  %v3894_v12 = vunpack.c.l.b16 %v3882_v20 }
 0x483   : > { %v4443_v7 = vadd.f32 %v4442_v59, %v4380_v62  ;;  %v3885_v62 = vsel %vm6150_vm7, %v3883_v22, %v3884_v19 }
 0x484   : > { %v3756_v43 = vpop.f32.mrf.mxu3 }
 0x485   : > { %v3855_v57 = vadd.f32 %v3756_v43, %v3561_v23  ;;  %5058 = vmatmul.msk.bf16.gmra.mxu2 %vm1163_vm3, %v5502_v3  ;;  %v3213_v29 = vpop.f32.mrf.mxu1  ;;  %v3610_v23 = vrot.slane %v3608_v39, 4 }
 0x486   : > { %v3309_v26 = vadd.f32 %v3213_v29, %v6909_v31  ;;  %v356_v31 = vld [vmem:[%s5627_s11 + $0x164] sm:$0x1] }
 0x487   : > { %v4119_v6 = vadd.f32 %v4020_v30, %v3855_v57  ;;  %v3895_v57 = vunpack.c.l.b16 %v3885_v62  ;;  %v3611_v29 = vor.u32 %v3610_v23, %v3606_v40  ;;  %v5166_v23 = vld [vmem:[%s5627_s11 + $0x15c] sm:$0xff] }
 0x488   : > { %v3465_v42 = vpop.f32.mrf.mxu2 }
 0x489   : > { %v5270_v55 = vpack.c.bf16 %v4119_v6, %v4118_v10  ;;  %v4310_v51 = vadd.f32 %v4309_v24, %v4119_v6  ;;  %v4381_v59 = vmul.f32 %v4119_v6, %v4119_v6  ;;  %5091 = vmatmul.msk.bf16.gmra.mxu3 %vm1163_vm3, %v6938_v2  ;;  %v3562_v5 = vadd.f32 %v3465_v42, %v3308_v46 }
 0x48a   : > { %v4023_v37 = vpop.f32.mrf.mxu0  ;;  %v3614_v2 = vshll.u32 %v7336_v58, 16  ;;  %v3618_v10 = vshrl.u32 %v7336_v58, 16  ;;  %v3634_v6 = vpack.c.b16 %v3631_v11, %v3630_v27  ;;  %v3898_v25 = vpack.c.b16 %v3895_v57, %v3894_v12 }
 0x48b   : > { %5346 = vst [vmem:[%s7079_s7 + $0xa0] sm:$0xff] %v5270_v55   ;;  %v4444_v63 = vadd.f32 %v4443_v7, %v4381_v59  ;;  %v3612_v55 = vrot.slane %v3611_v29, 4 }
 0x48c   : > { %v3759_v54 = vpop.f32.mrf.mxu3  ;;  %v3616_v9 = vrot.slane %v3614_v2, 5  ;;  %v3620_v30 = vrot.slane %v3618_v10, 4 }
 0x48d   : > { %5125 = vmatmul.msk.bf16.gmra.mxu0 %vm1163_vm3, %v7331_v21  ;;  %v3856_v60 = vadd.f32 %v3759_v54, %v3562_v5  ;;  %v3216_v50 = vpop.f32.mrf.mxu1  ;;  %v3887_v5 = vrot.slane %v7336_v58, 5  ;;  %v3886_v54 = vrot.slane %v3884_v19, 4 }
 0x48e   : > { %v3621_v45 = vor.u32 %v3620_v30, %v3616_v9  ;;  %v3310_v44 = vadd.f32 %v3216_v50, %v6921_v38  ;;  %v3617_v38 = vsel %vm5647_vm4, %v3612_v55, %v3616_v9 }
 0x48f   : > { %v4120_v52 = vadd.f32 %v4023_v37, %v3856_v60  ;;  %v3889_v10 = vrot.slane %v3887_v5, 4  ;;  %v3890_v60 = vrot.slane %v356_v31, 5  ;;  %v3888_v19 = vsel %vm6150_vm7, %v3886_v54, %v3887_v5 }
 0x490   : > { %v3467_v24 = vpop.f32.mrf.mxu2  ;;  %5018 = vmatmul.msk.bf16.gmra.mxu1 %vm1163_vm3, %v7297_v13  ;;  %v3624_v13 = vshll.u32 %v356_v31, 16 }
 0x491   : > { %v4311_v18 = vadd.f32 %v4310_v51, %v4120_v52  ;;  %v4382_v0 = vmul.f32 %v4120_v52, %v4120_v52  ;;  %v3563_v7 = vadd.f32 %v3467_v24, %v3309_v26  ;;  %v3622_v51 = vrot.slane %v3621_v45, 4 }
 0x492   : > { %v4025_v43 = vpop.f32.mrf.mxu0  ;;  %v3626_v59 = vrot.slane %v3624_v13, 5  ;;  %v3632_v26 = vunpack.c.l.b16 %v3617_v38  ;;  %v3891_v47 = vsel %vm6150_vm7, %v3889_v10, %v3890_v60 }
 0x493   : > { %v4445_v17 = vadd.f32 %v4444_v63, %v4382_v0  ;;  %v3897_v0 = vunpack.c.l.b16 %v3891_v47 }
 0x494   : > { %v3761_v3 = vpop.f32.mrf.mxu3  ;;  %v3627_v58 = vsel %vm5647_vm4, %v3622_v51, %v3626_v59 }
 0x495   : > { %v3857_v48 = vadd.f32 %v3761_v3, %v3563_v7  ;;  %5059 = vmatmul.msk.bf16.gmra.mxu2 %vm1163_vm3, %v5165_v32  ;;  %v3218_v56 = vpop.f32.mrf.mxu1  ;;  %v3633_v27 = vunpack.c.l.b16 %v3627_v58 }
 0x496   : > { %v3311_v49 = vadd.f32 %v3218_v56, %v6935_v1  ;;  %v3896_v1 = vunpack.c.l.b16 %v3888_v19 }
 0x497   : > { %v4121_v46 = vadd.f32 %v4025_v43, %v3857_v48 }
 0x498   : > { %v3470_v42 = vpop.f32.mrf.mxu2  ;;  %v3899_v43 = vpack.c.b16 %v3897_v0, %v3896_v1 }
 0x499   : > { %v5275_v37 = vpack.c.bf16 %v4121_v46, %v4120_v52  ;;  %v4312_v36 = vadd.f32 %v4311_v18, %v4121_v46  ;;  %v4383_v40 = vmul.f32 %v4121_v46, %v4121_v46  ;;  %5092 = vmatmul.msk.bf16.gmra.mxu3 %vm1163_vm3, %v3634_v6  ;;  %v3564_v63 = vadd.f32 %v3470_v42, %v3310_v44 }
 0x49a   : > { %v4028_v16 = vpop.f32.mrf.mxu0 }
 0x49b   : > { %5347 = vst [vmem:[%s7079_s7 + $0xa8] sm:$0xff] %v5275_v37   ;;  %v4446_v61 = vadd.f32 %v4445_v17, %v4383_v40 }
 0x49c   : > { %v3764_v22 = vpop.f32.mrf.mxu3 }
 0x49d   : > { %5126 = vmatmul.msk.bf16.gmra.mxu0 %vm1163_vm3, %v3898_v25  ;;  %v3858_v39 = vadd.f32 %v3764_v22, %v3564_v63  ;;  %v3221_v2 = vpop.f32.mrf.mxu1 }
 0x49e   : > { %v3312_v31 = vadd.f32 %v3221_v2, %v6943_v53 }
 0x49f   : > { %v4122_v50 = vadd.f32 %v4028_v16, %v3858_v39 }
 0x4a0   : > { %v3472_v52 = vpop.f32.mrf.mxu2  ;;  %5019 = vmatmul.msk.bf16.gmra.mxu1 %vm1163_vm3, %v7331_v21  ;;  %v3635_v21 = vpack.c.b16 %v3633_v27, %v3632_v26 }
 0x4a1   : > { %v4313_v20 = vadd.f32 %v4312_v36, %v4122_v50  ;;  %v4384_v24 = vmul.f32 %v4122_v50, %v4122_v50  ;;  %v3565_v62 = vadd.f32 %v3472_v52, %v3311_v49 }
 0x4a2   : > { %v4030_v9 = vpop.f32.mrf.mxu0 }
 0x4a3   : > { %v4447_v30 = vadd.f32 %v4446_v61, %v4384_v24 }
 0x4a4   : > { %v3766_v18 = vpop.f32.mrf.mxu3 }
 0x4a5   : > { %v3859_v7 = vadd.f32 %v3766_v18, %v3565_v62  ;;  %5060 = vmatmul.msk.bf16.gmra.mxu2 %vm1163_vm3, %v5166_v23  ;;  %v3223_v32 = vpop.f32.mrf.mxu1  ;;  %v7727_v23 = vld [vmem:[#allocation2_spill] sm:$0xff] }
 0x4a6   : > { %v3313_v46 = vadd.f32 %v3223_v32, %v6950_v35 }
 0x4a7   : > { %v4123_v11 = vadd.f32 %v4030_v9, %v3859_v7 }
 0x4a8   : > { %v3475_v17 = vpop.f32.mrf.mxu2 }
 0x4a9   : > { %v5280_v12 = vpack.c.bf16 %v4123_v11, %v4122_v50  ;;  %v4314_v57 = vadd.f32 %v4313_v20, %v4123_v11  ;;  %v4385_v41 = vmul.f32 %v4123_v11, %v4123_v11  ;;  %5093 = vmatmul.msk.bf16.gmra.mxu3 %vm1163_vm3, %v3635_v21  ;;  %v3566_v3 = vadd.f32 %v3475_v17, %v3312_v31 }
 0x4aa   : > { %v4033_v29 = vpop.f32.mrf.mxu0 }
 0x4ab   : > { %5348 = vst [vmem:[%s7079_s7 + $0xb0] sm:$0xff] %v5280_v12   ;;  %v4448_v45 = vadd.f32 %v4447_v30, %v4385_v41 }
 0x4ac   : > { %v3769_v13 = vpop.f32.mrf.mxu3 }
 0x4ad   : > { %5127 = vmatmul.msk.bf16.gmra.mxu0 %vm1163_vm3, %v3899_v43  ;;  %v3860_v48 = vadd.f32 %v3769_v13, %v3566_v3  ;;  %v3226_v6 = vpop.f32.mrf.mxu1  ;;  %v7728_v43 = vld [vmem:[#allocation52_spill] sm:$0xff] }
 0x4ae   : > { %v3314_v40 = vadd.f32 %v3226_v6, %v6957_v33 }
 0x4af   : > { %v4124_v56 = vadd.f32 %v4033_v29, %v3860_v48 }
 0x4b0   : > { %v3477_v53 = vpop.f32.mrf.mxu2 }
 0x4b1   : > { %v4315_v44 = vadd.f32 %v4314_v57, %v4124_v56  ;;  %v4386_v25 = vmul.f32 %v4124_v56, %v4124_v56  ;;  %v3567_v42 = vadd.f32 %v3477_v53, %v3313_v46  ;;  %v7729_v46 = vld [vmem:[#allocation55_spill] sm:$0xff] }
 0x4b2   : > { %v4035_v55 = vpop.f32.mrf.mxu0 }
 0x4b3   : > { %v4449_v51 = vadd.f32 %v4448_v45, %v4386_v25 }
 0x4b4   : > { %v3771_v59 = vpop.f32.mrf.mxu3 }
 0x4b5   : > { %v3861_v5 = vadd.f32 %v3771_v59, %v3567_v42  ;;  %v3228_v37 = vpop.f32.mrf.mxu1 }
 0x4b6   : > { %v3315_v60 = vadd.f32 %v3228_v37, %v6964_v34 }
 0x4b7   : > { %v4125_v36 = vadd.f32 %v4035_v55, %v3861_v5 }
 0x4b8   : > { %v3480_v63 = vpop.f32.mrf.mxu2 }
 0x4b9   : > { %v5285_v16 = vpack.c.bf16 %v4125_v36, %v4124_v56  ;;  %v4316_v61 = vadd.f32 %v4315_v44, %v4125_v36  ;;  %v4387_v22 = vmul.f32 %v4125_v36, %v4125_v36  ;;  %v3568_v38 = vadd.f32 %v3480_v63, %v3314_v40 }
 0x4ba   : > { %v4038_v54 = vpop.f32.mrf.mxu0 }
 0x4bb   : > { %5349 = vst [vmem:[%s7079_s7 + $0xb8] sm:$0xff] %v5285_v16   ;;  %v4450_v35 = vadd.f32 %v4449_v51, %v4387_v22  ;;  %v7730_v16 = vld [vmem:[#allocation59_spill] sm:$0xff] }
 0x4bc   : > { %v3774_v39 = vpop.f32.mrf.mxu3 }
 0x4bd   : > { %v3862_v2 = vadd.f32 %v3774_v39, %v3568_v38  ;;  %v3231_v58 = vpop.f32.mrf.mxu1 }
 0x4be   : > { %v3316_v47 = vadd.f32 %v3231_v58, %v7727_v23 }
 0x4bf   : > { %v4126_v10 = vadd.f32 %v4038_v54, %v3862_v2 }
 0x4c0   : > { %v3482_v50 = vpop.f32.mrf.mxu2 }
 0x4c1   : > { %v4317_v49 = vadd.f32 %v4316_v61, %v4126_v10  ;;  %v4388_v52 = vmul.f32 %v4126_v10, %v4126_v10  ;;  %v3569_v26 = vadd.f32 %v3482_v50, %v3315_v60 }
 0x4c2   : > { %v4040_v33 = vpop.f32.mrf.mxu0 }
 0x4c3   : > { %v4451_v27 = vadd.f32 %v4450_v35, %v4388_v52 }
 0x4c4   : > { %v3776_v19 = vpop.f32.mrf.mxu3 }
 0x4c5   : > { %v3863_v20 = vadd.f32 %v3776_v19, %v3569_v26  ;;  %v3233_v24 = vpop.f32.mrf.mxu1 }
 0x4c6   : > { %v3317_v17 = vadd.f32 %v3233_v24, %v7728_v43 }
 0x4c7   : > { %v4127_v62 = vadd.f32 %v4040_v33, %v3863_v20 }
 0x4c8   : > { %v3485_v9 = vpop.f32.mrf.mxu2 }
 0x4c9   : > { %v5290_v30 = vpack.c.bf16 %v4127_v62, %v4126_v10  ;;  %v4318_v18 = vadd.f32 %v4317_v49, %v4127_v62  ;;  %v4389_v1 = vmul.f32 %v4127_v62, %v4127_v62  ;;  %v3570_v0 = vadd.f32 %v3485_v9, %v3316_v47  ;;  %v7731_v49 = vld [vmem:[#allocation61_spill] sm:$0xff] }
 0x4ca   : > { %v4043_v7 = vpop.f32.mrf.mxu0 }
 0x4cb   : > { %5350 = vst [vmem:[%s7079_s7 + $0xc0] sm:$0xff] %v5290_v30   ;;  %v4452_v34 = vadd.f32 %v4451_v27, %v4389_v1 }
 0x4cc   : > { %v3779_v21 = vpop.f32.mrf.mxu3 }
 0x4cd   : > { %v3864_v32 = vadd.f32 %v3779_v21, %v3570_v0  ;;  %v3236_v11 = vpop.f32.mrf.mxu1 }
 0x4ce   : > { %v3318_v53 = vadd.f32 %v3236_v11, %v7729_v46 }
 0x4cf   : > { %v4128_v31 = vadd.f32 %v4043_v7, %v3864_v32 }
 0x4d0   : > { %v3487_v12 = vpop.f32.mrf.mxu2 }
 0x4d1   : > { %v4319_v57 = vadd.f32 %v4318_v18, %v4128_v31  ;;  %v4390_v41 = vmul.f32 %v4128_v31, %v4128_v31  ;;  %v3571_v3 = vadd.f32 %v3487_v12, %v3317_v17  ;;  %v7732_v18 = vld [vmem:[#allocation32_spill] sm:$0xff] }
 0x4d2   : > { %v4045_v29 = vpop.f32.mrf.mxu0 }
 0x4d3   : > { %v4453_v45 = vadd.f32 %v4452_v34, %v4390_v41 }
 0x4d4   : > { %v3781_v13 = vpop.f32.mrf.mxu3 }
 0x4d5   : > { %v3865_v48 = vadd.f32 %v3781_v13, %v3571_v3  ;;  %v3238_v6 = vpop.f32.mrf.mxu1 }
 0x4d6   : > { %v3319_v61 = vadd.f32 %v3238_v6, %v7730_v16 }
 0x4d7   : > { %v4129_v56 = vadd.f32 %v4045_v29, %v3865_v48 }
 0x4d8   : > { %v3490_v44 = vpop.f32.mrf.mxu2 }
 0x4d9   : > { %v5295_v25 = vpack.c.bf16 %v4129_v56, %v4128_v31  ;;  %v4320_v42 = vadd.f32 %v4319_v57, %v4129_v56  ;;  %v4391_v55 = vmul.f32 %v4129_v56, %v4129_v56  ;;  %v3572_v51 = vadd.f32 %v3490_v44, %v3318_v53 }
 0x4da   : > { %v4048_v59 = vpop.f32.mrf.mxu0 }
 0x4db   : > { %5351 = vst [vmem:[%s7079_s7 + $0xc8] sm:$0xff] %v5295_v25   ;;  %v4454_v5 = vadd.f32 %v4453_v45, %v4391_v55  ;;  %v7733_v25 = vld [vmem:[#allocation23_spill] sm:$0xff] }
 0x4dc   : > { %v3784_v37 = vpop.f32.mrf.mxu3 }
 0x4dd   : > { %v3866_v36 = vadd.f32 %v3784_v37, %v3572_v51  ;;  %v3241_v40 = vpop.f32.mrf.mxu1 }
 0x4de   : > { %v3320_v52 = vadd.f32 %v3241_v40, %v7731_v49 }
 0x4df   : > { %v4130_v63 = vadd.f32 %v4048_v59, %v3866_v36 }
 0x4e0   : > { %v3492_v22 = vpop.f32.mrf.mxu2 }
 0x4e1   : > { %v4321_v38 = vadd.f32 %v4320_v42, %v4130_v63  ;;  %v4392_v54 = vmul.f32 %v4130_v63, %v4130_v63  ;;  %v3573_v35 = vadd.f32 %v3492_v22, %v3319_v61 }
 0x4e2   : > { %v4050_v39 = vpop.f32.mrf.mxu0 }
 0x4e3   : > { %v4455_v2 = vadd.f32 %v4454_v5, %v4392_v54 }
 0x4e4   : > { %v3786_v58 = vpop.f32.mrf.mxu3 }
 0x4e5   : > { %v3867_v10 = vadd.f32 %v3786_v58, %v3573_v35  ;;  %v3243_v60 = vpop.f32.mrf.mxu1 }
 0x4e6   : > { %v3321_v1 = vadd.f32 %v3243_v60, %v7732_v18 }
 0x4e7   : > { %v4131_v50 = vadd.f32 %v4050_v39, %v3867_v10 }
 0x4e8   : > { %v3495_v26 = vpop.f32.mrf.mxu2 }
 0x4e9   : > { %v5300_v33 = vpack.c.bf16 %v4131_v50, %v4130_v63  ;;  %v4322_v27 = vadd.f32 %v4321_v38, %v4131_v50  ;;  %v4393_v19 = vmul.f32 %v4131_v50, %v4131_v50  ;;  %v3574_v20 = vadd.f32 %v3495_v26, %v3320_v52  ;;  %v7734_v52 = vld [vmem:[#allocation12_spill] sm:$0xff] }
 0x4ea   : > { %v4053_v24 = vpop.f32.mrf.mxu0 }
 0x4eb   : > { %5352 = vst [vmem:[%s7079_s7 + $0xd0] sm:$0xff] %v5300_v33   ;;  %v4456_v62 = vadd.f32 %v4455_v2, %v4393_v19 }
 0x4ec   : > { %v3789_v23 = vpop.f32.mrf.mxu3 }
 0x4ed   : > { %v3868_v47 = vadd.f32 %v3789_v23, %v3574_v20  ;;  %v3246_v9 = vpop.f32.mrf.mxu1 }
 0x4ee   : > { %v3322_v57 = vadd.f32 %v3246_v9, %v7013_v14 }
 0x4ef   : > { %v4132_v30 = vadd.f32 %v4053_v24, %v3868_v47 }
 0x4f0   : > { %v3497_v0 = vpop.f32.mrf.mxu2 }
 0x4f1   : > { %v4323_v7 = vadd.f32 %v4322_v27, %v4132_v30  ;;  %v4394_v34 = vmul.f32 %v4132_v30, %v4132_v30  ;;  %v3575_v21 = vadd.f32 %v3497_v0, %v3321_v1 }
 0x4f2   : > { %v4055_v32 = vpop.f32.mrf.mxu0 }
 0x4f3   : > { %v4457_v11 = vadd.f32 %v4456_v62, %v4394_v34 }
 0x4f4   : > { %v3791_v31 = vpop.f32.mrf.mxu3 }
 0x4f5   : > { %v3869_v43 = vadd.f32 %v3791_v31, %v3575_v21  ;;  %v3248_v17 = vpop.f32.mrf.mxu1 }
 0x4f6   : > { %v3323_v42 = vadd.f32 %v3248_v17, %v7733_v25 }
 0x4f7   : > { %v4133_v12 = vadd.f32 %v4055_v32, %v3869_v43 }
 0x4f8   : > { %v3500_v41 = vpop.f32.mrf.mxu2 }
 0x4f9   : > { %v5305_v3 = vpack.c.bf16 %v4133_v12, %v4132_v30  ;;  %v4324_v29 = vadd.f32 %v4323_v7, %v4133_v12  ;;  %v4395_v45 = vmul.f32 %v4133_v12, %v4133_v12  ;;  %v3576_v13 = vadd.f32 %v3500_v41, %v3322_v57 }
 0x4fa   : > { %v4058_v48 = vpop.f32.mrf.mxu0 }
 0x4fb   : > { %5353 = vst [vmem:[%s7079_s7 + $0xd8] sm:$0xff] %v5305_v3   ;;  %v4458_v6 = vadd.f32 %v4457_v11, %v4395_v45 }
 0x4fc   : > { %v3794_v56 = vpop.f32.mrf.mxu3 }
 0x4fd   : > { %v3870_v46 = vadd.f32 %v3794_v56, %v3576_v13  ;;  %v3251_v53 = vpop.f32.mrf.mxu1 }
 0x4fe   : > { %v3324_v61 = vadd.f32 %v3251_v53, %v7027_v8 }
 0x4ff   : > { %v4134_v44 = vadd.f32 %v4058_v48, %v3870_v46 }
 0x500   : > { %v3502_v55 = vpop.f32.mrf.mxu2 }
 0x501   : > { %v4325_v51 = vadd.f32 %v4324_v29, %v4134_v44  ;;  %v4396_v59 = vmul.f32 %v4134_v44, %v4134_v44  ;;  %v3577_v5 = vadd.f32 %v3502_v55, %v3323_v42 }
 0x502   : > { %v4060_v14 = vpop.f32.mrf.mxu0 }
 0x503   : > { %v4459_v37 = vadd.f32 %v4458_v6, %v4396_v59 }
 0x504   : > { %v3796_v36 = vpop.f32.mrf.mxu3 }
 0x505   : > { %v3871_v40 = vadd.f32 %v3796_v36, %v3577_v5  ;;  %v3253_v63 = vpop.f32.mrf.mxu1 }
 0x506   : > { %v3325_v26 = vadd.f32 %v3253_v63, %v7734_v52 }
 0x507   : > { %v4135_v16 = vadd.f32 %v4060_v14, %v3871_v40 }
 0x508   : > { %v3505_v22 = vpop.f32.mrf.mxu2 }
 0x509   : > { %v5310_v38 = vpack.c.bf16 %v4135_v16, %v4134_v44  ;;  %v4326_v54 = vadd.f32 %v4325_v51, %v4135_v16  ;;  %v4397_v35 = vmul.f32 %v4135_v16, %v4135_v16  ;;  %v3578_v39 = vadd.f32 %v3505_v22, %v3324_v61 }
 0x50a   : > { %v4063_v2 = vpop.f32.mrf.mxu0 }
 0x50b   : > { %5354 = vst [vmem:[%s7079_s7 + $0xe0] sm:$0xff] %v5310_v38   ;;  %v4460_v58 = vadd.f32 %v4459_v37, %v4397_v35  ;;  %v7735_v37 = vld [vmem:[#allocation41_spill] sm:$0xff] }
 0x50c   : > { %v3799_v10 = vpop.f32.mrf.mxu3 }
 0x50d   : > { %v3872_v60 = vadd.f32 %v3799_v10, %v3578_v39  ;;  %v3256_v50 = vpop.f32.mrf.mxu1 }
 0x50e   : > { %v3326_v9 = vadd.f32 %v3256_v50, %v7041_v15 }
 0x50f   : > { %v4136_v49 = vadd.f32 %v4063_v2, %v3872_v60 }
 0x510   : > { %v3507_v33 = vpop.f32.mrf.mxu2 }
 0x511   : > { %v4327_v27 = vadd.f32 %v4326_v54, %v4136_v49  ;;  %v4398_v19 = vmul.f32 %v4136_v49, %v4136_v49  ;;  %v3579_v20 = vadd.f32 %v3507_v33, %v3325_v26 }
 0x512   : > { %v4065_v8 = vpop.f32.mrf.mxu0 }
 0x513   : > { %v4461_v24 = vadd.f32 %v4460_v58, %v4398_v19 }
 0x514   : > { %v3801_v62 = vpop.f32.mrf.mxu3 }
 0x515   : > { %v3873_v23 = vadd.f32 %v3801_v62, %v3579_v20  ;;  %v3258_v30 = vpop.f32.mrf.mxu1 }
 0x516   : > { %v3327_v17 = vadd.f32 %v3258_v30, %v7048_v4 }
 0x517   : > { %v4137_v47 = vadd.f32 %v4065_v8, %v3873_v23 }
 0x518   : > { %v3510_v18 = vpop.f32.mrf.mxu2 }
 0x519   : > { %v5315_v1 = vpack.c.bf16 %v4137_v47, %v4136_v49  ;;  %v4328_v0 = vadd.f32 %v4327_v27, %v4137_v47  ;;  %v4399_v7 = vmul.f32 %v4137_v47, %v4137_v47  ;;  %v3580_v34 = vadd.f32 %v3510_v18, %v3326_v9 }
 0x51a   : > { %v4068_v21 = vpop.f32.mrf.mxu0 }
 0x51b   : > { %5355 = vst [vmem:[%s7079_s7 + $0xe8] sm:$0xff] %v5315_v1   ;;  %v4462_v32 = vadd.f32 %v4461_v24, %v4399_v7 }
 0x51c   : > { %v3804_v11 = vpop.f32.mrf.mxu3 }
 0x51d   : > { %v3874_v31 = vadd.f32 %v3804_v11, %v3580_v34  ;;  %v3261_v15 = vpop.f32.mrf.mxu1 }
 0x51e   : > { %v3328_v56 = vadd.f32 %v3261_v15, %v7055_v28 }
 0x51f   : > { %v4138_v43 = vadd.f32 %v4068_v21, %v3874_v31 }
 0x520   : > { %v3512_v12 = vpop.f32.mrf.mxu2 }
 0x521   : > { %v4329_v57 = vadd.f32 %v4328_v0, %v4138_v43  ;;  %v4400_v41 = vmul.f32 %v4138_v43, %v4138_v43  ;;  %v3581_v3 = vadd.f32 %v3512_v12, %v3327_v17 }
 0x522   : > { %v4070_v29 = vpop.f32.mrf.mxu0 }
 0x523   : > { %v4463_v45 = vadd.f32 %v4462_v32, %v4400_v41 }
 0x524   : > { %v3806_v13 = vpop.f32.mrf.mxu3 }
 0x525   : > { %v3875_v48 = vadd.f32 %v3806_v13, %v3581_v3  ;;  %v3263_v55 = vpop.f32.mrf.mxu1 }
 0x526   : > { %v3329_v36 = vadd.f32 %v3263_v55, %v7735_v37 }
 0x527   : > { %v4139_v6 = vadd.f32 %v4070_v29, %v3875_v48 }
 0x528   : > { %v3515_v46 = vpop.f32.mrf.mxu2 }
 0x529   : > { %v5320_v53 = vpack.c.bf16 %v4139_v6, %v4138_v43  ;;  %v4330_v44 = vadd.f32 %v4329_v57, %v4139_v6  ;;  %v4401_v25 = vmul.f32 %v4139_v6, %v4139_v6  ;;  %v3582_v42 = vadd.f32 %v3515_v46, %v3328_v56 }
 0x52a   : > { %v4073_v51 = vpop.f32.mrf.mxu0 }
 0x52b   : > { %5356 = vst [vmem:[%s7079_s7 + $0xf0] sm:$0xff] %v5320_v53   ;;  %v4464_v4 = vadd.f32 %v4463_v45, %v4401_v25 }
 0x52c   : > { %v3809_v59 = vpop.f32.mrf.mxu3 }
 0x52d   : > { %v3876_v5 = vadd.f32 %v3809_v59, %v3582_v42 }
 0x52f   : > { %v4140_v14 = vadd.f32 %v4073_v51, %v3876_v5 }
 0x530   : > { %v3517_v40 = vpop.f32.mrf.mxu2 }
 0x531   : > { %v4331_v28 = vadd.f32 %v4330_v44, %v4140_v14  ;;  %v4402_v63 = vmul.f32 %v4140_v14, %v4140_v14  ;;  %v3583_v16 = vadd.f32 %v3517_v40, %v3329_v36 }
 0x532   : > { %v4075_v54 = vpop.f32.mrf.mxu0 }
 0x533   : > { %v4465_v61 = vadd.f32 %v4464_v4, %v4402_v63 }
 0x534   : > { %v3811_v22 = vpop.f32.mrf.mxu3 }
 0x535   : > { %v3877_v38 = vadd.f32 %v3811_v22, %v3583_v16 }
 0x537   : > { %v4141_v35 = vadd.f32 %v4075_v54, %v3877_v38 }
 0x539   : > { %v5325_v39 = vpack.c.bf16 %v4141_v35, %v4140_v14  ;;  %v4332_v2 = vadd.f32 %v4331_v28, %v4141_v35  ;;  %v4403_v58 = vmul.f32 %v4141_v35, %v4141_v35 }
 0x53b   : > { %5357 = vst [vmem:[%s7079_s7 + $0xf8] sm:$0xff] %v5325_v39   ;;  %v4333_v10 = vrot.slane %v4332_v2, 4  ;;  %v4466_v60 = vadd.f32 %v4465_v61, %v4403_v58 }
 0x53d   : > { %v4334_v50 = vadd.f32 %v4333_v10, %v4332_v2  ;;  %v4467_v49 = vrot.slane %v4466_v60, 4 }
 0x53f   : > { %v4335_v52 = vrot.slane %v4334_v50, 2  ;;  %v4468_v26 = vadd.f32 %v4467_v49, %v4466_v60 }
 0x541   : > { %v4336_v33 = vadd.f32 %v4335_v52, %v4334_v50  ;;  %v4469_v27 = vrot.slane %v4468_v26, 2 }
 0x543   : > { %v4337_v19 = vrot.slane %v4336_v33, 1  ;;  %v4470_v20 = vadd.f32 %v4469_v27, %v4468_v26 }
 0x545   : > { %v4338_v8 = vadd.f32 %v4337_v19, %v4336_v33  ;;  %v4471_v24 = vrot.slane %v4470_v20, 1 }
 0x547   : > { %4339 = vst [vmem:[%s253_s13] sm:$0xff] %v4338_v8  ;;  %v4472_v62 = vadd.f32 %v4471_v24, %v4470_v20 }
 0x549   : > { %4473 = vst [vmem:[%s261_s22] sm:$0xff] %v4472_v62 }
 0x54a PF: > { %s15_s19 = sadd.s32 1, %s5541_s19   ;;  %s7736_s15 = smov %s5533_s17 }
 0x54b   : > { %p12_p8 = scmp.ge.s32.totalorder %s15_s19, 6   ;;  %s7737_s16 = smov %s5537_s18 }
 0x54c   : > { %s7738_s17 = smov %s7741_s20  ;;  %s7739_s18 = smov %s7745_s21 }
 0x54d   :  { %14 = sbr.rel (!%p12_p8) target bundleno = 3 (0x3), region = 91 }

</bundles_post_ra>
